<compile_context>
chip_gen: v7x
topology: tpu7x:2x2x1
jax: 0.10.0
libtpu: 0.0.40
codegen_flags: <defaults>
</compile_context>

<pallas_src>
import functools

import numpy as np
import jax
import jax.numpy as jnp
from jax import lax
from jax.experimental import pallas as pl
from jax.experimental.pallas import tpu as pltpu

EPS = 1e-5  # nn.InstanceNorm2d default eps


# --------------------------------------------------------------------------
# Fused kernel: dense_conv_1 + DS_DDB (depth stages) + dense_conv_2
# --------------------------------------------------------------------------
def _dense_encoder_kernel(x_ref, w1_ref, wdw_ref, wpw_ref, w2_ref, np_ref,
                          mask_ref, sel_ref, o_ref, skip_ref, dw_ref, *,
                          C, H, W, Wout, depth, btile):
    HW = H * W
    L = btile * HW                      # folded batch-tile lane width
    HWo = H * Wout
    HWo_pad = sel_ref.shape[1]          # per-sample output width, multiple of 128
    f32 = jnp.float32

    def in_prelu(y, site, width, n_valid):
        # InstanceNorm2d(affine=True) + PReLU.  Per-sample stats over the first
        # n_valid lanes of each `width`-wide chunk (columns >= n_valid must be
        # exactly zero, true for the padded final output).  One-pass stats
        # (two independent XLU reductions) + one scale/shift FMA pass.
        g = np_ref[3 * site + 0]                            # (C, 1)
        be = np_ref[3 * site + 1]
        a = np_ref[3 * site + 2]
        inv_n = 1.0 / n_valid
        parts = []
        for b in range(btile):
            yb = y[:, b * width:(b + 1) * width]
            mean = jnp.sum(yb, axis=1, keepdims=True) * inv_n
            ex2 = jnp.sum(yb * yb, axis=1, keepdims=True) * inv_n
            var = jnp.maximum(ex2 - mean * mean, 0.0)
            scale = g * lax.rsqrt(var + EPS)
            shift = be - mean * scale
            yn = yb * scale + shift
            parts.append(jnp.where(yn >= 0.0, yn, a * yn))
        return parts[0] if btile == 1 else jnp.concatenate(parts, axis=1)

    def dw_stage(xin, i, dil, cin):
        # depthwise dilated 3x3 on one sample: 9 lane-rolled taps (XLU) with
        # host-precomputed boundary masks; center tap initializes the accumulator.
        acc = xin * wdw_ref[0:cin, 9 * i + 4:9 * i + 5]     # center tap (d=0, mask=1)
        for kh in range(3):
            dh = (kh - 1) * dil
            for kw in range(3):
                if kh == 1 and kw == 1:
                    continue
                d = dh * W + (kw - 1)
                j = 9 * i + kh * 3 + kw
                shifted = pltpu.roll(xin, shift=(-d) % HW, axis=1)
                m = mask_ref[j:j + 1, :]                    # (1, HW) constant
                wcol = wdw_ref[0:cin, j:j + 1]              # (cin, 1) per-channel tap
                acc = acc + (shifted * m) * wcol
        return acc

    # ---- dense_conv_1: 1x1 conv (MXU, N = btile*HW) + IN + PReLU ----
    # (conv biases dropped: each conv is followed by InstanceNorm, which cancels
    #  any per-channel spatially-constant offset; validated against the reference)
    x0 = x_ref[...].astype(f32)                                      # (cin_pad, L)
    y = jnp.dot(w1_ref[...], x0, preferred_element_type=f32)         # (C, L)
    y = in_prelu(y, 0, HW, HW)
    skip_ref[(depth - 1) * C:depth * C, :] = y

    # ---- DS_DDB: dilated depthwise-separable stages, dense skip kept in VMEM ----
    for i in range(depth):
        dil = 2 ** i
        cin = (i + 1) * C
        base = (depth - 1 - i) * C
        if btile == 1:
            rhs = dw_stage(skip_ref[base:depth * C, :], i, dil, cin)
        else:
            for b in range(btile):
                xin = skip_ref[base:depth * C, b * HW:(b + 1) * HW]  # (cin, HW)
                dw_ref[0:cin, b * HW:(b + 1) * HW] = dw_stage(xin, i, dil, cin)
            rhs = dw_ref[0:cin, :]
        # pointwise 1x1 conv: one MXU matmul over the whole batch tile
        wpw = wpw_ref[i][:, 0:cin]                                   # (C, cin)
        y = jnp.dot(wpw, rhs, preferred_element_type=f32)            # (C, L)
        y = in_prelu(y, 1 + i, HW, HW)
        if i < depth - 1:
            skip_ref[(depth - 2 - i) * C:(depth - 1 - i) * C, :] = y

    # ---- dense_conv_2: Conv2d(C, C, (1,3), stride (1,2)) + IN + PReLU ----
    # stride-1 result as ONE matmul over stacked [y, roll-1, roll-2] (K = 3C),
    # then stride-2 column selection via the host-built 0/1 matrix (MXU).
    # Lane rolls may wrap across rows/samples, but the selection matrix only ever
    # reads source columns w <= W-1 of the same row (VALID (1,3)/stride-2), so
    # wrapped taps are never selected.  Do not change padding without adding a mask.
    y3 = jnp.concatenate(
        [y, pltpu.roll(y, shift=L - 1, axis=1), pltpu.roll(y, shift=L - 2, axis=1)],
        axis=0)                                                      # (3C, L)
    z = jnp.dot(w2_ref[...], y3, preferred_element_type=f32)         # (C, L)
    sel = sel_ref[...]                                               # (HW, HWo_pad)
    parts = []
    for b in range(btile):
        zb = z[:, b * HW:(b + 1) * HW]
        parts.append(jnp.dot(zb, sel, preferred_element_type=f32))   # (C, HWo_pad)
    y2 = parts[0] if btile == 1 else jnp.concatenate(parts, axis=1)
    o_ref[...] = in_prelu(y2, 1 + depth, HWo_pad, HWo)


# --------------------------------------------------------------------------
# Host-side constant packing
# --------------------------------------------------------------------------
def _pack_params(p, C, depth, cin_pad):
    in_ch = p["w1"].shape[1]
    w1 = jnp.pad(p["w1"][:, :, 0, 0], ((0, 0), (0, cin_pad - in_ch)))    # (C, cin_pad)
    wdw_all = jnp.zeros((depth * C, 9 * depth), jnp.float32)
    wpw_all = jnp.zeros((depth, C, depth * C), jnp.float32)
    cols = [p["g1"], p["be1"], p["a1"]]
    for i, st in enumerate(p["stages"]):
        cin = (i + 1) * C
        wdw_all = wdw_all.at[:cin, 9 * i:9 * (i + 1)].set(st["w_dw"][:, 0].reshape(cin, 9))
        wpw_all = wpw_all.at[i, :, :cin].set(st["w_pw"][:, :, 0, 0])
        cols += [st["g"], st["be"], st["a"]]
    cols += [p["g2"], p["be2"], p["a2"]]
    norm_params = jnp.stack(cols, axis=0)[:, :, None]                    # (3*(depth+2), C, 1)
    # dense_conv_2 weights packed for a single K=3C matmul: [kw=0 | kw=1 | kw=2]
    w2 = jnp.concatenate([p["w2"][:, :, 0, k] for k in range(3)], axis=1)  # (C, 3C)
    return w1, wdw_all, wpw_all, w2, norm_params


def _build_masks(H, W, depth):
    # (9*depth, HW) boundary masks for the dilated depthwise taps (host-built).
    HW = H * W
    hh = np.arange(HW) // W
    ww = np.arange(HW) % W
    masks = np.zeros((9 * depth, HW), np.float32)
    for i in range(depth):
        dil = 2 ** i
        for kh in range(3):
            dh = (kh - 1) * dil
            for kw in range(3):
                dw = kw - 1
                masks[9 * i + kh * 3 + kw] = (
                    (hh + dh >= 0) & (hh + dh < H) & (ww + dw >= 0) & (ww + dw < W)
                ).astype(np.float32)
    return jnp.asarray(masks)


def _build_sel(H, W, Wout, HWo_pad):
    # (HW, HWo_pad) 0/1 stride-2 column-selection matrix (host-built).
    HW = H * W
    HWo = H * Wout
    r = np.arange(HW)[:, None]
    c = np.arange(HWo_pad)[None, :]
    src = (c // Wout) * W + 2 * (c % Wout)
    return jnp.asarray(((r == src) & (c < HWo)).astype(np.float32))


# --------------------------------------------------------------------------
# DenseEncoder forward: one pallas_call over the (tiled) batch
# --------------------------------------------------------------------------
def dense_encoder_pallas(x_nchw, p, btile=None):
    B, Cin0, H, W = x_nchw.shape
    C = p["w1"].shape[0]
    depth = len(p["stages"])
    Wout = (W - 3) // 2 + 1
    HW, HWo = H * W, H * Wout
    HWo_pad = -(-HWo // 128) * 128            # lane-dense per-sample output width
    cin_pad = max(8, -(-Cin0 // 8) * 8)

    if btile is None:
        # Fold batch into lanes to grow matmul N / amortize per-step overhead,
        # but keep >= 2 grid blocks when possible so both v7x TensorCores get work.
        btile = 2 if B >= 4 else 1
    nb = -(-B // btile)
    b_pad = nb * btile
    L = btile * HW

    w1, wdw_all, wpw_all, w2c, norm_params = _pack_params(p, C, depth, cin_pad)
    masks = _build_masks(H, W, depth)
    sel = _build_sel(H, W, Wout, HWo_pad)

    x2 = jnp.pad(x_nchw.reshape(B, Cin0, HW),
                 ((0, b_pad - B), (0, cin_pad - Cin0), (0, 0)))
    # (nb, btile, cin_pad, HW) -> (nb, cin_pad, btile*HW): batch tile folded into lanes
    x2 = x2.reshape(nb, btile, cin_pad, HW).transpose(0, 2, 1, 3).reshape(nb, cin_pad, L)

    kern = functools.partial(_dense_encoder_kernel, C=C, H=H, W=W, Wout=Wout,
                             depth=depth, btile=btile)

    def full(shape):
        n = len(shape)
        return pl.BlockSpec(shape, lambda b: (0,) * n)

    y = pl.pallas_call(
        kern,
        out_shape=jax.ShapeDtypeStruct((nb, C, btile * HWo_pad), jnp.float32),
        grid=(nb,),
        in_specs=[
            pl.BlockSpec((None, cin_pad, L), lambda b: (b, 0, 0)),   # x, per-block
            full((C, cin_pad)),                                      # w1
            full((depth * C, 9 * depth)),                            # depthwise taps
            full((depth, C, depth * C)),                             # pointwise weights
            full((C, 3 * C)),                                        # dense_conv_2 (K=3C)
            full((3 * (depth + 2), C, 1)),                           # IN gamma/beta + PReLU a
            full((9 * depth, HW)),                                   # boundary masks
            full((HW, HWo_pad)),                                     # stride-2 selection
        ],
        out_specs=pl.BlockSpec((None, C, btile * HWo_pad), lambda b: (b, 0, 0)),
        scratch_shapes=[pltpu.VMEM((depth * C, L), jnp.float32),     # dense-skip buffer
                        pltpu.VMEM((depth * C, L), jnp.float32)],    # depthwise acc (btile>1)
        compiler_params=pltpu.CompilerParams(dimension_semantics=("parallel",)),
    )(x2, w1, wdw_all, wpw_all, w2c, norm_params, masks, sel)

    # unpack: (nb, C, btile*HWo_pad) -> (B, C, H, Wout); pad columns / pad batch sliced away
    y = y.reshape(nb, C, btile, HWo_pad)[..., :HWo]
    y = y.transpose(0, 2, 1, 3).reshape(b_pad, C, H, Wout)
    return y[:B]


# --------------------------------------------------------------------------
# Parameter init (deterministic, PyTorch weight layouts kept for the reference)
# --------------------------------------------------------------------------
def init_params(key, in_ch, C, depth=4):
    ks = iter(jax.random.split(key, 64))

    def nrm(shape, scale=0.1):
        return scale * jax.random.normal(next(ks), shape, dtype=jnp.float32)

    p = {
        "w1": nrm((C, in_ch, 1, 1)), "b1": nrm((C,), 0.05),
        "g1": 1.0 + nrm((C,), 0.05), "be1": nrm((C,), 0.05),
        "a1": jnp.full((C,), 0.25, jnp.float32),
        "stages": [],
        "w2": nrm((C, C, 1, 3)), "b2": nrm((C,), 0.05),
        "g2": 1.0 + nrm((C,), 0.05), "be2": nrm((C,), 0.05),
        "a2": jnp.full((C,), 0.25, jnp.float32),
    }
    for i in range(depth):
        cin = C * (i + 1)
        p["stages"].append({
            "w_dw": nrm((cin, 1, 3, 3)), "b_dw": nrm((cin,), 0.05),
            "w_pw": nrm((C, cin, 1, 1)), "b_pw": nrm((C,), 0.05),
            "g": 1.0 + nrm((C,), 0.05), "be": nrm((C,), 0.05),
            "a": jnp.full((C,), 0.25, jnp.float32),
        })
    return p


# --------------------------------------------------------------------------
# Pure-JAX reference (NCHW, lax.conv, WITH conv biases) to validate the kernel
# --------------------------------------------------------------------------
def dense_encoder_ref(x, p):
    dn = ("NCHW", "OIHW", "NCHW")
    prec = lax.Precision.HIGHEST

    def in_prelu(y, g, be, a):
        mean = jnp.mean(y, axis=(2, 3), keepdims=True)
        var = jnp.var(y, axis=(2, 3), keepdims=True)
        yn = (y - mean) / jnp.sqrt(var + EPS)
        yn = yn * g[None, :, None, None] + be[None, :, None, None]
        return jnp.where(yn >= 0.0, yn, a[None, :, None, None] * yn)

    y = lax.conv_general_dilated(x, p["w1"], (1, 1), "VALID",
                                 dimension_numbers=dn, precision=prec)
    y = in_prelu(y + p["b1"][None, :, None, None], p["g1"], p["be1"], p["a1"])

    skip = y
    for i, st in enumerate(p["stages"]):
        dil = 2 ** i
        cin = skip.shape[1]
        yd = lax.conv_general_dilated(skip, st["w_dw"], (1, 1),
                                      padding=((dil, dil), (1, 1)),
                                      rhs_dilation=(dil, 1),
                                      feature_group_count=cin,
                                      dimension_numbers=dn, precision=prec)
        yd = yd + st["b_dw"][None, :, None, None]
        yp = lax.conv_general_dilated(yd, st["w_pw"], (1, 1), "VALID",
                                      dimension_numbers=dn, precision=prec)
        y = in_prelu(yp + st["b_pw"][None, :, None, None], st["g"], st["be"], st["a"])
        skip = jnp.concatenate([y, skip], axis=1)

    y2 = lax.conv_general_dilated(y, p["w2"], (1, 2), "VALID",
                                  dimension_numbers=dn, precision=prec)
    return in_prelu(y2 + p["b2"][None, :, None, None], p["g2"], p["be2"], p["a2"])


if __name__ == "__main__":
    key = jax.random.PRNGKey(0)
    kx, kp = jax.random.split(key)

    B, in_ch, H, W = 2, 2, 16, 16   # x: [batch, in_channel, time, freq]
    C = 16                           # h.dense_channel

    x = jax.random.normal(kx, (B, in_ch, H, W), dtype=jnp.float32)
    params = init_params(kp, in_ch, C, depth=4)

    ref = jax.block_until_ready(dense_encoder_ref(x, params))
    # btile=1: two parallel grid blocks (feeds both v7x cores);
    # btile=2: batch folded into lanes (matmul N = 512, single lane-dense block).
    for bt in (1, 2):
        out = jax.block_until_ready(dense_encoder_pallas(x, params, btile=bt))
        assert out.shape == (B, C, H, (W - 3) // 2 + 1), out.shape
        np.testing.assert_allclose(np.asarray(out), np.asarray(ref), rtol=1e-2, atol=1e-2)
    print("KERNEL_OK")
</pallas_src>

<mosaic_0001>
module attributes {stable_mosaic.version = 11 : i64} {
  func.func @_dense_encoder_kernel(%arg0: i32, %arg1: memref<1x8x256xf32, #tpu.memory_space<vmem>>, %arg2: memref<16x8xf32, #tpu.memory_space<vmem>>, %arg3: memref<64x36xf32, #tpu.memory_space<vmem>>, %arg4: memref<4x16x64xf32, #tpu.memory_space<vmem>>, %arg5: memref<16x48xf32, #tpu.memory_space<vmem>>, %arg6: memref<18x16x1xf32, #tpu.memory_space<vmem>>, %arg7: memref<36x256xf32, #tpu.memory_space<vmem>>, %arg8: memref<256x128xf32, #tpu.memory_space<vmem>>, %arg9: memref<1x16x128xf32, #tpu.memory_space<vmem>>, %arg10: memref<64x256xf32, #tpu.memory_space<vmem>>, %arg11: memref<64x256xf32, #tpu.memory_space<vmem>>) attributes {dimension_semantics = [#tpu.dimension_semantics<parallel>], iteration_bounds = array<i64: 2>, scalar_prefetch = 0 : i64, scratch_operands = 2 : i64, tpu.core_type = #tpu.core_type<tc>, window_params = [{transform_indices = @transform_0, window_bounds = array<i64: 1, 8, 256>}, {pipeline_mode = #tpu.pipeline_mode<synchronous>, transform_indices = @transform_1, window_bounds = array<i64: 16, 8>}, {pipeline_mode = #tpu.pipeline_mode<synchronous>, transform_indices = @transform_2, window_bounds = array<i64: 64, 36>}, {pipeline_mode = #tpu.pipeline_mode<synchronous>, transform_indices = @transform_3, window_bounds = array<i64: 4, 16, 64>}, {pipeline_mode = #tpu.pipeline_mode<synchronous>, transform_indices = @transform_4, window_bounds = array<i64: 16, 48>}, {pipeline_mode = #tpu.pipeline_mode<synchronous>, transform_indices = @transform_5, window_bounds = array<i64: 18, 16, 1>}, {pipeline_mode = #tpu.pipeline_mode<synchronous>, transform_indices = @transform_6, window_bounds = array<i64: 36, 256>}, {pipeline_mode = #tpu.pipeline_mode<synchronous>, transform_indices = @transform_7, window_bounds = array<i64: 256, 128>}, {transform_indices = @transform_8, window_bounds = array<i64: 1, 16, 128>}]} {
    %c0 = arith.constant 0 : index
    %c0_0 = arith.constant 0 : index
    %c0_1 = arith.constant 0 : index
    %0 = vector.load %arg1[%c0, %c0_0, %c0_1] : memref<1x8x256xf32, #tpu.memory_space<vmem>>, vector<1x8x256xf32>
    %1 = vector.shape_cast %0 : vector<1x8x256xf32> to vector<8x256xf32>
    %c0_2 = arith.constant 0 : index
    %c0_3 = arith.constant 0 : index
    %2 = vector.load %arg2[%c0_2, %c0_3] : memref<16x8xf32, #tpu.memory_space<vmem>>, vector<16x8xf32>
    %cst = arith.constant dense<0.000000e+00> : vector<16x256xf32>
    %3 = tpu.matmul %2, %1, %cst {dimension_numbers = #tpu.dot_dimension_numbers<[1], [0], [0], [1], [0, 0, 1, 1], [], []>} : vector<16x8xf32>, vector<8x256xf32>, vector<16x256xf32> -> vector<16x256xf32>
    %c0_4 = arith.constant 0 : index
    %c0_5 = arith.constant 0 : index
    %c0_6 = arith.constant 0 : index
    %4 = vector.load %arg6[%c0_4, %c0_5, %c0_6] : memref<18x16x1xf32, #tpu.memory_space<vmem>>, vector<1x16x1xf32>
    %5 = vector.shape_cast %4 : vector<1x16x1xf32> to vector<16x1xf32>
    %c1 = arith.constant 1 : index
    %c0_7 = arith.constant 0 : index
    %c0_8 = arith.constant 0 : index
    %6 = vector.load %arg6[%c1, %c0_7, %c0_8] : memref<18x16x1xf32, #tpu.memory_space<vmem>>, vector<1x16x1xf32>
    %7 = vector.shape_cast %6 : vector<1x16x1xf32> to vector<16x1xf32>
    %c2 = arith.constant 2 : index
    %c0_9 = arith.constant 0 : index
    %c0_10 = arith.constant 0 : index
    %8 = vector.load %arg6[%c2, %c0_9, %c0_10] : memref<18x16x1xf32, #tpu.memory_space<vmem>>, vector<1x16x1xf32>
    %9 = vector.shape_cast %8 : vector<1x16x1xf32> to vector<16x1xf32>
    %cst_11 = arith.constant dense<0.000000e+00> : vector<16xf32>
    %10 = vector.multi_reduction <add>, %3, %cst_11 [1] : vector<16x256xf32> to vector<16xf32>
    %11 = vector.shape_cast %10 : vector<16xf32> to vector<16x1xf32>
    %cst_12 = arith.constant 3.906250e-03 : f32
    %12 = vector.broadcast %cst_12 : f32 to vector<16x1xf32>
    %13 = arith.mulf %11, %12 : vector<16x1xf32>
    %14 = arith.mulf %3, %3 : vector<16x256xf32>
    %cst_13 = arith.constant dense<0.000000e+00> : vector<16xf32>
    %15 = vector.multi_reduction <add>, %14, %cst_13 [1] : vector<16x256xf32> to vector<16xf32>
    %16 = vector.shape_cast %15 : vector<16xf32> to vector<16x1xf32>
    %cst_14 = arith.constant 3.906250e-03 : f32
    %17 = vector.broadcast %cst_14 : f32 to vector<16x1xf32>
    %18 = arith.mulf %16, %17 : vector<16x1xf32>
    %19 = arith.mulf %13, %13 : vector<16x1xf32>
    %20 = arith.subf %18, %19 : vector<16x1xf32>
    %cst_15 = arith.constant 0.000000e+00 : f32
    %21 = vector.broadcast %cst_15 : f32 to vector<16x1xf32>
    %22 = arith.maximumf %20, %21 : vector<16x1xf32>
    %cst_16 = arith.constant 9.99999974E-6 : f32
    %23 = vector.broadcast %cst_16 : f32 to vector<16x1xf32>
    %24 = arith.addf %22, %23 : vector<16x1xf32>
    %25 = math.rsqrt %24 : vector<16x1xf32>
    %26 = arith.mulf %5, %25 : vector<16x1xf32>
    %27 = arith.mulf %13, %26 : vector<16x1xf32>
    %28 = arith.subf %7, %27 : vector<16x1xf32>
    %29 = vector.broadcast %26 : vector<16x1xf32> to vector<16x256xf32>
    %30 = arith.mulf %3, %29 : vector<16x256xf32>
    %31 = vector.broadcast %28 : vector<16x1xf32> to vector<16x256xf32>
    %32 = arith.addf %30, %31 : vector<16x256xf32>
    %cst_17 = arith.constant 0.000000e+00 : f32
    %33 = vector.broadcast %cst_17 : f32 to vector<16x256xf32>
    %34 = arith.cmpf oge, %32, %33 : vector<16x256xf32>
    %35 = vector.broadcast %9 : vector<16x1xf32> to vector<16x256xf32>
    %36 = arith.mulf %35, %32 : vector<16x256xf32>
    %37 = arith.select %34, %32, %36 : vector<16x256xi1>, vector<16x256xf32>
    %c48 = arith.constant 48 : index
    %c0_18 = arith.constant 0 : index
    %38 = vector.load %arg10[%c48, %c0_18] : memref<64x256xf32, #tpu.memory_space<vmem>>, vector<16x256xf32>
    tpu.vector_store %arg10[%c48, %c0_18], %37 {strides = array<i32>} : memref<64x256xf32, #tpu.memory_space<vmem>>, vector<16x256xf32>,
    %c48_19 = arith.constant 48 : index
    %c0_20 = arith.constant 0 : index
    %39 = vector.load %arg10[%c48_19, %c0_20] : memref<64x256xf32, #tpu.memory_space<vmem>>, vector<16x256xf32>
    %c0_21 = arith.constant 0 : index
    %c4 = arith.constant 4 : index
    %40 = vector.load %arg3[%c0_21, %c4] : memref<64x36xf32, #tpu.memory_space<vmem>>, vector<16x1xf32>
    %41 = vector.broadcast %40 : vector<16x1xf32> to vector<16x256xf32>
    %42 = arith.mulf %39, %41 : vector<16x256xf32>
    %c17_i32 = arith.constant 17 : i32
    %43 = tpu.dynamic_rotate %39 by %c17_i32 dim 1 : vector<16x256xf32>, i32 -> vector<16x256xf32>
    %c0_22 = arith.constant 0 : index
    %c0_23 = arith.constant 0 : index
    %44 = vector.load %arg7[%c0_22, %c0_23] : memref<36x256xf32, #tpu.memory_space<vmem>>, vector<1x256xf32>
    %c0_24 = arith.constant 0 : index
    %c0_25 = arith.constant 0 : index
    %45 = vector.load %arg3[%c0_24, %c0_25] : memref<64x36xf32, #tpu.memory_space<vmem>>, vector<16x1xf32>
    %46 = vector.broadcast %44 : vector<1x256xf32> to vector<16x256xf32>
    %47 = arith.mulf %43, %46 : vector<16x256xf32>
    %48 = vector.broadcast %45 : vector<16x1xf32> to vector<16x256xf32>
    %49 = arith.mulf %47, %48 : vector<16x256xf32>
    %50 = arith.addf %42, %49 : vector<16x256xf32>
    %c16_i32 = arith.constant 16 : i32
    %51 = tpu.dynamic_rotate %39 by %c16_i32 dim 1 : vector<16x256xf32>, i32 -> vector<16x256xf32>
    %c1_26 = arith.constant 1 : index
    %c0_27 = arith.constant 0 : index
    %52 = vector.load %arg7[%c1_26, %c0_27] : memref<36x256xf32, #tpu.memory_space<vmem>>, vector<1x256xf32>
    %c0_28 = arith.constant 0 : index
    %c1_29 = arith.constant 1 : index
    %53 = vector.load %arg3[%c0_28, %c1_29] : memref<64x36xf32, #tpu.memory_space<vmem>>, vector<16x1xf32>
    %54 = vector.broadcast %52 : vector<1x256xf32> to vector<16x256xf32>
    %55 = arith.mulf %51, %54 : vector<16x256xf32>
    %56 = vector.broadcast %53 : vector<16x1xf32> to vector<16x256xf32>
    %57 = arith.mulf %55, %56 : vector<16x256xf32>
    %58 = arith.addf %50, %57 : vector<16x256xf32>
    %c15_i32 = arith.constant 15 : i32
    %59 = tpu.dynamic_rotate %39 by %c15_i32 dim 1 : vector<16x256xf32>, i32 -> vector<16x256xf32>
    %c2_30 = arith.constant 2 : index
    %c0_31 = arith.constant 0 : index
    %60 = vector.load %arg7[%c2_30, %c0_31] : memref<36x256xf32, #tpu.memory_space<vmem>>, vector<1x256xf32>
    %c0_32 = arith.constant 0 : index
    %c2_33 = arith.constant 2 : index
    %61 = vector.load %arg3[%c0_32, %c2_33] : memref<64x36xf32, #tpu.memory_space<vmem>>, vector<16x1xf32>
    %62 = vector.broadcast %60 : vector<1x256xf32> to vector<16x256xf32>
    %63 = arith.mulf %59, %62 : vector<16x256xf32>
    %64 = vector.broadcast %61 : vector<16x1xf32> to vector<16x256xf32>
    %65 = arith.mulf %63, %64 : vector<16x256xf32>
    %66 = arith.addf %58, %65 : vector<16x256xf32>
    %c1_i32 = arith.constant 1 : i32
    %67 = tpu.dynamic_rotate %39 by %c1_i32 dim 1 : vector<16x256xf32>, i32 -> vector<16x256xf32>
    %c3 = arith.constant 3 : index
    %c0_34 = arith.constant 0 : index
    %68 = vector.load %arg7[%c3, %c0_34] : memref<36x256xf32, #tpu.memory_space<vmem>>, vector<1x256xf32>
    %c0_35 = arith.constant 0 : index
    %c3_36 = arith.constant 3 : index
    %69 = vector.load %arg3[%c0_35, %c3_36] : memref<64x36xf32, #tpu.memory_space<vmem>>, vector<16x1xf32>
    %70 = vector.broadcast %68 : vector<1x256xf32> to vector<16x256xf32>
    %71 = arith.mulf %67, %70 : vector<16x256xf32>
    %72 = vector.broadcast %69 : vector<16x1xf32> to vector<16x256xf32>
    %73 = arith.mulf %71, %72 : vector<16x256xf32>
    %74 = arith.addf %66, %73 : vector<16x256xf32>
    %c255_i32 = arith.constant 255 : i32
    %75 = tpu.dynamic_rotate %39 by %c255_i32 dim 1 : vector<16x256xf32>, i32 -> vector<16x256xf32>
    %c5 = arith.constant 5 : index
    %c0_37 = arith.constant 0 : index
    %76 = vector.load %arg7[%c5, %c0_37] : memref<36x256xf32, #tpu.memory_space<vmem>>, vector<1x256xf32>
    %c0_38 = arith.constant 0 : index
    %c5_39 = arith.constant 5 : index
    %77 = vector.load %arg3[%c0_38, %c5_39] : memref<64x36xf32, #tpu.memory_space<vmem>>, vector<16x1xf32>
    %78 = vector.broadcast %76 : vector<1x256xf32> to vector<16x256xf32>
    %79 = arith.mulf %75, %78 : vector<16x256xf32>
    %80 = vector.broadcast %77 : vector<16x1xf32> to vector<16x256xf32>
    %81 = arith.mulf %79, %80 : vector<16x256xf32>
    %82 = arith.addf %74, %81 : vector<16x256xf32>
    %c241_i32 = arith.constant 241 : i32
    %83 = tpu.dynamic_rotate %39 by %c241_i32 dim 1 : vector<16x256xf32>, i32 -> vector<16x256xf32>
    %c6 = arith.constant 6 : index
    %c0_40 = arith.constant 0 : index
    %84 = vector.load %arg7[%c6, %c0_40] : memref<36x256xf32, #tpu.memory_space<vmem>>, vector<1x256xf32>
    %c0_41 = arith.constant 0 : index
    %c6_42 = arith.constant 6 : index
    %85 = vector.load %arg3[%c0_41, %c6_42] : memref<64x36xf32, #tpu.memory_space<vmem>>, vector<16x1xf32>
    %86 = vector.broadcast %84 : vector<1x256xf32> to vector<16x256xf32>
    %87 = arith.mulf %83, %86 : vector<16x256xf32>
    %88 = vector.broadcast %85 : vector<16x1xf32> to vector<16x256xf32>
    %89 = arith.mulf %87, %88 : vector<16x256xf32>
    %90 = arith.addf %82, %89 : vector<16x256xf32>
    %c240_i32 = arith.constant 240 : i32
    %91 = tpu.dynamic_rotate %39 by %c240_i32 dim 1 : vector<16x256xf32>, i32 -> vector<16x256xf32>
    %c7 = arith.constant 7 : index
    %c0_43 = arith.constant 0 : index
    %92 = vector.load %arg7[%c7, %c0_43] : memref<36x256xf32, #tpu.memory_space<vmem>>, vector<1x256xf32>
    %c0_44 = arith.constant 0 : index
    %c7_45 = arith.constant 7 : index
    %93 = vector.load %arg3[%c0_44, %c7_45] : memref<64x36xf32, #tpu.memory_space<vmem>>, vector<16x1xf32>
    %94 = vector.broadcast %92 : vector<1x256xf32> to vector<16x256xf32>
    %95 = arith.mulf %91, %94 : vector<16x256xf32>
    %96 = vector.broadcast %93 : vector<16x1xf32> to vector<16x256xf32>
    %97 = arith.mulf %95, %96 : vector<16x256xf32>
    %98 = arith.addf %90, %97 : vector<16x256xf32>
    %c239_i32 = arith.constant 239 : i32
    %99 = tpu.dynamic_rotate %39 by %c239_i32 dim 1 : vector<16x256xf32>, i32 -> vector<16x256xf32>
    %c8 = arith.constant 8 : index
    %c0_46 = arith.constant 0 : index
    %100 = vector.load %arg7[%c8, %c0_46] : memref<36x256xf32, #tpu.memory_space<vmem>>, vector<1x256xf32>
    %c0_47 = arith.constant 0 : index
    %c8_48 = arith.constant 8 : index
    %101 = vector.load %arg3[%c0_47, %c8_48] : memref<64x36xf32, #tpu.memory_space<vmem>>, vector<16x1xf32>
    %102 = vector.broadcast %100 : vector<1x256xf32> to vector<16x256xf32>
    %103 = arith.mulf %99, %102 : vector<16x256xf32>
    %104 = vector.broadcast %101 : vector<16x1xf32> to vector<16x256xf32>
    %105 = arith.mulf %103, %104 : vector<16x256xf32>
    %106 = arith.addf %98, %105 : vector<16x256xf32>
    %c0_49 = arith.constant 0 : index
    %c0_50 = arith.constant 0 : index
    %c0_51 = arith.constant 0 : index
    %107 = vector.load %arg4[%c0_49, %c0_50, %c0_51] : memref<4x16x64xf32, #tpu.memory_space<vmem>>, vector<1x16x64xf32>
    %108 = vector.shape_cast %107 : vector<1x16x64xf32> to vector<16x64xf32>
    %109 = vector.extract_strided_slice %108 {offsets = [0, 0], sizes = [16, 16], strides = [1, 1]} : vector<16x64xf32> to vector<16x16xf32>
    %cst_52 = arith.constant dense<0.000000e+00> : vector<16x256xf32>
    %110 = tpu.matmul %109, %106, %cst_52 {dimension_numbers = #tpu.dot_dimension_numbers<[1], [0], [0], [1], [0, 0, 1, 1], [], []>} : vector<16x16xf32>, vector<16x256xf32>, vector<16x256xf32> -> vector<16x256xf32>
    %c3_53 = arith.constant 3 : index
    %c0_54 = arith.constant 0 : index
    %c0_55 = arith.constant 0 : index
    %111 = vector.load %arg6[%c3_53, %c0_54, %c0_55] : memref<18x16x1xf32, #tpu.memory_space<vmem>>, vector<1x16x1xf32>
    %112 = vector.shape_cast %111 : vector<1x16x1xf32> to vector<16x1xf32>
    %c4_56 = arith.constant 4 : index
    %c0_57 = arith.constant 0 : index
    %c0_58 = arith.constant 0 : index
    %113 = vector.load %arg6[%c4_56, %c0_57, %c0_58] : memref<18x16x1xf32, #tpu.memory_space<vmem>>, vector<1x16x1xf32>
    %114 = vector.shape_cast %113 : vector<1x16x1xf32> to vector<16x1xf32>
    %c5_59 = arith.constant 5 : index
    %c0_60 = arith.constant 0 : index
    %c0_61 = arith.constant 0 : index
    %115 = vector.load %arg6[%c5_59, %c0_60, %c0_61] : memref<18x16x1xf32, #tpu.memory_space<vmem>>, vector<1x16x1xf32>
    %116 = vector.shape_cast %115 : vector<1x16x1xf32> to vector<16x1xf32>
    %cst_62 = arith.constant dense<0.000000e+00> : vector<16xf32>
    %117 = vector.multi_reduction <add>, %110, %cst_62 [1] : vector<16x256xf32> to vector<16xf32>
    %118 = vector.shape_cast %117 : vector<16xf32> to vector<16x1xf32>
    %cst_63 = arith.constant 3.906250e-03 : f32
    %119 = vector.broadcast %cst_63 : f32 to vector<16x1xf32>
    %120 = arith.mulf %118, %119 : vector<16x1xf32>
    %121 = arith.mulf %110, %110 : vector<16x256xf32>
    %cst_64 = arith.constant dense<0.000000e+00> : vector<16xf32>
    %122 = vector.multi_reduction <add>, %121, %cst_64 [1] : vector<16x256xf32> to vector<16xf32>
    %123 = vector.shape_cast %122 : vector<16xf32> to vector<16x1xf32>
    %cst_65 = arith.constant 3.906250e-03 : f32
    %124 = vector.broadcast %cst_65 : f32 to vector<16x1xf32>
    %125 = arith.mulf %123, %124 : vector<16x1xf32>
    %126 = arith.mulf %120, %120 : vector<16x1xf32>
    %127 = arith.subf %125, %126 : vector<16x1xf32>
    %cst_66 = arith.constant 0.000000e+00 : f32
    %128 = vector.broadcast %cst_66 : f32 to vector<16x1xf32>
    %129 = arith.maximumf %127, %128 : vector<16x1xf32>
    %cst_67 = arith.constant 9.99999974E-6 : f32
    %130 = vector.broadcast %cst_67 : f32 to vector<16x1xf32>
    %131 = arith.addf %129, %130 : vector<16x1xf32>
    %132 = math.rsqrt %131 : vector<16x1xf32>
    %133 = arith.mulf %112, %132 : vector<16x1xf32>
    %134 = arith.mulf %120, %133 : vector<16x1xf32>
    %135 = arith.subf %114, %134 : vector<16x1xf32>
    %136 = vector.broadcast %133 : vector<16x1xf32> to vector<16x256xf32>
    %137 = arith.mulf %110, %136 : vector<16x256xf32>
    %138 = vector.broadcast %135 : vector<16x1xf32> to vector<16x256xf32>
    %139 = arith.addf %137, %138 : vector<16x256xf32>
    %cst_68 = arith.constant 0.000000e+00 : f32
    %140 = vector.broadcast %cst_68 : f32 to vector<16x256xf32>
    %141 = arith.cmpf oge, %139, %140 : vector<16x256xf32>
    %142 = vector.broadcast %116 : vector<16x1xf32> to vector<16x256xf32>
    %143 = arith.mulf %142, %139 : vector<16x256xf32>
    %144 = arith.select %141, %139, %143 : vector<16x256xi1>, vector<16x256xf32>
    %c32 = arith.constant 32 : index
    %c0_69 = arith.constant 0 : index
    %145 = vector.load %arg10[%c32, %c0_69] : memref<64x256xf32, #tpu.memory_space<vmem>>, vector<16x256xf32>
    tpu.vector_store %arg10[%c32, %c0_69], %144 {strides = array<i32>} : memref<64x256xf32, #tpu.memory_space<vmem>>, vector<16x256xf32>,
    %c32_70 = arith.constant 32 : index
    %c0_71 = arith.constant 0 : index
    %146 = vector.load %arg10[%c32_70, %c0_71] : memref<64x256xf32, #tpu.memory_space<vmem>>, vector<32x256xf32>
    %c0_72 = arith.constant 0 : index
    %c13 = arith.constant 13 : index
    %147 = vector.load %arg3[%c0_72, %c13] : memref<64x36xf32, #tpu.memory_space<vmem>>, vector<32x1xf32>
    %148 = vector.broadcast %147 : vector<32x1xf32> to vector<32x256xf32>
    %149 = arith.mulf %146, %148 : vector<32x256xf32>
    %c33_i32 = arith.constant 33 : i32
    %150 = tpu.dynamic_rotate %146 by %c33_i32 dim 1 : vector<32x256xf32>, i32 -> vector<32x256xf32>
    %c9 = arith.constant 9 : index
    %c0_73 = arith.constant 0 : index
    %151 = vector.load %arg7[%c9, %c0_73] : memref<36x256xf32, #tpu.memory_space<vmem>>, vector<1x256xf32>
    %c0_74 = arith.constant 0 : index
    %c9_75 = arith.constant 9 : index
    %152 = vector.load %arg3[%c0_74, %c9_75] : memref<64x36xf32, #tpu.memory_space<vmem>>, vector<32x1xf32>
    %153 = vector.broadcast %151 : vector<1x256xf32> to vector<32x256xf32>
    %154 = arith.mulf %150, %153 : vector<32x256xf32>
    %155 = vector.broadcast %152 : vector<32x1xf32> to vector<32x256xf32>
    %156 = arith.mulf %154, %155 : vector<32x256xf32>
    %157 = arith.addf %149, %156 : vector<32x256xf32>
    %c32_i32 = arith.constant 32 : i32
    %158 = tpu.dynamic_rotate %146 by %c32_i32 dim 1 : vector<32x256xf32>, i32 -> vector<32x256xf32>
    %c10 = arith.constant 10 : index
    %c0_76 = arith.constant 0 : index
    %159 = vector.load %arg7[%c10, %c0_76] : memref<36x256xf32, #tpu.memory_space<vmem>>, vector<1x256xf32>
    %c0_77 = arith.constant 0 : index
    %c10_78 = arith.constant 10 : index
    %160 = vector.load %arg3[%c0_77, %c10_78] : memref<64x36xf32, #tpu.memory_space<vmem>>, vector<32x1xf32>
    %161 = vector.broadcast %159 : vector<1x256xf32> to vector<32x256xf32>
    %162 = arith.mulf %158, %161 : vector<32x256xf32>
    %163 = vector.broadcast %160 : vector<32x1xf32> to vector<32x256xf32>
    %164 = arith.mulf %162, %163 : vector<32x256xf32>
    %165 = arith.addf %157, %164 : vector<32x256xf32>
    %c31_i32 = arith.constant 31 : i32
    %166 = tpu.dynamic_rotate %146 by %c31_i32 dim 1 : vector<32x256xf32>, i32 -> vector<32x256xf32>
    %c11 = arith.constant 11 : index
    %c0_79 = arith.constant 0 : index
    %167 = vector.load %arg7[%c11, %c0_79] : memref<36x256xf32, #tpu.memory_space<vmem>>, vector<1x256xf32>
    %c0_80 = arith.constant 0 : index
    %c11_81 = arith.constant 11 : index
    %168 = vector.load %arg3[%c0_80, %c11_81] : memref<64x36xf32, #tpu.memory_space<vmem>>, vector<32x1xf32>
    %169 = vector.broadcast %167 : vector<1x256xf32> to vector<32x256xf32>
    %170 = arith.mulf %166, %169 : vector<32x256xf32>
    %171 = vector.broadcast %168 : vector<32x1xf32> to vector<32x256xf32>
    %172 = arith.mulf %170, %171 : vector<32x256xf32>
    %173 = arith.addf %165, %172 : vector<32x256xf32>
    %c1_i32_82 = arith.constant 1 : i32
    %174 = tpu.dynamic_rotate %146 by %c1_i32_82 dim 1 : vector<32x256xf32>, i32 -> vector<32x256xf32>
    %c12 = arith.constant 12 : index
    %c0_83 = arith.constant 0 : index
    %175 = vector.load %arg7[%c12, %c0_83] : memref<36x256xf32, #tpu.memory_space<vmem>>, vector<1x256xf32>
    %c0_84 = arith.constant 0 : index
    %c12_85 = arith.constant 12 : index
    %176 = vector.load %arg3[%c0_84, %c12_85] : memref<64x36xf32, #tpu.memory_space<vmem>>, vector<32x1xf32>
    %177 = vector.broadcast %175 : vector<1x256xf32> to vector<32x256xf32>
    %178 = arith.mulf %174, %177 : vector<32x256xf32>
    %179 = vector.broadcast %176 : vector<32x1xf32> to vector<32x256xf32>
    %180 = arith.mulf %178, %179 : vector<32x256xf32>
    %181 = arith.addf %173, %180 : vector<32x256xf32>
    %c255_i32_86 = arith.constant 255 : i32
    %182 = tpu.dynamic_rotate %146 by %c255_i32_86 dim 1 : vector<32x256xf32>, i32 -> vector<32x256xf32>
    %c14 = arith.constant 14 : index
    %c0_87 = arith.constant 0 : index
    %183 = vector.load %arg7[%c14, %c0_87] : memref<36x256xf32, #tpu.memory_space<vmem>>, vector<1x256xf32>
    %c0_88 = arith.constant 0 : index
    %c14_89 = arith.constant 14 : index
    %184 = vector.load %arg3[%c0_88, %c14_89] : memref<64x36xf32, #tpu.memory_space<vmem>>, vector<32x1xf32>
    %185 = vector.broadcast %183 : vector<1x256xf32> to vector<32x256xf32>
    %186 = arith.mulf %182, %185 : vector<32x256xf32>
    %187 = vector.broadcast %184 : vector<32x1xf32> to vector<32x256xf32>
    %188 = arith.mulf %186, %187 : vector<32x256xf32>
    %189 = arith.addf %181, %188 : vector<32x256xf32>
    %c225_i32 = arith.constant 225 : i32
    %190 = tpu.dynamic_rotate %146 by %c225_i32 dim 1 : vector<32x256xf32>, i32 -> vector<32x256xf32>
    %c15 = arith.constant 15 : index
    %c0_90 = arith.constant 0 : index
    %191 = vector.load %arg7[%c15, %c0_90] : memref<36x256xf32, #tpu.memory_space<vmem>>, vector<1x256xf32>
    %c0_91 = arith.constant 0 : index
    %c15_92 = arith.constant 15 : index
    %192 = vector.load %arg3[%c0_91, %c15_92] : memref<64x36xf32, #tpu.memory_space<vmem>>, vector<32x1xf32>
    %193 = vector.broadcast %191 : vector<1x256xf32> to vector<32x256xf32>
    %194 = arith.mulf %190, %193 : vector<32x256xf32>
    %195 = vector.broadcast %192 : vector<32x1xf32> to vector<32x256xf32>
    %196 = arith.mulf %194, %195 : vector<32x256xf32>
    %197 = arith.addf %189, %196 : vector<32x256xf32>
    %c224_i32 = arith.constant 224 : i32
    %198 = tpu.dynamic_rotate %146 by %c224_i32 dim 1 : vector<32x256xf32>, i32 -> vector<32x256xf32>
    %c16 = arith.constant 16 : index
    %c0_93 = arith.constant 0 : index
    %199 = vector.load %arg7[%c16, %c0_93] : memref<36x256xf32, #tpu.memory_space<vmem>>, vector<1x256xf32>
    %c0_94 = arith.constant 0 : index
    %c16_95 = arith.constant 16 : index
    %200 = vector.load %arg3[%c0_94, %c16_95] : memref<64x36xf32, #tpu.memory_space<vmem>>, vector<32x1xf32>
    %201 = vector.broadcast %199 : vector<1x256xf32> to vector<32x256xf32>
    %202 = arith.mulf %198, %201 : vector<32x256xf32>
    %203 = vector.broadcast %200 : vector<32x1xf32> to vector<32x256xf32>
    %204 = arith.mulf %202, %203 : vector<32x256xf32>
    %205 = arith.addf %197, %204 : vector<32x256xf32>
    %c223_i32 = arith.constant 223 : i32
    %206 = tpu.dynamic_rotate %146 by %c223_i32 dim 1 : vector<32x256xf32>, i32 -> vector<32x256xf32>
    %c17 = arith.constant 17 : index
    %c0_96 = arith.constant 0 : index
    %207 = vector.load %arg7[%c17, %c0_96] : memref<36x256xf32, #tpu.memory_space<vmem>>, vector<1x256xf32>
    %c0_97 = arith.constant 0 : index
    %c17_98 = arith.constant 17 : index
    %208 = vector.load %arg3[%c0_97, %c17_98] : memref<64x36xf32, #tpu.memory_space<vmem>>, vector<32x1xf32>
    %209 = vector.broadcast %207 : vector<1x256xf32> to vector<32x256xf32>
    %210 = arith.mulf %206, %209 : vector<32x256xf32>
    %211 = vector.broadcast %208 : vector<32x1xf32> to vector<32x256xf32>
    %212 = arith.mulf %210, %211 : vector<32x256xf32>
    %213 = arith.addf %205, %212 : vector<32x256xf32>
    %c1_99 = arith.constant 1 : index
    %c0_100 = arith.constant 0 : index
    %c0_101 = arith.constant 0 : index
    %214 = vector.load %arg4[%c1_99, %c0_100, %c0_101] : memref<4x16x64xf32, #tpu.memory_space<vmem>>, vector<1x16x64xf32>
    %215 = vector.shape_cast %214 : vector<1x16x64xf32> to vector<16x64xf32>
    %216 = vector.extract_strided_slice %215 {offsets = [0, 0], sizes = [16, 32], strides = [1, 1]} : vector<16x64xf32> to vector<16x32xf32>
    %cst_102 = arith.constant dense<0.000000e+00> : vector<16x256xf32>
    %217 = tpu.matmul %216, %213, %cst_102 {dimension_numbers = #tpu.dot_dimension_numbers<[1], [0], [0], [1], [0, 0, 1, 1], [], []>} : vector<16x32xf32>, vector<32x256xf32>, vector<16x256xf32> -> vector<16x256xf32>
    %c6_103 = arith.constant 6 : index
    %c0_104 = arith.constant 0 : index
    %c0_105 = arith.constant 0 : index
    %218 = vector.load %arg6[%c6_103, %c0_104, %c0_105] : memref<18x16x1xf32, #tpu.memory_space<vmem>>, vector<1x16x1xf32>
    %219 = vector.shape_cast %218 : vector<1x16x1xf32> to vector<16x1xf32>
    %c7_106 = arith.constant 7 : index
    %c0_107 = arith.constant 0 : index
    %c0_108 = arith.constant 0 : index
    %220 = vector.load %arg6[%c7_106, %c0_107, %c0_108] : memref<18x16x1xf32, #tpu.memory_space<vmem>>, vector<1x16x1xf32>
    %221 = vector.shape_cast %220 : vector<1x16x1xf32> to vector<16x1xf32>
    %c8_109 = arith.constant 8 : index
    %c0_110 = arith.constant 0 : index
    %c0_111 = arith.constant 0 : index
    %222 = vector.load %arg6[%c8_109, %c0_110, %c0_111] : memref<18x16x1xf32, #tpu.memory_space<vmem>>, vector<1x16x1xf32>
    %223 = vector.shape_cast %222 : vector<1x16x1xf32> to vector<16x1xf32>
    %cst_112 = arith.constant dense<0.000000e+00> : vector<16xf32>
    %224 = vector.multi_reduction <add>, %217, %cst_112 [1] : vector<16x256xf32> to vector<16xf32>
    %225 = vector.shape_cast %224 : vector<16xf32> to vector<16x1xf32>
    %cst_113 = arith.constant 3.906250e-03 : f32
    %226 = vector.broadcast %cst_113 : f32 to vector<16x1xf32>
    %227 = arith.mulf %225, %226 : vector<16x1xf32>
    %228 = arith.mulf %217, %217 : vector<16x256xf32>
    %cst_114 = arith.constant dense<0.000000e+00> : vector<16xf32>
    %229 = vector.multi_reduction <add>, %228, %cst_114 [1] : vector<16x256xf32> to vector<16xf32>
    %230 = vector.shape_cast %229 : vector<16xf32> to vector<16x1xf32>
    %cst_115 = arith.constant 3.906250e-03 : f32
    %231 = vector.broadcast %cst_115 : f32 to vector<16x1xf32>
    %232 = arith.mulf %230, %231 : vector<16x1xf32>
    %233 = arith.mulf %227, %227 : vector<16x1xf32>
    %234 = arith.subf %232, %233 : vector<16x1xf32>
    %cst_116 = arith.constant 0.000000e+00 : f32
    %235 = vector.broadcast %cst_116 : f32 to vector<16x1xf32>
    %236 = arith.maximumf %234, %235 : vector<16x1xf32>
    %cst_117 = arith.constant 9.99999974E-6 : f32
    %237 = vector.broadcast %cst_117 : f32 to vector<16x1xf32>
    %238 = arith.addf %236, %237 : vector<16x1xf32>
    %239 = math.rsqrt %238 : vector<16x1xf32>
    %240 = arith.mulf %219, %239 : vector<16x1xf32>
    %241 = arith.mulf %227, %240 : vector<16x1xf32>
    %242 = arith.subf %221, %241 : vector<16x1xf32>
    %243 = vector.broadcast %240 : vector<16x1xf32> to vector<16x256xf32>
    %244 = arith.mulf %217, %243 : vector<16x256xf32>
    %245 = vector.broadcast %242 : vector<16x1xf32> to vector<16x256xf32>
    %246 = arith.addf %244, %245 : vector<16x256xf32>
    %cst_118 = arith.constant 0.000000e+00 : f32
    %247 = vector.broadcast %cst_118 : f32 to vector<16x256xf32>
    %248 = arith.cmpf oge, %246, %247 : vector<16x256xf32>
    %249 = vector.broadcast %223 : vector<16x1xf32> to vector<16x256xf32>
    %250 = arith.mulf %249, %246 : vector<16x256xf32>
    %251 = arith.select %248, %246, %250 : vector<16x256xi1>, vector<16x256xf32>
    %c16_119 = arith.constant 16 : index
    %c0_120 = arith.constant 0 : index
    %252 = vector.load %arg10[%c16_119, %c0_120] : memref<64x256xf32, #tpu.memory_space<vmem>>, vector<16x256xf32>
    tpu.vector_store %arg10[%c16_119, %c0_120], %251 {strides = array<i32>} : memref<64x256xf32, #tpu.memory_space<vmem>>, vector<16x256xf32>,
    %c16_121 = arith.constant 16 : index
    %c0_122 = arith.constant 0 : index
    %253 = vector.load %arg10[%c16_121, %c0_122] : memref<64x256xf32, #tpu.memory_space<vmem>>, vector<48x256xf32>
    %c0_123 = arith.constant 0 : index
    %c22 = arith.constant 22 : index
    %254 = vector.load %arg3[%c0_123, %c22] : memref<64x36xf32, #tpu.memory_space<vmem>>, vector<48x1xf32>
    %255 = vector.broadcast %254 : vector<48x1xf32> to vector<48x256xf32>
    %256 = arith.mulf %253, %255 : vector<48x256xf32>
    %c65_i32 = arith.constant 65 : i32
    %257 = tpu.dynamic_rotate %253 by %c65_i32 dim 1 : vector<48x256xf32>, i32 -> vector<48x256xf32>
    %c18 = arith.constant 18 : index
    %c0_124 = arith.constant 0 : index
    %258 = vector.load %arg7[%c18, %c0_124] : memref<36x256xf32, #tpu.memory_space<vmem>>, vector<1x256xf32>
    %c0_125 = arith.constant 0 : index
    %c18_126 = arith.constant 18 : index
    %259 = vector.load %arg3[%c0_125, %c18_126] : memref<64x36xf32, #tpu.memory_space<vmem>>, vector<48x1xf32>
    %260 = vector.broadcast %258 : vector<1x256xf32> to vector<48x256xf32>
    %261 = arith.mulf %257, %260 : vector<48x256xf32>
    %262 = vector.broadcast %259 : vector<48x1xf32> to vector<48x256xf32>
    %263 = arith.mulf %261, %262 : vector<48x256xf32>
    %264 = arith.addf %256, %263 : vector<48x256xf32>
    %c64_i32 = arith.constant 64 : i32
    %265 = tpu.dynamic_rotate %253 by %c64_i32 dim 1 : vector<48x256xf32>, i32 -> vector<48x256xf32>
    %c19 = arith.constant 19 : index
    %c0_127 = arith.constant 0 : index
    %266 = vector.load %arg7[%c19, %c0_127] : memref<36x256xf32, #tpu.memory_space<vmem>>, vector<1x256xf32>
    %c0_128 = arith.constant 0 : index
    %c19_129 = arith.constant 19 : index
    %267 = vector.load %arg3[%c0_128, %c19_129] : memref<64x36xf32, #tpu.memory_space<vmem>>, vector<48x1xf32>
    %268 = vector.broadcast %266 : vector<1x256xf32> to vector<48x256xf32>
    %269 = arith.mulf %265, %268 : vector<48x256xf32>
    %270 = vector.broadcast %267 : vector<48x1xf32> to vector<48x256xf32>
    %271 = arith.mulf %269, %270 : vector<48x256xf32>
    %272 = arith.addf %264, %271 : vector<48x256xf32>
    %c63_i32 = arith.constant 63 : i32
    %273 = tpu.dynamic_rotate %253 by %c63_i32 dim 1 : vector<48x256xf32>, i32 -> vector<48x256xf32>
    %c20 = arith.constant 20 : index
    %c0_130 = arith.constant 0 : index
    %274 = vector.load %arg7[%c20, %c0_130] : memref<36x256xf32, #tpu.memory_space<vmem>>, vector<1x256xf32>
    %c0_131 = arith.constant 0 : index
    %c20_132 = arith.constant 20 : index
    %275 = vector.load %arg3[%c0_131, %c20_132] : memref<64x36xf32, #tpu.memory_space<vmem>>, vector<48x1xf32>
    %276 = vector.broadcast %274 : vector<1x256xf32> to vector<48x256xf32>
    %277 = arith.mulf %273, %276 : vector<48x256xf32>
    %278 = vector.broadcast %275 : vector<48x1xf32> to vector<48x256xf32>
    %279 = arith.mulf %277, %278 : vector<48x256xf32>
    %280 = arith.addf %272, %279 : vector<48x256xf32>
    %c1_i32_133 = arith.constant 1 : i32
    %281 = tpu.dynamic_rotate %253 by %c1_i32_133 dim 1 : vector<48x256xf32>, i32 -> vector<48x256xf32>
    %c21 = arith.constant 21 : index
    %c0_134 = arith.constant 0 : index
    %282 = vector.load %arg7[%c21, %c0_134] : memref<36x256xf32, #tpu.memory_space<vmem>>, vector<1x256xf32>
    %c0_135 = arith.constant 0 : index
    %c21_136 = arith.constant 21 : index
    %283 = vector.load %arg3[%c0_135, %c21_136] : memref<64x36xf32, #tpu.memory_space<vmem>>, vector<48x1xf32>
    %284 = vector.broadcast %282 : vector<1x256xf32> to vector<48x256xf32>
    %285 = arith.mulf %281, %284 : vector<48x256xf32>
    %286 = vector.broadcast %283 : vector<48x1xf32> to vector<48x256xf32>
    %287 = arith.mulf %285, %286 : vector<48x256xf32>
    %288 = arith.addf %280, %287 : vector<48x256xf32>
    %c255_i32_137 = arith.constant 255 : i32
    %289 = tpu.dynamic_rotate %253 by %c255_i32_137 dim 1 : vector<48x256xf32>, i32 -> vector<48x256xf32>
    %c23 = arith.constant 23 : index
    %c0_138 = arith.constant 0 : index
    %290 = vector.load %arg7[%c23, %c0_138] : memref<36x256xf32, #tpu.memory_space<vmem>>, vector<1x256xf32>
    %c0_139 = arith.constant 0 : index
    %c23_140 = arith.constant 23 : index
    %291 = vector.load %arg3[%c0_139, %c23_140] : memref<64x36xf32, #tpu.memory_space<vmem>>, vector<48x1xf32>
    %292 = vector.broadcast %290 : vector<1x256xf32> to vector<48x256xf32>
    %293 = arith.mulf %289, %292 : vector<48x256xf32>
    %294 = vector.broadcast %291 : vector<48x1xf32> to vector<48x256xf32>
    %295 = arith.mulf %293, %294 : vector<48x256xf32>
    %296 = arith.addf %288, %295 : vector<48x256xf32>
    %c193_i32 = arith.constant 193 : i32
    %297 = tpu.dynamic_rotate %253 by %c193_i32 dim 1 : vector<48x256xf32>, i32 -> vector<48x256xf32>
    %c24 = arith.constant 24 : index
    %c0_141 = arith.constant 0 : index
    %298 = vector.load %arg7[%c24, %c0_141] : memref<36x256xf32, #tpu.memory_space<vmem>>, vector<1x256xf32>
    %c0_142 = arith.constant 0 : index
    %c24_143 = arith.constant 24 : index
    %299 = vector.load %arg3[%c0_142, %c24_143] : memref<64x36xf32, #tpu.memory_space<vmem>>, vector<48x1xf32>
    %300 = vector.broadcast %298 : vector<1x256xf32> to vector<48x256xf32>
    %301 = arith.mulf %297, %300 : vector<48x256xf32>
    %302 = vector.broadcast %299 : vector<48x1xf32> to vector<48x256xf32>
    %303 = arith.mulf %301, %302 : vector<48x256xf32>
    %304 = arith.addf %296, %303 : vector<48x256xf32>
    %c192_i32 = arith.constant 192 : i32
    %305 = tpu.dynamic_rotate %253 by %c192_i32 dim 1 : vector<48x256xf32>, i32 -> vector<48x256xf32>
    %c25 = arith.constant 25 : index
    %c0_144 = arith.constant 0 : index
    %306 = vector.load %arg7[%c25, %c0_144] : memref<36x256xf32, #tpu.memory_space<vmem>>, vector<1x256xf32>
    %c0_145 = arith.constant 0 : index
    %c25_146 = arith.constant 25 : index
    %307 = vector.load %arg3[%c0_145, %c25_146] : memref<64x36xf32, #tpu.memory_space<vmem>>, vector<48x1xf32>
    %308 = vector.broadcast %306 : vector<1x256xf32> to vector<48x256xf32>
    %309 = arith.mulf %305, %308 : vector<48x256xf32>
    %310 = vector.broadcast %307 : vector<48x1xf32> to vector<48x256xf32>
    %311 = arith.mulf %309, %310 : vector<48x256xf32>
    %312 = arith.addf %304, %311 : vector<48x256xf32>
    %c191_i32 = arith.constant 191 : i32
    %313 = tpu.dynamic_rotate %253 by %c191_i32 dim 1 : vector<48x256xf32>, i32 -> vector<48x256xf32>
    %c26 = arith.constant 26 : index
    %c0_147 = arith.constant 0 : index
    %314 = vector.load %arg7[%c26, %c0_147] : memref<36x256xf32, #tpu.memory_space<vmem>>, vector<1x256xf32>
    %c0_148 = arith.constant 0 : index
    %c26_149 = arith.constant 26 : index
    %315 = vector.load %arg3[%c0_148, %c26_149] : memref<64x36xf32, #tpu.memory_space<vmem>>, vector<48x1xf32>
    %316 = vector.broadcast %314 : vector<1x256xf32> to vector<48x256xf32>
    %317 = arith.mulf %313, %316 : vector<48x256xf32>
    %318 = vector.broadcast %315 : vector<48x1xf32> to vector<48x256xf32>
    %319 = arith.mulf %317, %318 : vector<48x256xf32>
    %320 = arith.addf %312, %319 : vector<48x256xf32>
    %c2_150 = arith.constant 2 : index
    %c0_151 = arith.constant 0 : index
    %c0_152 = arith.constant 0 : index
    %321 = vector.load %arg4[%c2_150, %c0_151, %c0_152] : memref<4x16x64xf32, #tpu.memory_space<vmem>>, vector<1x16x64xf32>
    %322 = vector.shape_cast %321 : vector<1x16x64xf32> to vector<16x64xf32>
    %323 = vector.extract_strided_slice %322 {offsets = [0, 0], sizes = [16, 48], strides = [1, 1]} : vector<16x64xf32> to vector<16x48xf32>
    %cst_153 = arith.constant dense<0.000000e+00> : vector<16x256xf32>
    %324 = tpu.matmul %323, %320, %cst_153 {dimension_numbers = #tpu.dot_dimension_numbers<[1], [0], [0], [1], [0, 0, 1, 1], [], []>} : vector<16x48xf32>, vector<48x256xf32>, vector<16x256xf32> -> vector<16x256xf32>
    %c9_154 = arith.constant 9 : index
    %c0_155 = arith.constant 0 : index
    %c0_156 = arith.constant 0 : index
    %325 = vector.load %arg6[%c9_154, %c0_155, %c0_156] : memref<18x16x1xf32, #tpu.memory_space<vmem>>, vector<1x16x1xf32>
    %326 = vector.shape_cast %325 : vector<1x16x1xf32> to vector<16x1xf32>
    %c10_157 = arith.constant 10 : index
    %c0_158 = arith.constant 0 : index
    %c0_159 = arith.constant 0 : index
    %327 = vector.load %arg6[%c10_157, %c0_158, %c0_159] : memref<18x16x1xf32, #tpu.memory_space<vmem>>, vector<1x16x1xf32>
    %328 = vector.shape_cast %327 : vector<1x16x1xf32> to vector<16x1xf32>
    %c11_160 = arith.constant 11 : index
    %c0_161 = arith.constant 0 : index
    %c0_162 = arith.constant 0 : index
    %329 = vector.load %arg6[%c11_160, %c0_161, %c0_162] : memref<18x16x1xf32, #tpu.memory_space<vmem>>, vector<1x16x1xf32>
    %330 = vector.shape_cast %329 : vector<1x16x1xf32> to vector<16x1xf32>
    %cst_163 = arith.constant dense<0.000000e+00> : vector<16xf32>
    %331 = vector.multi_reduction <add>, %324, %cst_163 [1] : vector<16x256xf32> to vector<16xf32>
    %332 = vector.shape_cast %331 : vector<16xf32> to vector<16x1xf32>
    %cst_164 = arith.constant 3.906250e-03 : f32
    %333 = vector.broadcast %cst_164 : f32 to vector<16x1xf32>
    %334 = arith.mulf %332, %333 : vector<16x1xf32>
    %335 = arith.mulf %324, %324 : vector<16x256xf32>
    %cst_165 = arith.constant dense<0.000000e+00> : vector<16xf32>
    %336 = vector.multi_reduction <add>, %335, %cst_165 [1] : vector<16x256xf32> to vector<16xf32>
    %337 = vector.shape_cast %336 : vector<16xf32> to vector<16x1xf32>
    %cst_166 = arith.constant 3.906250e-03 : f32
    %338 = vector.broadcast %cst_166 : f32 to vector<16x1xf32>
    %339 = arith.mulf %337, %338 : vector<16x1xf32>
    %340 = arith.mulf %334, %334 : vector<16x1xf32>
    %341 = arith.subf %339, %340 : vector<16x1xf32>
    %cst_167 = arith.constant 0.000000e+00 : f32
    %342 = vector.broadcast %cst_167 : f32 to vector<16x1xf32>
    %343 = arith.maximumf %341, %342 : vector<16x1xf32>
    %cst_168 = arith.constant 9.99999974E-6 : f32
    %344 = vector.broadcast %cst_168 : f32 to vector<16x1xf32>
    %345 = arith.addf %343, %344 : vector<16x1xf32>
    %346 = math.rsqrt %345 : vector<16x1xf32>
    %347 = arith.mulf %326, %346 : vector<16x1xf32>
    %348 = arith.mulf %334, %347 : vector<16x1xf32>
    %349 = arith.subf %328, %348 : vector<16x1xf32>
    %350 = vector.broadcast %347 : vector<16x1xf32> to vector<16x256xf32>
    %351 = arith.mulf %324, %350 : vector<16x256xf32>
    %352 = vector.broadcast %349 : vector<16x1xf32> to vector<16x256xf32>
    %353 = arith.addf %351, %352 : vector<16x256xf32>
    %cst_169 = arith.constant 0.000000e+00 : f32
    %354 = vector.broadcast %cst_169 : f32 to vector<16x256xf32>
    %355 = arith.cmpf oge, %353, %354 : vector<16x256xf32>
    %356 = vector.broadcast %330 : vector<16x1xf32> to vector<16x256xf32>
    %357 = arith.mulf %356, %353 : vector<16x256xf32>
    %358 = arith.select %355, %353, %357 : vector<16x256xi1>, vector<16x256xf32>
    %c0_170 = arith.constant 0 : index
    %c0_171 = arith.constant 0 : index
    %359 = vector.load %arg10[%c0_170, %c0_171] : memref<64x256xf32, #tpu.memory_space<vmem>>, vector<16x256xf32>
    tpu.vector_store %arg10[%c0_170, %c0_171], %358 {strides = array<i32>} : memref<64x256xf32, #tpu.memory_space<vmem>>, vector<16x256xf32>,
    %c0_172 = arith.constant 0 : index
    %c0_173 = arith.constant 0 : index
    %360 = vector.load %arg10[%c0_172, %c0_173] : memref<64x256xf32, #tpu.memory_space<vmem>>, vector<64x256xf32>
    %c0_174 = arith.constant 0 : index
    %c31 = arith.constant 31 : index
    %361 = vector.load %arg3[%c0_174, %c31] : memref<64x36xf32, #tpu.memory_space<vmem>>, vector<64x1xf32>
    %362 = vector.broadcast %361 : vector<64x1xf32> to vector<64x256xf32>
    %363 = arith.mulf %360, %362 : vector<64x256xf32>
    %c129_i32 = arith.constant 129 : i32
    %364 = tpu.dynamic_rotate %360 by %c129_i32 dim 1 : vector<64x256xf32>, i32 -> vector<64x256xf32>
    %c27 = arith.constant 27 : index
    %c0_175 = arith.constant 0 : index
    %365 = vector.load %arg7[%c27, %c0_175] : memref<36x256xf32, #tpu.memory_space<vmem>>, vector<1x256xf32>
    %c0_176 = arith.constant 0 : index
    %c27_177 = arith.constant 27 : index
    %366 = vector.load %arg3[%c0_176, %c27_177] : memref<64x36xf32, #tpu.memory_space<vmem>>, vector<64x1xf32>
    %367 = vector.broadcast %365 : vector<1x256xf32> to vector<64x256xf32>
    %368 = arith.mulf %364, %367 : vector<64x256xf32>
    %369 = vector.broadcast %366 : vector<64x1xf32> to vector<64x256xf32>
    %370 = arith.mulf %368, %369 : vector<64x256xf32>
    %371 = arith.addf %363, %370 : vector<64x256xf32>
    %c128_i32 = arith.constant 128 : i32
    %372 = tpu.dynamic_rotate %360 by %c128_i32 dim 1 : vector<64x256xf32>, i32 -> vector<64x256xf32>
    %c28 = arith.constant 28 : index
    %c0_178 = arith.constant 0 : index
    %373 = vector.load %arg7[%c28, %c0_178] : memref<36x256xf32, #tpu.memory_space<vmem>>, vector<1x256xf32>
    %c0_179 = arith.constant 0 : index
    %c28_180 = arith.constant 28 : index
    %374 = vector.load %arg3[%c0_179, %c28_180] : memref<64x36xf32, #tpu.memory_space<vmem>>, vector<64x1xf32>
    %375 = vector.broadcast %373 : vector<1x256xf32> to vector<64x256xf32>
    %376 = arith.mulf %372, %375 : vector<64x256xf32>
    %377 = vector.broadcast %374 : vector<64x1xf32> to vector<64x256xf32>
    %378 = arith.mulf %376, %377 : vector<64x256xf32>
    %379 = arith.addf %371, %378 : vector<64x256xf32>
    %c127_i32 = arith.constant 127 : i32
    %380 = tpu.dynamic_rotate %360 by %c127_i32 dim 1 : vector<64x256xf32>, i32 -> vector<64x256xf32>
    %c29 = arith.constant 29 : index
    %c0_181 = arith.constant 0 : index
    %381 = vector.load %arg7[%c29, %c0_181] : memref<36x256xf32, #tpu.memory_space<vmem>>, vector<1x256xf32>
    %c0_182 = arith.constant 0 : index
    %c29_183 = arith.constant 29 : index
    %382 = vector.load %arg3[%c0_182, %c29_183] : memref<64x36xf32, #tpu.memory_space<vmem>>, vector<64x1xf32>
    %383 = vector.broadcast %381 : vector<1x256xf32> to vector<64x256xf32>
    %384 = arith.mulf %380, %383 : vector<64x256xf32>
    %385 = vector.broadcast %382 : vector<64x1xf32> to vector<64x256xf32>
    %386 = arith.mulf %384, %385 : vector<64x256xf32>
    %387 = arith.addf %379, %386 : vector<64x256xf32>
    %c1_i32_184 = arith.constant 1 : i32
    %388 = tpu.dynamic_rotate %360 by %c1_i32_184 dim 1 : vector<64x256xf32>, i32 -> vector<64x256xf32>
    %c30 = arith.constant 30 : index
    %c0_185 = arith.constant 0 : index
    %389 = vector.load %arg7[%c30, %c0_185] : memref<36x256xf32, #tpu.memory_space<vmem>>, vector<1x256xf32>
    %c0_186 = arith.constant 0 : index
    %c30_187 = arith.constant 30 : index
    %390 = vector.load %arg3[%c0_186, %c30_187] : memref<64x36xf32, #tpu.memory_space<vmem>>, vector<64x1xf32>
    %391 = vector.broadcast %389 : vector<1x256xf32> to vector<64x256xf32>
    %392 = arith.mulf %388, %391 : vector<64x256xf32>
    %393 = vector.broadcast %390 : vector<64x1xf32> to vector<64x256xf32>
    %394 = arith.mulf %392, %393 : vector<64x256xf32>
    %395 = arith.addf %387, %394 : vector<64x256xf32>
    %c255_i32_188 = arith.constant 255 : i32
    %396 = tpu.dynamic_rotate %360 by %c255_i32_188 dim 1 : vector<64x256xf32>, i32 -> vector<64x256xf32>
    %c32_189 = arith.constant 32 : index
    %c0_190 = arith.constant 0 : index
    %397 = vector.load %arg7[%c32_189, %c0_190] : memref<36x256xf32, #tpu.memory_space<vmem>>, vector<1x256xf32>
    %c0_191 = arith.constant 0 : index
    %c32_192 = arith.constant 32 : index
    %398 = vector.load %arg3[%c0_191, %c32_192] : memref<64x36xf32, #tpu.memory_space<vmem>>, vector<64x1xf32>
    %399 = vector.broadcast %397 : vector<1x256xf32> to vector<64x256xf32>
    %400 = arith.mulf %396, %399 : vector<64x256xf32>
    %401 = vector.broadcast %398 : vector<64x1xf32> to vector<64x256xf32>
    %402 = arith.mulf %400, %401 : vector<64x256xf32>
    %403 = arith.addf %395, %402 : vector<64x256xf32>
    %c129_i32_193 = arith.constant 129 : i32
    %404 = tpu.dynamic_rotate %360 by %c129_i32_193 dim 1 : vector<64x256xf32>, i32 -> vector<64x256xf32>
    %c33 = arith.constant 33 : index
    %c0_194 = arith.constant 0 : index
    %405 = vector.load %arg7[%c33, %c0_194] : memref<36x256xf32, #tpu.memory_space<vmem>>, vector<1x256xf32>
    %c0_195 = arith.constant 0 : index
    %c33_196 = arith.constant 33 : index
    %406 = vector.load %arg3[%c0_195, %c33_196] : memref<64x36xf32, #tpu.memory_space<vmem>>, vector<64x1xf32>
    %407 = vector.broadcast %405 : vector<1x256xf32> to vector<64x256xf32>
    %408 = arith.mulf %404, %407 : vector<64x256xf32>
    %409 = vector.broadcast %406 : vector<64x1xf32> to vector<64x256xf32>
    %410 = arith.mulf %408, %409 : vector<64x256xf32>
    %411 = arith.addf %403, %410 : vector<64x256xf32>
    %c128_i32_197 = arith.constant 128 : i32
    %412 = tpu.dynamic_rotate %360 by %c128_i32_197 dim 1 : vector<64x256xf32>, i32 -> vector<64x256xf32>
    %c34 = arith.constant 34 : index
    %c0_198 = arith.constant 0 : index
    %413 = vector.load %arg7[%c34, %c0_198] : memref<36x256xf32, #tpu.memory_space<vmem>>, vector<1x256xf32>
    %c0_199 = arith.constant 0 : index
    %c34_200 = arith.constant 34 : index
    %414 = vector.load %arg3[%c0_199, %c34_200] : memref<64x36xf32, #tpu.memory_space<vmem>>, vector<64x1xf32>
    %415 = vector.broadcast %413 : vector<1x256xf32> to vector<64x256xf32>
    %416 = arith.mulf %412, %415 : vector<64x256xf32>
    %417 = vector.broadcast %414 : vector<64x1xf32> to vector<64x256xf32>
    %418 = arith.mulf %416, %417 : vector<64x256xf32>
    %419 = arith.addf %411, %418 : vector<64x256xf32>
    %c127_i32_201 = arith.constant 127 : i32
    %420 = tpu.dynamic_rotate %360 by %c127_i32_201 dim 1 : vector<64x256xf32>, i32 -> vector<64x256xf32>
    %c35 = arith.constant 35 : index
    %c0_202 = arith.constant 0 : index
    %421 = vector.load %arg7[%c35, %c0_202] : memref<36x256xf32, #tpu.memory_space<vmem>>, vector<1x256xf32>
    %c0_203 = arith.constant 0 : index
    %c35_204 = arith.constant 35 : index
    %422 = vector.load %arg3[%c0_203, %c35_204] : memref<64x36xf32, #tpu.memory_space<vmem>>, vector<64x1xf32>
    %423 = vector.broadcast %421 : vector<1x256xf32> to vector<64x256xf32>
    %424 = arith.mulf %420, %423 : vector<64x256xf32>
    %425 = vector.broadcast %422 : vector<64x1xf32> to vector<64x256xf32>
    %426 = arith.mulf %424, %425 : vector<64x256xf32>
    %427 = arith.addf %419, %426 : vector<64x256xf32>
    %c3_205 = arith.constant 3 : index
    %c0_206 = arith.constant 0 : index
    %c0_207 = arith.constant 0 : index
    %428 = vector.load %arg4[%c3_205, %c0_206, %c0_207] : memref<4x16x64xf32, #tpu.memory_space<vmem>>, vector<1x16x64xf32>
    %429 = vector.shape_cast %428 : vector<1x16x64xf32> to vector<16x64xf32>
    %cst_208 = arith.constant dense<0.000000e+00> : vector<16x256xf32>
    %430 = tpu.matmul %429, %427, %cst_208 {dimension_numbers = #tpu.dot_dimension_numbers<[1], [0], [0], [1], [0, 0, 1, 1], [], []>} : vector<16x64xf32>, vector<64x256xf32>, vector<16x256xf32> -> vector<16x256xf32>
    %c12_209 = arith.constant 12 : index
    %c0_210 = arith.constant 0 : index
    %c0_211 = arith.constant 0 : index
    %431 = vector.load %arg6[%c12_209, %c0_210, %c0_211] : memref<18x16x1xf32, #tpu.memory_space<vmem>>, vector<1x16x1xf32>
    %432 = vector.shape_cast %431 : vector<1x16x1xf32> to vector<16x1xf32>
    %c13_212 = arith.constant 13 : index
    %c0_213 = arith.constant 0 : index
    %c0_214 = arith.constant 0 : index
    %433 = vector.load %arg6[%c13_212, %c0_213, %c0_214] : memref<18x16x1xf32, #tpu.memory_space<vmem>>, vector<1x16x1xf32>
    %434 = vector.shape_cast %433 : vector<1x16x1xf32> to vector<16x1xf32>
    %c14_215 = arith.constant 14 : index
    %c0_216 = arith.constant 0 : index
    %c0_217 = arith.constant 0 : index
    %435 = vector.load %arg6[%c14_215, %c0_216, %c0_217] : memref<18x16x1xf32, #tpu.memory_space<vmem>>, vector<1x16x1xf32>
    %436 = vector.shape_cast %435 : vector<1x16x1xf32> to vector<16x1xf32>
    %cst_218 = arith.constant dense<0.000000e+00> : vector<16xf32>
    %437 = vector.multi_reduction <add>, %430, %cst_218 [1] : vector<16x256xf32> to vector<16xf32>
    %438 = vector.shape_cast %437 : vector<16xf32> to vector<16x1xf32>
    %cst_219 = arith.constant 3.906250e-03 : f32
    %439 = vector.broadcast %cst_219 : f32 to vector<16x1xf32>
    %440 = arith.mulf %438, %439 : vector<16x1xf32>
    %441 = arith.mulf %430, %430 : vector<16x256xf32>
    %cst_220 = arith.constant dense<0.000000e+00> : vector<16xf32>
    %442 = vector.multi_reduction <add>, %441, %cst_220 [1] : vector<16x256xf32> to vector<16xf32>
    %443 = vector.shape_cast %442 : vector<16xf32> to vector<16x1xf32>
    %cst_221 = arith.constant 3.906250e-03 : f32
    %444 = vector.broadcast %cst_221 : f32 to vector<16x1xf32>
    %445 = arith.mulf %443, %444 : vector<16x1xf32>
    %446 = arith.mulf %440, %440 : vector<16x1xf32>
    %447 = arith.subf %445, %446 : vector<16x1xf32>
    %cst_222 = arith.constant 0.000000e+00 : f32
    %448 = vector.broadcast %cst_222 : f32 to vector<16x1xf32>
    %449 = arith.maximumf %447, %448 : vector<16x1xf32>
    %cst_223 = arith.constant 9.99999974E-6 : f32
    %450 = vector.broadcast %cst_223 : f32 to vector<16x1xf32>
    %451 = arith.addf %449, %450 : vector<16x1xf32>
    %452 = math.rsqrt %451 : vector<16x1xf32>
    %453 = arith.mulf %432, %452 : vector<16x1xf32>
    %454 = arith.mulf %440, %453 : vector<16x1xf32>
    %455 = arith.subf %434, %454 : vector<16x1xf32>
    %456 = vector.broadcast %453 : vector<16x1xf32> to vector<16x256xf32>
    %457 = arith.mulf %430, %456 : vector<16x256xf32>
    %458 = vector.broadcast %455 : vector<16x1xf32> to vector<16x256xf32>
    %459 = arith.addf %457, %458 : vector<16x256xf32>
    %cst_224 = arith.constant 0.000000e+00 : f32
    %460 = vector.broadcast %cst_224 : f32 to vector<16x256xf32>
    %461 = arith.cmpf oge, %459, %460 : vector<16x256xf32>
    %462 = vector.broadcast %436 : vector<16x1xf32> to vector<16x256xf32>
    %463 = arith.mulf %462, %459 : vector<16x256xf32>
    %464 = arith.select %461, %459, %463 : vector<16x256xi1>, vector<16x256xf32>
    %c255_i32_225 = arith.constant 255 : i32
    %465 = tpu.dynamic_rotate %464 by %c255_i32_225 dim 1 : vector<16x256xf32>, i32 -> vector<16x256xf32>
    %c254_i32 = arith.constant 254 : i32
    %466 = tpu.dynamic_rotate %464 by %c254_i32 dim 1 : vector<16x256xf32>, i32 -> vector<16x256xf32>
    %467 = tpu.concatenate %464, %465, %466 in 0 : vector<16x256xf32>, vector<16x256xf32>, vector<16x256xf32> -> vector<48x256xf32>
    %c0_226 = arith.constant 0 : index
    %c0_227 = arith.constant 0 : index
    %468 = vector.load %arg5[%c0_226, %c0_227] : memref<16x48xf32, #tpu.memory_space<vmem>>, vector<16x48xf32>
    %cst_228 = arith.constant dense<0.000000e+00> : vector<16x256xf32>
    %469 = tpu.matmul %468, %467, %cst_228 {dimension_numbers = #tpu.dot_dimension_numbers<[1], [0], [0], [1], [0, 0, 1, 1], [], []>} : vector<16x48xf32>, vector<48x256xf32>, vector<16x256xf32> -> vector<16x256xf32>
    %c0_229 = arith.constant 0 : index
    %c0_230 = arith.constant 0 : index
    %470 = vector.load %arg8[%c0_229, %c0_230] : memref<256x128xf32, #tpu.memory_space<vmem>>, vector<256x128xf32>
    %cst_231 = arith.constant dense<0.000000e+00> : vector<16x128xf32>
    %471 = tpu.matmul %469, %470, %cst_231 {dimension_numbers = #tpu.dot_dimension_numbers<[1], [0], [0], [1], [0, 0, 1, 1], [], []>} : vector<16x256xf32>, vector<256x128xf32>, vector<16x128xf32> -> vector<16x128xf32>
    %c15_232 = arith.constant 15 : index
    %c0_233 = arith.constant 0 : index
    %c0_234 = arith.constant 0 : index
    %472 = vector.load %arg6[%c15_232, %c0_233, %c0_234] : memref<18x16x1xf32, #tpu.memory_space<vmem>>, vector<1x16x1xf32>
    %473 = vector.shape_cast %472 : vector<1x16x1xf32> to vector<16x1xf32>
    %c16_235 = arith.constant 16 : index
    %c0_236 = arith.constant 0 : index
    %c0_237 = arith.constant 0 : index
    %474 = vector.load %arg6[%c16_235, %c0_236, %c0_237] : memref<18x16x1xf32, #tpu.memory_space<vmem>>, vector<1x16x1xf32>
    %475 = vector.shape_cast %474 : vector<1x16x1xf32> to vector<16x1xf32>
    %c17_238 = arith.constant 17 : index
    %c0_239 = arith.constant 0 : index
    %c0_240 = arith.constant 0 : index
    %476 = vector.load %arg6[%c17_238, %c0_239, %c0_240] : memref<18x16x1xf32, #tpu.memory_space<vmem>>, vector<1x16x1xf32>
    %477 = vector.shape_cast %476 : vector<1x16x1xf32> to vector<16x1xf32>
    %cst_241 = arith.constant dense<0.000000e+00> : vector<16xf32>
    %478 = vector.multi_reduction <add>, %471, %cst_241 [1] : vector<16x128xf32> to vector<16xf32>
    %479 = vector.shape_cast %478 : vector<16xf32> to vector<16x1xf32>
    %cst_242 = arith.constant 0.00892857183 : f32
    %480 = vector.broadcast %cst_242 : f32 to vector<16x1xf32>
    %481 = arith.mulf %479, %480 : vector<16x1xf32>
    %482 = arith.mulf %471, %471 : vector<16x128xf32>
    %cst_243 = arith.constant dense<0.000000e+00> : vector<16xf32>
    %483 = vector.multi_reduction <add>, %482, %cst_243 [1] : vector<16x128xf32> to vector<16xf32>
    %484 = vector.shape_cast %483 : vector<16xf32> to vector<16x1xf32>
    %cst_244 = arith.constant 0.00892857183 : f32
    %485 = vector.broadcast %cst_244 : f32 to vector<16x1xf32>
    %486 = arith.mulf %484, %485 : vector<16x1xf32>
    %487 = arith.mulf %481, %481 : vector<16x1xf32>
    %488 = arith.subf %486, %487 : vector<16x1xf32>
    %cst_245 = arith.constant 0.000000e+00 : f32
    %489 = vector.broadcast %cst_245 : f32 to vector<16x1xf32>
    %490 = arith.maximumf %488, %489 : vector<16x1xf32>
    %cst_246 = arith.constant 9.99999974E-6 : f32
    %491 = vector.broadcast %cst_246 : f32 to vector<16x1xf32>
    %492 = arith.addf %490, %491 : vector<16x1xf32>
    %493 = math.rsqrt %492 : vector<16x1xf32>
    %494 = arith.mulf %473, %493 : vector<16x1xf32>
    %495 = arith.mulf %481, %494 : vector<16x1xf32>
    %496 = arith.subf %475, %495 : vector<16x1xf32>
    %497 = vector.broadcast %494 : vector<16x1xf32> to vector<16x128xf32>
    %498 = arith.mulf %471, %497 : vector<16x128xf32>
    %499 = vector.broadcast %496 : vector<16x1xf32> to vector<16x128xf32>
    %500 = arith.addf %498, %499 : vector<16x128xf32>
    %cst_247 = arith.constant 0.000000e+00 : f32
    %501 = vector.broadcast %cst_247 : f32 to vector<16x128xf32>
    %502 = arith.cmpf oge, %500, %501 : vector<16x128xf32>
    %503 = vector.broadcast %477 : vector<16x1xf32> to vector<16x128xf32>
    %504 = arith.mulf %503, %500 : vector<16x128xf32>
    %505 = arith.select %502, %500, %504 : vector<16x128xi1>, vector<16x128xf32>
    %c0_248 = arith.constant 0 : index
    %c0_249 = arith.constant 0 : index
    %c0_250 = arith.constant 0 : index
    %506 = vector.load %arg9[%c0_248, %c0_249, %c0_250] : memref<1x16x128xf32, #tpu.memory_space<vmem>>, vector<1x16x128xf32>
    %507 = vector.shape_cast %506 : vector<1x16x128xf32> to vector<16x128xf32>
    %508 = vector.shape_cast %505 : vector<16x128xf32> to vector<1x16x128xf32>
    tpu.vector_store %arg9[%c0_248, %c0_249, %c0_250], %508 {strides = array<i32>} : memref<1x16x128xf32, #tpu.memory_space<vmem>>, vector<1x16x128xf32>,
    return
  }
  func.func @transform_0(%arg0: i32) -> (i32, i32, i32) {
    %c0_i32 = arith.constant 0 : i32
    %c0_i32_0 = arith.constant 0 : i32
    %c0_i32_1 = arith.constant 0 : i32
    return %arg0, %c0_i32, %c0_i32_0 : i32, i32, i32
  }
  func.func @transform_1(%arg0: i32) -> (i32, i32) {
    %c0_i32 = arith.constant 0 : i32
    %c0_i32_0 = arith.constant 0 : i32
    %c0_i32_1 = arith.constant 0 : i32
    return %c0_i32, %c0_i32_0 : i32, i32
  }
  func.func @transform_2(%arg0: i32) -> (i32, i32) {
    %c0_i32 = arith.constant 0 : i32
    %c0_i32_0 = arith.constant 0 : i32
    %c0_i32_1 = arith.constant 0 : i32
    return %c0_i32, %c0_i32_0 : i32, i32
  }
  func.func @transform_3(%arg0: i32) -> (i32, i32, i32) {
    %c0_i32 = arith.constant 0 : i32
    %c0_i32_0 = arith.constant 0 : i32
    %c0_i32_1 = arith.constant 0 : i32
    %c0_i32_2 = arith.constant 0 : i32
    return %c0_i32, %c0_i32_0, %c0_i32_1 : i32, i32, i32
  }
  func.func @transform_4(%arg0: i32) -> (i32, i32) {
    %c0_i32 = arith.constant 0 : i32
    %c0_i32_0 = arith.constant 0 : i32
    %c0_i32_1 = arith.constant 0 : i32
    return %c0_i32, %c0_i32_0 : i32, i32
  }
  func.func @transform_5(%arg0: i32) -> (i32, i32, i32) {
    %c0_i32 = arith.constant 0 : i32
    %c0_i32_0 = arith.constant 0 : i32
    %c0_i32_1 = arith.constant 0 : i32
    %c0_i32_2 = arith.constant 0 : i32
    return %c0_i32, %c0_i32_0, %c0_i32_1 : i32, i32, i32
  }
  func.func @transform_6(%arg0: i32) -> (i32, i32) {
    %c0_i32 = arith.constant 0 : i32
    %c0_i32_0 = arith.constant 0 : i32
    %c0_i32_1 = arith.constant 0 : i32
    return %c0_i32, %c0_i32_0 : i32, i32
  }
  func.func @transform_7(%arg0: i32) -> (i32, i32) {
    %c0_i32 = arith.constant 0 : i32
    %c0_i32_0 = arith.constant 0 : i32
    %c0_i32_1 = arith.constant 0 : i32
    return %c0_i32, %c0_i32_0 : i32, i32
  }
  func.func @transform_8(%arg0: i32) -> (i32, i32, i32) {
    %c0_i32 = arith.constant 0 : i32
    %c0_i32_0 = arith.constant 0 : i32
    %c0_i32_1 = arith.constant 0 : i32
    return %arg0, %c0_i32, %c0_i32_0 : i32, i32, i32
  }
}

</mosaic_0001>

<bundles_post_ra>
// kernel: tpu_custom_call.1
= control target key start
LH: loop header
LB: loop body
LE: loop exit
PB: predicated region body
PF: predicated region fallthrough
CT: control target
= control target key end

     0   :  { %13 = vsyncpa [#allocation5], 0  ;;  %s8979_s0 = inlined_call_operand.vmem [shape: f32[2,8,256], index: 0, kind: input, shape index: {}]   ;;  %s8980_s1 = inlined_call_operand.vmem [shape: f32[16,8], index: 1, kind: input, shape index: {}]   ;;  %s8981_s2 = inlined_call_operand.vmem [shape: f32[64,36], index: 2, kind: input, shape index: {}]   ;;  %s8982_s3 = inlined_call_operand.vmem [shape: f32[4,16,64], index: 3, kind: input, shape index: {}]   ;;  %s8983_s4 = inlined_call_operand.vmem [shape: f32[16,48], index: 4, kind: input, shape index: {}]   ;;  %s8984_s5 = inlined_call_operand.vmem [shape: f32[18,16,1], index: 5, kind: input, shape index: {}]   ;;  %s8985_s6 = inlined_call_operand.vmem [shape: f32[36,256], index: 6, kind: input, shape index: {}]   ;;  %s8986_s7 = inlined_call_operand.vmem [shape: f32[256,128], index: 7, kind: input, shape index: {}]   ;;  %s8987_s8 = inlined_call_operand.hbm [shape: f32[2,16,128], index: 8, kind: output, shape index: {}]  }
   0x1   :  { %15 = vsyncpa [#allocation5 + $0x1], 0  ;;  %s5079_s27 = smov 0   ;;  %s5081_s28 = smov 0  }
   0x2   :  { %s5083_s29 = smov 0   ;;  %s5085_s30 = smov 0  }
   0x3 LB: > { %s5100_s9 = sadd.s32 4294967295, %s4974_s30   ;;  %s4401_s10 = sadd.s32 4294967294, %s4974_s30   ;;  %s4974_s30 = sphi %s5085_s30, %s9869_s30   ;;  %s4970_s29 = sphi %s5083_s29, %s9868_s29   ;;  %s4966_s28 = sphi %s5081_s28, %s9867_s28   ;;  %s4962_s27 = sphi %s5079_s27, %s9866_s27  }
   0x4   : > { %s5104_s11 = sadd.s32 1, %s4974_s30   ;;  %s201_s12 = sadd.s32 1, %s4970_s29 }
   0x5   : > { %s198_s13 = ssub.s32 %s4974_s30, %s5104_s11  ;;  %p211_p0 = scmp.ne.s32.totalorder %s4970_s29, %s4966_s28 }
   0x6   : > { %p199_p1 = scmp.eq.s32.totalorder %s198_s13, 0  ;;  %p212_p2 = scmp.eq.s32.totalorder %s5100_s9, 1 }
   0x7   : > { %p217_p3 = scmp.ne.s32.totalorder %s4966_s28, %s4962_s27  ;;  %p218_p4 = scmp.eq.s32.totalorder %s4401_s10, 1 }
   0x8   : > { %s5115_s14 = scalar_select %p199_p1, %s4970_s29, %s201_s12  }
   0x9   : > { %p5117_p5 = por %p212_p2, %p211_p0  ;;  %p5121_p6 = por %p218_p4, %p217_p3 }
   0xa   : > { %p4404_p7 = scmp.ge.s32.totalorder %s4974_s30, 1  ;;  %p265_p8 = scmp.lt.s32.totalorder %s4974_s30, 3 }
   0xc   : > { %p266_p9 = pnand %p4404_p7, %p265_p8 }
   0xe   : > { %269 = sbr.rel (%p266_p9) target bundleno = 4333 (0x10ed), region = 52 }
  0x15   : > { %p299_p10 = scmp.lt.s32.totalorder %s5100_s9, 1  ;;  %v8991_v0 = vmov 0.0   ;;  %v306_v3 = vld [vmem:[%s8980_s1] sm:$0xff]  ;;  %vm308_vm0 = vcmask 64512   ;;  %v307_v4 = vld [vmem:[%s8980_s1 + $0x8] sm:$0xff]  ;;  %v8988_v5 = vmov 0  }
  0x16   : > { %379 = vmatprep.mubr.f32.mxu0 %v8991_v0  ;;  %952 = vmatprep.mubr.f32.mxu1 %v8991_v0  ;;  %v4978_v6 = vmov 1   ;;  %v4412_v19 = vld [vmem:[%s8984_s5 + $0x20] sm:$0xff]  ;;  %v4413_v20 = vld [vmem:[%s8984_s5 + $0x28] sm:$0xff]  ;;  %v4979_v23 = vmov 2   ;;  %v4980_v24 = vmov 4   ;;  %v4981_v25 = vmov 3  }
  0x17   : > { %s300_s17 = scalar_select %p299_p10, %s5100_s9, 1  ;;  %4716 = vset.pattern.permute.xlu1 %v8988_v5  ;;  %4720 = vset.pattern.permute.xlu0 %v4978_v6  ;;  %v5172_v21 = vld [vmem:[%s8981_s2 + $0x8] sm:$0xff]  ;;  %v5178_v22 = vld [vmem:[%s8981_s2] sm:$0xff]  ;;  %v4982_v26 = vmov 5   ;;  %v4983_v27 = vmov 6   ;;  %v4984_v28 = vmov 7  }
  0x18   : > { %9303 = vst [vmem:[#allocation7_spill] sm:$0xff] %v5172_v21  ;;  %9304 = vst [vmem:[#allocation8_spill] sm:$0xff] %v5178_v22  ;;  %v392_v45 = vld [vmem:[%s8984_s5] sm:$0xff]  ;;  %v393_v48 = vld [vmem:[%s8984_s5 + $0x8] sm:$0xff]  ;;  %v4985_v57 = vmov 8   ;;  %v4986_v58 = vmov 13  }
  0x19   : > { %s4496_s18 = sshll.u32 %s300_s17, 4  ;;  %v4410_v52 = vld [vmem:[%s8984_s5 + $0x10] sm:$0xff]  ;;  %v4411_v55 = vld [vmem:[%s8984_s5 + $0x18] sm:$0xff]  ;;  %s4987_s13 = smov 17   ;;  %vm881_vm13 = vcmask 130048  }
  0x1a   : > { %s303_s21 = scalar_lea.vmem %s8979_s0, %s4496_s18  ;;  %s4988_s17 = smov 15  }
  0x1b   : > { %v305_v1 = vld [vmem:[%s303_s21 + $0x8] sm:$0xff]  ;;  %v304_v2 = vld [vmem:[%s303_s21] sm:$0xff]  ;;  %s4989_s18 = smov 16   ;;  %s4990_s19 = smov 127  }
  0x1c   : > { %315 = vmatprep.subr.mxu0 %v305_v1  ;;  %s4991_s20 = smov 112   ;;  %s4992_s21 = smov 111  }
  0x1d   : > { %316 = vmatpush1.msra.mxu0 %v304_v2  ;;  %s4993_s22 = smov 1   ;;  %s4994_s23 = smov 113  }
  0x1e   : > { %4408 = vmatmul.mubr.msk.f32.vlgmr.msra.gmra.mrb[0].mxu0 %vm308_vm0, %v306_v3  ;;  %s4998_s12 = smov 33   ;;  %s5007_s25 = smov 96  }
  0x1f   : > { %385 = vmatprep.mubr.f32.mxu0 %v8991_v0  ;;  %s5015_s24 = smov 63  }
  0x22   : > { %4409 = vmatmul.mubr.msk.f32.gmra.mrb[2].mxu0 %vm308_vm0, %v307_v4 }
  0x23   : > { %1800 = vmatprep.mubr.f32.mxu0 %v8991_v0  ;;  %v4417_v0 = vld [vmem:[%s8985_s6 + $0x5] ss:$8 sm:$0x3] }
  0xf1   : > { %v5143_v7 = vpop.f32.mrb[0].mxu0 }
  0xf2   : > { %v5145_v8 = vpop.f32.mrb[1].mxu0  ;;  %v408_v9 = vmul.f32 %v5143_v7, %v5143_v7 }
  0xf3   : > { %v400_v10 = vadd.f32 %v5145_v8, %v5143_v7  ;;  %v409_v11 = vmul.f32 %v5145_v8, %v5145_v8 }
  0xf5   : > { %401 = vadd.xlane.f32.xlu0 %v400_v10  ;;  %v5153_v12 = vpop.f32.mrb[2].mxu0  ;;  %v412_v13 = vadd.f32 %v409_v11, %v408_v9 }
  0xf6   : > { %v5155_v14 = vpop.f32.mrb[3].mxu0  ;;  %v410_v15 = vmul.f32 %v5153_v12, %v5153_v12 }
  0xf7   : > { %413 = vadd.xlane.f32.xlu1 %v412_v13  ;;  %v403_v16 = vadd.f32 %v5155_v14, %v5153_v12  ;;  %v411_v17 = vmul.f32 %v5155_v14, %v5155_v14 }
  0xf9   : > { %404 = vadd.xlane.f32.xlu0 %v403_v16  ;;  %v415_v18 = vadd.f32 %v411_v17, %v410_v15 }
  0xfb   : > { %416 = vadd.xlane.f32.xlu1 %v415_v18 }
 0x10c   : > { %470 = vperm.xlu1 %4716, %v4412_v19  }
 0x10f   : > { %592 = vperm.xlu0 %4720, %v5172_v21  }
 0x110   : > { %475 = vperm.xlu1 %4716, %v4413_v20  }
 0x113   : > { %4721 = vset.pattern.permute.xlu0 %v4979_v23 }
 0x114   : > { %4717 = vset.pattern.permute.xlu1 %v4980_v24  ;;  %634 = vperm.xlu0 %4721, %v5178_v22  }
 0x115   : > { %498 = vperm.xlu1 %4717, %v5178_v22  }
 0x118   : > { %4722 = vset.pattern.permute.xlu0 %v8988_v5 }
 0x119   : > { %503 = vperm.xlu1 %4717, %v5172_v21   ;;  %546 = vperm.xlu0 %4722, %v5172_v21  }
 0x11d   : > { %4718 = vset.pattern.permute.xlu1 %v8988_v5 }
 0x11e   : > { %542 = vperm.xlu1 %4718, %v5178_v22  }
 0x122   : > { %4719 = vset.pattern.permute.xlu1 %v4978_v6 }
 0x123   : > { %588 = vperm.xlu1 %4719, %v5178_v22  }
 0x127   : > { %4723 = vset.pattern.permute.xlu1 %v4979_v23 }
 0x128   : > { %638 = vperm.xlu1 %4723, %v5172_v21  }
 0x12c   : > { %4724 = vset.pattern.permute.xlu1 %v4981_v25 }
 0x12d   : > { %680 = vperm.xlu1 %4724, %v5178_v22  }
 0x131   : > { %4727 = vset.pattern.permute.xlu1 %v4982_v26 }
 0x132   : > { %730 = vperm.xlu1 %4727, %v5172_v21  }
 0x136   : > { %4728 = vset.pattern.permute.xlu1 %v4983_v27 }
 0x137   : > { %772 = vperm.xlu1 %4728, %v5178_v22  }
 0x13b   : > { %4731 = vset.pattern.permute.xlu1 %v4984_v28 }
 0x13c   : > { %822 = vperm.xlu1 %4731, %v5172_v21  }
 0x140   : > { %4732 = vset.pattern.permute.xlu1 %v8988_v5 }
 0x182   : > { %v402_v29 = vpop.xlane.xlu0 %401 }
 0x183   : > { %v406_v30 = vmul.f32 0.00390625, %v402_v29 }
 0x184   : > { %v414_v31 = vpop.xlane.xlu1 %413 }
 0x185   : > { %v420_v32 = vmul.f32 %v406_v30, %v406_v30  ;;  %v418_v33 = vmul.f32 0.00390625, %v414_v31 }
 0x186   : > { %v405_v34 = vpop.xlane.xlu0 %404 }
 0x187   : > { %v422_v35 = vsub.f32 %v418_v33, %v420_v32  ;;  %v407_v36 = vmul.f32 0.00390625, %v405_v34  ;;  %v5293_v33 = vld [vmem:[%s8981_s2 + $0x18] sm:$0xff]  ;;  %v5301_v34 = vld [vmem:[%s8981_s2 + $0x10] sm:$0xff] }
 0x188   : > { %v417_v37 = vpop.xlane.xlu1 %416  ;;  %9311 = vst [vmem:[#allocation15_spill] sm:$0xff] %v5293_v33  ;;  %9312 = vst [vmem:[#allocation16_spill] sm:$0xff] %v5301_v34 }
 0x189   : > { %v424_v38 = vmax.f32 %v422_v35, 0.0  ;;  %v421_v39 = vmul.f32 %v407_v36, %v407_v36  ;;  %v419_v40 = vmul.f32 0.00390625, %v417_v37  ;;  %v4995_v35 = vmov 9  }
 0x18a   : > { %v4997_v37 = vmov 11  }
 0x18b   : > { %v426_v41 = vadd.f32 1e-05, %v424_v38  ;;  %v423_v42 = vsub.f32 %v419_v40, %v421_v39  ;;  %v4427_v38 = vld [vmem:[%s8984_s5 + $0x50] sm:$0xff]  ;;  %v8990_v39 = vmov 12   ;;  %v4428_v40 = vld [vmem:[%s8984_s5 + $0x58] sm:$0xff] }
 0x18c   : > { %v471_v59 = vpop.permute.xlu1 %470 }
 0x18d   : > { %4876 = vrsqrt.f32 %v426_v41  ;;  %v425_v43 = vmax.f32 %v423_v42, 0.0 }
 0x18e   : > { %v5226_v4 = vpop.permute.xlu0 %592 }
 0x18f   : > { %v427_v44 = vadd.f32 1e-05, %v425_v43 }
 0x190   : > { %v476_v60 = vpop.permute.xlu1 %475 }
 0x191   : > { %4878 = vrsqrt.f32 %v427_v44 }
 0x193   : > { %v5230_v9 = vpop.permute.xlu0 %634 }
 0x194   : > { %v5214_v61 = vpop.permute.xlu1 %498 }
 0x197   : > { %v4877_v46 = vpop.eup %4876 }
 0x198   : > { %v430_v47 = vmul.f32 %v4877_v46, %v392_v45  ;;  %v5216_v62 = vpop.permute.xlu1 %503  ;;  %v5234_v11 = vpop.permute.xlu0 %546 }
 0x19a   : > { %438 = vperm.xlu0 %4722, %v430_v47   ;;  %v432_v51 = vmul.f32 %v430_v47, %v406_v30 }
 0x19b   : > { %v4879_v49 = vpop.eup %4878 }
 0x19c   : > { %v431_v50 = vmul.f32 %v4879_v49, %v393_v48  ;;  %v434_v53 = vsub.f32 %v4410_v52, %v432_v51 }
 0x19d   : > { %v5218_v63 = vpop.permute.xlu1 %542 }
 0x19e   : > { %443 = vperm.xlu1 %4732, %v431_v50   ;;  %4725 = vset.pattern.permute.xlu0 %v4981_v25  ;;  %v433_v54 = vmul.f32 %v431_v50, %v407_v36  ;;  %v4996_v36 = vmov 10  }
 0x19f   : > { %684 = vperm.xlu0 %4725, %v5172_v21  }
 0x1a0   : > { %v435_v56 = vsub.f32 %v4411_v55, %v433_v54 }
 0x1a2   : > { %452 = vperm.xlu1 %4732, %v434_v53   ;;  %v5220_v1 = vpop.permute.xlu1 %588 }
 0x1a3   : > { %4726 = vset.pattern.permute.xlu0 %v4982_v26 }
 0x1a4   : > { %726 = vperm.xlu0 %4726, %v5178_v22  }
 0x1a6   : > { %457 = vperm.xlu1 %4732, %v435_v56  }
 0x1a7   : > { %v5222_v2 = vpop.permute.xlu1 %638 }
 0x1a8   : > { %4729 = vset.pattern.permute.xlu0 %v4983_v27 }
 0x1a9   : > { %776 = vperm.xlu0 %4729, %v5172_v21  }
 0x1aa   : > { %4733 = vset.pattern.permute.xlu1 %v4985_v57 }
 0x1ab   : > { %864 = vperm.xlu1 %4733, %v5178_v22  }
 0x1ac   : > { %v5224_v3 = vpop.permute.xlu1 %680 }
 0x1ad   : > { %4730 = vset.pattern.permute.xlu0 %v4984_v28 }
 0x1ae   : > { %818 = vperm.xlu0 %4730, %v5178_v22  }
 0x1af   : > { %4735 = vset.pattern.permute.xlu1 %v8988_v5 }
 0x1b1   : > { %v5228_v6 = vpop.permute.xlu1 %730 }
 0x1b2   : > { %4734 = vset.pattern.permute.xlu0 %v4985_v57  ;;  %9305 = vst [vmem:[#allocation9_spill] sm:$0xff] %v5228_v6 }
 0x1b3   : > { %868 = vperm.xlu0 %4734, %v5172_v21  }
 0x1b6   : > { %v5232_v10 = vpop.permute.xlu1 %772 }
 0x1b7   : > { %4740 = vset.pattern.permute.xlu0 %v4986_v58 }
 0x1bb   : > { %v5236_v13 = vpop.permute.xlu1 %822 }
 0x1bc   : > { %9306 = vst [vmem:[#allocation10_spill] sm:$0xff] %v5236_v13 }
 0x219   : > { %v439_v15 = vpop.permute.xlu0 %438 }
 0x21a   : > { %v446_v17 = vmul.f32 %v439_v15, %v5143_v7  ;;  %v447_v18 = vmul.f32 %v439_v15, %v5145_v8  ;;  %v518_v15 = vlaneseq }
 0x21d   : > { %v444_v16 = vpop.permute.xlu1 %443 }
 0x21e   : > { %v448_v8 = vmul.f32 %v444_v16, %v5153_v12  ;;  %v449_v29 = vmul.f32 %v444_v16, %v5155_v14  ;;  %v5331_v41 = vpop.permute.xlu0 %684 }
 0x221   : > { %v453_v19 = vpop.permute.xlu1 %452 }
 0x222   : > { %v460_v20 = vadd.f32 %v453_v19, %v446_v17  ;;  %v461_v23 = vadd.f32 %v453_v19, %v447_v18  ;;  %v5380_v17 = vand.u32 127, %v518_v15  ;;  %v528_v18 = vshrl.u32 %v518_v15, 7 }
 0x223   : > { %v5335_v42 = vpop.permute.xlu0 %726 }
 0x224   : > { %vm464_vm1 = vcmp.ge.f32.partialorder %v460_v20, 0.0  ;;  %vm465_vm2 = vcmp.ge.f32.partialorder %v461_v23, 0.0  ;;  %v478_v24 = vmul.f32 %v471_v59, %v460_v20  ;;  %v479_v25 = vmul.f32 %v471_v59, %v461_v23 }
 0x225   : > { %v458_v7 = vpop.permute.xlu1 %457  ;;  %vm520_vm5 = vcmp.lt.s32.totalorder %v5380_v17, 17  ;;  %vm565_vm6 = vcmp.lt.s32.totalorder %v5380_v17, 16  ;;  %vm611_vm7 = vcmp.lt.s32.totalorder %v5380_v17, 15  ;;  %vm657_vm8 = vcmp.lt.s32.totalorder %v5380_v17, 1 }
 0x226   : > { %v5240_v26 = vsel %vm464_vm1, %v460_v20, %v478_v24  ;;  %v5242_v27 = vsel %vm465_vm2, %v461_v23, %v479_v25  ;;  %v462_v28 = vadd.f32 %v458_v7, %v448_v8  ;;  %v463_v30 = vadd.f32 %v458_v7, %v449_v29  ;;  %v525_v23 = vld [vmem:[%s8985_s6] ss:$8 sm:$0x3]  ;;  %v4414_v8 = vld [vmem:[%s8985_s6 + $0x1] ss:$8 sm:$0x3] }
 0x227   : > { %9307 = vst [vmem:[#allocation11_spill] sm:$0xff] %v5240_v26  ;;  %9308 = vst [vmem:[#allocation12_spill] sm:$0xff] %v5242_v27  ;;  %514 = vrot.lane.b32.xlu0 %v5242_v27, %s4987_s13  ;;  %510 = vrot.lane.b32.xlu1 %v5240_v26, %s4987_s13  ;;  %v5390_v24 = vsub.s32 0, %v528_v18  ;;  %v5392_v25 = vsub.s32 1, %v528_v18  ;;  %vm703_vm9 = vcmp.lt.s32.totalorder %v5380_v17, 127  ;;  %vm749_vm10 = vcmp.lt.s32.totalorder %v5380_v17, 113 }
 0x228   : > { %v480_v31 = vmul.f32 %v476_v60, %v462_v28  ;;  %vm466_vm3 = vcmp.ge.f32.partialorder %v462_v28, 0.0  ;;  %v481_v12 = vmul.f32 %v476_v60, %v463_v30  ;;  %vm467_vm4 = vcmp.ge.f32.partialorder %v463_v30, 0.0  ;;  %v5338_v43 = vpop.permute.xlu0 %776 }
 0x229   : > { %9313 = vst [vmem:[#allocation17_spill] sm:$0xff] %v5338_v43  ;;  %9317 = vst [vmem:[#allocation21_spill] sm:$0xff] %v5390_v24  ;;  %v530_v29 = vrot.slane %v525_v23, %v5390_v24  ;;  %vm795_vm11 = vcmp.lt.s32.totalorder %v5380_v17, 112  ;;  %vm841_vm12 = vcmp.lt.s32.totalorder %v5380_v17, 111  ;;  %vm1120_vm2 = vcmp.lt.s32.totalorder %v5380_v17, 33 }
 0x22a   : > { %v5264_v32 = vsel %vm466_vm3, %v462_v28, %v480_v31  ;;  %v5269_v14 = vsel %vm467_vm4, %v463_v30, %v481_v12  ;;  %v5345_v45 = vpop.permute.xlu1 %864  ;;  %9318 = vst [vmem:[#allocation22_spill] sm:$0xff] %v5392_v25  ;;  %v4415_v28 = vld [vmem:[%s8985_s6 + $0x2] ss:$8 sm:$0x3]  ;;  %v534_v30 = vrot.slane %v525_v23, %v5392_v25  ;;  %vm1198_vm3 = vcmp.lt.s32.totalorder %v5380_v17, 32 }
 0x22b   : > { %607 = vrot.lane.b32.xlu0 %v5242_v27, %s4988_s17  ;;  %557 = vrot.lane.b32.xlu1 %v5240_v26, %s4989_s18  ;;  %9309 = vst [vmem:[#allocation13_spill] sm:$0xff] %v5264_v32  ;;  %9310 = vst [vmem:[#allocation14_spill] sm:$0xff] %v5269_v14  ;;  %v5429_v23 = vrot.slane %v4415_v28, %v5392_v25  ;;  %vm1276_vm4 = vcmp.lt.s32.totalorder %v5380_v17, 31 }
 0x22c   : > { %9315 = vst [vmem:[#allocation19_spill] sm:$0xff] %v5345_v45 }
 0x22d   : > { %v5342_v44 = vpop.permute.xlu0 %818 }
 0x22e   : > { %9314 = vst [vmem:[#allocation18_spill] sm:$0xff] %v5342_v44 }
 0x22f   : > { %699 = vrot.lane.b32.xlu0 %v5242_v27, %s4990_s19  ;;  %561 = vrot.lane.b32.xlu1 %v5242_v27, %s4989_s18 }
 0x232   : > { %v5347_v46 = vpop.permute.xlu0 %868 }
 0x233   : > { %791 = vrot.lane.b32.xlu0 %v5242_v27, %s4991_s20  ;;  %603 = vrot.lane.b32.xlu1 %v5240_v26, %s4988_s17  ;;  %9316 = vst [vmem:[#allocation20_spill] sm:$0xff] %v5347_v46 }
 0x237   : > { %833 = vrot.lane.b32.xlu0 %v5240_v26, %s4992_s21  ;;  %649 = vrot.lane.b32.xlu1 %v5240_v26, %s4993_s22 }
 0x23b   : > { %559 = vrot.lane.b32.xlu0 %v5264_v32, %s4989_s18  ;;  %653 = vrot.lane.b32.xlu1 %v5242_v27, %s4993_s22 }
 0x23f   : > { %563 = vrot.lane.b32.xlu0 %v5269_v14, %s4989_s18  ;;  %695 = vrot.lane.b32.xlu1 %v5240_v26, %s4990_s19  ;;  %s5030_s18 = smov 126  }
 0x243   : > { %651 = vrot.lane.b32.xlu0 %v5264_v32, %s4993_s22  ;;  %741 = vrot.lane.b32.xlu1 %v5240_v26, %s4994_s23 }
 0x247   : > { %655 = vrot.lane.b32.xlu0 %v5269_v14, %s4993_s22  ;;  %745 = vrot.lane.b32.xlu1 %v5242_v27, %s4994_s23 }
 0x24b   : > { %743 = vrot.lane.b32.xlu0 %v5264_v32, %s4994_s23  ;;  %787 = vrot.lane.b32.xlu1 %v5240_v26, %s4991_s20 }
 0x24f   : > { %747 = vrot.lane.b32.xlu0 %v5269_v14, %s4994_s23  ;;  %512 = vrot.lane.b32.xlu1 %v5264_v32, %s4987_s13  ;;  %s5003_s23 = smov 31  }
 0x253   : > { %837 = vrot.lane.b32.xlu0 %v5242_v27, %s4992_s21  ;;  %516 = vrot.lane.b32.xlu1 %v5269_v14, %s4987_s13  ;;  %s5006_s13 = smov 97  }
 0x257   : > { %1093 = vperm.xlu0 %4740, %v5293_v33   ;;  %605 = vrot.lane.b32.xlu1 %v5264_v32, %s4988_s17 }
 0x25b   : > { %4741 = vset.pattern.permute.xlu0 %v4995_v35  ;;  %609 = vrot.lane.b32.xlu1 %v5269_v14, %s4988_s17  ;;  %s5008_s17 = smov 95  }
 0x25c   : > { %1159 = vperm.xlu0 %4741, %v5301_v34  }
 0x25f   : > { %697 = vrot.lane.b32.xlu1 %v5264_v32, %s4990_s19 }
 0x260   : > { %4742 = vset.pattern.permute.xlu0 %v4996_v36 }
 0x261   : > { %1229 = vperm.xlu0 %4742, %v5178_v22  }
 0x263   : > { %701 = vrot.lane.b32.xlu1 %v5269_v14, %s4990_s19 }
 0x265   : > { %1237 = vperm.xlu0 %4742, %v5301_v34  }
 0x267   : > { %789 = vrot.lane.b32.xlu1 %v5264_v32, %s4991_s20 }
 0x269   : > { %4745 = vset.pattern.permute.xlu0 %v4997_v37 }
 0x26a   : > { %1311 = vperm.xlu0 %4745, %v5172_v21  }
 0x26b   : > { %793 = vrot.lane.b32.xlu1 %v5269_v14, %s4991_s20  ;;  %s5013_s20 = smov 64  }
 0x26e   : > { %1116 = vrot.lane.b32.xlu0 %v5242_v27, %s4998_s12 }
 0x26f   : > { %835 = vrot.lane.b32.xlu1 %v5264_v32, %s4992_s21 }
 0x272   : > { %1315 = vperm.xlu0 %4745, %v5301_v34  }
 0x273   : > { %839 = vrot.lane.b32.xlu1 %v5269_v14, %s4992_s21  ;;  %s5001_s21 = smov 32  }
 0x276   : > { %4748 = vset.pattern.permute.xlu0 %v8990_v39 }
 0x277   : > { %1044 = vperm.xlu1 %4735, %v4427_v38   ;;  %v5417_v38 = vrot.slane %v4415_v28, %v5390_v24 }
 0x27b   : > { %1049 = vperm.xlu1 %4735, %v4428_v40   ;;  %v4416_v40 = vld [vmem:[%s8985_s6 + $0x3] ss:$8 sm:$0x3] }
 0x27f   : > { %4736 = vset.pattern.permute.xlu1 %v4986_v58 }
 0x280   : > { %1078 = vperm.xlu1 %4736, %v5178_v22  }
 0x284   : > { %1083 = vperm.xlu1 %4736, %v5172_v21  }
 0x288   : > { %4737 = vset.pattern.permute.xlu1 %v4995_v35 }
 0x289   : > { %1151 = vperm.xlu1 %4737, %v5178_v22  }
 0x28d   : > { %1155 = vperm.xlu1 %4737, %v5172_v21  }
 0x291   : > { %4738 = vset.pattern.permute.xlu1 %v4996_v36 }
 0x292   : > { %1233 = vperm.xlu1 %4738, %v5172_v21  }
 0x296   : > { %4739 = vset.pattern.permute.xlu1 %v4986_v58 }
 0x297   : > { %1088 = vperm.xlu1 %4739, %v5301_v34   ;;  %v5438_v34 = vrot.slane %v4416_v40, %v5390_v24 }
 0x299   : > { %v511_v47 = vpop.permute.xlu1 %510  ;;  %v515_v48 = vpop.permute.xlu0 %514 }
 0x29a   : > { %v521_v31 = vsel %vm520_vm5, %v511_v47, %v515_v48  ;;  %v523_v12 = vsel %vm520_vm5, %v515_v48, %v511_v47  ;;  %v506_v47 = vmul.f32 %v5214_v61, %v5240_v26 }
 0x29b   : > { %4743 = vset.pattern.permute.xlu1 %v4995_v35  ;;  %v537_v5 = vmul.f32 %v530_v29, %v523_v12 }
 0x29c   : > { %1163 = vperm.xlu1 %4743, %v5293_v33  }
 0x29d   : > { %v558_v49 = vpop.permute.xlu1 %557  ;;  %v5352_v50 = vpop.permute.xlu0 %607 }
 0x2a0   : > { %4744 = vset.pattern.permute.xlu1 %v4997_v37 }
 0x2a1   : > { %1307 = vperm.xlu1 %4744, %v5178_v22   ;;  %v562_v51 = vpop.permute.xlu1 %561  ;;  %v5355_v53 = vpop.permute.xlu0 %699 }
 0x2a2   : > { %v566_v48 = vsel %vm565_vm6, %v558_v49, %v562_v51  ;;  %v568_v18 = vsel %vm565_vm6, %v562_v51, %v558_v49  ;;  %v5445_v49 = vmul.f32 %v5216_v62, %v5264_v32 }
 0x2a5   : > { %4746 = vset.pattern.permute.xlu1 %v4996_v36  ;;  %v604_v52 = vpop.permute.xlu1 %603  ;;  %v5362_v55 = vpop.permute.xlu0 %791  ;;  %v5410_v36 = vrot.slane %v4414_v8, %v5390_v24 }
 0x2a6   : > { %1241 = vperm.xlu1 %4746, %v5293_v33   ;;  %v614_v12 = vsel %vm611_vm7, %v5352_v50, %v604_v52 }
 0x2a7   : > { %v583_v51 = vmul.f32 %v5410_v36, %v568_v18  ;;  %v629_v21 = vmul.f32 %v5417_v38, %v614_v12 }
 0x2a9   : > { %v5358_v54 = vpop.permute.xlu1 %649  ;;  %v5368_v58 = vpop.permute.xlu0 %833  ;;  %v641_v13 = vmul.f32 %v5230_v9, %v629_v21 }
 0x2aa   : > { %4747 = vset.pattern.permute.xlu1 %v8990_v39  ;;  %v538_v39 = vmul.f32 %v534_v30, %v521_v31  ;;  %v612_v31 = vsel %vm611_vm7, %v604_v52, %v5352_v50 }
 0x2ab   : > { %1384 = vperm.xlu1 %4747, %v5178_v22   ;;  %v630_v22 = vmul.f32 %v5429_v23, %v612_v31  ;;  %v4420_v31 = vld [vmem:[%s8985_s6 + $0x10] ss:$8 sm:$0x3] }
 0x2ac   : > { %v550_v50 = vmul.f32 %v5218_v63, %v538_v39  ;;  %v595_v39 = vmul.f32 %v5220_v1, %v583_v51  ;;  %v5509_v6 = vrot.slane %v4420_v31, %v5390_v24 }
 0x2ad   : > { %v654_v56 = vpop.permute.xlu1 %653  ;;  %v5376_v60 = vpop.permute.xlu0 %559  ;;  %v642_v43 = vmul.f32 %v5230_v9, %v630_v22 }
 0x2ae   : > { %v658_v52 = vsel %vm657_vm8, %v5358_v54, %v654_v56 }
 0x2af   : > { %1108 = vrot.lane.b32.xlu1 %v5240_v26, %s4998_s12  ;;  %v5441_v26 = vrot.slane %v4416_v40, %v5392_v25 }
 0x2b0   : > { %4749 = vset.pattern.permute.xlu1 %v4997_v37  ;;  %v5413_v37 = vrot.slane %v4414_v8, %v5392_v25  ;;  %v507_v8 = vmul.f32 %v5214_v61, %v5242_v27  ;;  %v5449_v61 = vmul.f32 %v5216_v62, %v5269_v14  ;;  %v5464_v62 = vrot.slane %v4417_v0, %v5392_v25  ;;  %v4419_v27 = vld [vmem:[%s8985_s6 + $0x7] ss:$8 sm:$0x3] }
 0x2b1   : > { %v5366_v57 = vpop.permute.xlu1 %695  ;;  %v5384_v20 = vpop.permute.xlu0 %563  ;;  %v676_v45 = vmul.f32 %v5441_v26, %v658_v52  ;;  %v5512_v52 = vrot.slane %v4420_v31, %v5392_v25 }
 0x2b2   : > { %v584_v28 = vmul.f32 %v5413_v37, %v566_v48  ;;  %v4418_v48 = vld [vmem:[%s8985_s6 + $0x6] ss:$8 sm:$0x3]  ;;  %v554_v51 = vadd.f32 %v550_v50, %v507_v8  ;;  %v569_v21 = vsel %vm565_vm6, %v5384_v20, %v5376_v60 }
 0x2b3   : > { %1110 = vrot.lane.b32.xlu1 %v5264_v32, %s4998_s12  ;;  %v5461_v32 = vrot.slane %v4417_v0, %v5390_v24  ;;  %v660_v0 = vsel %vm657_vm8, %v654_v56, %v5358_v54  ;;  %v5490_v54 = vrot.slane %v4418_v48, %v5390_v24  ;;  %v5493_v56 = vrot.slane %v4418_v48, %v5392_v25 }
 0x2b4   : > { %v596_v33 = vmul.f32 %v5220_v1, %v584_v28  ;;  %v675_v46 = vmul.f32 %v5438_v34, %v660_v0  ;;  %v5504_v1 = vrot.slane %v4419_v27, %v5392_v25 }
 0x2b5   : > { %v5372_v59 = vpop.permute.xlu1 %741  ;;  %v5407_v35 = vpop.permute.xlu0 %651 }
 0x2b6   : > { %v687_v9 = vmul.f32 %v5224_v3, %v675_v46 }
 0x2b7   : > { %1118 = vrot.lane.b32.xlu1 %v5269_v14, %s4998_s12  ;;  %v549_v14 = vmul.f32 %v5218_v63, %v537_v5 }
 0x2b9   : > { %v5378_v16 = vpop.permute.xlu1 %745  ;;  %v656_v18 = vpop.permute.xlu0 %655 }
 0x2bd   : > { %v5382_v19 = vpop.permute.xlu1 %787  ;;  %v744_v44 = vpop.permute.xlu0 %743 }
 0x2c1   : > { %v513_v7 = vpop.permute.xlu1 %512 }
 0x2c5   : > { %v517_v15 = vpop.permute.xlu1 %516 }
 0x2c6   : > { %v522_v5 = vsel %vm520_vm5, %v513_v7, %v517_v15  ;;  %v524_v63 = vsel %vm520_vm5, %v517_v15, %v513_v7  ;;  %v5501_v7 = vrot.slane %v4419_v27, %v5390_v24  ;;  %v553_v15 = vadd.f32 %v549_v14, %v506_v47 }
 0x2c7   : > { %v539_v28 = vmul.f32 %v530_v29, %v524_v63  ;;  %v540_v48 = vmul.f32 %v534_v30, %v522_v5  ;;  %v567_v27 = vsel %vm565_vm6, %v5376_v60, %v5384_v20  ;;  %v688_v14 = vmul.f32 %v5224_v3, %v676_v45  ;;  %v748_v5 = vpop.permute.xlu0 %747 }
 0x2c8   : > { %9319 = vst [vmem:[#allocation23_spill] sm:$0xff] %v5501_v7  ;;  %v599_v0 = vadd.f32 %v595_v39, %v553_v15  ;;  %v600_v7 = vadd.f32 %v596_v33, %v554_v51  ;;  %v704_v30 = vsel %vm703_vm9, %v5366_v57, %v5355_v53  ;;  %v706_v60 = vsel %vm703_vm9, %v5355_v53, %v5366_v57 }
 0x2c9   : > { %v606_v40 = vpop.permute.xlu1 %605  ;;  %v551_v46 = vmul.f32 %v5234_v11, %v539_v28  ;;  %v552_v3 = vmul.f32 %v5234_v11, %v540_v48  ;;  %v585_v47 = vmul.f32 %v5410_v36, %v569_v21  ;;  %v586_v8 = vmul.f32 %v5413_v37, %v567_v27 }
 0x2ca   : > { %v645_v45 = vadd.f32 %v641_v13, %v599_v0  ;;  %v646_v20 = vadd.f32 %v642_v43, %v600_v7  ;;  %v752_v53 = vsel %vm749_vm10, %v5378_v16, %v5372_v59  ;;  %v721_v37 = vmul.f32 %v5461_v32, %v704_v30 }
 0x2cb   : > { %v722_v50 = vmul.f32 %v5464_v62, %v706_v60  ;;  %v659_v63 = vsel %vm657_vm8, %v5407_v35, %v656_v18  ;;  %v768_v39 = vmul.f32 %v5493_v56, %v752_v53  ;;  %v597_v7 = vmul.f32 %v5226_v4, %v585_v47  ;;  %v9320_v60 = vld [vmem:[#allocation9_spill] sm:$0xff] }
 0x2cc   : > { %v691_v57 = vadd.f32 %v687_v9, %v645_v45  ;;  %v692_v36 = vadd.f32 %v688_v14, %v646_v20  ;;  %v598_v15 = vmul.f32 %v5226_v4, %v586_v8  ;;  %v678_v48 = vmul.f32 %v5441_v26, %v659_v63 }
 0x2cd   : > { %v610_v12 = vpop.permute.xlu1 %609  ;;  %v734_v51 = vmul.f32 %v5335_v42, %v722_v50  ;;  %v780_v9 = vmul.f32 %v5232_v10, %v768_v39  ;;  %v798_v26 = vsel %vm795_vm11, %v5362_v55, %v5382_v19  ;;  %v9323_v39 = vld [vmem:[#allocation17_spill] sm:$0xff]  ;;  %vm1508_vm5 = vcmp.lt.s32.totalorder %v5380_v17, 97 }
 0x2ce   : > { %v613_v33 = vsel %vm611_vm7, %v606_v40, %v610_v12  ;;  %v615_v29 = vsel %vm611_vm7, %v610_v12, %v606_v40  ;;  %v750_v40 = vsel %vm749_vm10, %v5372_v59, %v5378_v16  ;;  %v661_v59 = vsel %vm657_vm8, %v656_v18, %v5407_v35 }
 0x2cf   : > { %v631_v11 = vmul.f32 %v5417_v38, %v615_v29  ;;  %v632_v13 = vmul.f32 %v5429_v23, %v613_v33  ;;  %v555_v16 = vadd.f32 %v551_v46, %v5445_v49  ;;  %v556_v38 = vadd.f32 %v552_v3, %v5449_v61  ;;  %v9321_v45 = vld [vmem:[#allocation23_spill] sm:$0xff] }
 0x2d0   : > { %v767_v23 = vmul.f32 %v5490_v54, %v750_v40  ;;  %v733_v61 = vmul.f32 %v5335_v42, %v721_v37  ;;  %v677_v28 = vmul.f32 %v5438_v34, %v661_v59  ;;  %v838_v34 = vpop.permute.xlu0 %837  ;;  %v753_v42 = vsel %vm749_vm10, %v748_v5, %v744_v44 }
 0x2d1   : > { %v698_v22 = vpop.permute.xlu1 %697  ;;  %v643_v35 = vmul.f32 %v5222_v2, %v631_v11  ;;  %v644_v49 = vmul.f32 %v5222_v2, %v632_v13  ;;  %v601_v0 = vadd.f32 %v597_v7, %v555_v16  ;;  %v602_v27 = vadd.f32 %v598_v15, %v556_v38  ;;  %v9322_v16 = vld [vmem:[#allocation18_spill] sm:$0xff] }
 0x2d2   : > { %v779_v4 = vmul.f32 %v5232_v10, %v767_v23  ;;  %v796_v2 = vsel %vm795_vm11, %v5382_v19, %v5362_v55  ;;  %v689_v33 = vmul.f32 %v5331_v41, %v677_v28  ;;  %v690_v29 = vmul.f32 %v5331_v41, %v678_v48 }
 0x2d3   : > { %v648_v14 = vadd.f32 %v644_v49, %v602_v27  ;;  %v842_v19 = vsel %vm841_vm12, %v5368_v58, %v838_v34  ;;  %v813_v41 = vmul.f32 %v9321_v45, %v796_v2  ;;  %v814_v20 = vmul.f32 %v5504_v1, %v798_v26  ;;  %v9325_v49 = vld [vmem:[#allocation19_spill] sm:$0xff] }
 0x2d4   : > { %v770_v8 = vmul.f32 %v5493_v56, %v753_v42  ;;  %v859_v37 = vmul.f32 %v5509_v6, %v842_v19  ;;  %vm1586_vm6 = vcmp.lt.s32.totalorder %v5380_v17, 96  ;;  %vm1664_vm7 = vcmp.lt.s32.totalorder %v5380_v17, 95 }
 0x2d5   : > { %v702_v43 = vpop.permute.xlu1 %701  ;;  %v825_v38 = vmul.f32 %v9322_v16, %v813_v41  ;;  %v826_v56 = vmul.f32 %v9322_v16, %v814_v20 }
 0x2d6   : > { %v705_v31 = vsel %vm703_vm9, %v698_v22, %v702_v43  ;;  %v707_v12 = vsel %vm703_vm9, %v702_v43, %v698_v22  ;;  %v694_v43 = vadd.f32 %v690_v29, %v648_v14 }
 0x2d7   : > { %v723_v21 = vmul.f32 %v5461_v32, %v705_v31  ;;  %v724_v22 = vmul.f32 %v5464_v62, %v707_v12  ;;  %v751_v32 = vsel %vm749_vm10, %v744_v44, %v748_v5  ;;  %v647_v62 = vadd.f32 %v643_v35, %v601_v0  ;;  %v9324_v12 = vld [vmem:[#allocation10_spill] sm:$0xff] }
 0x2d8   : > { %v844_v44 = vsel %vm841_vm12, %v838_v34, %v5368_v58  ;;  %v769_v47 = vmul.f32 %v5490_v54, %v751_v32  ;;  %v737_v58 = vadd.f32 %v733_v61, %v691_v57  ;;  %v738_v5 = vadd.f32 %v734_v51, %v692_v36 }
 0x2d9   : > { %v790_v18 = vpop.permute.xlu1 %789  ;;  %v735_v46 = vmul.f32 %v9320_v60, %v723_v21  ;;  %v736_v3 = vmul.f32 %v9320_v60, %v724_v22  ;;  %v693_v40 = vadd.f32 %v689_v33, %v647_v62  ;;  %v860_v50 = vmul.f32 %v5512_v52, %v844_v44  ;;  %v880_v33 = vld [vmem:[%s8982_s3 + $0x8] sm:$0xff] }
 0x2da   : > { %v784_v54 = vadd.f32 %v780_v9, %v738_v5  ;;  %v783_v23 = vadd.f32 %v779_v4, %v737_v58  ;;  %v781_v31 = vmul.f32 %v9323_v39, %v769_v47  ;;  %v871_v61 = vmul.f32 %v9325_v49, %v859_v37  ;;  %v9326_v4 = vld [vmem:[#allocation20_spill] sm:$0xff]  ;;  %v9334_v37 = vld [vmem:[#allocation13_spill] sm:$0xff]  ;;  %v9336_v5 = vld [vmem:[#allocation14_spill] sm:$0xff] }
 0x2db   : > { %v739_v63 = vadd.f32 %v735_v46, %v693_v40  ;;  %v740_v59 = vadd.f32 %v736_v3, %v694_v43  ;;  %v5000_v40 = vmov 14   ;;  %v9332_v43 = vmov 12   ;;  %v9333_v58 = vld [vmem:[#allocation12_spill] sm:$0xff] }
 0x2dc   : > { %v830_v27 = vadd.f32 %v826_v56, %v784_v54  ;;  %v829_v21 = vadd.f32 %v825_v38, %v783_v23  ;;  %v5004_v38 = vmov 16   ;;  %v9339_v23 = vmov 0  }
 0x2dd   : > { %v794_v10 = vpop.permute.xlu1 %793  ;;  %v785_v0 = vadd.f32 %v781_v31, %v739_v63  ;;  %v5002_v63 = vmov 15   ;;  %v5005_v31 = vmov 17   ;;  %vm1729_vm10 = vcmask 261120  }
 0x2de   : > { %v797_v30 = vsel %vm795_vm11, %v790_v18, %v794_v10  ;;  %v799_v55 = vsel %vm795_vm11, %v794_v10, %v790_v18  ;;  %v872_v18 = vmul.f32 %v9325_v49, %v860_v50  ;;  %v875_v42 = vadd.f32 %v871_v61, %v829_v21  ;;  %v9335_v50 = vld [vmem:[#allocation16_spill] sm:$0xff] }
 0x2df   : > { %v815_v53 = vmul.f32 %v9321_v45, %v797_v30  ;;  %v816_v11 = vmul.f32 %v5504_v1, %v799_v55  ;;  %v782_v1 = vmul.f32 %v9323_v39, %v770_v8  ;;  %v9328_v8 = vld [vmem:[#allocation15_spill] sm:$0xff] }
 0x2e0   : > { %v876_v34 = vadd.f32 %v872_v18, %v830_v27 }
 0x2e1   : > { %v836_v13 = vpop.permute.xlu1 %835  ;;  %v827_v7 = vmul.f32 %v9324_v12, %v815_v53  ;;  %v828_v15 = vmul.f32 %v9324_v12, %v816_v11  ;;  %v786_v48 = vadd.f32 %v782_v1, %v740_v59  ;;  %v9329_v53 = vld [vmem:[#allocation8_spill] sm:$0xff]  ;;  %v9330_v11 = vld [vmem:[#allocation7_spill] sm:$0xff] }
 0x2e3   : > { %v832_v22 = vadd.f32 %v828_v15, %v786_v48  ;;  %v831_v2 = vadd.f32 %v827_v7, %v785_v0 }
 0x2e5   : > { %v840_v57 = vpop.permute.xlu1 %839 }
 0x2e6   : > { %v843_v36 = vsel %vm841_vm12, %v836_v13, %v840_v57  ;;  %v845_v35 = vsel %vm841_vm12, %v840_v57, %v836_v13  ;;  %v9331_v13 = vld [vmem:[#allocation11_spill] sm:$0xff]  ;;  %v5727_v57 = vpop.permute.xlu0 %1093 }
 0x2e7   : > { %v861_v51 = vmul.f32 %v5509_v6, %v843_v36  ;;  %v862_v28 = vmul.f32 %v5512_v52, %v845_v35  ;;  %v879_v6 = vld [vmem:[%s8982_s3] sm:$0xff]  ;;  %v9327_v52 = vmov 0.0  }
 0x2e9   : > { %v874_v9 = vmul.f32 %v9326_v4, %v862_v28  ;;  %v873_v26 = vmul.f32 %v9326_v4, %v861_v51 }
 0x2ea   : > { %v5731_v36 = vpop.permute.xlu0 %1159 }
 0x2eb   : > { %v878_v32 = vadd.f32 %v874_v9, %v832_v22  ;;  %v877_v62 = vadd.f32 %v873_v26, %v831_v2 }
 0x2ed   : > { %v4536_v14 = vpack.c.bf16 %v878_v32, %v876_v34  ;;  %v4538_v10 = vpack.c.bf16 %v877_v62, %v875_v42 }
 0x2ee   : > { %v5735_v49 = vpop.permute.xlu0 %1229 }
 0x2ef   : > { %4537 = vmatprep.subr.bf16.mxu1 %v4536_v14  ;;  %9344 = vst [vmem:[#allocation20_spill] sm:$0xff] %v5735_v49 }
 0x2f0   : > { %4539 = vmatpush1.bf16.msra.mxu1 %v4538_v10 }
 0x2f2   : > { %v5739_v61 = vpop.permute.xlu0 %1237 }
 0x2f3   : > { %4421 = vmatmul.mubr.msk.f32.vlgmr.msra.gmra.mrb[0].mxu1 %vm881_vm13, %v879_v6 }
 0x2f4   : > { %958 = vmatprep.mubr.f32.mxu1 %v9327_v52 }
 0x2f6   : > { %v5682_v59 = vpop.permute.xlu1 %1044  ;;  %v5743_v28 = vpop.permute.xlu0 %1311 }
 0x2f7   : > { %4422 = vmatmul.mubr.msk.f32.gmra.mrb[2].mxu1 %vm881_vm13, %v880_v33  ;;  %9346 = vst [vmem:[#allocation8_spill] sm:$0xff] %v5743_v28 }
 0x2f8   : > { %2813 = vmatprep.mubr.f32.mxu1 %v9327_v52 }
 0x2fa   : > { %v5690_v16 = vpop.permute.xlu1 %1049  ;;  %v5747_v0 = vpop.permute.xlu0 %1116 }
 0x2fe   : > { %v5751_v21 = vpop.permute.xlu0 %1315 }
 0x2ff   : > { %v5696_v54 = vpop.permute.xlu1 %1078 }
 0x300   : > { %9337 = vst [vmem:[#allocation9_spill] sm:$0xff] %v5696_v54 }
 0x303   : > { %v5704_v56 = vpop.permute.xlu1 %1083 }
 0x304   : > { %9338 = vst [vmem:[#allocation23_spill] sm:$0xff] %v5704_v56 }
 0x308   : > { %v5710_v39 = vpop.permute.xlu1 %1151 }
 0x309   : > { %9340 = vst [vmem:[#allocation18_spill] sm:$0xff] %v5710_v39 }
 0x30c   : > { %v5713_v1 = vpop.permute.xlu1 %1155 }
 0x30d   : > { %9341 = vst [vmem:[#allocation17_spill] sm:$0xff] %v5713_v1 }
 0x311   : > { %v5719_v12 = vpop.permute.xlu1 %1233 }
 0x312   : > { %9342 = vst [vmem:[#allocation10_spill] sm:$0xff] %v5719_v12 }
 0x316   : > { %v5723_v7 = vpop.permute.xlu1 %1088 }
 0x31b   : > { %v5729_v15 = vpop.permute.xlu1 %1163 }
 0x320   : > { %v5733_v35 = vpop.permute.xlu1 %1307 }
 0x321   : > { %9343 = vst [vmem:[#allocation19_spill] sm:$0xff] %v5733_v35 }
 0x325   : > { %v5737_v18 = vpop.permute.xlu1 %1241 }
 0x32a   : > { %v5741_v51 = vpop.permute.xlu1 %1384 }
 0x32b   : > { %9345 = vst [vmem:[#allocation15_spill] sm:$0xff] %v5741_v51 }
 0x32e   : > { %v5745_v48 = vpop.permute.xlu1 %1108 }
 0x332   : > { %v5749_v27 = vpop.permute.xlu1 %1110 }
 0x336   : > { %v5753_v22 = vpop.permute.xlu1 %1118 }
 0x3c6   : > { %v5638_v29 = vpop.f32.mrb[0].mxu1 }
 0x3c7   : > { %v5640_v30 = vpop.f32.mrb[1].mxu1  ;;  %v982_v55 = vmul.f32 %v5638_v29, %v5638_v29 }
 0x3c8   : > { %v974_v19 = vadd.f32 %v5640_v30, %v5638_v29  ;;  %v983_v44 = vmul.f32 %v5640_v30, %v5640_v30 }
 0x3ca   : > { %975 = vadd.xlane.f32.xlu0 %v974_v19  ;;  %v5648_v60 = vpop.f32.mrb[2].mxu1  ;;  %v986_v46 = vadd.f32 %v983_v44, %v982_v55 }
 0x3cb   : > { %v5650_v3 = vpop.f32.mrb[3].mxu1  ;;  %v984_v45 = vmul.f32 %v5648_v60, %v5648_v60 }
 0x3cc   : > { %v977_v41 = vadd.f32 %v5650_v3, %v5648_v60  ;;  %v985_v20 = vmul.f32 %v5650_v3, %v5650_v3 }
 0x3ce   : > { %987 = vadd.xlane.f32.xlu0 %v986_v46  ;;  %978 = vadd.xlane.f32.xlu1 %v977_v41  ;;  %v989_v47 = vadd.f32 %v985_v20, %v984_v45  ;;  %v4423_v45 = vld [vmem:[%s8984_s5 + $0x30] sm:$0xff] }
 0x3d2   : > { %990 = vadd.xlane.f32.xlu0 %v989_v47  ;;  %v4424_v47 = vld [vmem:[%s8984_s5 + $0x38] sm:$0xff] }
 0x3df   : > { %1319 = vperm.xlu1 %4749, %v9328_v8  }
 0x3e3   : > { %4750 = vset.pattern.permute.xlu1 %v5000_v40 }
 0x3e4   : > { %1461 = vperm.xlu1 %4750, %v9329_v53  }
 0x3e8   : > { %1388 = vperm.xlu0 %4748, %v9330_v11   ;;  %1186 = vrot.lane.b32.xlu1 %v9331_v13, %s5001_s21 }
 0x3e9   : > { %4752 = vset.pattern.permute.xlu1 %v9332_v43  ;;  %v4900_v43 = vld [vmem:[%s8981_s2 + $0x8] sm:$0xff] }
 0x3ec   : > { %1194 = vrot.lane.b32.xlu0 %v9333_v58, %s5001_s21  ;;  %1188 = vrot.lane.b32.xlu1 %v9334_v37, %s5001_s21 }
 0x3f0   : > { %1392 = vperm.xlu0 %4748, %v9335_v50   ;;  %1196 = vrot.lane.b32.xlu1 %v9336_v5, %s5001_s21 }
 0x3f4   : > { %4751 = vset.pattern.permute.xlu0 %v5000_v40  ;;  %1396 = vperm.xlu1 %4752, %v9328_v8  }
 0x3f5   : > { %1465 = vperm.xlu0 %4751, %v9330_v11  }
 0x3f8   : > { %4753 = vset.pattern.permute.xlu1 %v5002_v63 }
 0x3f9   : > { %1272 = vrot.lane.b32.xlu0 %v9333_v58, %s5003_s23  ;;  %1539 = vperm.xlu1 %4753, %v9329_v53  }
 0x3fd   : > { %1469 = vperm.xlu0 %4751, %v9335_v50   ;;  %1264 = vrot.lane.b32.xlu1 %v9331_v13, %s5003_s23 }
 0x3fe   : > { %4755 = vset.pattern.permute.xlu1 %v5000_v40 }
 0x401   : > { %4754 = vset.pattern.permute.xlu0 %v5002_v63  ;;  %1266 = vrot.lane.b32.xlu1 %v9334_v37, %s5003_s23 }
 0x402   : > { %1543 = vperm.xlu0 %4754, %v9330_v11  }
 0x405   : > { %1274 = vrot.lane.b32.xlu1 %v9336_v5, %s5003_s23 }
 0x406   : > { %1350 = vrot.lane.b32.xlu0 %v9333_v58, %s4993_s22 }
 0x409   : > { %1473 = vperm.xlu1 %4755, %v9328_v8  }
 0x40a   : > { %1547 = vperm.xlu0 %4754, %v9335_v50  }
 0x40d   : > { %4756 = vset.pattern.permute.xlu1 %v5004_v38 }
 0x40e   : > { %4757 = vset.pattern.permute.xlu0 %v5004_v38  ;;  %1617 = vperm.xlu1 %4756, %v9329_v53  }
 0x40f   : > { %1621 = vperm.xlu0 %4757, %v9330_v11  }
 0x412   : > { %1342 = vrot.lane.b32.xlu1 %v9331_v13, %s4993_s22 }
 0x413   : > { %1427 = vrot.lane.b32.xlu0 %v9333_v58, %s4990_s19  ;;  %4758 = vset.pattern.permute.xlu1 %v5002_v63 }
 0x416   : > { %1344 = vrot.lane.b32.xlu1 %v9334_v37, %s4993_s22 }
 0x417   : > { %1625 = vperm.xlu0 %4757, %v9335_v50  }
 0x41a   : > { %1352 = vrot.lane.b32.xlu1 %v9336_v5, %s4993_s22 }
 0x41b   : > { %4761 = vset.pattern.permute.xlu0 %v9339_v23 }
 0x41e   : > { %1551 = vperm.xlu1 %4758, %v9328_v8  }
 0x422   : > { %4759 = vset.pattern.permute.xlu1 %v5005_v31 }
 0x423   : > { %1695 = vperm.xlu1 %4759, %v9329_v53  }
 0x427   : > { %1419 = vrot.lane.b32.xlu1 %v9331_v13, %s4990_s19 }
 0x428   : > { %4760 = vset.pattern.permute.xlu1 %v9339_v23 }
 0x42b   : > { %1421 = vrot.lane.b32.xlu1 %v9334_v37, %s4990_s19 }
 0x42f   : > { %1429 = vrot.lane.b32.xlu1 %v9336_v5, %s4990_s19 }
 0x457   : > { %v976_v4 = vpop.xlane.xlu0 %975 }
 0x458   : > { %v980_v9 = vmul.f32 0.00390625, %v976_v4  ;;  %v4425_v4 = vld [vmem:[%s8984_s5 + $0x40] sm:$0xff] }
 0x45a   : > { %v994_v34 = vmul.f32 %v980_v9, %v980_v9 }
 0x45b   : > { %v979_v2 = vpop.xlane.xlu1 %978  ;;  %v988_v26 = vpop.xlane.xlu0 %987 }
 0x45c   : > { %v981_v32 = vmul.f32 0.00390625, %v979_v2  ;;  %v992_v42 = vmul.f32 0.00390625, %v988_v26 }
 0x45e   : > { %v995_v62 = vmul.f32 %v981_v32, %v981_v32  ;;  %v996_v14 = vsub.f32 %v992_v42, %v994_v34 }
 0x45f   : > { %v991_v10 = vpop.xlane.xlu0 %990  ;;  %v5763_v11 = vpop.permute.xlu1 %1319 }
 0x460   : > { %v998_v6 = vmax.f32 %v996_v14, 0.0  ;;  %v993_v33 = vmul.f32 0.00390625, %v991_v10 }
 0x462   : > { %v1000_v55 = vadd.f32 1e-05, %v998_v6  ;;  %v997_v19 = vsub.f32 %v993_v33, %v995_v62 }
 0x463   : > { %v5774_v63 = vpop.permute.xlu1 %1461 }
 0x464   : > { %4880 = vrsqrt.f32 %v1000_v55  ;;  %v999_v44 = vmax.f32 %v997_v19, 0.0  ;;  %9347 = vst [vmem:[#allocation7_spill] sm:$0xff] %v5774_v63 }
 0x466   : > { %v1001_v46 = vadd.f32 1e-05, %v999_v44  ;;  %v9016_v44 = vmov 22  }
 0x467   : > { %v5782_v2 = vpop.permute.xlu1 %1186 }
 0x468   : > { %4882 = vrsqrt.f32 %v1001_v46  ;;  %v5822_v46 = vpop.permute.xlu0 %1388 }
 0x469   : > { %9350 = vst [vmem:[#allocation25_spill] sm:$0xff] %v5822_v46 }
 0x46b   : > { %v5793_v26 = vpop.permute.xlu1 %1188 }
 0x46e   : > { %v4881_v41 = vpop.eup %4880 }
 0x46f   : > { %v1004_v20 = vmul.f32 %v4881_v41, %v4423_v45  ;;  %v5826_v41 = vpop.permute.xlu0 %1194 }
 0x471   : > { %1012 = vperm.xlu1 %4760, %v1004_v20  }
 0x472   : > { %v4883_v40 = vpop.eup %4882 }
 0x473   : > { %v1005_v53 = vmul.f32 %v4883_v40, %v4424_v47  ;;  %v5830_v47 = vpop.permute.xlu0 %1392 }
 0x475   : > { %4763 = vset.pattern.permute.xlu1 %v5004_v38  ;;  %1017 = vperm.xlu0 %4761, %v1005_v53   ;;  %v1006_v38 = vmul.f32 %v1004_v20, %v980_v9  ;;  %v4426_v9 = vld [vmem:[%s8984_s5 + $0x48] sm:$0xff] }
 0x476   : > { %1629 = vperm.xlu1 %4763, %v9328_v8  }
 0x479   : > { %4762 = vset.pattern.permute.xlu0 %v5005_v31 }
 0x47a   : > { %1496 = vrot.lane.b32.xlu1 %v9331_v13, %s5006_s13  ;;  %1699 = vperm.xlu0 %4762, %v4900_v43  }
 0x47b   : > { %4764 = vset.pattern.permute.xlu1 %v5005_v31  ;;  %v1007_v31 = vmul.f32 %v1005_v53, %v981_v32  ;;  %v5834_v53 = vpop.permute.xlu0 %1465 }
 0x47c   : > { %9352 = vst [vmem:[#allocation27_spill] sm:$0xff] %v5834_v53 }
 0x47d   : > { %v1009_v34 = vsub.f32 %v4426_v9, %v1007_v31 }
 0x47e   : > { %1504 = vrot.lane.b32.xlu1 %v9333_v58, %s5006_s13  ;;  %1498 = vrot.lane.b32.xlu0 %v9334_v37, %s5006_s13 }
 0x482   : > { %1703 = vperm.xlu1 %4764, %v9335_v50   ;;  %1506 = vrot.lane.b32.xlu0 %v9336_v5, %s5006_s13  ;;  %v1008_v50 = vsub.f32 %v4425_v4, %v1006_v38  ;;  %v5838_v38 = vpop.permute.xlu0 %1272 }
 0x486   : > { %1574 = vrot.lane.b32.xlu1 %v9331_v13, %s5007_s25  ;;  %1707 = vperm.xlu0 %4762, %v9328_v8   ;;  %v5797_v8 = vpop.permute.xlu1 %1196  ;;  %v5842_v31 = vpop.permute.xlu0 %1469 }
 0x487   : > { %4765 = vset.pattern.permute.xlu1 %v9339_v23 }
 0x48a   : > { %1026 = vperm.xlu1 %4765, %v1008_v50   ;;  %1582 = vrot.lane.b32.xlu0 %v9333_v58, %s5007_s25  ;;  %v5803_v32 = vpop.permute.xlu1 %1396  ;;  %v5846_v9 = vpop.permute.xlu0 %1543 }
 0x48b   : > { %4769 = vset.pattern.permute.xlu0 %v9016_v44  ;;  %9353 = vst [vmem:[#allocation28_spill] sm:$0xff] %v5846_v9 }
 0x48e   : > { %1652 = vrot.lane.b32.xlu0 %v9331_v13, %s5008_s17  ;;  %1031 = vperm.xlu1 %4765, %v1009_v34   ;;  %v5805_v42 = vpop.permute.xlu1 %1539  ;;  %v5848_v44 = vpop.permute.xlu0 %1350 }
 0x48f   : > { %9348 = vst [vmem:[#allocation16_spill] sm:$0xff] %v5805_v42 }
 0x492   : > { %1576 = vrot.lane.b32.xlu1 %v9334_v37, %s5007_s25  ;;  %v5807_v62 = vpop.permute.xlu1 %1264 }
 0x496   : > { %1584 = vrot.lane.b32.xlu1 %v9336_v5, %s5007_s25  ;;  %v5809_v14 = vpop.permute.xlu1 %1266 }
 0x49a   : > { %v5811_v10 = vpop.permute.xlu1 %1274 }
 0x49e   : > { %v5813_v6 = vpop.permute.xlu1 %1473 }
 0x4a2   : > { %v5815_v33 = vpop.permute.xlu1 %1617 }
 0x4a3   : > { %9349 = vst [vmem:[#allocation24_spill] sm:$0xff] %v5815_v33 }
 0x4a6   : > { %v5817_v55 = vpop.permute.xlu1 %1342 }
 0x4aa   : > { %v5819_v19 = vpop.permute.xlu1 %1344 }
 0x4ae   : > { %v5824_v45 = vpop.permute.xlu1 %1352 }
 0x4b2   : > { %v5828_v20 = vpop.permute.xlu1 %1551 }
 0x4b6   : > { %v5832_v40 = vpop.permute.xlu1 %1695 }
 0x4b7   : > { %9351 = vst [vmem:[#allocation26_spill] sm:$0xff] %v5832_v40  ;;  %v5854_v40 = vpop.permute.xlu0 %1547 }
 0x4ba   : > { %v5836_v43 = vpop.permute.xlu1 %1419 }
 0x4bb   : > { %v5858_v53 = vpop.permute.xlu0 %1621 }
 0x4bc   : > { %9355 = vst [vmem:[#allocation30_spill] sm:$0xff] %v5858_v53 }
 0x4be   : > { %v5840_v4 = vpop.permute.xlu1 %1421 }
 0x4bf   : > { %v5864_v28 = vpop.permute.xlu0 %1427 }
 0x4c2   : > { %v5844_v50 = vpop.permute.xlu1 %1429 }
 0x4c3   : > { %v5868_v1 = vpop.permute.xlu0 %1625 }
 0x4c4   : > { %9358 = vst [vmem:[#allocation33_spill] sm:$0xff] %v5868_v1  ;;  %v9370_v1 = vmov 19  }
 0x4f0   : > { %v1013_v34 = vpop.permute.xlu1 %1012 }
 0x4f1   : > { %v1020_v9 = vmul.f32 %v1013_v34, %v5638_v29  ;;  %v1021_v63 = vmul.f32 %v1013_v34, %v5640_v30  ;;  %v5964_v34 = vld [vmem:[%s8981_s2 + $0x18] sm:$0xff] }
 0x4f2   : > { %9365 = vst [vmem:[#allocation40_spill] sm:$0xff] %v5964_v34 }
 0x4f4   : > { %v1018_v29 = vpop.permute.xlu0 %1017 }
 0x4f5   : > { %v5850_v23 = vpop.permute.xlu1 %1629 }
 0x4f6   : > { %9354 = vst [vmem:[#allocation29_spill] sm:$0xff] %v5850_v23 }
 0x4f9   : > { %v5852_v52 = vpop.permute.xlu1 %1496 }
 0x4fd   : > { %v5856_v33 = vpop.permute.xlu1 %1504 }
 0x501   : > { %v5860_v46 = vpop.permute.xlu1 %1703 }
 0x502   : > { %9356 = vst [vmem:[#allocation31_spill] sm:$0xff] %v5860_v46 }
 0x505   : > { %v5862_v42 = vpop.permute.xlu1 %1574 }
 0x506   : > { %9357 = vst [vmem:[#allocation32_spill] sm:$0xff] %v5862_v42 }
 0x509   : > { %v1027_v12 = vpop.permute.xlu1 %1026 }
 0x50a   : > { %v1034_v23 = vadd.f32 %v1027_v12, %v1020_v9  ;;  %v1035_v51 = vadd.f32 %v1027_v12, %v1021_v63  ;;  %v1023_v12 = vmul.f32 %v1018_v29, %v5650_v3  ;;  %v9042_v9 = vmov 18  }
 0x50c   : > { %vm1038_vm14 = vcmp.ge.f32.partialorder %v1034_v23, 0.0  ;;  %vm1039_vm15 = vcmp.ge.f32.partialorder %v1035_v51, 0.0  ;;  %v1052_v35 = vmul.f32 %v5682_v59, %v1034_v23  ;;  %v1053_v53 = vmul.f32 %v5682_v59, %v1035_v51 }
 0x50d   : > { %v1032_v30 = vpop.permute.xlu1 %1031  ;;  %v1022_v59 = vmul.f32 %v1018_v29, %v5648_v60  ;;  %v4445_v29 = vld [vmem:[%s8984_s5 + $0x80] sm:$0xff] }
 0x50e   : > { %v5872_v46 = vsel %vm1038_vm14, %v1034_v23, %v1052_v35  ;;  %v5874_v49 = vsel %vm1039_vm15, %v1035_v51, %v1053_v53  ;;  %v1037_v35 = vadd.f32 %v1032_v30, %v1023_v12  ;;  %v5955_v53 = vld [vmem:[%s8981_s2 + $0x8] sm:$0xff]  ;;  %v9036_v12 = vmov 19  }
 0x50f   : > { %9359 = vst [vmem:[#allocation34_spill] sm:$0xff] %v5872_v46  ;;  %9360 = vst [vmem:[#allocation35_spill] sm:$0xff] %v5874_v49  ;;  %1112 = vrot.lane.b32.xlu0 %v5874_v49, %s4998_s12  ;;  %1104 = vrot.lane.b32.xlu1 %v5872_v46, %s4998_s12  ;;  %v1036_v23 = vadd.f32 %v1032_v30, %v1022_v59  ;;  %v5983_v30 = vld [vmem:[%s8981_s2 + $0x20] sm:$0xff]  ;;  %v5985_v59 = vpop.permute.xlu0 %1699  ;;  %vm2106_vm15 = vcmp.lt.s32.totalorder %v5380_v17, 64 }
 0x510   : > { %v1055_v60 = vmul.f32 %v5690_v16, %v1037_v35  ;;  %vm1041_vm1 = vcmp.ge.f32.partialorder %v1037_v35, 0.0  ;;  %9364 = vst [vmem:[#allocation39_spill] sm:$0xff] %v5955_v53  ;;  %9366 = vst [vmem:[#allocation41_spill] sm:$0xff] %v5983_v30 }
 0x511   : > { %v1054_v51 = vmul.f32 %v5690_v16, %v1036_v23  ;;  %vm1040_vm0 = vcmp.ge.f32.partialorder %v1036_v23, 0.0  ;;  %v5947_v16 = vld [vmem:[%s8981_s2 + $0x10] sm:$0xff]  ;;  %9367 = vst [vmem:[#allocation42_spill] sm:$0xff] %v5985_v59 }
 0x512   : > { %v5902_v3 = vsel %vm1041_vm1, %v1037_v35, %v1055_v60  ;;  %9363 = vst [vmem:[#allocation38_spill] sm:$0xff] %v5947_v16  ;;  %v9368_v60 = vmov 22   ;;  %vm2216_vm1 = vcmp.lt.s32.totalorder %v5380_v17, 63 }
 0x513   : > { %1190 = vrot.lane.b32.xlu0 %v5874_v49, %s5001_s21  ;;  %1182 = vrot.lane.b32.xlu1 %v5872_v46, %s5001_s21  ;;  %v5896_v63 = vsel %vm1040_vm0, %v1036_v23, %v1054_v51  ;;  %9362 = vst [vmem:[#allocation37_spill] sm:$0xff] %v5902_v3  ;;  %v4446_v23 = vld [vmem:[%s8984_s5 + $0x88] sm:$0xff]  ;;  %v5992_v35 = vpop.permute.xlu0 %1498  ;;  %v5998_v51 = vld [vmem:[%s8981_s2] sm:$0xff]  ;;  %vm1996_vm0 = vcmp.lt.s32.totalorder %v5380_v17, 65 }
 0x514   : > { %9361 = vst [vmem:[#allocation36_spill] sm:$0xff] %v5896_v63 }
 0x517   : > { %1260 = vrot.lane.b32.xlu0 %v5872_v46, %s5003_s23  ;;  %1648 = vrot.lane.b32.xlu1 %v5872_v46, %s5008_s17 }
 0x51b   : > { %1268 = vrot.lane.b32.xlu0 %v5874_v49, %s5003_s23  ;;  %1656 = vrot.lane.b32.xlu1 %v5874_v49, %s5008_s17 }
 0x51f   : > { %1338 = vrot.lane.b32.xlu0 %v5872_v46, %s4993_s22  ;;  %1106 = vrot.lane.b32.xlu1 %v5896_v63, %s4998_s12 }
 0x523   : > { %1346 = vrot.lane.b32.xlu0 %v5874_v49, %s4993_s22  ;;  %1114 = vrot.lane.b32.xlu1 %v5902_v3, %s4998_s12 }
 0x527   : > { %1415 = vrot.lane.b32.xlu0 %v5872_v46, %s4990_s19  ;;  %1184 = vrot.lane.b32.xlu1 %v5896_v63, %s5001_s21 }
 0x52b   : > { %1423 = vrot.lane.b32.xlu0 %v5874_v49, %s4990_s19  ;;  %1192 = vrot.lane.b32.xlu1 %v5902_v3, %s5001_s21 }
 0x52f   : > { %1492 = vrot.lane.b32.xlu0 %v5872_v46, %s5006_s13  ;;  %1262 = vrot.lane.b32.xlu1 %v5896_v63, %s5003_s23 }
 0x533   : > { %1500 = vrot.lane.b32.xlu0 %v5874_v49, %s5006_s13  ;;  %1270 = vrot.lane.b32.xlu1 %v5902_v3, %s5003_s23 }
 0x537   : > { %1570 = vrot.lane.b32.xlu0 %v5872_v46, %s5007_s25  ;;  %1340 = vrot.lane.b32.xlu1 %v5896_v63, %s4993_s22 }
 0x53b   : > { %1578 = vrot.lane.b32.xlu0 %v5874_v49, %s5007_s25  ;;  %1348 = vrot.lane.b32.xlu1 %v5902_v3, %s4993_s22 }
 0x53f   : > { %1650 = vrot.lane.b32.xlu0 %v5896_v63, %s5008_s17  ;;  %1417 = vrot.lane.b32.xlu1 %v5896_v63, %s4990_s19 }
 0x543   : > { %1658 = vrot.lane.b32.xlu0 %v5902_v3, %s5008_s17  ;;  %1425 = vrot.lane.b32.xlu1 %v5902_v3, %s4990_s19 }
 0x547   : > { %1660 = vrot.lane.b32.xlu0 %v9333_v58, %s5008_s17  ;;  %1494 = vrot.lane.b32.xlu1 %v5896_v63, %s5006_s13 }
 0x54b   : > { %1942 = vperm.xlu0 %4769, %v5947_v16   ;;  %1502 = vrot.lane.b32.xlu1 %v5902_v3, %s5006_s13  ;;  %s5011_s13 = smov 65  }
 0x54f   : > { %4770 = vset.pattern.permute.xlu0 %v9042_v9  ;;  %1572 = vrot.lane.b32.xlu1 %v5896_v63, %s5007_s25  ;;  %v6020_v63 = vpop.permute.xlu1 %1576 }
 0x550   : > { %2039 = vperm.xlu0 %4770, %v5955_v53   ;;  %9372 = vst [vmem:[#allocation45_spill] sm:$0xff] %v6020_v63 }
 0x553   : > { %1580 = vrot.lane.b32.xlu1 %v5902_v3, %s5007_s25  ;;  %v9377_v3 = vmov 18   ;;  %s296_s25 = sand.u32 1, %s4966_s28  }
 0x554   : > { %2047 = vperm.xlu0 %4770, %v5964_v34  }
 0x557   : > { %1654 = vrot.lane.b32.xlu1 %v9334_v37, %s5008_s17 }
 0x558   : > { %1976 = vrot.lane.b32.xlu0 %v5872_v46, %s5011_s13 }
 0x55b   : > { %1662 = vrot.lane.b32.xlu1 %v9336_v5, %s5008_s17  ;;  %s5031_s17 = smov [#allocation4]  }
 0x55c   : > { %1988 = vrot.lane.b32.xlu0 %v5874_v49, %s5011_s13 }
 0x55f   : > { %1892 = vperm.xlu1 %4765, %v4445_v29   ;;  %v6004_v29 = vpop.permute.xlu0 %1506 }
 0x560   : > { %2051 = vperm.xlu0 %4770, %v5983_v30  }
 0x563   : > { %1897 = vperm.xlu1 %4765, %v4446_v23   ;;  %v6010_v23 = vpop.permute.xlu0 %1707 }
 0x564   : > { %4777 = vset.pattern.permute.xlu0 %v9036_v12  ;;  %9369 = vst [vmem:[#allocation43_spill] sm:$0xff] %v6010_v23  ;;  %v9045_v12 = vmov 20   ;;  %v6027_v23 = vpop.permute.xlu1 %1584 }
 0x565   : > { %2153 = vperm.xlu0 %4777, %v5947_v16   ;;  %9374 = vst [vmem:[#allocation47_spill] sm:$0xff] %v6027_v23 }
 0x567   : > { %4766 = vset.pattern.permute.xlu1 %v9368_v60  ;;  %v6018_v59 = vpop.permute.xlu0 %1582 }
 0x568   : > { %1932 = vperm.xlu1 %4766, %v5998_v51   ;;  %9371 = vst [vmem:[#allocation44_spill] sm:$0xff] %v6018_v59 }
 0x569   : > { %2086 = vrot.lane.b32.xlu0 %v5872_v46, %s5013_s20 }
 0x56c   : > { %1937 = vperm.xlu1 %4766, %v5955_v53  }
 0x56d   : > { %2098 = vrot.lane.b32.xlu0 %v5874_v49, %s5013_s20 }
 0x570   : > { %4767 = vset.pattern.permute.xlu1 %v9042_v9  ;;  %v6025_v9 = vpop.permute.xlu0 %1652 }
 0x571   : > { %2161 = vperm.xlu0 %4777, %v5983_v30   ;;  %2035 = vperm.xlu1 %4767, %v5998_v51   ;;  %9373 = vst [vmem:[#allocation46_spill] sm:$0xff] %v6025_v9  ;;  %v4429_v9 = vld [vmem:[%s8985_s6 + $0x11] ss:$8 sm:$0x3] }
 0x572   : > { %v6050_v39 = vrot.slane %v4429_v9, %v5390_v24  ;;  %v6053_v54 = vrot.slane %v4429_v9, %v5392_v25  ;;  %v1124_v9 = vsel %vm1120_vm2, %v5749_v27, %v5753_v22 }
 0x574   : > { %9380 = vst [vmem:[#allocation52_spill] sm:$0xff] %v6050_v39  ;;  %9381 = vst [vmem:[#allocation53_spill] sm:$0xff] %v6053_v54 }
 0x575   : > { %4781 = vset.pattern.permute.xlu0 %v9045_v12  ;;  %4768 = vset.pattern.permute.xlu1 %v9370_v1 }
 0x576   : > { %2267 = vperm.xlu0 %4781, %v5964_v34   ;;  %2145 = vperm.xlu1 %4768, %v5998_v51  }
 0x57a   : > { %1980 = vrot.lane.b32.xlu0 %v9331_v13, %s5011_s13  ;;  %2149 = vperm.xlu1 %4768, %v5955_v53  }
 0x57e   : > { %1992 = vrot.lane.b32.xlu0 %v9333_v58, %s5011_s13  ;;  %4771 = vset.pattern.permute.xlu1 %v9368_v60 }
 0x57f   : > { %1947 = vperm.xlu1 %4771, %v5964_v34  }
 0x581   : > { %v6033_v12 = vpop.permute.xlu1 %1104  ;;  %v6035_v56 = vpop.permute.xlu0 %1112 }
 0x582   : > { %9375 = vst [vmem:[#allocation48_spill] sm:$0xff] %v6033_v12  ;;  %9376 = vst [vmem:[#allocation49_spill] sm:$0xff] %v6035_v56  ;;  %2196 = vrot.lane.b32.xlu0 %v5872_v46, %s5015_s24  ;;  %v1123_v46 = vsel %vm1120_vm2, %v5745_v48, %v5747_v0 }
 0x583   : > { %4772 = vset.pattern.permute.xlu1 %v9377_v3  ;;  %v1147_v59 = vmul.f32 %v6053_v54, %v1123_v46  ;;  %v1201_v46 = vsel %vm1198_vm3, %v5782_v2, %v5826_v41 }
 0x584   : > { %2043 = vperm.xlu1 %4772, %v5947_v16   ;;  %v1127_v16 = vsel %vm1120_vm2, %v5747_v0, %v5745_v48 }
 0x585   : > { %v6045_v63 = vpop.permute.xlu1 %1182  ;;  %v6047_v23 = vpop.permute.xlu0 %1190  ;;  %v1146_v0 = vmul.f32 %v6050_v39, %v1127_v16  ;;  %v4431_v16 = vld [vmem:[%s8985_s6 + $0x13] ss:$8 sm:$0x3] }
 0x586   : > { %9378 = vst [vmem:[#allocation50_spill] sm:$0xff] %v6045_v63  ;;  %9379 = vst [vmem:[#allocation51_spill] sm:$0xff] %v6047_v23  ;;  %2208 = vrot.lane.b32.xlu0 %v5874_v49, %s5015_s24  ;;  %v4430_v63 = vld [vmem:[%s8985_s6 + $0x12] ss:$8 sm:$0x3]  ;;  %v1128_v49 = vsel %vm1120_vm2, %v5753_v22, %v5749_v27  ;;  %v9382_v23 = vmov 20   ;;  %v1149_v27 = vmul.f32 %v6053_v54, %v1124_v9 }
 0x587   : > { %v6086_v12 = vrot.slane %v4430_v63, %v5390_v24  ;;  %v1148_v56 = vmul.f32 %v6050_v39, %v1128_v49  ;;  %v6091_v22 = vrot.slane %v4430_v63, %v5392_v25  ;;  %v1202_v49 = vsel %vm1198_vm3, %v5793_v26, %v5797_v8 }
 0x588   : > { %4773 = vset.pattern.permute.xlu1 %v9382_v23  ;;  %v1206_v63 = vsel %vm1198_vm3, %v5797_v8, %v5793_v26  ;;  %v6121_v23 = vrot.slane %v4431_v16, %v5390_v24  ;;  %v1283_v8 = vsel %vm1276_vm4, %v5838_v38, %v5807_v62 }
 0x589   : > { %v6078_v42 = vpop.permute.xlu1 %1648  ;;  %2255 = vperm.xlu1 %4773, %v5998_v51   ;;  %v6081_v48 = vpop.permute.xlu0 %1260  ;;  %9385 = vst [vmem:[#allocation56_spill] sm:$0xff] %v6091_v22  ;;  %v1225_v54 = vmul.f32 %v6091_v22, %v1201_v46  ;;  %v1226_v39 = vmul.f32 %v6086_v12, %v1206_v63  ;;  %v1227_v26 = vmul.f32 %v6091_v22, %v1202_v49 }
 0x58a   : > { %9383 = vst [vmem:[#allocation54_spill] sm:$0xff] %v6078_v42  ;;  %9384 = vst [vmem:[#allocation55_spill] sm:$0xff] %v6081_v48  ;;  %v1205_v42 = vsel %vm1198_vm3, %v5826_v41, %v5782_v2  ;;  %v1170_v2 = vmul.f32 %v5731_v36, %v1146_v0  ;;  %v1171_v0 = vmul.f32 %v5731_v36, %v1147_v59  ;;  %v4432_v36 = vld [vmem:[%s8985_s6 + $0x14] ss:$8 sm:$0x3] }
 0x58b   : > { %v1224_v41 = vmul.f32 %v6086_v12, %v1205_v42  ;;  %v1172_v42 = vmul.f32 %v5729_v15, %v1148_v56  ;;  %v1102_v46 = vmul.f32 %v5727_v57, %v9334_v37  ;;  %v1103_v49 = vmul.f32 %v5727_v57, %v9336_v5 }
 0x58c   : > { %v1101_v63 = vmul.f32 %v5723_v7, %v9333_v58  ;;  %v6142_v22 = vrot.slane %v4431_v16, %v5392_v25  ;;  %v1302_v57 = vmul.f32 %v6121_v23, %v1283_v8  ;;  %v4433_v16 = vld [vmem:[%s8985_s6 + $0x16] ss:$8 sm:$0x3]  ;;  %v1249_v58 = vmul.f32 %v5739_v61, %v1225_v54 }
 0x58d   : > { %v6113_v9 = vpop.permute.xlu1 %1656  ;;  %2259 = vperm.xlu1 %4773, %v5955_v53   ;;  %v6116_v48 = vpop.permute.xlu0 %1268  ;;  %v1100_v53 = vmul.f32 %v5723_v7, %v9331_v13  ;;  %v1279_v7 = vsel %vm1276_vm4, %v5807_v62, %v5838_v38  ;;  %v1250_v13 = vmul.f32 %v5737_v18, %v1226_v39  ;;  %v6166_v37 = vrot.slane %v4432_v36, %v5390_v24 }
 0x58e   : > { %9386 = vst [vmem:[#allocation57_spill] sm:$0xff] %v6113_v9  ;;  %v1173_v9 = vmul.f32 %v5729_v15, %v1149_v27  ;;  %v1248_v27 = vmul.f32 %v5739_v61, %v1224_v41  ;;  %v1180_v41 = vadd.f32 %v1172_v42, %v1102_v46  ;;  %v1303_v62 = vmul.f32 %v6142_v22, %v1279_v7 }
 0x58f   : > { %v1178_v59 = vadd.f32 %v1170_v2, %v1100_v53  ;;  %v1251_v53 = vmul.f32 %v5737_v18, %v1227_v26  ;;  %v1179_v2 = vadd.f32 %v1171_v0, %v1101_v63  ;;  %v6170_v38 = vrot.slane %v4432_v36, %v5392_v25 }
 0x590   : > { %v1181_v5 = vadd.f32 %v1173_v9, %v1103_v49  ;;  %v6173_v8 = vrot.slane %v4433_v16, %v5390_v24  ;;  %v6176_v54 = vrot.slane %v4433_v16, %v5392_v25  ;;  %v1326_v9 = vmul.f32 %v5751_v21, %v1302_v57 }
 0x591   : > { %4774 = vset.pattern.permute.xlu1 %v9370_v1  ;;  %v6148_v56 = vpop.permute.xlu1 %1106  ;;  %v6150_v15 = vpop.permute.xlu0 %1338  ;;  %v1256_v61 = vadd.f32 %v1248_v27, %v1178_v59  ;;  %v1280_v26 = vsel %vm1276_vm4, %v5809_v14, %v5811_v10  ;;  %v1284_v0 = vsel %vm1276_vm4, %v5811_v10, %v5809_v14  ;;  %v9082_v42 = vmov 21   ;;  %v4434_v59 = vld [vmem:[%s8985_s6 + $0x17] ss:$8 sm:$0x3] }
 0x592   : > { %2157 = vperm.xlu1 %4774, %v5964_v34   ;;  %v1257_v46 = vadd.f32 %v1249_v58, %v1179_v2  ;;  %v1258_v49 = vadd.f32 %v1250_v13, %v1180_v41  ;;  %v1259_v63 = vadd.f32 %v1251_v53, %v1181_v5  ;;  %v1360_v36 = vsel %vm657_vm8, %v5848_v44, %v5817_v55 }
 0x593   : > { %v1356_v14 = vsel %vm657_vm8, %v5817_v55, %v5848_v44  ;;  %v1357_v13 = vsel %vm657_vm8, %v5819_v19, %v5824_v45  ;;  %v1361_v58 = vsel %vm657_vm8, %v5824_v45, %v5819_v19  ;;  %v1327_v5 = vmul.f32 %v5751_v21, %v1303_v62 }
 0x594   : > { %v1304_v10 = vmul.f32 %v6121_v23, %v1284_v0  ;;  %v1305_v27 = vmul.f32 %v6142_v22, %v1280_v26  ;;  %v1433_v55 = vsel %vm703_vm9, %v5836_v43, %v5864_v28  ;;  %v1334_v57 = vadd.f32 %v1326_v9, %v1256_v61 }
 0x595   : > { %v6178_v39 = vpop.permute.xlu1 %1114  ;;  %v6180_v18 = vpop.permute.xlu0 %1346  ;;  %v1379_v19 = vmul.f32 %v6166_v37, %v1360_v36  ;;  %v6226_v45 = vrot.slane %v4434_v59, %v5390_v24  ;;  %v6229_v21 = vrot.slane %v4434_v59, %v5392_v25  ;;  %v1380_v16 = vmul.f32 %v6170_v38, %v1356_v14 }
 0x596   : > { %4775 = vset.pattern.permute.xlu1 %v9082_v42  ;;  %v1381_v53 = vmul.f32 %v6166_v37, %v1361_v58  ;;  %v1382_v2 = vmul.f32 %v6170_v38, %v1357_v13  ;;  %v1437_v41 = vsel %vm703_vm9, %v5864_v28, %v5836_v43  ;;  %v1456_v62 = vmul.f32 %v6173_v8, %v1433_v55  ;;  %v9405_v42 = vld [vmem:[#allocation47_spill] sm:$0xff] }
 0x597   : > { %2364 = vperm.xlu1 %4775, %v5998_v51   ;;  %v1434_v61 = vsel %vm703_vm9, %v5840_v4, %v5844_v50  ;;  %v1438_v9 = vsel %vm703_vm9, %v5844_v50, %v5840_v4  ;;  %v1511_v26 = vsel %vm1508_vm5, %v5852_v52, %v5856_v33  ;;  %v1335_v28 = vadd.f32 %v1327_v5, %v1257_v46  ;;  %v6266_v50 = vld [vmem:[%s8981_s2 + $0x28] sm:$0xff] }
 0x598   : > { %v1328_v43 = vmul.f32 %v5763_v11, %v1304_v10  ;;  %v1515_v0 = vsel %vm1508_vm5, %v5856_v33, %v5852_v52  ;;  %v1403_v46 = vmul.f32 %v5830_v47, %v1379_v19  ;;  %v1457_v59 = vmul.f32 %v6176_v54, %v1437_v41  ;;  %v4435_v5 = vld [vmem:[%s8985_s6 + $0x20] ss:$8 sm:$0x3] }
 0x599   : > { %v6220_v44 = vpop.permute.xlu1 %1184  ;;  %v6222_v7 = vpop.permute.xlu0 %1415  ;;  %v1516_v52 = vsel %vm1508_vm5, %v6004_v29, %v5992_v35  ;;  %v1404_v33 = vmul.f32 %v5830_v47, %v1380_v16  ;;  %v1458_v14 = vmul.f32 %v6173_v8, %v1434_v61  ;;  %v1459_v13 = vmul.f32 %v6176_v54, %v1438_v9 }
 0x59a   : > { %v1534_v58 = vmul.f32 %v6226_v45, %v1511_v26  ;;  %v1405_v10 = vmul.f32 %v5803_v32, %v1381_v53  ;;  %v1480_v55 = vmul.f32 %v5842_v31, %v1456_v62  ;;  %v1336_v47 = vadd.f32 %v1328_v43, %v1258_v49 }
 0x59b   : > { %4776 = vset.pattern.permute.xlu1 %v9368_v60  ;;  %v1329_v60 = vmul.f32 %v5763_v11, %v1305_v27  ;;  %v1512_v11 = vsel %vm1508_vm5, %v5992_v35, %v6004_v29  ;;  %v1406_v27 = vmul.f32 %v5803_v32, %v1382_v2  ;;  %v1535_v35 = vmul.f32 %v6229_v21, %v1515_v0 }
 0x59c   : > { %1952 = vperm.xlu1 %4776, %v5983_v30   ;;  %v1536_v19 = vmul.f32 %v6226_v45, %v1512_v11  ;;  %v1537_v16 = vmul.f32 %v6229_v21, %v1516_v52  ;;  %v1411_v9 = vadd.f32 %v1403_v46, %v1334_v57  ;;  %v1481_v53 = vmul.f32 %v5842_v31, %v1457_v59  ;;  %v9387_v46 = vld [vmem:[#allocation49_spill] sm:$0xff]  ;;  %v9388_v59 = vld [vmem:[#allocation48_spill] sm:$0xff] }
 0x59d   : > { %v6259_v36 = vpop.permute.xlu1 %1192  ;;  %v6261_v4 = vpop.permute.xlu0 %1423  ;;  %v1337_v29 = vadd.f32 %v1329_v60, %v1259_v63  ;;  %v6299_v32 = vrot.slane %v4435_v5, %v5390_v24  ;;  %v1412_v2 = vadd.f32 %v1404_v33, %v1335_v28  ;;  %v1482_v49 = vmul.f32 %v5813_v6, %v1458_v14  ;;  %v9390_v33 = vld [vmem:[#allocation32_spill] sm:$0xff] }
 0x59e   : > { %v1483_v63 = vmul.f32 %v5813_v6, %v1459_v13  ;;  %v1558_v62 = vmul.f32 %v5854_v40, %v1534_v58  ;;  %v1413_v26 = vadd.f32 %v1405_v10, %v1336_v47  ;;  %v1488_v60 = vadd.f32 %v1480_v55, %v1411_v9  ;;  %v9391_v55 = vld [vmem:[#allocation52_spill] sm:$0xff]  ;;  %v9392_v47 = vld [vmem:[#allocation53_spill] sm:$0xff] }
 0x59f   : > { %v1414_v43 = vadd.f32 %v1406_v27, %v1337_v29  ;;  %v1559_v0 = vmul.f32 %v5854_v40, %v1535_v35  ;;  %v1560_v31 = vmul.f32 %v5828_v20, %v1536_v19  ;;  %v1561_v57 = vmul.f32 %v5828_v20, %v1537_v16  ;;  %v9389_v20 = vld [vmem:[#allocation44_spill] sm:$0xff]  ;;  %v9394_v19 = vld [vmem:[#allocation50_spill] sm:$0xff] }
 0x5a0   : > { %1957 = vperm.xlu1 %4776, %v6266_v50   ;;  %v1121_v28 = vsel %vm1120_vm2, %v9388_v59, %v9387_v46  ;;  %v1125_v6 = vsel %vm1120_vm2, %v9387_v46, %v9388_v59  ;;  %v6322_v52 = vrot.slane %v4435_v5, %v5392_v25  ;;  %v1589_v14 = vsel %vm1586_vm6, %v9390_v33, %v9389_v20  ;;  %v9393_v5 = vld [vmem:[#allocation51_spill] sm:$0xff] }
 0x5a1   : > { %v6292_v41 = vpop.permute.xlu1 %1262  ;;  %v6294_v61 = vpop.permute.xlu0 %1492  ;;  %v1490_v13 = vadd.f32 %v1482_v49, %v1413_v26  ;;  %v1491_v58 = vadd.f32 %v1483_v63, %v1414_v43  ;;  %v6328_v10 = vadd.f32 %v1558_v62, %v1488_v60  ;;  %v1593_v27 = vsel %vm1586_vm6, %v9389_v20, %v9390_v33  ;;  %v9399_v46 = vld [vmem:[#allocation55_spill] sm:$0xff]  ;;  %v9402_v33 = vld [vmem:[#allocation34_spill] sm:$0xff] }
 0x5a2   : > { %v1142_v35 = vmul.f32 %v9391_v55, %v1125_v6  ;;  %v1143_v29 = vmul.f32 %v9392_v47, %v1121_v28  ;;  %v1199_v16 = vsel %vm1198_vm3, %v9394_v19, %v9393_v5  ;;  %v1203_v9 = vsel %vm1198_vm3, %v9393_v5, %v9394_v19  ;;  %v9401_v28 = vld [vmem:[#allocation56_spill] sm:$0xff] }
 0x5a3   : > { %v6349_v49 = vadd.f32 %v1560_v31, %v1490_v13  ;;  %v6351_v63 = vadd.f32 %v1561_v57, %v1491_v58  ;;  %v6354_v62 = vmul.f32 %v6299_v32, %v1589_v14  ;;  %v9398_v26 = vmov 20   ;;  %v9400_v57 = vld [vmem:[#allocation38_spill] sm:$0xff]  ;;  %v9403_v14 = vld [vmem:[#allocation9_spill] sm:$0xff] }
 0x5a4   : > { %4778 = vset.pattern.permute.xlu1 %v9377_v3  ;;  %v1489_v3 = vadd.f32 %v1481_v53, %v1412_v2  ;;  %v4436_v53 = vld [vmem:[%s8985_s6 + $0x21] ss:$8 sm:$0x3]  ;;  %v6360_v60 = vmul.f32 %v6322_v52, %v1593_v27  ;;  %v1281_v31 = vsel %vm1276_vm4, %v6116_v48, %v9399_v46  ;;  %v1220_v59 = vmul.f32 %v6086_v12, %v1203_v9  ;;  %v9404_v58 = vld [vmem:[#allocation18_spill] sm:$0xff] }
 0x5a5   : > { %2055 = vperm.xlu1 %4778, %v6266_v50   ;;  %v6317_v11 = vpop.permute.xlu1 %1270  ;;  %v6319_v40 = vpop.permute.xlu0 %1500  ;;  %9396 = vst [vmem:[#allocation48_spill] sm:$0xff] %v6349_v49  ;;  %9397 = vst [vmem:[#allocation44_spill] sm:$0xff] %v6351_v63  ;;  %v1221_v6 = vmul.f32 %v9401_v28, %v1199_v16  ;;  %v1096_v13 = vmul.f32 %v9403_v14, %v9402_v33  ;;  %v1166_v27 = vmul.f32 %v9404_v58, %v1142_v35  ;;  %v9410_v33 = vld [vmem:[#allocation36_spill] sm:$0xff]  ;;  %v9092_v30 = vmov 23  }
 0x5a6   : > { %v6347_v2 = vadd.f32 %v1559_v0, %v1489_v3  ;;  %v1277_v0 = vsel %vm1276_vm4, %v9399_v46, %v6116_v48  ;;  %v6375_v3 = vrot.slane %v4436_v53, %v5390_v24  ;;  %v1167_v5 = vmul.f32 %v9404_v58, %v1143_v29  ;;  %v9406_v29 = vld [vmem:[#allocation45_spill] sm:$0xff] }
 0x5a7   : > { %v6384_v48 = vrot.slane %v4436_v53, %v5392_v25  ;;  %v1298_v19 = vmul.f32 %v6121_v23, %v1281_v31  ;;  %v1299_v9 = vmul.f32 %v6142_v22, %v1277_v0  ;;  %v1122_v16 = vsel %vm1120_vm2, %v6148_v56, %v6178_v39  ;;  %v9407_v31 = vld [vmem:[#allocation35_spill] sm:$0xff]  ;;  %v9408_v58 = vld [vmem:[#allocation37_spill] sm:$0xff] }
 0x5a8   : > { %9395 = vst [vmem:[#allocation49_spill] sm:$0xff] %v6347_v2  ;;  %v1126_v46 = vsel %vm1120_vm2, %v6178_v39, %v6148_v56  ;;  %v6400_v53 = vsel %vm1586_vm6, %v9406_v29, %v9405_v42  ;;  %v1097_v0 = vmul.f32 %v9403_v14, %v9407_v31  ;;  %v9409_v25 = vld [vmem:[#allocation23_spill] sm:$0xff]  ;;  %v9411_v56 = vld [vmem:[#allocation20_spill] sm:$0xff]  ;;  %v1354_v49 = vsel %vm657_vm8, %v6150_v15, %v6180_v18 }
 0x5a9   : > { %4779 = vset.pattern.permute.xlu1 %v9398_v26  ;;  %v6357_v43 = vpop.permute.xlu1 %1340  ;;  %v6377_v20 = vpop.permute.xlu0 %1570  ;;  %v1099_v24 = vmul.f32 %v9409_v25, %v9408_v58  ;;  %v1098_v34 = vmul.f32 %v9409_v25, %v9410_v33  ;;  %v1244_v39 = vmul.f32 %v9411_v56, %v1220_v59  ;;  %v1245_v63 = vmul.f32 %v9411_v56, %v1221_v6  ;;  %v9412_v58 = vld [vmem:[#allocation57_spill] sm:$0xff]  ;;  %v9413_v6 = vld [vmem:[#allocation54_spill] sm:$0xff]  ;;  %v9414_v2 = vld [vmem:[#allocation19_spill] sm:$0xff] }
 0x5aa   : > { %2263 = vperm.xlu1 %4779, %v9400_v57   ;;  %v1358_v14 = vsel %vm657_vm8, %v6180_v18, %v6150_v15  ;;  %v1174_v25 = vadd.f32 %v1166_v27, %v1096_v13  ;;  %v1175_v31 = vadd.f32 %v1167_v5, %v1097_v0  ;;  %v1145_v59 = vmul.f32 %v9392_v47, %v1122_v16 }
 0x5ab   : > { %v1665_v56 = vsel %vm1664_vm7, %v9413_v6, %v9412_v58  ;;  %v1669_v33 = vsel %vm1664_vm7, %v9412_v58, %v9413_v6  ;;  %v1322_v15 = vmul.f32 %v9414_v2, %v1298_v19  ;;  %v1323_v18 = vmul.f32 %v9414_v2, %v1299_v9 }
 0x5ac   : > { %v1376_v47 = vmul.f32 %v6170_v38, %v1354_v49  ;;  %v1200_v5 = vsel %vm1198_vm3, %v6220_v44, %v6259_v36  ;;  %v1204_v16 = vsel %vm1198_vm3, %v6259_v36, %v6220_v44  ;;  %v6446_v2 = vsel %vm1586_vm6, %v9405_v42, %v9406_v29  ;;  %v9416_v49 = vld [vmem:[#allocation17_spill] sm:$0xff] }
 0x5ad   : > { %v1349_v35 = vpop.permute.xlu1 %1348  ;;  %v1579_v13 = vpop.permute.xlu0 %1578  ;;  %v1252_v19 = vadd.f32 %v1244_v39, %v1174_v25  ;;  %v1253_v9 = vadd.f32 %v1245_v63, %v1175_v31  ;;  %v1169_v58 = vmul.f32 %v9416_v49, %v1145_v59  ;;  %v1435_v44 = vsel %vm703_vm9, %v6261_v4, %v6222_v7  ;;  %v9417_v25 = vld [vmem:[#allocation15_spill] sm:$0xff] }
 0x5ae   : > { %4780 = vset.pattern.permute.xlu1 %v9092_v30  ;;  %v1144_v30 = vmul.f32 %v9391_v55, %v1126_v46  ;;  %v1375_v55 = vmul.f32 %v6166_v37, %v1358_v14  ;;  %v9415_v46 = vld [vmem:[#allocation39_spill] sm:$0xff]  ;;  %v1431_v14 = vsel %vm703_vm9, %v6222_v7, %v6261_v4  ;;  %v6460_v42 = vmul.f32 %v6375_v3, %v1665_v56 }
 0x5af   : > { %2473 = vperm.xlu1 %4780, %v5998_v51   ;;  %v6463_v36 = vmul.f32 %v6384_v48, %v1669_v33  ;;  %v1223_v63 = vmul.f32 %v9401_v28, %v1200_v5  ;;  %v1330_v31 = vadd.f32 %v1322_v15, %v1252_v19  ;;  %v1331_v39 = vadd.f32 %v1323_v18, %v1253_v9 }
 0x5b0   : > { %v1168_v0 = vmul.f32 %v9416_v49, %v1144_v30  ;;  %v1222_v30 = vmul.f32 %v6086_v12, %v1204_v16  ;;  %v1399_v59 = vmul.f32 %v9417_v25, %v1375_v55  ;;  %v1400_v6 = vmul.f32 %v9417_v25, %v1376_v47  ;;  %v9418_v55 = vld [vmem:[#allocation10_spill] sm:$0xff] }
 0x5b1   : > { %v1418_v27 = vpop.permute.xlu1 %1417  ;;  %v1452_v49 = vmul.f32 %v6173_v8, %v1431_v14  ;;  %v1453_v7 = vmul.f32 %v6176_v54, %v1435_v44  ;;  %v1278_v4 = vsel %vm1276_vm4, %v6292_v41, %v6317_v11  ;;  %v1282_v12 = vsel %vm1276_vm4, %v6317_v11, %v6292_v41  ;;  %v1651_v28 = vpop.permute.xlu0 %1650 }
 0x5b2   : > { %v1176_v33 = vadd.f32 %v1168_v0, %v1098_v34  ;;  %v1177_v56 = vadd.f32 %v1169_v58, %v1099_v24  ;;  %v1509_v15 = vsel %vm1508_vm5, %v6294_v61, %v6319_v40  ;;  %v1513_v18 = vsel %vm1508_vm5, %v6319_v40, %v6294_v61  ;;  %v9419_v40 = vld [vmem:[#allocation7_spill] sm:$0xff] }
 0x5b3   : > { %2477 = vperm.xlu1 %4780, %v9415_v46   ;;  %v1246_v47 = vmul.f32 %v9418_v55, %v1222_v30  ;;  %v1247_v41 = vmul.f32 %v9418_v55, %v1223_v63  ;;  %v1355_v24 = vsel %vm657_vm8, %v6357_v43, %v1349_v35  ;;  %v1407_v11 = vadd.f32 %v1399_v59, %v1330_v31 }
 0x5b4   : > { %v1408_v5 = vadd.f32 %v1400_v6, %v1331_v39  ;;  %v1300_v16 = vmul.f32 %v6121_v23, %v1282_v12  ;;  %v1301_v61 = vmul.f32 %v6142_v22, %v1278_v4  ;;  %v1476_v19 = vmul.f32 %v9419_v40, %v1452_v49  ;;  %v9421_v39 = vld [vmem:[#allocation8_spill] sm:$0xff]  ;;  %v9423_v4 = vld [vmem:[#allocation25_spill] sm:$0xff] }
 0x5b5   : > { %v1426_v29 = vpop.permute.xlu1 %1425  ;;  %v1477_v9 = vmul.f32 %v9419_v40, %v1453_v7  ;;  %v1530_v0 = vmul.f32 %v6226_v45, %v1509_v15  ;;  %v1531_v58 = vmul.f32 %v6229_v21, %v1513_v18  ;;  %v1378_v44 = vmul.f32 %v6170_v38, %v1355_v24  ;;  %v1659_v31 = vpop.permute.xlu0 %1658  ;;  %v9422_v6 = vld [vmem:[#allocation16_spill] sm:$0xff] }
 0x5b6   : > { %v1436_v23 = vsel %vm703_vm9, %v1426_v29, %v1418_v27  ;;  %v1254_v22 = vadd.f32 %v1246_v47, %v1176_v33  ;;  %v1255_v30 = vadd.f32 %v1247_v41, %v1177_v56  ;;  %v1587_v63 = vsel %vm1586_vm6, %v6377_v20, %v1579_v13 }
 0x5b7   : > { %4782 = vset.pattern.permute.xlu1 %v9370_v1  ;;  %v1359_v1 = vsel %vm657_vm8, %v1349_v35, %v6357_v43  ;;  %v1432_v43 = vsel %vm703_vm9, %v1418_v27, %v1426_v29  ;;  %v9420_v35 = vmov 21   ;;  %v1324_v25 = vmul.f32 %v9421_v39, %v1300_v16 }
 0x5b8   : > { %2165 = vperm.xlu1 %4782, %v6266_v50   ;;  %v1377_v14 = vmul.f32 %v6166_v37, %v1359_v1  ;;  %v1591_v37 = vsel %vm1586_vm6, %v1579_v13, %v6377_v20  ;;  %v1325_v27 = vmul.f32 %v9421_v39, %v1301_v61  ;;  %v1554_v49 = vmul.f32 %v9422_v6, %v1530_v0  ;;  %v9424_v61 = vld [vmem:[#allocation27_spill] sm:$0xff]  ;;  %v9425_v0 = vld [vmem:[#allocation24_spill] sm:$0xff] }
 0x5b9   : > { %v1495_v34 = vpop.permute.xlu1 %1494  ;;  %v1555_v7 = vmul.f32 %v9422_v6, %v1531_v58  ;;  %v1454_v20 = vmul.f32 %v6173_v8, %v1432_v43  ;;  %v1455_v13 = vmul.f32 %v6176_v54, %v1436_v23  ;;  %v1402_v33 = vmul.f32 %v9423_v4, %v1378_v44  ;;  %v1661_v40 = vpop.permute.xlu0 %1660 }
 0x5ba   : > { %v1401_v12 = vmul.f32 %v9423_v4, %v1377_v14  ;;  %v1608_v56 = vmul.f32 %v6299_v32, %v1587_v63  ;;  %v1609_v15 = vmul.f32 %v6322_v52, %v1591_v37  ;;  %v1484_v18 = vadd.f32 %v1476_v19, %v1407_v11  ;;  %v9427_v63 = vld [vmem:[#allocation46_spill] sm:$0xff] }
 0x5bb   : > { %v1485_v55 = vadd.f32 %v1477_v9, %v1408_v5  ;;  %v9098_v24 = vmov 24   ;;  %v1332_v1 = vadd.f32 %v1324_v25, %v1254_v22  ;;  %v1333_v54 = vadd.f32 %v1325_v27, %v1255_v30 }
 0x5bc   : > { %4783 = vset.pattern.permute.xlu1 %v9420_v35  ;;  %v1670_v16 = vsel %vm1664_vm7, %v1659_v31, %v1651_v28  ;;  %v1562_v11 = vadd.f32 %v1554_v49, %v1484_v18  ;;  %v1632_v58 = vmul.f32 %v9425_v0, %v1608_v56  ;;  %v1633_v14 = vmul.f32 %v9425_v0, %v1609_v15  ;;  %v9429_v18 = vld [vmem:[#allocation26_spill] sm:$0xff] }
 0x5bd   : > { %2372 = vperm.xlu1 %4783, %v9400_v57   ;;  %v1503_v38 = vpop.permute.xlu1 %1502  ;;  %v1563_v5 = vadd.f32 %v1555_v7, %v1485_v55  ;;  %v1409_v19 = vadd.f32 %v1401_v12, %v1332_v1  ;;  %v1410_v9 = vadd.f32 %v1402_v33, %v1333_v54  ;;  %v1689_v43 = vmul.f32 %v6384_v48, %v1670_v16  ;;  %v9428_v12 = vld [vmem:[#allocation30_spill] sm:$0xff]  ;;  %v9433_v16 = vld [vmem:[#allocation29_spill] sm:$0xff] }
 0x5be   : > { %v1510_v29 = vsel %vm1508_vm5, %v1495_v34, %v1503_v38  ;;  %v1514_v59 = vsel %vm1508_vm5, %v1503_v38, %v1495_v34  ;;  %v1666_v34 = vsel %vm1664_vm7, %v1651_v28, %v1659_v31  ;;  %v9426_v28 = vld [vmem:[#allocation28_spill] sm:$0xff]  ;;  %v1667_v37 = vsel %vm1664_vm7, %v9427_v63, %v1661_v40 }
 0x5bf   : > { %v1532_v47 = vmul.f32 %v6226_v45, %v1510_v29  ;;  %v1533_v41 = vmul.f32 %v6229_v21, %v1514_v59  ;;  %v1478_v45 = vmul.f32 %v9424_v61, %v1454_v20  ;;  %v1479_v21 = vmul.f32 %v9424_v61, %v1455_v13 }
 0x5c0   : > { %v1688_v44 = vmul.f32 %v6375_v3, %v1666_v34  ;;  %v1671_v31 = vsel %vm1664_vm7, %v1661_v40, %v9427_v63  ;;  %v1614_v6 = vmul.f32 %v6299_v32, %v6400_v53  ;;  %v1615_v49 = vmul.f32 %v6322_v52, %v6446_v2  ;;  %v9431_v2 = vld [vmem:[#allocation42_spill] sm:$0xff]  ;;  %v9437_v63 = vld [vmem:[#allocation48_spill] sm:$0xff] }
 0x5c1   : > { %4784 = vset.pattern.permute.xlu1 %v9098_v24  ;;  %v1573_v8 = vpop.permute.xlu1 %1572  ;;  %v1556_v23 = vmul.f32 %v9426_v28, %v1532_v47  ;;  %v1557_v22 = vmul.f32 %v9426_v28, %v1533_v41  ;;  %v1486_v25 = vadd.f32 %v1478_v45, %v1409_v19  ;;  %v1487_v27 = vadd.f32 %v1479_v21, %v1410_v9  ;;  %v9434_v9 = vld [vmem:[#allocation31_spill] sm:$0xff] }
 0x5c2   : > { %2546 = vperm.xlu1 %4784, %v5998_v51   ;;  %v1640_v7 = vadd.f32 %v1632_v58, %v1562_v11  ;;  %v1641_v20 = vadd.f32 %v1633_v14, %v1563_v5  ;;  %v1710_v55 = vmul.f32 %v9429_v18, %v6460_v42  ;;  %v1711_v47 = vmul.f32 %v9429_v18, %v6463_v36  ;;  %v9432_v42 = vld [vmem:[#allocation33_spill] sm:$0xff] }
 0x5c3   : > { %v1564_v13 = vadd.f32 %v1556_v23, %v1486_v25  ;;  %v1565_v4 = vadd.f32 %v1557_v22, %v1487_v27  ;;  %v1691_v53 = vmul.f32 %v6384_v48, %v1671_v31  ;;  %v1712_v41 = vmul.f32 %v9431_v2, %v1688_v44  ;;  %v9436_v22 = vld [vmem:[#allocation49_spill] sm:$0xff]  ;;  %v9438_v31 = vld [vmem:[#allocation43_spill] sm:$0xff]  ;;  %v9439_v25 = vld [vmem:[#allocation44_spill] sm:$0xff] }
 0x5c4   : > { %v1636_v34 = vmul.f32 %v9432_v42, %v6354_v62  ;;  %v1637_v36 = vmul.f32 %v9432_v42, %v6360_v60  ;;  %v1638_v11 = vmul.f32 %v9433_v16, %v1614_v6  ;;  %v1639_v5 = vmul.f32 %v9433_v16, %v1615_v49  ;;  %v9435_v60 = vld [vmem:[#allocation14_spill] sm:$0xff] }
 0x5c5   : > { %v1581_v30 = vpop.permute.xlu1 %1580  ;;  %v1719_v45 = vadd.f32 %v1711_v47, %v1641_v20  ;;  %v1718_v40 = vadd.f32 %v1710_v55, %v1640_v7  ;;  %v1715_v58 = vmul.f32 %v9434_v9, %v1691_v53  ;;  %v9441_v7 = vld [vmem:[#allocation37_spill] sm:$0xff]  ;;  %vm2742_vm2 = vcmask 392192  }
 0x5c6   : > { %v1588_v38 = vsel %vm1586_vm6, %v1573_v8, %v1581_v30  ;;  %v1592_v39 = vsel %vm1586_vm6, %v1581_v30, %v1573_v8  ;;  %2550 = vperm.xlu1 %4784, %v9415_v46   ;;  %v1713_v8 = vmul.f32 %v9431_v2, %v1689_v43  ;;  %v1644_v23 = vadd.f32 %v1636_v34, %v6328_v10  ;;  %v4437_v20 = vld [vmem:[%s8982_s3 + $0x10] sm:$0xff] }
 0x5c7   : > { %v1610_v29 = vmul.f32 %v6299_v32, %v1588_v38  ;;  %v1611_v59 = vmul.f32 %v6322_v52, %v1592_v39  ;;  %v1690_v32 = vmul.f32 %v6375_v3, %v1667_v37  ;;  %v9430_v52 = vld [vmem:[#allocation13_spill] sm:$0xff]  ;;  %v1645_v30 = vadd.f32 %v1637_v36, %v9436_v22 }
 0x5c8   : > { %v1646_v37 = vadd.f32 %v1638_v11, %v9437_v63  ;;  %v1647_v27 = vadd.f32 %v1639_v5, %v9439_v25  ;;  %v9458_v63 = vld [vmem:[#allocation35_spill] sm:$0xff]  ;;  %v9461_v25 = vmov 0  }
 0x5c9   : > { %v1634_v33 = vmul.f32 %v9428_v12, %v1610_v29  ;;  %v1635_v56 = vmul.f32 %v9428_v12, %v1611_v59  ;;  %v1655_v15 = vpop.permute.xlu1 %1654  ;;  %v1714_v0 = vmul.f32 %v9434_v9, %v1690_v32  ;;  %v9440_v29 = vld [vmem:[#allocation36_spill] sm:$0xff]  ;;  %v1723_v59 = vadd.f32 %v1715_v58, %v1645_v30 }
 0x5ca   : > { %1982 = vrot.lane.b32.xlu1 %v9430_v52, %s5011_s13  ;;  %v9096_v9 = vmov 25   ;;  %v9452_v58 = vld [vmem:[#allocation40_spill] sm:$0xff] }
 0x5cb   : > { %v1642_v1 = vadd.f32 %v1634_v33, %v1564_v13  ;;  %v1643_v54 = vadd.f32 %v1635_v56, %v1565_v4  ;;  %4785 = vset.pattern.permute.xlu1 %v9398_v26  ;;  %v9442_v13 = vmov 0.0   ;;  %v4438_v4 = vld [vmem:[%s8982_s3 + $0x18] sm:$0xff] }
 0x5cd   : > { %v1663_v61 = vpop.permute.xlu1 %1662  ;;  %v1721_v21 = vadd.f32 %v1713_v8, %v1643_v54  ;;  %v1720_v19 = vadd.f32 %v1712_v41, %v1642_v1 }
 0x5ce   : > { %v1668_v26 = vsel %vm1664_vm7, %v1655_v15, %v1663_v61  ;;  %v1672_v62 = vsel %vm1664_vm7, %v1663_v61, %v1655_v15  ;;  %1994 = vrot.lane.b32.xlu1 %v9435_v60, %s5011_s13 }
 0x5cf   : > { %v1692_v14 = vmul.f32 %v6375_v3, %v1668_v26  ;;  %v1693_v44 = vmul.f32 %v6384_v48, %v1672_v62  ;;  %v4540_v43 = vpack.c.bf16 %v1721_v21, %v1719_v45  ;;  %v4542_v28 = vpack.c.bf16 %v1720_v19, %v1718_v40  ;;  %v9451_v19 = vld [vmem:[#allocation41_spill] sm:$0xff] }
 0x5d0   : > { %v1722_v3 = vadd.f32 %v1714_v0, %v1644_v23  ;;  %v9450_v40 = vmov 23   ;;  %v9456_v23 = vld [vmem:[#allocation34_spill] sm:$0xff] }
 0x5d1   : > { %v1716_v38 = vmul.f32 %v9438_v31, %v1692_v14  ;;  %v1717_v39 = vmul.f32 %v9438_v31, %v1693_v44  ;;  %4541 = vmatprep.subr.bf16.mxu0 %v4540_v43  ;;  %v9454_v14 = vld [vmem:[#allocation11_spill] sm:$0xff]  ;;  %v6693_v43 = vpop.permute.xlu0 %1942  ;;  %v9094_v31 = vmov 26  }
 0x5d2   : > { %1978 = vrot.lane.b32.xlu1 %v9440_v29, %s5011_s13  ;;  %4543 = vmatpush1.bf16.msra.mxu0 %v4542_v28 }
 0x5d3   : > { %v1724_v48 = vadd.f32 %v1716_v38, %v1646_v37  ;;  %v1725_v6 = vadd.f32 %v1717_v39, %v1647_v27 }
 0x5d5   : > { %v4544_v10 = vpack.c.bf16 %v1725_v6, %v1723_v59  ;;  %v4546_v49 = vpack.c.bf16 %v1724_v48, %v1722_v3  ;;  %v6700_v22 = vpop.permute.xlu0 %2039 }
 0x5d6   : > { %1990 = vrot.lane.b32.xlu1 %v9441_v7, %s5011_s13  ;;  %9457 = vst [vmem:[#allocation9_spill] sm:$0xff] %v6700_v22 }
 0x5d7   : > { %4545 = vmatprep.subr.bf16.mxu0 %v4544_v10 }
 0x5d8   : > { %4547 = vmatpush1.bf16.msra.mxu0 %v4546_v49 }
 0x5d9   : > { %v6712_v38 = vpop.permute.xlu0 %2047 }
 0x5da   : > { %2088 = vrot.lane.b32.xlu1 %v9440_v29, %s5013_s20 }
 0x5db   : > { %4439 = vmatmul.mubr.msk.f32.vlgmr.msra.gmra.mrb[4].mxu0 %vm1729_vm10, %v4437_v20 }
 0x5dc   : > { %1806 = vmatprep.mubr.f32.mxu0 %v9442_v13 }
 0x5de   : > { %2100 = vrot.lane.b32.xlu1 %v9441_v7, %s5013_s20  ;;  %v6618_v12 = vpop.permute.xlu1 %1892 }
 0x5df   : > { %4440 = vmatmul.mubr.msk.f32.gmra.mrb[6].mxu0 %vm1729_vm10, %v4438_v4 }
 0x5e2   : > { %2198 = vrot.lane.b32.xlu1 %v9440_v29, %s5015_s24  ;;  %v6620_v33 = vpop.permute.xlu1 %1897 }
 0x5e6   : > { %2210 = vrot.lane.b32.xlu1 %v9441_v7, %s5015_s24 }
 0x5e7   : > { %v6622_v56 = vpop.permute.xlu1 %1932 }
 0x5e8   : > { %9443 = vst [vmem:[#allocation32_spill] sm:$0xff] %v6622_v56 }
 0x5eb   : > { %v6624_v15 = vpop.permute.xlu1 %1937 }
 0x5ec   : > { %9444 = vst [vmem:[#allocation52_spill] sm:$0xff] %v6624_v15 }
 0x5f0   : > { %v6626_v18 = vpop.permute.xlu1 %2035 }
 0x5f1   : > { %9445 = vst [vmem:[#allocation53_spill] sm:$0xff] %v6626_v18 }
 0x5f5   : > { %v6630_v47 = vpop.permute.xlu1 %2145 }
 0x5f6   : > { %9446 = vst [vmem:[#allocation51_spill] sm:$0xff] %v6630_v47 }
 0x5f9   : > { %v6650_v16 = vpop.permute.xlu1 %2149 }
 0x5fa   : > { %9447 = vst [vmem:[#allocation50_spill] sm:$0xff] %v6650_v16 }
 0x5fe   : > { %v6652_v5 = vpop.permute.xlu1 %1947 }
 0x603   : > { %v6654_v61 = vpop.permute.xlu1 %2043 }
 0x608   : > { %v6656_v45 = vpop.permute.xlu1 %2255 }
 0x609   : > { %9448 = vst [vmem:[#allocation55_spill] sm:$0xff] %v6656_v45 }
 0x60c   : > { %v6659_v21 = vpop.permute.xlu1 %2259 }
 0x60d   : > { %9449 = vst [vmem:[#allocation38_spill] sm:$0xff] %v6659_v21 }
 0x611   : > { %v6665_v0 = vpop.permute.xlu1 %2157 }
 0x616   : > { %v6671_v26 = vpop.permute.xlu1 %2364 }
 0x617   : > { %9453 = vst [vmem:[#allocation56_spill] sm:$0xff] %v6671_v26 }
 0x61b   : > { %v6678_v62 = vpop.permute.xlu1 %1952 }
 0x61f   : > { %v6687_v44 = vpop.permute.xlu1 %1957 }
 0x624   : > { %v6695_v28 = vpop.permute.xlu1 %2055 }
 0x629   : > { %v6702_v30 = vpop.permute.xlu1 %2263 }
 0x62e   : > { %v6708_v37 = vpop.permute.xlu1 %2473 }
 0x62f   : > { %9459 = vst [vmem:[#allocation18_spill] sm:$0xff] %v6708_v37 }
 0x632   : > { %v6717_v39 = vpop.permute.xlu1 %2477 }
 0x633   : > { %9460 = vst [vmem:[#allocation47_spill] sm:$0xff] %v6717_v39 }
 0x6ae   : > { %v6628_v55 = vpop.f32.mrb[4].mxu0 }
 0x6af   : > { %v1830_v32 = vmul.f32 %v6628_v55, %v6628_v55  ;;  %v6634_v53 = vpop.f32.mrb[5].mxu0 }
 0x6b0   : > { %v1822_v2 = vadd.f32 %v6634_v53, %v6628_v55  ;;  %v1831_v41 = vmul.f32 %v6634_v53, %v6634_v53 }
 0x6b2   : > { %1823 = vadd.xlane.f32.xlu0 %v1822_v2  ;;  %v6640_v8 = vpop.f32.mrb[6].mxu0  ;;  %v1834_v1 = vadd.f32 %v1831_v41, %v1830_v32 }
 0x6b3   : > { %v1832_v54 = vmul.f32 %v6640_v8, %v6640_v8  ;;  %v6644_v42 = vpop.f32.mrb[7].mxu0 }
 0x6b4   : > { %v1825_v34 = vadd.f32 %v6644_v42, %v6640_v8  ;;  %v1833_v36 = vmul.f32 %v6644_v42, %v6644_v42 }
 0x6b6   : > { %1835 = vadd.xlane.f32.xlu0 %v1834_v1  ;;  %1826 = vadd.xlane.f32.xlu1 %v1825_v34  ;;  %v1837_v11 = vadd.f32 %v1833_v36, %v1832_v54 }
 0x6ba   : > { %1838 = vadd.xlane.f32.xlu0 %v1837_v11 }
 0x6c7   : > { %2275 = vperm.xlu1 %4785, %v6266_v50  }
 0x6cb   : > { %4786 = vset.pattern.permute.xlu1 %v9450_v40 }
 0x6cc   : > { %2481 = vperm.xlu1 %4786, %v9400_v57  }
 0x6d0   : > { %2271 = vperm.xlu0 %4781, %v9451_v19   ;;  %4789 = vset.pattern.permute.xlu1 %v9096_v9 }
 0x6d1   : > { %2619 = vperm.xlu1 %4789, %v5998_v51  }
 0x6d4   : > { %4787 = vset.pattern.permute.xlu0 %v9450_v40 }
 0x6d5   : > { %2485 = vperm.xlu0 %4787, %v9452_v58   ;;  %2623 = vperm.xlu1 %4789, %v9415_v46  }
 0x6d9   : > { %4788 = vset.pattern.permute.xlu0 %v9420_v35  ;;  %2092 = vrot.lane.b32.xlu1 %v9430_v52, %s5013_s20 }
 0x6da   : > { %2368 = vperm.xlu0 %4788, %v9415_v46   ;;  %4790 = vset.pattern.permute.xlu1 %v9420_v35  ;;  %v9455_v35 = vld [vmem:[#allocation12_spill] sm:$0xff] }
 0x6dd   : > { %2104 = vrot.lane.b32.xlu1 %v9435_v60, %s5013_s20 }
 0x6de   : > { %2376 = vperm.xlu0 %4788, %v9452_v58  }
 0x6e1   : > { %2308 = vrot.lane.b32.xlu1 %v9440_v29, %s4993_s22 }
 0x6e2   : > { %2090 = vrot.lane.b32.xlu0 %v9454_v14, %s5013_s20 }
 0x6e5   : > { %2320 = vrot.lane.b32.xlu1 %v9441_v7, %s4993_s22 }
 0x6e6   : > { %2102 = vrot.lane.b32.xlu0 %v9455_v35, %s5013_s20 }
 0x6e9   : > { %2384 = vperm.xlu1 %4790, %v6266_v50  }
 0x6ea   : > { %2306 = vrot.lane.b32.xlu0 %v9456_v23, %s4993_s22 }
 0x6ed   : > { %4791 = vset.pattern.permute.xlu1 %v9098_v24 }
 0x6ee   : > { %2318 = vrot.lane.b32.xlu0 %v9458_v63, %s4993_s22  ;;  %2554 = vperm.xlu1 %4791, %v9400_v57   ;;  %v6721_v57 = vpop.permute.xlu0 %1976 }
 0x6f2   : > { %2380 = vperm.xlu0 %4788, %v9451_v19   ;;  %4792 = vset.pattern.permute.xlu1 %v9094_v31  ;;  %v6732_v27 = vpop.permute.xlu0 %1988 }
 0x6f3   : > { %2692 = vperm.xlu1 %4792, %v5998_v51   ;;  %v6728_v51 = vpop.permute.xlu1 %2165 }
 0x6f4   : > { %9462 = vst [vmem:[#allocation45_spill] sm:$0xff] %v6728_v51 }
 0x6f6   : > { %2200 = vrot.lane.b32.xlu0 %v9454_v14, %s5015_s24  ;;  %v6742_v3 = vpop.permute.xlu0 %2051 }
 0x6f7   : > { %2696 = vperm.xlu1 %4792, %v9415_v46   ;;  %4793 = vset.pattern.permute.xlu0 %v9461_v25  ;;  %v6738_v46 = vpop.permute.xlu1 %2372 }
 0x6f8   : > { %9463 = vst [vmem:[#allocation23_spill] sm:$0xff] %v6738_v46 }
 0x6fa   : > { %2212 = vrot.lane.b32.xlu0 %v9455_v35, %s5015_s24  ;;  %v6748_v59 = vpop.permute.xlu0 %2153 }
 0x6fb   : > { %2202 = vrot.lane.b32.xlu1 %v9430_v52, %s5015_s24  ;;  %v6746_v48 = vpop.permute.xlu1 %2546 }
 0x6fc   : > { %4796 = vset.pattern.permute.xlu1 %v9461_v25  ;;  %9464 = vst [vmem:[#allocation20_spill] sm:$0xff] %v6746_v48 }
 0x6fe   : > { %2415 = vrot.lane.b32.xlu0 %v9456_v23, %s4990_s19  ;;  %v6752_v10 = vpop.permute.xlu0 %2086 }
 0x6ff   : > { %2214 = vrot.lane.b32.xlu1 %v9435_v60, %s5015_s24  ;;  %v6750_v6 = vpop.permute.xlu1 %2550 }
 0x700   : > { %9465 = vst [vmem:[#allocation57_spill] sm:$0xff] %v6750_v6 }
 0x702   : > { %2427 = vrot.lane.b32.xlu0 %v9458_v63, %s4990_s19  ;;  %v6756_v20 = vpop.permute.xlu0 %2098 }
 0x703   : > { %2417 = vrot.lane.b32.xlu1 %v9440_v29, %s4990_s19  ;;  %v6754_v49 = vpop.permute.xlu1 %1982 }
 0x706   : > { %v6760_v32 = vpop.permute.xlu0 %2161 }
 0x707   : > { %2429 = vrot.lane.b32.xlu1 %v9441_v7, %s4990_s19  ;;  %v6758_v4 = vpop.permute.xlu1 %1994  ;;  %9466 = vst [vmem:[#allocation54_spill] sm:$0xff] %v6760_v32 }
 0x70a   : > { %v6764_v41 = vpop.permute.xlu0 %2267 }
 0x70b   : > { %v6762_v2 = vpop.permute.xlu1 %1978  ;;  %9467 = vst [vmem:[#allocation19_spill] sm:$0xff] %v6764_v41 }
 0x70e   : > { %v6768_v54 = vpop.permute.xlu0 %1980 }
 0x70f   : > { %v6766_v1 = vpop.permute.xlu1 %1990 }
 0x712   : > { %v6772_v36 = vpop.permute.xlu0 %1992 }
 0x713   : > { %v6770_v34 = vpop.permute.xlu1 %2088 }
 0x716   : > { %v6776_v19 = vpop.permute.xlu0 %2196 }
 0x717   : > { %v6774_v11 = vpop.permute.xlu1 %2100 }
 0x71a   : > { %v6780_v31 = vpop.permute.xlu0 %2208 }
 0x71b   : > { %v6778_v58 = vpop.permute.xlu1 %2198 }
 0x71f   : > { %v6782_v9 = vpop.permute.xlu1 %2210 }
 0x73f   : > { %v1824_v24 = vpop.xlane.xlu0 %1823 }
 0x740   : > { %v1828_v13 = vmul.f32 0.00390625, %v1824_v24  ;;  %v4441_v24 = vld [vmem:[%s8984_s5 + $0x60] sm:$0xff] }
 0x742   : > { %v1842_v16 = vmul.f32 %v1828_v13, %v1828_v13 }
 0x743   : > { %v1836_v6 = vpop.xlane.xlu0 %1835  ;;  %v1827_v39 = vpop.xlane.xlu1 %1826 }
 0x744   : > { %v1840_v21 = vmul.f32 0.00390625, %v1836_v6  ;;  %v1829_v37 = vmul.f32 0.00390625, %v1827_v39  ;;  %v6807_v39 = vld [vmem:[%s8981_s2 + $0x18] sm:$0xff] }
 0x746   : > { %v1844_v26 = vsub.f32 %v1840_v21, %v1842_v16  ;;  %v1843_v22 = vmul.f32 %v1829_v37, %v1829_v37  ;;  %v4442_v16 = vld [vmem:[%s8984_s5 + $0x68] sm:$0xff] }
 0x747   : > { %v1839_v45 = vpop.xlane.xlu0 %1838 }
 0x748   : > { %v1846_v47 = vmax.f32 %v1844_v26, 0.0  ;;  %v1841_v48 = vmul.f32 0.00390625, %v1839_v45 }
 0x74a   : > { %v1848_v18 = vadd.f32 1e-05, %v1846_v47  ;;  %v1845_v15 = vsub.f32 %v1841_v48, %v1843_v22  ;;  %v9468_v22 = vmov 24   ;;  %v9471_v48 = vmov 26  }
 0x74c   : > { %4884 = vrsqrt.f32 %v1848_v18  ;;  %v1847_v56 = vmax.f32 %v1845_v15, 0.0  ;;  %v4443_v15 = vld [vmem:[%s8984_s5 + $0x70] sm:$0xff] }
 0x74e   : > { %v1849_v32 = vadd.f32 1e-05, %v1847_v56  ;;  %v6797_v56 = vld [vmem:[%s8981_s2 + $0x20] sm:$0xff] }
 0x750   : > { %4886 = vrsqrt.f32 %v1849_v32 }
 0x756   : > { %v4885_v46 = vpop.eup %4884 }
 0x757   : > { %v1852_v51 = vmul.f32 %v4885_v46, %v4441_v24  ;;  %v4903_v46 = vld [vmem:[%s8981_s2 + $0x10] sm:$0xff] }
 0x759   : > { %1860 = vperm.xlu0 %4793, %v1852_v51   ;;  %v1854_v45 = vmul.f32 %v1852_v51, %v1828_v13  ;;  %v4444_v13 = vld [vmem:[%s8984_s5 + $0x78] sm:$0xff] }
 0x75a   : > { %v4887_v21 = vpop.eup %4886 }
 0x75b   : > { %v1853_v26 = vmul.f32 %v4887_v21, %v4442_v16  ;;  %v1856_v18 = vsub.f32 %v4443_v15, %v1854_v45  ;;  %v6841_v16 = vpop.permute.xlu0 %2271 }
 0x75c   : > { %9475 = vst [vmem:[#allocation7_spill] sm:$0xff] %v6841_v16 }
 0x75d   : > { %4794 = vset.pattern.permute.xlu0 %v9450_v40  ;;  %1865 = vperm.xlu1 %4796, %v1853_v26   ;;  %v1855_v47 = vmul.f32 %v1853_v26, %v1829_v37  ;;  %v9469_v37 = vmov 25  }
 0x75e   : > { %2489 = vperm.xlu0 %4794, %v6797_v56  }
 0x75f   : > { %v1857_v51 = vsub.f32 %v4444_v13, %v1855_v47  ;;  %v6843_v21 = vpop.permute.xlu0 %2485 }
 0x760   : > { %9476 = vst [vmem:[#allocation8_spill] sm:$0xff] %v6843_v21 }
 0x761   : > { %1874 = vperm.xlu1 %4796, %v1856_v18  }
 0x762   : > { %4795 = vset.pattern.permute.xlu0 %v9468_v22 }
 0x763   : > { %2558 = vperm.xlu0 %4795, %v6807_v39   ;;  %v6847_v45 = vpop.permute.xlu0 %2368 }
 0x764   : > { %9478 = vst [vmem:[#allocation25_spill] sm:$0xff] %v6847_v45 }
 0x765   : > { %1879 = vperm.xlu1 %4796, %v1857_v51  }
 0x767   : > { %2322 = vrot.lane.b32.xlu0 %v9455_v35, %s4993_s22  ;;  %v6851_v18 = vpop.permute.xlu0 %2376 }
 0x768   : > { %9479 = vst [vmem:[#allocation27_spill] sm:$0xff] %v6851_v18 }
 0x769   : > { %4797 = vset.pattern.permute.xlu1 %v9450_v40  ;;  %v6828_v40 = vpop.permute.xlu1 %2275 }
 0x76a   : > { %2493 = vperm.xlu1 %4797, %v6266_v50   ;;  %9470 = vst [vmem:[#allocation39_spill] sm:$0xff] %v6828_v40 }
 0x76b   : > { %2562 = vperm.xlu0 %4795, %v6797_v56   ;;  %v6855_v13 = vpop.permute.xlu0 %2090 }
 0x76c   : > { %9481 = vst [vmem:[#allocation28_spill] sm:$0xff] %v6855_v13 }
 0x76d   : > { %v6832_v6 = vpop.permute.xlu1 %2481 }
 0x76e   : > { %4798 = vset.pattern.permute.xlu1 %v9469_v37  ;;  %9472 = vst [vmem:[#allocation17_spill] sm:$0xff] %v6832_v6 }
 0x76f   : > { %4799 = vset.pattern.permute.xlu0 %v9469_v37  ;;  %2627 = vperm.xlu1 %4798, %v4903_v46   ;;  %v6859_v51 = vpop.permute.xlu0 %2102 }
 0x770   : > { %2631 = vperm.xlu0 %4799, %v6807_v39   ;;  %9483 = vst [vmem:[#allocation30_spill] sm:$0xff] %v6859_v51 }
 0x771   : > { %v6837_v32 = vpop.permute.xlu1 %2619 }
 0x772   : > { %9473 = vst [vmem:[#allocation15_spill] sm:$0xff] %v6837_v32 }
 0x773   : > { %2310 = vrot.lane.b32.xlu1 %v9454_v14, %s4993_s22 }
 0x774   : > { %4800 = vset.pattern.permute.xlu1 %v9468_v22 }
 0x775   : > { %v6839_v24 = vpop.permute.xlu1 %2623 }
 0x776   : > { %9474 = vst [vmem:[#allocation10_spill] sm:$0xff] %v6839_v24 }
 0x777   : > { %2312 = vrot.lane.b32.xlu1 %v9430_v52, %s4993_s22 }
 0x779   : > { %v6845_v26 = vpop.permute.xlu1 %2092 }
 0x77a   : > { %9477 = vst [vmem:[#allocation16_spill] sm:$0xff] %v6845_v26 }
 0x77b   : > { %2324 = vrot.lane.b32.xlu1 %v9435_v60, %s4993_s22 }
 0x77d   : > { %v6849_v15 = vpop.permute.xlu1 %2104 }
 0x77f   : > { %2566 = vperm.xlu1 %4800, %v6266_v50  }
 0x781   : > { %v6853_v47 = vpop.permute.xlu1 %2308 }
 0x782   : > { %9480 = vst [vmem:[#allocation24_spill] sm:$0xff] %v6853_v47 }
 0x783   : > { %4801 = vset.pattern.permute.xlu1 %v9471_v48 }
 0x784   : > { %2700 = vperm.xlu1 %4801, %v4903_v46   ;;  %v6863_v46 = vpop.permute.xlu0 %2306 }
 0x785   : > { %v6857_v22 = vpop.permute.xlu1 %2320  ;;  %9485 = vst [vmem:[#allocation42_spill] sm:$0xff] %v6863_v46 }
 0x786   : > { %9482 = vst [vmem:[#allocation46_spill] sm:$0xff] %v6857_v22 }
 0x788   : > { %2419 = vrot.lane.b32.xlu1 %v9454_v14, %s4990_s19  ;;  %v6867_v32 = vpop.permute.xlu0 %2318 }
 0x789   : > { %4803 = vset.pattern.permute.xlu1 %v9469_v37  ;;  %v6861_v37 = vpop.permute.xlu1 %2384  ;;  %9487 = vst [vmem:[#allocation29_spill] sm:$0xff] %v6867_v32 }
 0x78a   : > { %9484 = vst [vmem:[#allocation26_spill] sm:$0xff] %v6861_v37 }
 0x78c   : > { %v6871_v21 = vpop.permute.xlu0 %2380 }
 0x78d   : > { %v6865_v24 = vpop.permute.xlu1 %2554  ;;  %9489 = vst [vmem:[#allocation49_spill] sm:$0xff] %v6871_v21 }
 0x78e   : > { %9486 = vst [vmem:[#allocation33_spill] sm:$0xff] %v6865_v24 }
 0x790   : > { %v6875_v16 = vpop.permute.xlu0 %2200 }
 0x791   : > { %v6869_v45 = vpop.permute.xlu1 %2692  ;;  %9491 = vst [vmem:[#allocation43_spill] sm:$0xff] %v6875_v16 }
 0x792   : > { %9488 = vst [vmem:[#allocation31_spill] sm:$0xff] %v6869_v45 }
 0x794   : > { %v6879_v18 = vpop.permute.xlu0 %2212 }
 0x795   : > { %v6873_v40 = vpop.permute.xlu1 %2696  ;;  %9493 = vst [vmem:[#allocation41_spill] sm:$0xff] %v6879_v18 }
 0x796   : > { %9490 = vst [vmem:[#allocation48_spill] sm:$0xff] %v6873_v40 }
 0x798   : > { %v6883_v37 = vpop.permute.xlu0 %2415 }
 0x799   : > { %v6877_v6 = vpop.permute.xlu1 %2202  ;;  %9495 = vst [vmem:[#allocation58_spill] sm:$0xff] %v6883_v37 }
 0x79a   : > { %9492 = vst [vmem:[#allocation44_spill] sm:$0xff] %v6877_v6 }
 0x79c   : > { %v6887_v24 = vpop.permute.xlu0 %2427 }
 0x79d   : > { %v6881_v51 = vpop.permute.xlu1 %2214  ;;  %9497 = vst [vmem:[#allocation60_spill] sm:$0xff] %v6887_v24 }
 0x79e   : > { %9494 = vst [vmem:[#allocation40_spill] sm:$0xff] %v6881_v51 }
 0x7a1   : > { %v6885_v13 = vpop.permute.xlu1 %2417 }
 0x7a2   : > { %9496 = vst [vmem:[#allocation59_spill] sm:$0xff] %v6885_v13 }
 0x7a5   : > { %v6889_v32 = vpop.permute.xlu1 %2429 }
 0x7a6   : > { %9498 = vst [vmem:[#allocation61_spill] sm:$0xff] %v6889_v32 }
 0x7d8   : > { %v1861_v45 = vpop.permute.xlu0 %1860 }
 0x7d9   : > { %v1868_v40 = vmul.f32 %v1861_v45, %v6628_v55  ;;  %v1869_v16 = vmul.f32 %v1861_v45, %v6634_v53  ;;  %v6997_v45 = vld [vmem:[%s8981_s2 + $0x8] sm:$0xff] }
 0x7da   : > { %9505 = vst [vmem:[#allocation68_spill] sm:$0xff] %v6997_v45 }
 0x7dc   : > { %v1866_v21 = vpop.permute.xlu1 %1865 }
 0x7dd   : > { %v1870_v18 = vmul.f32 %v1866_v21, %v6640_v8  ;;  %v1871_v55 = vmul.f32 %v1866_v21, %v6644_v42 }
 0x7e0   : > { %v1875_v46 = vpop.permute.xlu1 %1874 }
 0x7e1   : > { %v1882_v6 = vadd.f32 %v1875_v46, %v1868_v40  ;;  %v1883_v47 = vadd.f32 %v1875_v46, %v1869_v16  ;;  %v9146_v16 = vmov 31   ;;  %v4447_v46 = vld [vmem:[%s8985_s6 + $0x22] ss:$8 sm:$0x3] }
 0x7e3   : > { %vm1886_vm11 = vcmp.ge.f32.partialorder %v1882_v6, 0.0  ;;  %v1900_v51 = vmul.f32 %v6618_v12, %v1882_v6  ;;  %v1901_v13 = vmul.f32 %v6618_v12, %v1883_v47  ;;  %vm1887_vm12 = vcmp.ge.f32.partialorder %v1883_v47, 0.0 }
 0x7e4   : > { %v1880_v37 = vpop.permute.xlu1 %1879 }
 0x7e5   : > { %v6896_v24 = vsel %vm1886_vm11, %v1882_v6, %v1900_v51  ;;  %v1884_v32 = vadd.f32 %v1880_v37, %v1870_v18  ;;  %v6903_v53 = vsel %vm1887_vm12, %v1883_v47, %v1901_v13  ;;  %v1885_v8 = vadd.f32 %v1880_v37, %v1871_v55  ;;  %v7003_v18 = vld [vmem:[%s8981_s2 + $0x10] sm:$0xff]  ;;  %v7014_v51 = vld [vmem:[%s8981_s2 + $0x20] sm:$0xff] }
 0x7e6   : > { %9499 = vst [vmem:[#allocation62_spill] sm:$0xff] %v6896_v24  ;;  %2082 = vrot.lane.b32.xlu0 %v6896_v24, %s5013_s20  ;;  %1972 = vrot.lane.b32.xlu1 %v6896_v24, %s5011_s13  ;;  %9500 = vst [vmem:[#allocation63_spill] sm:$0xff] %v6903_v53  ;;  %v9144_v13 = vmov 27   ;;  %v4448_v55 = vld [vmem:[%s8985_s6 + $0x23] ss:$8 sm:$0x3] }
 0x7e7   : > { %v1902_v40 = vmul.f32 %v6620_v33, %v1884_v32  ;;  %vm1888_vm13 = vcmp.ge.f32.partialorder %v1884_v32, 0.0  ;;  %v1903_v12 = vmul.f32 %v6620_v33, %v1885_v8  ;;  %vm1889_vm14 = vcmp.ge.f32.partialorder %v1885_v8, 0.0  ;;  %v6963_v33 = vld [vmem:[%s8981_s2 + $0x18] sm:$0xff]  ;;  %9507 = vst [vmem:[#allocation70_spill] sm:$0xff] %v7014_v51 }
 0x7e9   : > { %v6911_v6 = vsel %vm1888_vm13, %v1884_v32, %v1902_v40  ;;  %v6917_v42 = vsel %vm1889_vm14, %v1885_v8, %v1903_v12  ;;  %v4463_v32 = vld [vmem:[%s8984_s5 + $0xb0] sm:$0xff]  ;;  %v6992_v21 = vpop.permute.xlu1 %2493  ;;  %v9142_v8 = vmov 28   ;;  %vm4047_vm13 = vcmp.lt.s32.totalorder %v5380_v17, 126  ;;  %v4052_v17 = vld [vmem:[%s8983_s4] sm:$0xff] }
 0x7ea   : > { %2094 = vrot.lane.b32.xlu0 %v6903_v53, %s5013_s20  ;;  %1984 = vrot.lane.b32.xlu1 %v6903_v53, %s5011_s13  ;;  %9501 = vst [vmem:[#allocation64_spill] sm:$0xff] %v6911_v6  ;;  %9502 = vst [vmem:[#allocation65_spill] sm:$0xff] %v6917_v42  ;;  %v4452_v40 = vld [vmem:[%s8985_s6 + $0x30] ss:$8 sm:$0x3] }
 0x7eb   : > { %9504 = vst [vmem:[#allocation67_spill] sm:$0xff] %v6992_v21  ;;  %v4453_v12 = vld [vmem:[%s8985_s6 + $0x31] ss:$8 sm:$0x3] }
 0x7ee   : > { %1974 = vrot.lane.b32.xlu0 %v6911_v6, %s5011_s13  ;;  %2192 = vrot.lane.b32.xlu1 %v6896_v24, %s5015_s24  ;;  %v7005_v47 = vpop.permute.xlu1 %2627 }
 0x7ef   : > { %9506 = vst [vmem:[#allocation69_spill] sm:$0xff] %v7005_v47  ;;  %v4449_v47 = vld [vmem:[%s8985_s6 + $0x24] ss:$8 sm:$0x3] }
 0x7f2   : > { %1986 = vrot.lane.b32.xlu0 %v6917_v42, %s5011_s13  ;;  %2204 = vrot.lane.b32.xlu1 %v6903_v53, %s5015_s24  ;;  %v7017_v37 = vpop.permute.xlu1 %2310 }
 0x7f3   : > { %9508 = vst [vmem:[#allocation71_spill] sm:$0xff] %v7017_v37  ;;  %v9517_v37 = vmov 31  }
 0x7f6   : > { %2431 = vrot.lane.b32.xlu0 %v9455_v35, %s4990_s19  ;;  %2302 = vrot.lane.b32.xlu1 %v6896_v24, %s4993_s22 }
 0x7fa   : > { %2194 = vrot.lane.b32.xlu0 %v6911_v6, %s5015_s24  ;;  %2314 = vrot.lane.b32.xlu1 %v6903_v53, %s4993_s22 }
 0x7fe   : > { %2206 = vrot.lane.b32.xlu0 %v6917_v42, %s5015_s24  ;;  %2411 = vrot.lane.b32.xlu1 %v6896_v24, %s4990_s19 }
 0x802   : > { %2304 = vrot.lane.b32.xlu0 %v6911_v6, %s4993_s22  ;;  %2423 = vrot.lane.b32.xlu1 %v6903_v53, %s4990_s19 }
 0x806   : > { %2316 = vrot.lane.b32.xlu0 %v6917_v42, %s4993_s22  ;;  %2084 = vrot.lane.b32.xlu1 %v6911_v6, %s5013_s20 }
 0x80a   : > { %2413 = vrot.lane.b32.xlu0 %v6911_v6, %s4990_s19  ;;  %2096 = vrot.lane.b32.xlu1 %v6917_v42, %s5013_s20  ;;  %v4454_v6 = vld [vmem:[%s8985_s6 + $0x32] ss:$8 sm:$0x3]  ;;  %s4497_s20 = sshll.u32 %s5100_s9, 8  ;;  %s8938_s9 = scalar_lea.sflag [#allocation5], %s296_s25 }
 0x80e   : > { %2425 = vrot.lane.b32.xlu0 %v6917_v42, %s4990_s19  ;;  %2421 = vrot.lane.b32.xlu1 %v9430_v52, %s4990_s19 }
 0x812   : > { %2635 = vperm.xlu0 %4799, %v6797_v56   ;;  %2433 = vrot.lane.b32.xlu1 %v9435_v60, %s4990_s19 }
 0x816   : > { %4802 = vset.pattern.permute.xlu0 %v9471_v48  ;;  %2639 = vperm.xlu1 %4803, %v6266_v50  }
 0x817   : > { %2704 = vperm.xlu0 %4802, %v6807_v39   ;;  %v6983_v39 = vld [vmem:[%s8981_s2] sm:$0xff] }
 0x81a   : > { %4804 = vset.pattern.permute.xlu1 %v9471_v48  ;;  %v2947_v48 = vld [vmem:[%s8981_s2 + $0x30] sm:$0xff] }
 0x81b   : > { %2712 = vperm.xlu0 %4802, %v6266_v50   ;;  %2708 = vperm.xlu1 %4804, %v6797_v56   ;;  %v6974_v50 = vld [vmem:[%s8981_s2 + $0x28] sm:$0xff]  ;;  %v4464_v56 = vld [vmem:[%s8984_s5 + $0xb8] sm:$0xff] }
 0x81c   : > { %9503 = vst [vmem:[#allocation66_spill] sm:$0xff] %v6974_v50 }
 0x81f   : > { %4810 = vset.pattern.permute.xlu0 %v9146_v16  ;;  %4805 = vset.pattern.permute.xlu1 %v9461_v25 }
 0x820   : > { %2966 = vperm.xlu0 %4810, %v6963_v33   ;;  %2905 = vperm.xlu1 %4805, %v4463_v32   ;;  %v7038_v32 = vpop.permute.xlu0 %2489 }
 0x821   : > { %9509 = vst [vmem:[#allocation72_spill] sm:$0xff] %v7038_v32 }
 0x824   : > { %2976 = vperm.xlu0 %4810, %v6974_v50   ;;  %2910 = vperm.xlu1 %4805, %v4464_v56   ;;  %v7040_v56 = vpop.permute.xlu1 %2312  ;;  %v7118_v22 = vpop.permute.xlu0 %2558 }
 0x825   : > { %9510 = vst [vmem:[#allocation73_spill] sm:$0xff] %v7040_v56  ;;  %9520 = vst [vmem:[#allocation80_spill] sm:$0xff] %v7118_v22  ;;  %v9525_v22 = vmov 27  }
 0x828   : > { %3025 = vrot.lane.b32.xlu0 %v6903_v53, %s4993_s22  ;;  %4806 = vset.pattern.permute.xlu1 %v9146_v16  ;;  %v7120_v41 = vpop.permute.xlu1 %2324 }
 0x829   : > { %2951 = vperm.xlu1 %4806, %v6983_v39   ;;  %9521 = vst [vmem:[#allocation81_spill] sm:$0xff] %v7120_v41 }
 0x82c   : > { %2981 = vperm.xlu0 %4810, %v2947_v48   ;;  %v9511_v48 = vld [vmem:[#allocation21_spill] sm:$0xff] }
 0x82d   : > { %2956 = vperm.xlu1 %4806, %v6997_v45   ;;  %v7049_v25 = vrot.slane %v4448_v55, %v9511_v48  ;;  %v7058_v32 = vrot.slane %v4452_v40, %v9511_v48  ;;  %v7079_v53 = vrot.slane %v4453_v12, %v9511_v48  ;;  %v7099_v50 = vrot.slane %v4449_v47, %v9511_v48 }
 0x82f   : > { %9513 = vst [vmem:[#allocation74_spill] sm:$0xff] %v7049_v25  ;;  %9516 = vst [vmem:[#allocation77_spill] sm:$0xff] %v7079_v53 }
 0x830   : > { %4822 = vset.pattern.permute.xlu0 %v9144_v13  ;;  %9518 = vst [vmem:[#allocation78_spill] sm:$0xff] %v7099_v50 }
 0x831   : > { %3091 = vperm.xlu0 %4822, %v7003_v18   ;;  %4807 = vset.pattern.permute.xlu1 %v9144_v13  ;;  %v9512_v13 = vld [vmem:[#allocation22_spill] sm:$0xff] }
 0x832   : > { %3083 = vperm.xlu1 %4807, %v6983_v39   ;;  %v7046_v16 = vrot.slane %v4447_v46, %v9512_v13  ;;  %v7052_v21 = vrot.slane %v4448_v55, %v9512_v13  ;;  %v7061_v42 = vrot.slane %v4452_v40, %v9512_v13  ;;  %v2115_v55 = vsel %vm2106_vm15, %v6756_v20, %v6752_v10 }
 0x833   : > { %v2005_v40 = vsel %vm1996_vm0, %v6732_v27, %v6721_v57  ;;  %v7082_v56 = vrot.slane %v4453_v12, %v9512_v13  ;;  %v2007_v12 = vsel %vm1996_vm0, %v6772_v36, %v6768_v54  ;;  %v2136_v24 = vmul.f32 %v7049_v25, %v2115_v55 }
 0x834   : > { %9514 = vst [vmem:[#allocation75_spill] sm:$0xff] %v7052_v21  ;;  %9515 = vst [vmem:[#allocation76_spill] sm:$0xff] %v7061_v42 }
 0x835   : > { %3099 = vperm.xlu0 %4822, %v7014_v51  }
 0x836   : > { %3087 = vperm.xlu1 %4807, %v6997_v45  }
 0x839   : > { %3015 = vrot.lane.b32.xlu0 %v9440_v29, %s4993_s22 }
 0x83a   : > { %4808 = vset.pattern.permute.xlu1 %v9142_v8  ;;  %v7043_v8 = vrot.slane %v4447_v46, %v9511_v48  ;;  %v2109_v46 = vsel %vm2106_vm15, %v6752_v10, %v6756_v20  ;;  %v1999_v10 = vsel %vm1996_vm0, %v6721_v57, %v6732_v27  ;;  %v2001_v20 = vsel %vm1996_vm0, %v6768_v54, %v6772_v36 }
 0x83b   : > { %3180 = vperm.xlu1 %4808, %v6997_v45   ;;  %v2137_v51 = vmul.f32 %v7052_v21, %v2109_v46  ;;  %v7105_v57 = vrot.slane %v4449_v47, %v9512_v13  ;;  %v7108_v27 = vrot.slane %v4454_v6, %v9511_v48  ;;  %v1965_v54 = vmul.f32 %v6693_v43, %v9458_v63 }
 0x83c   : > { %v2026_v36 = vmul.f32 %v7043_v8, %v2005_v40  ;;  %v7116_v45 = vrot.slane %v4454_v6, %v9512_v13  ;;  %v2027_v47 = vmul.f32 %v7046_v16, %v1999_v10  ;;  %v7124_v48 = vmul.f32 %v7058_v32, %v1999_v10 }
 0x83d   : > { %9519 = vst [vmem:[#allocation79_spill] sm:$0xff] %v7105_v57  ;;  %v2030_v26 = vmul.f32 %v7043_v8, %v2007_v12  ;;  %v7132_v63 = vmul.f32 %v7079_v53, %v2109_v46  ;;  %v7135_v6 = vmul.f32 %v7082_v56, %v2115_v55  ;;  %v2172_v10 = vmul.f32 %v6748_v59, %v2136_v24 }
 0x83e   : > { %9522 = vst [vmem:[#allocation82_spill] sm:$0xff] %v7124_v48  ;;  %v2062_v41 = vmul.f32 %v6654_v61, %v2026_v36  ;;  %v2173_v48 = vmul.f32 %v6748_v59, %v2137_v51  ;;  %v7142_v13 = vmul.f32 %v7058_v32, %v2001_v20  ;;  %v7147_v46 = vmul.f32 %v7061_v42, %v2007_v12 }
 0x83f   : > { %4809 = vset.pattern.permute.xlu1 %v9517_v37  ;;  %v1964_v37 = vmul.f32 %v6693_v43, %v9456_v23  ;;  %v2031_v23 = vmul.f32 %v7046_v16, %v2001_v20  ;;  %v7129_v43 = vmul.f32 %v7061_v42, %v2005_v40  ;;  %9523 = vst [vmem:[#allocation83_spill] sm:$0xff] %v7132_v63  ;;  %9524 = vst [vmem:[#allocation84_spill] sm:$0xff] %v7135_v6  ;;  %v9566_v6 = vld [vmem:[#allocation59_spill] sm:$0xff] }
 0x840   : > { %2961 = vperm.xlu1 %4809, %v7003_v18   ;;  %9526 = vst [vmem:[#allocation85_spill] sm:$0xff] %v7142_v13  ;;  %v2063_v40 = vmul.f32 %v6654_v61, %v2027_v47  ;;  %9527 = vst [vmem:[#allocation86_spill] sm:$0xff] %v7147_v46  ;;  %v1966_v55 = vmul.f32 %v6652_v5, %v9440_v29  ;;  %v2225_v24 = vsel %vm2216_vm1, %v6780_v31, %v6776_v19 }
 0x841   : > { %v2066_v59 = vmul.f32 %v6742_v3, %v2030_v26  ;;  %v2067_v51 = vmul.f32 %v6742_v3, %v2031_v23  ;;  %v1967_v61 = vmul.f32 %v6652_v5, %v9441_v7  ;;  %v2219_v20 = vsel %vm2216_vm1, %v6776_v19, %v6780_v31  ;;  %v7175_v23 = vpop.permute.xlu0 %2322  ;;  %v7177_v3 = vpop.permute.xlu1 %2566 }
 0x842   : > { %v2074_v12 = vadd.f32 %v2062_v41, %v1964_v37  ;;  %v2002_v36 = vsel %vm1996_vm0, %v6754_v49, %v6758_v4  ;;  %v2008_v26 = vsel %vm1996_vm0, %v6758_v4, %v6754_v49  ;;  %v2006_v5 = vsel %vm1996_vm0, %v6766_v1, %v6762_v2  ;;  %9528 = vst [vmem:[#allocation87_spill] sm:$0xff] %v7177_v3 }
 0x843   : > { %v2075_v31 = vadd.f32 %v2063_v40, %v1965_v54  ;;  %v2246_v41 = vmul.f32 %v7099_v50, %v2225_v24  ;;  %v1968_v19 = vmul.f32 %v6678_v62, %v9454_v14  ;;  %v2000_v49 = vsel %vm1996_vm0, %v6762_v2, %v6766_v1 }
 0x844   : > { %4811 = vset.pattern.permute.xlu1 %v9525_v22  ;;  %v9176_v4 = vmov 29   ;;  %v2247_v37 = vmul.f32 %v7105_v57, %v2219_v20  ;;  %v7189_v47 = vmul.f32 %v7108_v27, %v2219_v20  ;;  %v1969_v54 = vmul.f32 %v6678_v62, %v9455_v35 }
 0x845   : > { %3095 = vperm.xlu1 %4811, %v6963_v33   ;;  %v2116_v40 = vsel %vm2106_vm15, %v6774_v11, %v6770_v34  ;;  %v2032_v2 = vmul.f32 %v7043_v8, %v2008_v26  ;;  %v2033_v1 = vmul.f32 %v7046_v16, %v2002_v36  ;;  %v2110_v20 = vsel %vm2106_vm15, %v6770_v34, %v6774_v11 }
 0x846   : > { %9529 = vst [vmem:[#allocation88_spill] sm:$0xff] %v7189_v47  ;;  %v7206_v62 = vmul.f32 %v7116_v45, %v2225_v24  ;;  %v2282_v35 = vmul.f32 %v6702_v30, %v2246_v41  ;;  %v2029_v14 = vmul.f32 %v7046_v16, %v2000_v49  ;;  %v2226_v29 = vsel %vm2216_vm1, %v6782_v9, %v6778_v58  ;;  %v7225_v41 = vpop.permute.xlu0 %2562 }
 0x847   : > { %v7214_v7 = vadd.f32 %v2066_v59, %v1968_v19  ;;  %v2184_v47 = vadd.f32 %v2172_v10, %v2074_v12  ;;  %v2185_v3 = vadd.f32 %v2173_v48, %v2075_v31  ;;  %v2138_v46 = vmul.f32 %v7049_v25, %v2116_v40  ;;  %9531 = vst [vmem:[#allocation90_spill] sm:$0xff] %v7225_v41 }
 0x848   : > { %9530 = vst [vmem:[#allocation89_spill] sm:$0xff] %v7206_v62  ;;  %v7217_v13 = vadd.f32 %v2067_v51, %v1969_v54  ;;  %v2283_v34 = vmul.f32 %v6702_v30, %v2247_v37  ;;  %v2139_v11 = vmul.f32 %v7052_v21, %v2110_v20  ;;  %v2220_v24 = vsel %vm2216_vm1, %v6778_v58, %v6782_v9  ;;  %v7227_v62 = vpop.permute.xlu1 %2700 }
 0x849   : > { %4812 = vset.pattern.permute.xlu1 %v9176_v4  ;;  %v2028_v4 = vmul.f32 %v7043_v8, %v2006_v5  ;;  %9532 = vst [vmem:[#allocation91_spill] sm:$0xff] %v7227_v62  ;;  %v9533_v59 = vmov 28   ;;  %v2068_v48 = vmul.f32 %v6695_v28, %v2032_v2  ;;  %v2069_v10 = vmul.f32 %v6695_v28, %v2033_v1  ;;  %v9537_v1 = vld [vmem:[#allocation19_spill] sm:$0xff] }
 0x84a   : > { %3317 = vperm.xlu1 %4812, %v6983_v39   ;;  %v2248_v30 = vmul.f32 %v7099_v50, %v2226_v29  ;;  %v1970_v12 = vmul.f32 %v6687_v44, %v9430_v52  ;;  %v1971_v9 = vmul.f32 %v6687_v44, %v9435_v60  ;;  %v7239_v58 = vadd.f32 %v2282_v35, %v2184_v47 }
 0x84b   : > { %v2064_v51 = vmul.f32 %v6712_v38, %v2028_v4  ;;  %v2065_v31 = vmul.f32 %v6712_v38, %v2029_v14  ;;  %v2174_v19 = vmul.f32 %v6665_v0, %v2138_v46  ;;  %v2249_v28 = vmul.f32 %v7105_v57, %v2220_v24  ;;  %v9534_v4 = vld [vmem:[#allocation16_spill] sm:$0xff] }
 0x84c   : > { %v2112_v37 = vsel %vm2106_vm15, %v9534_v4, %v6849_v15  ;;  %v2118_v54 = vsel %vm2106_vm15, %v6849_v15, %v9534_v4  ;;  %v7252_v2 = vadd.f32 %v2283_v34, %v2185_v3  ;;  %v7255_v44 = vmul.f32 %v7058_v32, %v2002_v36  ;;  %v4450_v36 = vld [vmem:[%s8985_s6 + $0x25] ss:$8 sm:$0x3]  ;;  %v7270_v34 = vpop.permute.xlu1 %2419 }
 0x84d   : > { %v7258_v14 = vmul.f32 %v7061_v42, %v2008_v26  ;;  %v2175_v35 = vmul.f32 %v6665_v0, %v2139_v11  ;;  %v2080_v38 = vadd.f32 %v2068_v48, %v1970_v12  ;;  %v2081_v46 = vadd.f32 %v2069_v10, %v1971_v9  ;;  %v7268_v26 = vpop.permute.xlu0 %2631  ;;  %9539 = vst [vmem:[#allocation93_spill] sm:$0xff] %v7270_v34  ;;  %v9544_v12 = vld [vmem:[#allocation21_spill] sm:$0xff]  ;;  %v9548_v4 = vld [vmem:[#allocation24_spill] sm:$0xff] }
 0x84e   : > { %4813 = vset.pattern.permute.xlu1 %v9533_v59  ;;  %9535 = vst [vmem:[#allocation16_spill] sm:$0xff] %v7255_v44  ;;  %v2076_v47 = vadd.f32 %v2064_v51, %v1966_v55  ;;  %v2284_v60 = vmul.f32 %v9537_v1, %v2248_v30  ;;  %v2077_v52 = vadd.f32 %v2065_v31, %v1967_v61  ;;  %9538 = vst [vmem:[#allocation19_spill] sm:$0xff] %v7268_v26  ;;  %v9185_v31 = vmov 30   ;;  %v9563_v44 = vld [vmem:[#allocation44_spill] sm:$0xff] }
 0x84f   : > { %3184 = vperm.xlu1 %4813, %v7003_v18   ;;  %9536 = vst [vmem:[#allocation92_spill] sm:$0xff] %v7258_v14  ;;  %v2142_v15 = vmul.f32 %v7049_v25, %v2118_v54  ;;  %v2143_v3 = vmul.f32 %v7052_v21, %v2112_v37  ;;  %v7273_v0 = vmul.f32 %v7058_v32, %v2000_v49  ;;  %v4451_v49 = vld [vmem:[%s8985_s6 + $0x27] ss:$8 sm:$0x3] }
 0x850   : > { %v7276_v55 = vmul.f32 %v7061_v42, %v2006_v5  ;;  %v2285_v61 = vmul.f32 %v9537_v1, %v2249_v28  ;;  %v2187_v11 = vadd.f32 %v2175_v35, %v2077_v52  ;;  %v7280_v48 = vmul.f32 %v7079_v53, %v2110_v20  ;;  %v9545_v52 = vld [vmem:[#allocation22_spill] sm:$0xff]  ;;  %v9549_v35 = vld [vmem:[#allocation68_spill] sm:$0xff] }
 0x851   : > { %v7283_v10 = vmul.f32 %v7082_v56, %v2116_v40  ;;  %v7286_v51 = vmul.f32 %v7108_v27, %v2220_v24  ;;  %v7292_v5 = vmul.f32 %v7116_v45, %v2226_v29  ;;  %v7295_v9 = vrot.slane %v4450_v36, %v9544_v12  ;;  %v9546_v40 = vld [vmem:[#allocation45_spill] sm:$0xff]  ;;  %v9547_v28 = vld [vmem:[#allocation46_spill] sm:$0xff]  ;;  %v9562_v14 = vld [vmem:[#allocation40_spill] sm:$0xff] }
 0x852   : > { %9540 = vst [vmem:[#allocation94_spill] sm:$0xff] %v7280_v48  ;;  %v7298_v20 = vrot.slane %v4450_v36, %v9545_v52  ;;  %v2178_v24 = vmul.f32 %v9546_v40, %v2142_v15  ;;  %v2335_v29 = vsel %vm657_vm8, %v9547_v28, %v9548_v4  ;;  %v2297_v36 = vadd.f32 %v2285_v61, %v2187_v11  ;;  %v9550_v15 = vld [vmem:[#allocation42_spill] sm:$0xff]  ;;  %v9564_v48 = vld [vmem:[#allocation27_spill] sm:$0xff] }
 0x853   : > { %3188 = vperm.xlu1 %4813, %v6963_v33   ;;  %v2186_v33 = vadd.f32 %v2174_v19, %v2076_v47  ;;  %9541 = vst [vmem:[#allocation95_spill] sm:$0xff] %v7283_v10  ;;  %9542 = vst [vmem:[#allocation96_spill] sm:$0xff] %v7286_v51  ;;  %v2179_v19 = vmul.f32 %v9546_v40, %v2143_v3  ;;  %v7321_v40 = vrot.slane %v4451_v49, %v9544_v12  ;;  %v9555_v51 = vld [vmem:[#allocation30_spill] sm:$0xff] }
 0x854   : > { %9543 = vst [vmem:[#allocation97_spill] sm:$0xff] %v7292_v5  ;;  %v9554_v5 = vld [vmem:[#allocation28_spill] sm:$0xff]  ;;  %v2357_v12 = vmul.f32 %v7295_v9, %v2335_v29  ;;  %v9558_v29 = vmov 31   ;;  %v2222_v10 = vsel %vm2216_vm1, %v9563_v44, %v9562_v14 }
 0x855   : > { %v2296_v30 = vadd.f32 %v2284_v60, %v2186_v33  ;;  %v2329_v60 = vsel %vm657_vm8, %v9548_v4, %v9547_v28  ;;  %v9551_v33 = vld [vmem:[#allocation29_spill] sm:$0xff]  ;;  %v7327_v28 = vmul.f32 %v7079_v53, %v2112_v37  ;;  %v7330_v4 = vmul.f32 %v7082_v56, %v2118_v54  ;;  %v9556_v54 = vld [vmem:[#allocation60_spill] sm:$0xff] }
 0x856   : > { %v2334_v3 = vsel %vm657_vm8, %v9551_v33, %v9550_v15  ;;  %v2117_v61 = vsel %vm2106_vm15, %v9555_v51, %v9554_v5  ;;  %v2328_v11 = vsel %vm657_vm8, %v9550_v15, %v9551_v33  ;;  %v2111_v37 = vsel %vm2106_vm15, %v9554_v5, %v9555_v51 }
 0x857   : > { %4814 = vset.pattern.permute.xlu1 %v9185_v31  ;;  %v7324_v31 = vrot.slane %v4451_v49, %v9545_v52  ;;  %9552 = vst [vmem:[#allocation45_spill] sm:$0xff] %v7327_v28  ;;  %9553 = vst [vmem:[#allocation46_spill] sm:$0xff] %v7330_v4  ;;  %v2358_v49 = vmul.f32 %v7298_v20, %v2329_v60  ;;  %v9557_v52 = vld [vmem:[#allocation58_spill] sm:$0xff]  ;;  %v7350_v28 = vadd.f32 %v2178_v24, %v2080_v38  ;;  %v9559_v24 = vld [vmem:[#allocation41_spill] sm:$0xff] }
 0x858   : > { %3414 = vperm.xlu1 %4814, %v9549_v35   ;;  %v7312_v47 = vpop.permute.xlu1 %1972  ;;  %v7314_v1 = vpop.permute.xlu0 %2082  ;;  %v2437_v4 = vsel %vm703_vm9, %v9557_v52, %v9556_v54  ;;  %v7352_v62 = vadd.f32 %v2179_v19, %v2081_v46  ;;  %v2355_v15 = vmul.f32 %v7295_v9, %v2334_v3  ;;  %v2443_v60 = vsel %vm703_vm9, %v9556_v54, %v9557_v52  ;;  %v9560_v46 = vld [vmem:[#allocation43_spill] sm:$0xff]  ;;  %v9561_v3 = vld [vmem:[#allocation70_spill] sm:$0xff] }
 0x859   : > { %v2140_v5 = vmul.f32 %v7049_v25, %v2117_v61  ;;  %v2356_v38 = vmul.f32 %v7298_v20, %v2328_v11  ;;  %v2221_v19 = vsel %vm2216_vm1, %v9560_v46, %v9559_v24  ;;  %v2227_v52 = vsel %vm2216_vm1, %v9559_v24, %v9560_v46 }
 0x85a   : > { %v2141_v54 = vmul.f32 %v7052_v21, %v2111_v37  ;;  %v2228_v11 = vsel %vm2216_vm1, %v9562_v14, %v9563_v44  ;;  %v2464_v26 = vmul.f32 %v7321_v40, %v2437_v4  ;;  %v2393_v41 = vmul.f32 %v9564_v48, %v2357_v12  ;;  %v9569_v12 = vld [vmem:[#allocation54_spill] sm:$0xff] }
 0x85b   : > { %v2394_v24 = vmul.f32 %v9564_v48, %v2358_v49  ;;  %v2465_v46 = vmul.f32 %v7324_v31, %v2443_v60  ;;  %v2250_v59 = vmul.f32 %v7099_v50, %v2227_v52  ;;  %v2251_v35 = vmul.f32 %v7105_v57, %v2221_v19  ;;  %v9570_v21 = vld [vmem:[#allocation62_spill] sm:$0xff] }
 0x85c   : > { %4815 = vset.pattern.permute.xlu1 %v9558_v29  ;;  %v7360_v33 = vpop.permute.xlu1 %1984  ;;  %v7362_v51 = vpop.permute.xlu0 %2094  ;;  %v9567_v29 = vld [vmem:[#allocation23_spill] sm:$0xff]  ;;  %v2176_v4 = vmul.f32 %v9569_v12, %v2140_v5  ;;  %v2252_v60 = vmul.f32 %v7099_v50, %v2228_v11  ;;  %v2177_v25 = vmul.f32 %v9569_v12, %v2141_v54  ;;  %v7411_v42 = vmul.f32 %v7079_v53, %v2111_v37 }
 0x85d   : > { %2971 = vperm.xlu1 %4815, %v9561_v3   ;;  %v9565_v3 = vld [vmem:[#allocation61_spill] sm:$0xff]  ;;  %v2391_v34 = vmul.f32 %v9567_v29, %v2355_v15  ;;  %v2392_v49 = vmul.f32 %v9567_v29, %v2356_v38  ;;  %v2253_v15 = vmul.f32 %v7105_v57, %v2222_v10  ;;  %v2405_v5 = vadd.f32 %v2393_v41, %v2296_v30  ;;  %v9574_v12 = vld [vmem:[#allocation7_spill] sm:$0xff] }
 0x85e   : > { %v2438_v63 = vsel %vm703_vm9, %v9566_v6, %v9565_v3  ;;  %v2444_v44 = vsel %vm703_vm9, %v9565_v3, %v9566_v6  ;;  %9571 = vst [vmem:[#allocation42_spill] sm:$0xff] %v7411_v42  ;;  %v9572_v6 = vld [vmem:[#allocation17_spill] sm:$0xff]  ;;  %v7417_v29 = vmul.f32 %v7082_v56, %v2117_v61  ;;  %v2406_v50 = vadd.f32 %v2394_v24, %v2297_v36  ;;  %v9575_v30 = vld [vmem:[#allocation39_spill] sm:$0xff] }
 0x85f   : > { %v2500_v3 = vmul.f32 %v9572_v6, %v2464_v26  ;;  %v2501_v38 = vmul.f32 %v9572_v6, %v2465_v46  ;;  %v2467_v57 = vmul.f32 %v7324_v31, %v2444_v44  ;;  %v2403_v54 = vadd.f32 %v2391_v34, %v7239_v58  ;;  %v9576_v6 = vld [vmem:[#allocation66_spill] sm:$0xff]  ;;  %v9578_v34 = vld [vmem:[#allocation33_spill] sm:$0xff] }
 0x860   : > { %v7399_v14 = vpop.permute.xlu1 %2192  ;;  %v7401_v48 = vpop.permute.xlu0 %1974  ;;  %9573 = vst [vmem:[#allocation29_spill] sm:$0xff] %v7417_v29  ;;  %v2286_v37 = vmul.f32 %v9574_v12, %v2250_v59  ;;  %v2287_v42 = vmul.f32 %v9574_v12, %v2251_v35  ;;  %v2404_v41 = vadd.f32 %v2392_v49, %v7252_v2  ;;  %v2288_v61 = vmul.f32 %v9575_v30, %v2252_v60  ;;  %v9577_v58 = vld [vmem:[#allocation82_spill] sm:$0xff]  ;;  %v9579_v35 = vld [vmem:[#allocation8_spill] sm:$0xff] }
 0x861   : > { %9568 = vst [vmem:[#allocation24_spill] sm:$0xff] %v7401_v48  ;;  %3009 = vrot.lane.b32.xlu1 %v9570_v21, %s4993_s22  ;;  %v2466_v48 = vmul.f32 %v7321_v40, %v2438_v63  ;;  %v2188_v63 = vadd.f32 %v2176_v4, %v7214_v7  ;;  %v2289_v46 = vmul.f32 %v9575_v30, %v2253_v15 }
 0x862   : > { %4816 = vset.pattern.permute.xlu1 %v9525_v22  ;;  %v2189_v36 = vadd.f32 %v2177_v25, %v7217_v13  ;;  %v2573_v59 = vmul.f32 %v9578_v34, %v9577_v58  ;;  %v2512_v24 = vadd.f32 %v2500_v3, %v2403_v54  ;;  %v2574_v12 = vmul.f32 %v9578_v34, %v7129_v43  ;;  %v9584_v13 = vld [vmem:[#allocation80_spill] sm:$0xff] }
 0x863   : > { %v2502_v44 = vmul.f32 %v9579_v35, %v2466_v48  ;;  %v7438_v7 = vmul.f32 %v7108_v27, %v2221_v19  ;;  %v2513_v2 = vadd.f32 %v2501_v38, %v2404_v41  ;;  %v2503_v4 = vmul.f32 %v9579_v35, %v2467_v57  ;;  %v9600_v35 = vld [vmem:[#allocation64_spill] sm:$0xff] }
 0x864   : > { %v2205_v26 = vpop.permute.xlu1 %2204  ;;  %v7424_v53 = vpop.permute.xlu0 %1986  ;;  %v7441_v49 = vadd.f32 %v2286_v37, %v2188_v63  ;;  %v7443_v60 = vadd.f32 %v2287_v42, %v2189_v36  ;;  %v7446_v25 = vmul.f32 %v7116_v45, %v2227_v52  ;;  %v2575_v15 = vmul.f32 %v9584_v13, %v7273_v0  ;;  %v9599_v36 = vld [vmem:[#allocation32_spill] sm:$0xff] }
 0x865   : > { %3103 = vperm.xlu1 %4816, %v9576_v6   ;;  %9580 = vst [vmem:[#allocation28_spill] sm:$0xff] %v7438_v7  ;;  %v7453_v43 = vadd.f32 %v2288_v61, %v7350_v28  ;;  %v7456_v19 = vadd.f32 %v2289_v46, %v7352_v62  ;;  %v7459_v57 = vmul.f32 %v7108_v27, %v2222_v10  ;;  %v9589_v52 = vmov 29   ;;  %v9598_v46 = vld [vmem:[#allocation63_spill] sm:$0xff]  ;;  %v9608_v7 = vld [vmem:[#allocation78_spill] sm:$0xff] }
 0x866   : > { %9581 = vst [vmem:[#allocation30_spill] sm:$0xff] %v7441_v49  ;;  %9582 = vst [vmem:[#allocation60_spill] sm:$0xff] %v7443_v60  ;;  %v7462_v42 = vmul.f32 %v7116_v45, %v2228_v11  ;;  %v2514_v38 = vadd.f32 %v2502_v44, %v2405_v5  ;;  %v7465_v54 = vadd.f32 %v2573_v59, %v2512_v24  ;;  %v9593_v11 = vld [vmem:[#allocation71_spill] sm:$0xff]  ;;  %v9601_v44 = vld [vmem:[#allocation52_spill] sm:$0xff] }
 0x867   : > { %9583 = vst [vmem:[#allocation58_spill] sm:$0xff] %v7446_v25  ;;  %9585 = vst [vmem:[#allocation41_spill] sm:$0xff] %v7453_v43  ;;  %v1997_v0 = vsel %vm1996_vm0, %v7312_v47, %v7360_v33  ;;  %v2003_v62 = vsel %vm1996_vm0, %v7360_v33, %v7312_v47  ;;  %v7476_v10 = vadd.f32 %v2503_v4, %v2406_v50  ;;  %v9596_v50 = vld [vmem:[#allocation73_spill] sm:$0xff] }
 0x868   : > { %v2303_v48 = vpop.permute.xlu1 %2302  ;;  %v7450_v3 = vpop.permute.xlu0 %2431  ;;  %9586 = vst [vmem:[#allocation43_spill] sm:$0xff] %v7456_v19  ;;  %9587 = vst [vmem:[#allocation70_spill] sm:$0xff] %v7459_v57  ;;  %v7478_v28 = vadd.f32 %v2574_v12, %v2513_v2  ;;  %v2336_v5 = vsel %vm657_vm8, %v7175_v23, %v9593_v11  ;;  %v7486_v37 = vmul.f32 %v9584_v13, %v7276_v55  ;;  %v9597_v33 = vld [vmem:[#allocation81_spill] sm:$0xff]  ;;  %v9206_v13 = vmov 32  }
 0x869   : > { %9588 = vst [vmem:[#allocation40_spill] sm:$0xff] %v7462_v42  ;;  %4817 = vset.pattern.permute.xlu1 %v9589_v52  ;;  %9590 = vst [vmem:[#allocation44_spill] sm:$0xff] %v7465_v54  ;;  %v7488_v63 = vadd.f32 %v2575_v15, %v2514_v38  ;;  %v2330_v47 = vsel %vm657_vm8, %v9593_v11, %v7175_v23  ;;  %v2337_v41 = vsel %vm657_vm8, %v9597_v33, %v9596_v50  ;;  %v9602_v2 = vld [vmem:[#allocation65_spill] sm:$0xff] }
 0x86a   : > { %3325 = vperm.xlu1 %4817, %v7003_v18   ;;  %9591 = vst [vmem:[#allocation27_spill] sm:$0xff] %v7476_v10  ;;  %9592 = vst [vmem:[#allocation61_spill] sm:$0xff] %v7478_v28  ;;  %v1961_v58 = vmul.f32 %v9599_v36, %v9598_v46  ;;  %v1960_v55 = vmul.f32 %v9599_v36, %v9570_v21  ;;  %v2022_v34 = vmul.f32 %v7043_v8, %v2003_v62  ;;  %v9607_v42 = vld [vmem:[#allocation77_spill] sm:$0xff] }
 0x86b   : > { %9594 = vst [vmem:[#allocation59_spill] sm:$0xff] %v7486_v37  ;;  %9595 = vst [vmem:[#allocation23_spill] sm:$0xff] %v7488_v63  ;;  %v2023_v59 = vmul.f32 %v7046_v16, %v1997_v0  ;;  %v7505_v24 = vmul.f32 %v7295_v9, %v2336_v5  ;;  %v2331_v23 = vsel %vm657_vm8, %v9596_v50, %v9597_v33  ;;  %v9603_v33 = vld [vmem:[#allocation76_spill] sm:$0xff] }
 0x86c   : > { %v2315_v30 = vpop.permute.xlu1 %2314  ;;  %v2195_v61 = vpop.permute.xlu0 %2194  ;;  %v7513_v12 = vmul.f32 %v9601_v44, %v9600_v35  ;;  %v7517_v4 = vmul.f32 %v9601_v44, %v9602_v2  ;;  %v7521_v15 = vmul.f32 %v7298_v20, %v2330_v47  ;;  %v7524_v38 = vmul.f32 %v7295_v9, %v2337_v41  ;;  %v9610_v63 = vld [vmem:[#allocation24_spill] sm:$0xff] }
 0x86d   : > { %v2107_v11 = vsel %vm2106_vm15, %v7314_v1, %v7362_v51  ;;  %v2113_v5 = vsel %vm2106_vm15, %v7362_v51, %v7314_v1  ;;  %v2533_v50 = vmul.f32 %v7058_v32, %v1997_v0  ;;  %v2534_v47 = vmul.f32 %v9603_v33, %v2003_v62  ;;  %v9604_v1 = vld [vmem:[#allocation53_spill] sm:$0xff]  ;;  %v9605_v0 = vld [vmem:[#allocation74_spill] sm:$0xff]  ;;  %v9606_v62 = vld [vmem:[#allocation75_spill] sm:$0xff] }
 0x86e   : > { %4818 = vset.pattern.permute.xlu1 %v9206_v13  ;;  %v2217_v41 = vsel %vm2216_vm1, %v7399_v14, %v2205_v26  ;;  %v2223_v36 = vsel %vm2216_vm1, %v2205_v26, %v7399_v14  ;;  %v7544_v46 = vmul.f32 %v7298_v20, %v2331_v23  ;;  %v2058_v51 = vmul.f32 %v9604_v1, %v2022_v34  ;;  %v9609_v14 = vld [vmem:[#allocation79_spill] sm:$0xff] }
 0x86f   : > { %3503 = vperm.xlu1 %4818, %v6983_v39   ;;  %v2059_v52 = vmul.f32 %v9604_v1, %v2023_v59  ;;  %v2132_v21 = vmul.f32 %v9605_v0, %v2113_v5  ;;  %v2133_v2 = vmul.f32 %v9606_v62, %v2107_v11  ;;  %v2606_v57 = vmul.f32 %v9607_v42, %v2107_v11  ;;  %v9611_v59 = vld [vmem:[#allocation68_spill] sm:$0xff] }
 0x870   : > { %v2412_v44 = vpop.permute.xlu1 %2411  ;;  %v2207_v13 = vpop.permute.xlu0 %2206  ;;  %v2607_v25 = vmul.f32 %v7082_v56, %v2113_v5  ;;  %v2242_v35 = vmul.f32 %v9608_v7, %v2223_v36  ;;  %v2243_v26 = vmul.f32 %v9609_v14, %v2217_v41  ;;  %v7558_v23 = vsel %vm1996_vm0, %v9610_v63, %v7424_v53  ;;  %v9612_v11 = vld [vmem:[#allocation20_spill] sm:$0xff] }
 0x871   : > { %v7564_v34 = vsel %vm1996_vm0, %v7424_v53, %v9610_v63  ;;  %v7568_v5 = vmul.f32 %v9612_v11, %v2533_v50  ;;  %v7571_v1 = vmul.f32 %v9612_v11, %v2534_v47  ;;  %v2326_v29 = vsel %vm657_vm8, %v2303_v48, %v2315_v30  ;;  %v9613_v50 = vld [vmem:[#allocation51_spill] sm:$0xff] }
 0x872   : > { %v2332_v28 = vsel %vm657_vm8, %v2315_v30, %v2303_v48  ;;  %v2070_v43 = vadd.f32 %v2058_v51, %v1960_v55  ;;  %v2071_v60 = vadd.f32 %v2059_v52, %v1961_v58  ;;  %v2168_v49 = vmul.f32 %v9613_v50, %v2132_v21  ;;  %v9614_v30 = vld [vmem:[#allocation55_spill] sm:$0xff] }
 0x873   : > { %3507 = vperm.xlu1 %4818, %v9611_v59   ;;  %v2169_v47 = vmul.f32 %v9613_v50, %v2133_v2  ;;  %v2024_v11 = vmul.f32 %v7043_v8, %v7564_v34  ;;  %v2025_v48 = vmul.f32 %v7046_v16, %v7558_v23  ;;  %v2278_v37 = vmul.f32 %v9614_v30, %v2242_v35 }
 0x874   : > { %v2424_v54 = vpop.permute.xlu1 %2423  ;;  %v2305_v19 = vpop.permute.xlu0 %2304  ;;  %v2279_v52 = vmul.f32 %v9614_v30, %v2243_v26  ;;  %v2351_v58 = vmul.f32 %v7295_v9, %v2332_v28  ;;  %v2352_v55 = vmul.f32 %v7298_v20, %v2326_v29  ;;  %v9615_v51 = vmov 28  }
 0x875   : > { %v2435_v53 = vsel %vm703_vm9, %v2412_v44, %v2424_v54  ;;  %v2441_v63 = vsel %vm703_vm9, %v2424_v54, %v2412_v44  ;;  %v7594_v21 = vsel %vm2216_vm1, %v2195_v61, %v2207_v13  ;;  %v7598_v8 = vsel %vm2216_vm1, %v2207_v13, %v2195_v61  ;;  %v9616_v44 = vld [vmem:[#allocation15_spill] sm:$0xff]  ;;  %v9617_v13 = vld [vmem:[#allocation9_spill] sm:$0xff] }
 0x876   : > { %v2460_v16 = vmul.f32 %v7321_v40, %v2435_v53  ;;  %v2461_v54 = vmul.f32 %v7324_v31, %v2441_v63  ;;  %v2180_v2 = vadd.f32 %v2168_v49, %v2070_v43  ;;  %v2181_v29 = vadd.f32 %v2169_v47, %v2071_v60 }
 0x877   : > { %4819 = vset.pattern.permute.xlu1 %v9615_v51  ;;  %v7604_v26 = vmul.f32 %v9616_v44, %v2606_v57  ;;  %v7607_v50 = vmul.f32 %v9616_v44, %v2607_v25  ;;  %v2679_v30 = vmul.f32 %v7108_v27, %v2217_v41  ;;  %v2680_v61 = vmul.f32 %v7116_v45, %v2223_v36  ;;  %v9618_v51 = vld [vmem:[#allocation56_spill] sm:$0xff]  ;;  %v9619_v57 = vld [vmem:[#allocation18_spill] sm:$0xff] }
 0x878   : > { %3196 = vperm.xlu1 %4819, %v9576_v6   ;;  %v2085_v35 = vpop.permute.xlu1 %2084  ;;  %v2317_v28 = vpop.permute.xlu0 %2316  ;;  %v2060_v53 = vmul.f32 %v9617_v13, %v2024_v11  ;;  %v2061_v63 = vmul.f32 %v9617_v13, %v2025_v48  ;;  %v2387_v6 = vmul.f32 %v9618_v51, %v2351_v58  ;;  %v2388_v10 = vmul.f32 %v9618_v51, %v2352_v55  ;;  %v9622_v13 = vld [vmem:[#allocation50_spill] sm:$0xff] }
 0x879   : > { %v2244_v49 = vmul.f32 %v9608_v7, %v7598_v8  ;;  %v2245_v60 = vmul.f32 %v9609_v14, %v7594_v21  ;;  %v2290_v25 = vadd.f32 %v2278_v37, %v2180_v2  ;;  %v2291_v43 = vadd.f32 %v2279_v52, %v2181_v29  ;;  %v9621_v29 = vld [vmem:[#allocation38_spill] sm:$0xff] }
 0x87a   : > { %v2496_v41 = vmul.f32 %v9619_v57, %v2460_v16  ;;  %v2497_v36 = vmul.f32 %v9619_v57, %v2461_v54  ;;  %v9620_v47 = vmov 30   ;;  %v2327_v58 = vsel %vm657_vm8, %v2305_v19, %v2317_v28 }
 0x87b   : > { %v2333_v55 = vsel %vm657_vm8, %v2317_v28, %v2305_v19  ;;  %v2072_v14 = vadd.f32 %v2060_v53, %v7513_v12  ;;  %v2073_v52 = vadd.f32 %v2061_v63, %v7517_v4  ;;  %v2399_v54 = vadd.f32 %v2387_v6, %v2290_v25  ;;  %v9623_v25 = vld [vmem:[#allocation31_spill] sm:$0xff] }
 0x87c   : > { %4820 = vset.pattern.permute.xlu1 %v9620_v47  ;;  %v2097_v11 = vpop.permute.xlu1 %2096  ;;  %v2414_v48 = vpop.permute.xlu0 %2413  ;;  %v2400_v2 = vadd.f32 %v2388_v10, %v2291_v43  ;;  %v2280_v19 = vmul.f32 %v9621_v29, %v2244_v49  ;;  %v2281_v28 = vmul.f32 %v9621_v29, %v2245_v60  ;;  %v2353_v44 = vmul.f32 %v7295_v9, %v2333_v55 }
 0x87d   : > { %v2108_v7 = vsel %vm2106_vm15, %v2085_v35, %v2097_v11  ;;  %v2114_v37 = vsel %vm2106_vm15, %v2097_v11, %v2085_v35  ;;  %3418 = vperm.xlu1 %4820, %v7003_v18   ;;  %v2354_v35 = vmul.f32 %v7298_v20, %v2327_v58  ;;  %v2508_v63 = vadd.f32 %v2496_v41, %v2399_v54  ;;  %v9624_v11 = vld [vmem:[#allocation25_spill] sm:$0xff] }
 0x87e   : > { %v2134_v51 = vmul.f32 %v9605_v0, %v2114_v37  ;;  %v2135_v16 = vmul.f32 %v9606_v62, %v2108_v7  ;;  %v2509_v0 = vadd.f32 %v2497_v36, %v2400_v2  ;;  %v9211_v6 = vmov 33   ;;  %v9626_v54 = vld [vmem:[#allocation57_spill] sm:$0xff] }
 0x87f   : > { %v2715_v43 = vmul.f32 %v9623_v25, %v2679_v30  ;;  %v2716_v57 = vmul.f32 %v9623_v25, %v2680_v61  ;;  %v2535_v41 = vmul.f32 %v7058_v32, %v7558_v23  ;;  %v2536_v36 = vmul.f32 %v9603_v33, %v7564_v34  ;;  %v9625_v32 = vld [vmem:[#allocation47_spill] sm:$0xff] }
 0x880   : > { %v2170_v18 = vmul.f32 %v9622_v13, %v2134_v51  ;;  %v2171_v12 = vmul.f32 %v9622_v13, %v2135_v16  ;;  %v2422_v53 = vpop.permute.xlu1 %2421  ;;  %v2426_v4 = vpop.permute.xlu0 %2425  ;;  %v2390_v58 = vmul.f32 %v9624_v11, %v2354_v35  ;;  %v2609_v30 = vmul.f32 %v7082_v56, %v2114_v37 }
 0x881   : > { %v2436_v62 = vsel %vm703_vm9, %v2414_v48, %v2426_v4  ;;  %v2442_v10 = vsel %vm703_vm9, %v2426_v4, %v2414_v48  ;;  %4821 = vset.pattern.permute.xlu1 %v9211_v6  ;;  %v2389_v48 = vmul.f32 %v9624_v11, %v2353_v44  ;;  %v2582_v61 = vadd.f32 %v7571_v1, %v2509_v0 }
 0x882   : > { %v2182_v9 = vadd.f32 %v2170_v18, %v2072_v14  ;;  %v2183_v49 = vadd.f32 %v2171_v12, %v2073_v52  ;;  %v2462_v20 = vmul.f32 %v7321_v40, %v2436_v62  ;;  %v2463_v60 = vmul.f32 %v7324_v31, %v2442_v10  ;;  %3596 = vperm.xlu1 %4821, %v6983_v39  }
 0x883   : > { %v2581_v52 = vadd.f32 %v7568_v5, %v2508_v63  ;;  %v2608_v39 = vmul.f32 %v9607_v42, %v2108_v7  ;;  %v2571_v2 = vmul.f32 %v9626_v54, %v2535_v41  ;;  %v2572_v29 = vmul.f32 %v9626_v54, %v2536_v36  ;;  %v9627_v5 = vld [vmem:[#allocation93_spill] sm:$0xff]  ;;  %v9630_v63 = vld [vmem:[#allocation48_spill] sm:$0xff]  ;;  %v9643_v54 = vld [vmem:[#allocation86_spill] sm:$0xff] }
 0x884   : > { %v2292_v55 = vadd.f32 %v2280_v19, %v2182_v9  ;;  %v2293_v14 = vadd.f32 %v2281_v28, %v2183_v49  ;;  %v2498_v23 = vmul.f32 %v9625_v32, %v2462_v20  ;;  %v2499_v33 = vmul.f32 %v9625_v32, %v2463_v60  ;;  %v2434_v34 = vpop.permute.xlu1 %2433  ;;  %v7681_v19 = vld [vmem:[%s8981_s2 + $0x38] sm:$0xff]  ;;  %v9631_v9 = vld [vmem:[#allocation49_spill] sm:$0xff] }
 0x885   : > { %v2681_v42 = vmul.f32 %v7108_v27, %v7594_v21  ;;  %v2682_v56 = vmul.f32 %v7116_v45, %v7598_v8  ;;  %v2439_v1 = vsel %vm703_vm9, %v9627_v5, %v7450_v3  ;;  %v2440_v45 = vsel %vm703_vm9, %v2422_v53, %v2434_v34  ;;  %v9628_v28 = vld [vmem:[#allocation10_spill] sm:$0xff] }
 0x886   : > { %v2401_v51 = vadd.f32 %v2389_v48, %v2292_v55  ;;  %v2402_v16 = vadd.f32 %v2390_v58, %v2293_v14  ;;  %3600 = vperm.xlu1 %4821, %v9611_v59   ;;  %v2445_v59 = vsel %vm703_vm9, %v7450_v3, %v9627_v5  ;;  %v2446_v27 = vsel %vm703_vm9, %v2434_v34, %v2422_v53  ;;  %v9632_v60 = vld [vmem:[#allocation26_spill] sm:$0xff]  ;;  %v9633_v58 = vld [vmem:[#allocation83_spill] sm:$0xff]  ;;  %v9635_v14 = vld [vmem:[#allocation84_spill] sm:$0xff] }
 0x887   : > { %v2655_v21 = vadd.f32 %v7607_v50, %v2582_v61  ;;  %v2654_v8 = vadd.f32 %v7604_v26, %v2581_v52  ;;  %v2644_v44 = vmul.f32 %v9628_v28, %v2608_v39  ;;  %v2645_v3 = vmul.f32 %v9628_v28, %v2609_v30  ;;  %v9637_v30 = vld [vmem:[#allocation34_spill] sm:$0xff] }
 0x888   : > { %v2510_v7 = vadd.f32 %v2498_v23, %v2401_v51  ;;  %v2511_v37 = vadd.f32 %v2499_v33, %v2402_v16  ;;  %v9629_v13 = vmov 31   ;;  %v2468_v12 = vmul.f32 %v7321_v40, %v2439_v1  ;;  %v9639_v51 = vld [vmem:[#allocation27_spill] sm:$0xff]  ;;  %v9641_v23 = vld [vmem:[#allocation85_spill] sm:$0xff]  ;;  %v9642_v33 = vld [vmem:[#allocation90_spill] sm:$0xff] }
 0x889   : > { %v2469_v4 = vmul.f32 %v7324_v31, %v2445_v59  ;;  %v2717_v0 = vmul.f32 %v9630_v63, %v2681_v42  ;;  %v2718_v53 = vmul.f32 %v9630_v63, %v2682_v56  ;;  %v2470_v26 = vmul.f32 %v7321_v40, %v2440_v45  ;;  %v9640_v16 = vld [vmem:[#allocation59_spill] sm:$0xff]  ;;  %v9646_v1 = vld [vmem:[#allocation30_spill] sm:$0xff]  ;;  %v9648_v45 = vld [vmem:[#allocation41_spill] sm:$0xff] }
 0x88a   : > { %v2583_v35 = vadd.f32 %v2571_v2, %v2510_v7  ;;  %4823 = vset.pattern.permute.xlu1 %v9629_v13  ;;  %v2584_v18 = vadd.f32 %v2572_v29, %v2511_v37  ;;  %v2471_v50 = vmul.f32 %v7324_v31, %v2446_v27  ;;  %v2395_v49 = vmul.f32 %v9631_v9, %v7505_v24  ;;  %v9634_v31 = vld [vmem:[#allocation69_spill] sm:$0xff]  ;;  %v9636_v24 = vld [vmem:[#allocation72_spill] sm:$0xff]  ;;  %v9644_v29 = vld [vmem:[#allocation94_spill] sm:$0xff] }
 0x88b   : > { %2986 = vperm.xlu1 %4823, %v7681_v19   ;;  %v2396_v20 = vmul.f32 %v9631_v9, %v7521_v15  ;;  %v2397_v25 = vmul.f32 %v9632_v60, %v7524_v38  ;;  %v2398_v41 = vmul.f32 %v9632_v60, %v7544_v46  ;;  %v2728_v36 = vadd.f32 %v2716_v57, %v2655_v21  ;;  %v9638_v38 = vld [vmem:[#allocation67_spill] sm:$0xff]  ;;  %v9647_v7 = vld [vmem:[#allocation60_spill] sm:$0xff]  ;;  %v9659_v60 = vld [vmem:[#allocation89_spill] sm:$0xff] }
 0x88c   : > { %v2657_v62 = vadd.f32 %v2645_v3, %v2584_v18  ;;  %v2656_v10 = vadd.f32 %v2644_v44, %v2583_v35  ;;  %v2727_v48 = vadd.f32 %v2715_v43, %v2654_v8  ;;  %v2646_v55 = vmul.f32 %v9634_v31, %v9633_v58  ;;  %v9645_v42 = vld [vmem:[#allocation19_spill] sm:$0xff]  ;;  %v9650_v8 = vld [vmem:[#allocation44_spill] sm:$0xff]  ;;  %v9651_v44 = vld [vmem:[#allocation61_spill] sm:$0xff] }
 0x88d   : > { %v2647_v52 = vmul.f32 %v9634_v31, %v9635_v14  ;;  %v2504_v39 = vmul.f32 %v9636_v24, %v2468_v12  ;;  %v2505_v15 = vmul.f32 %v9636_v24, %v2469_v4  ;;  %v2506_v61 = vmul.f32 %v9638_v38, %v2470_v26  ;;  %v9652_v35 = vld [vmem:[#allocation95_spill] sm:$0xff]  ;;  %v9657_v9 = vld [vmem:[#allocation88_spill] sm:$0xff]  ;;  %v9662_v58 = vld [vmem:[#allocation45_spill] sm:$0xff] }
 0x88e   : > { %v2730_v11 = vadd.f32 %v2718_v53, %v2657_v62  ;;  %v2729_v40 = vadd.f32 %v2717_v0, %v2656_v10  ;;  %v2507_v46 = vmul.f32 %v9638_v38, %v2471_v50  ;;  %v2588_v32 = vadd.f32 %v9640_v16, %v9639_v51  ;;  %v9653_v18 = vld [vmem:[#allocation35_spill] sm:$0xff]  ;;  %v9654_v53 = vld [vmem:[#allocation16_spill] sm:$0xff] }
 0x88f   : > { %3013 = vrot.lane.b32.xlu1 %v9637_v30, %s4993_s22  ;;  %v2577_v34 = vmul.f32 %v9642_v33, %v9641_v23  ;;  %v2578_v2 = vmul.f32 %v9642_v33, %v9643_v54  ;;  %v2648_v56 = vmul.f32 %v9645_v42, %v9644_v29  ;;  %v2407_v59 = vadd.f32 %v2395_v49, %v9646_v1  ;;  %v9655_v26 = vld [vmem:[#allocation87_spill] sm:$0xff]  ;;  %v9656_v62 = vld [vmem:[#allocation92_spill] sm:$0xff] }
 0x890   : > { %v4548_v57 = vpack.c.bf16 %v2730_v11, %v2728_v36  ;;  %v4550_v43 = vpack.c.bf16 %v2729_v40, %v2727_v48  ;;  %4824 = vset.pattern.permute.xlu1 %v9525_v22  ;;  %v2408_v37 = vadd.f32 %v2396_v20, %v9647_v7  ;;  %v2409_v27 = vadd.f32 %v2397_v25, %v9648_v45  ;;  %v9649_v22 = vld [vmem:[#allocation43_spill] sm:$0xff]  ;;  %v9660_v36 = vld [vmem:[#allocation42_spill] sm:$0xff]  ;;  %v9661_v48 = vld [vmem:[#allocation29_spill] sm:$0xff] }
 0x891   : > { %v2636_v5 = vpop.permute.xlu0 %2635  ;;  %v2410_v21 = vadd.f32 %v2398_v41, %v9649_v22  ;;  %v2658_v28 = vadd.f32 %v2646_v55, %v9650_v8  ;;  %v2659_v3 = vadd.f32 %v2647_v52, %v9651_v44  ;;  %v2649_v13 = vmul.f32 %v9645_v42, %v9652_v35  ;;  %v9658_v49 = vld [vmem:[#allocation91_spill] sm:$0xff]  ;;  %v9663_v55 = vld [vmem:[#allocation46_spill] sm:$0xff]  ;;  %v9665_v38 = vld [vmem:[#allocation96_spill] sm:$0xff] }
 0x892   : > { %4549 = vmatprep.subr.bf16.mxu1 %v4548_v57  ;;  %v2516_v12 = vadd.f32 %v2504_v39, %v2407_v59  ;;  %v2517_v4 = vadd.f32 %v2505_v15, %v2408_v37  ;;  %v2518_v63 = vadd.f32 %v2506_v61, %v2409_v27  ;;  %v2579_v50 = vmul.f32 %v9655_v26, %v9654_v53  ;;  %v9664_v24 = vld [vmem:[#allocation23_spill] sm:$0xff]  ;;  %v9668_v45 = vld [vmem:[#allocation28_spill] sm:$0xff]  ;;  %v9669_v22 = vld [vmem:[#allocation58_spill] sm:$0xff] }
 0x893   : > { %3029 = vrot.lane.b32.xlu1 %v9653_v18, %s4993_s22  ;;  %4551 = vmatpush1.bf16.msra.mxu1 %v4550_v43  ;;  %v2519_v0 = vadd.f32 %v2507_v46, %v2410_v21  ;;  %v2580_v10 = vmul.f32 %v9655_v26, %v9656_v62  ;;  %v2719_v20 = vmul.f32 %v9658_v49, %v9657_v9  ;;  %v9666_v46 = vld [vmem:[#allocation97_spill] sm:$0xff]  ;;  %v9667_v43 = vld [vmem:[#allocation64_spill] sm:$0xff]  ;;  %v9670_v8 = vld [vmem:[#allocation70_spill] sm:$0xff] }
 0x894   : > { %v2720_v25 = vmul.f32 %v9658_v49, %v9659_v60  ;;  %v2650_v11 = vmul.f32 %v2636_v5, %v9660_v36  ;;  %v2651_v40 = vmul.f32 %v2636_v5, %v9661_v48  ;;  %v2660_v39 = vadd.f32 %v2648_v56, %v9664_v24  ;;  %v9672_v35 = vld [vmem:[#allocation65_spill] sm:$0xff]  ;;  %v4456_v9 = vld [vmem:[%s8982_s3 + $0x28] sm:$0xff] }
 0x895   : > { %v2640_v41 = vpop.permute.xlu1 %2639  ;;  %v2661_v15 = vadd.f32 %v2649_v13, %v2588_v32  ;;  %v2589_v51 = vadd.f32 %v2577_v34, %v2516_v12  ;;  %v2590_v16 = vadd.f32 %v2578_v2, %v2517_v4  ;;  %v2591_v23 = vadd.f32 %v2579_v50, %v2518_v63  ;;  %v9671_v34 = vld [vmem:[#allocation40_spill] sm:$0xff]  ;;  %v4455_v50 = vld [vmem:[%s8982_s3 + $0x20] sm:$0xff]  ;;  %v4465_v24 = vld [vmem:[%s8985_s6 + $0x33] ss:$8 sm:$0x3] }
 0x896   : > { %v2652_v31 = vmul.f32 %v2640_v41, %v9662_v58  ;;  %v2653_v14 = vmul.f32 %v2640_v41, %v9663_v55  ;;  %v2705_v52 = vpop.permute.xlu0 %2704  ;;  %v2592_v33 = vadd.f32 %v2580_v10, %v2519_v0  ;;  %v2731_v54 = vadd.f32 %v2719_v20, %v2658_v28 }
 0x897   : > { %v2721_v61 = vmul.f32 %v2705_v52, %v9665_v38  ;;  %v2722_v57 = vmul.f32 %v2705_v52, %v9666_v46  ;;  %3011 = vrot.lane.b32.xlu1 %v9667_v43, %s4993_s22  ;;  %v2732_v29 = vadd.f32 %v2720_v25, %v2659_v3  ;;  %v2662_v1 = vadd.f32 %v2650_v11, %v2589_v51  ;;  %v9687_v38 = vld [vmem:[#allocation21_spill] sm:$0xff]  ;;  %v9689_v46 = vld [vmem:[#allocation22_spill] sm:$0xff] }
 0x898   : > { %v2663_v59 = vadd.f32 %v2651_v40, %v2590_v16  ;;  %v2664_v7 = vadd.f32 %v2652_v31, %v2591_v23  ;;  %v2665_v56 = vadd.f32 %v2653_v14, %v2592_v33  ;;  %v9675_v10 = vmov 0.0  }
 0x899   : > { %v2733_v42 = vadd.f32 %v2721_v61, %v2660_v39  ;;  %v2734_v5 = vadd.f32 %v2722_v57, %v2661_v15  ;;  %v7807_v61 = vrot.slane %v4465_v24, %v9687_v38  ;;  %v7810_v57 = vrot.slane %v4465_v24, %v9689_v46 }
 0x89a   : > { %v2709_v32 = vpop.permute.xlu1 %2708  ;;  %v2713_v37 = vpop.permute.xlu0 %2712  ;;  %v9700_v24 = vmov 28  }
 0x89b   : > { %v2723_v27 = vmul.f32 %v2709_v32, %v9668_v45  ;;  %v2724_v21 = vmul.f32 %v2709_v32, %v9669_v22  ;;  %v2725_v44 = vmul.f32 %v2713_v37, %v9670_v8  ;;  %v2726_v2 = vmul.f32 %v2713_v37, %v9671_v34  ;;  %3027 = vrot.lane.b32.xlu1 %v9672_v35, %s4993_s22  ;;  %v7851_v34 = vld [vmem:[%s8981_s2 + $0x30] sm:$0xff] }
 0x89c   : > { %v4552_v28 = vpack.c.bf16 %v2734_v5, %v2732_v29  ;;  %v4554_v3 = vpack.c.bf16 %v2733_v42, %v2731_v54  ;;  %9688 = vst [vmem:[#allocation52_spill] sm:$0xff] %v7807_v61  ;;  %9690 = vst [vmem:[#allocation76_spill] sm:$0xff] %v7810_v57 }
 0x89d   : > { %v2735_v13 = vadd.f32 %v2723_v27, %v2662_v1  ;;  %v2736_v12 = vadd.f32 %v2724_v21, %v2663_v59  ;;  %v2737_v4 = vadd.f32 %v2725_v44, %v2664_v7  ;;  %v2738_v63 = vadd.f32 %v2726_v2, %v2665_v56  ;;  %v9695_v2 = vld [vmem:[#allocation62_spill] sm:$0xff] }
 0x89e   : > { %4553 = vmatprep.subr.bf16.mxu1 %v4552_v28  ;;  %v9696_v28 = vmov 29  }
 0x89f   : > { %4555 = vmatpush1.bf16.msra.mxu1 %v4554_v3  ;;  %v4556_v0 = vpack.c.bf16 %v2738_v63, %v2736_v12  ;;  %v4558_v53 = vpack.c.bf16 %v2737_v4, %v2735_v13  ;;  %v7759_v26 = vpop.permute.xlu1 %2905  ;;  %v7789_v40 = vpop.permute.xlu0 %2966  ;;  %v9697_v3 = vld [vmem:[#allocation37_spill] sm:$0xff]  ;;  %v7867_v13 = vld [vmem:[%s8981_s2 + $0x28] sm:$0xff]  ;;  %v9698_v4 = vmov 32  }
 0x8a0   : > { %9673 = vst [vmem:[#allocation54_spill] sm:$0xff] %v7759_v26  ;;  %9683 = vst [vmem:[#allocation71_spill] sm:$0xff] %v7789_v40  ;;  %v4906_v12 = vld [vmem:[%s8981_s2 + $0x8] sm:$0xff]  ;;  %v7878_v63 = vld [vmem:[%s8981_s2 + $0x10] sm:$0xff] }
 0x8a1   : > { %4557 = vmatprep.subr.bf16.mxu1 %v4556_v0  ;;  %v7884_v0 = vld [vmem:[%s8981_s2 + $0x18] sm:$0xff] }
 0x8a3   : > { %4559 = vmatpush1.bf16.msra.mxu1 %v4558_v53  ;;  %v7764_v62 = vpop.permute.xlu1 %2910  ;;  %v7793_v31 = vpop.permute.xlu0 %2976  ;;  %v9213_v53 = vmov 34  }
 0x8a4   : > { %9674 = vst [vmem:[#allocation17_spill] sm:$0xff] %v7764_v62 }
 0x8a6   : > { %4457 = vmatmul.mubr.msk.f32.vlgmr.msra.gmra.mrb[4].mxu1 %vm2742_vm2, %v4455_v50  ;;  %v7891_v50 = vld [vmem:[%s8981_s2] sm:$0xff] }
 0x8a7   : > { %2819 = vmatprep.mubr.f32.mxu1 %v9675_v10  ;;  %v3026_v14 = vpop.permute.xlu0 %3025 }
 0x8a8   : > { %v7771_v49 = vpop.permute.xlu1 %2951 }
 0x8a9   : > { %9676 = vst [vmem:[#allocation7_spill] sm:$0xff] %v7771_v49 }
 0x8aa   : > { %4458 = vmatmul.mubr.msk.f32.gmra.mrb[6].mxu1 %vm2742_vm2, %v4456_v9  ;;  %v9699_v9 = vld [vmem:[#allocation63_spill] sm:$0xff] }
 0x8ab   : > { %3919 = vmatprep.mubr.f32.mxu1 %v9675_v10  ;;  %v7804_v15 = vpop.permute.xlu0 %2981 }
 0x8ac   : > { %v7775_v20 = vpop.permute.xlu1 %2956 }
 0x8ad   : > { %9677 = vst [vmem:[#allocation39_spill] sm:$0xff] %v7775_v20 }
 0x8b0   : > { %v3092_v29 = vpop.permute.xlu0 %3091 }
 0x8b1   : > { %v7777_v60 = vpop.permute.xlu1 %3083 }
 0x8b2   : > { %9678 = vst [vmem:[#allocation66_spill] sm:$0xff] %v7777_v60 }
 0x8b5   : > { %v7779_v25 = vpop.permute.xlu1 %3087 }
 0x8b6   : > { %9679 = vst [vmem:[#allocation82_spill] sm:$0xff] %v7779_v25 }
 0x8ba   : > { %v7781_v41 = vpop.permute.xlu1 %3180 }
 0x8bb   : > { %9680 = vst [vmem:[#allocation33_spill] sm:$0xff] %v7781_v41 }
 0x8bf   : > { %v7783_v36 = vpop.permute.xlu1 %2961 }
 0x8c4   : > { %v7785_v11 = vpop.permute.xlu1 %3095 }
 0x8c5   : > { %9681 = vst [vmem:[#allocation8_spill] sm:$0xff] %v7785_v11 }
 0x8c9   : > { %v7787_v48 = vpop.permute.xlu1 %3317 }
 0x8ca   : > { %9682 = vst [vmem:[#allocation80_spill] sm:$0xff] %v7787_v48 }
 0x8ce   : > { %v7791_v58 = vpop.permute.xlu1 %3184 }
 0x8d2   : > { %v7795_v55 = vpop.permute.xlu1 %3188 }
 0x8d3   : > { %9684 = vst [vmem:[#allocation73_spill] sm:$0xff] %v7795_v55 }
 0x8d7   : > { %v7797_v52 = vpop.permute.xlu1 %3414 }
 0x8d8   : > { %9685 = vst [vmem:[#allocation81_spill] sm:$0xff] %v7797_v52  ;;  %v7956_v52 = vpop.permute.xlu0 %3099 }
 0x8d9   : > { %9712 = vst [vmem:[#allocation51_spill] sm:$0xff] %v7956_v52 }
 0x8dc   : > { %v7802_v39 = vpop.permute.xlu1 %2971 }
 0x8dd   : > { %9686 = vst [vmem:[#allocation32_spill] sm:$0xff] %v7802_v39 }
 0x8e0   : > { %v3010_v51 = vpop.permute.xlu1 %3009 }
 0x8e1   : > { %v7814_v16 = vsel %vm657_vm8, %v3010_v51, %v3026_v14  ;;  %v7818_v23 = vsel %vm657_vm8, %v3026_v14, %v3010_v51  ;;  %v7899_v14 = vld [vmem:[%s8981_s2 + $0x20] sm:$0xff] }
 0x8e2   : > { %v3070_v33 = vmul.f32 %v7807_v61, %v7814_v16  ;;  %v3071_v54 = vmul.f32 %v7810_v57, %v7818_v23 }
 0x8e4   : > { %v7824_v42 = vmul.f32 %v3092_v29, %v3070_v33  ;;  %v7826_v5 = vmul.f32 %v3092_v29, %v3071_v54  ;;  %v7912_v51 = vpop.permute.xlu1 %3103  ;;  %v9701_v33 = vld [vmem:[#allocation13_spill] sm:$0xff]  ;;  %v9702_v54 = vmov 0   ;;  %v9703_v29 = vld [vmem:[#allocation14_spill] sm:$0xff] }
 0x979   : > { %v7828_v1 = vpop.f32.mrb[4].mxu1 }
 0x97a   : > { %9691 = vst [vmem:[#allocation53_spill] sm:$0xff] %v7828_v1  ;;  %v2843_v59 = vmul.f32 %v7828_v1, %v7828_v1  ;;  %v7832_v7 = vpop.f32.mrb[5].mxu1 }
 0x97b   : > { %9692 = vst [vmem:[#allocation74_spill] sm:$0xff] %v7832_v7  ;;  %v2835_v56 = vadd.f32 %v7832_v7, %v7828_v1  ;;  %v2844_v32 = vmul.f32 %v7832_v7, %v7832_v7 }
 0x97d   : > { %2836 = vadd.xlane.f32.xlu1 %v2835_v56  ;;  %v7838_v37 = vpop.f32.mrb[6].mxu1  ;;  %v2847_v45 = vadd.f32 %v2844_v32, %v2843_v59  ;;  %v7920_v59 = vpop.permute.xlu1 %3325  ;;  %v9209_v56 = vmov 35   ;;  %v9704_v32 = vld [vmem:[#allocation36_spill] sm:$0xff] }
 0x97e   : > { %9693 = vst [vmem:[#allocation75_spill] sm:$0xff] %v7838_v37  ;;  %v2845_v27 = vmul.f32 %v7838_v37, %v7838_v37  ;;  %v7842_v22 = vpop.f32.mrb[7].mxu1 }
 0x97f   : > { %9694 = vst [vmem:[#allocation77_spill] sm:$0xff] %v7842_v22  ;;  %v2838_v21 = vadd.f32 %v7842_v22, %v7838_v37  ;;  %v2846_v8 = vmul.f32 %v7842_v22, %v7842_v22 }
 0x981   : > { %2848 = vadd.xlane.f32.xlu1 %v2847_v45  ;;  %2839 = vadd.xlane.f32.xlu0 %v2838_v21  ;;  %v2850_v44 = vadd.f32 %v2846_v8, %v2845_v27  ;;  %v7925_v45 = vpop.permute.xlu1 %3503  ;;  %v9706_v27 = vld [vmem:[#allocation11_spill] sm:$0xff]  ;;  %v9707_v21 = vld [vmem:[#allocation12_spill] sm:$0xff] }
 0x982   : > { %9705 = vst [vmem:[#allocation78_spill] sm:$0xff] %v7925_v45  ;;  %v3016_v45 = vpop.permute.xlu0 %3015 }
 0x985   : > { %2851 = vadd.xlane.f32.xlu0 %v2850_v44  ;;  %v7934_v8 = vpop.permute.xlu1 %3507 }
 0x986   : > { %9708 = vst [vmem:[#allocation79_spill] sm:$0xff] %v7934_v8 }
 0x989   : > { %v7938_v44 = vpop.permute.xlu1 %3196 }
 0x992   : > { %3107 = vperm.xlu1 %4824, %v7851_v34  }
 0x996   : > { %3243 = vrot.lane.b32.xlu1 %v9695_v2, %s4990_s19 }
 0x997   : > { %4827 = vset.pattern.permute.xlu1 %v9696_v28 }
 0x99a   : > { %3245 = vrot.lane.b32.xlu1 %v9667_v43, %s4990_s19 }
 0x99b   : > { %3031 = vrot.lane.b32.xlu0 %v9697_v3, %s4993_s22 }
 0x99e   : > { %3261 = vrot.lane.b32.xlu1 %v9672_v35, %s4990_s19 }
 0x99f   : > { %3111 = vperm.xlu0 %4822, %v7681_v19  }
 0x9a2   : > { %3337 = vperm.xlu1 %4827, %v7867_v13  }
 0x9a3   : > { %4825 = vset.pattern.permute.xlu0 %v9696_v28 }
 0x9a4   : > { %3321 = vperm.xlu0 %4825, %v4906_v12  }
 0x9a6   : > { %4828 = vset.pattern.permute.xlu1 %v9698_v4 }
 0x9a7   : > { %3511 = vperm.xlu1 %4828, %v7878_v63  }
 0x9a8   : > { %3329 = vperm.xlu0 %4825, %v7884_v0  }
 0x9ab   : > { %4829 = vset.pattern.permute.xlu1 %v9213_v53 }
 0x9ac   : > { %3689 = vperm.xlu1 %4829, %v7891_v50   ;;  %3259 = vrot.lane.b32.xlu0 %v9699_v9, %s4990_s19 }
 0x9b0   : > { %3693 = vperm.xlu1 %4829, %v4906_v12   ;;  %3333 = vperm.xlu0 %4825, %v7899_v14  }
 0x9b4   : > { %4830 = vset.pattern.permute.xlu1 %v9700_v24  ;;  %4826 = vset.pattern.permute.xlu0 %v9700_v24 }
 0x9b5   : > { %3204 = vperm.xlu1 %4830, %v7681_v19   ;;  %3176 = vperm.xlu0 %4826, %v7891_v50  }
 0x9b9   : > { %4831 = vset.pattern.permute.xlu1 %v9620_v47  ;;  %3192 = vperm.xlu0 %4826, %v7899_v14  }
 0x9ba   : > { %3426 = vperm.xlu1 %4831, %v7899_v14  }
 0x9bd   : > { %3200 = vperm.xlu0 %4826, %v7851_v34  }
 0x9be   : > { %4832 = vset.pattern.permute.xlu1 %v9211_v6 }
 0x9bf   : > { %3604 = vperm.xlu1 %4832, %v7878_v63  }
 0x9c1   : > { %3019 = vrot.lane.b32.xlu0 %v9701_v33, %s4993_s22 }
 0x9c2   : > { %4835 = vset.pattern.permute.xlu0 %v9702_v54 }
 0x9c3   : > { %3608 = vperm.xlu1 %4832, %v7884_v0  }
 0x9c5   : > { %3035 = vrot.lane.b32.xlu0 %v9703_v29, %s4993_s22 }
 0x9c7   : > { %4833 = vset.pattern.permute.xlu1 %v9209_v56 }
 0x9c8   : > { %3786 = vperm.xlu1 %4833, %v4906_v12   ;;  %v7942_v12 = vpop.permute.xlu1 %3418 }
 0x9c9   : > { %3249 = vrot.lane.b32.xlu0 %v9704_v32, %s4990_s19 }
 0x9cc   : > { %3017 = vrot.lane.b32.xlu1 %v9706_v27, %s4993_s22  ;;  %v7944_v24 = vpop.permute.xlu1 %3596 }
 0x9cd   : > { %3265 = vrot.lane.b32.xlu0 %v9697_v3, %s4990_s19  ;;  %4834 = vset.pattern.permute.xlu1 %v9702_v54  ;;  %9709 = vst [vmem:[#allocation24_spill] sm:$0xff] %v7944_v24 }
 0x9d0   : > { %3033 = vrot.lane.b32.xlu1 %v9707_v21, %s4993_s22  ;;  %v7946_v56 = vpop.permute.xlu1 %3600 }
 0x9d1   : > { %9710 = vst [vmem:[#allocation68_spill] sm:$0xff] %v7946_v56 }
 0x9d4   : > { %3247 = vrot.lane.b32.xlu1 %v9637_v30, %s4990_s19  ;;  %v7948_v6 = vpop.permute.xlu1 %2986 }
 0x9d8   : > { %3263 = vrot.lane.b32.xlu1 %v9653_v18, %s4990_s19  ;;  %v7950_v53 = vpop.permute.xlu1 %3013 }
 0x9dc   : > { %v7952_v10 = vpop.permute.xlu1 %3029 }
 0x9e0   : > { %v7954_v8 = vpop.permute.xlu1 %3011 }
 0x9e1   : > { %9711 = vst [vmem:[#allocation20_spill] sm:$0xff] %v7954_v8 }
 0x9e4   : > { %v7958_v25 = vpop.permute.xlu1 %3027 }
 0x9e5   : > { %9713 = vst [vmem:[#allocation55_spill] sm:$0xff] %v7958_v25 }
 0xa0a   : > { %v2837_v48 = vpop.xlane.xlu1 %2836 }
 0xa0b   : > { %v2841_v41 = vmul.f32 0.00390625, %v2837_v48 }
 0xa0d   : > { %v2855_v24 = vmul.f32 %v2841_v41, %v2841_v41 }
 0xa0e   : > { %v2849_v20 = vpop.xlane.xlu1 %2848  ;;  %v2840_v60 = vpop.xlane.xlu0 %2839 }
 0xa0f   : > { %v2853_v49 = vmul.f32 0.00390625, %v2849_v20  ;;  %v2842_v56 = vmul.f32 0.00390625, %v2840_v60 }
 0xa11   : > { %v2857_v54 = vsub.f32 %v2853_v49, %v2855_v24  ;;  %v2856_v55 = vmul.f32 %v2842_v56, %v2842_v56 }
 0xa12   : > { %v7960_v35 = vpop.permute.xlu1 %3107  ;;  %v2852_v40 = vpop.xlane.xlu0 %2851 }
 0xa13   : > { %v2859_v43 = vmax.f32 %v2857_v54, 0.0  ;;  %v2854_v11 = vmul.f32 0.00390625, %v2852_v40 }
 0xa15   : > { %v2861_v8 = vadd.f32 1e-05, %v2859_v43  ;;  %v2858_v62 = vsub.f32 %v2854_v11, %v2856_v55 }
 0xa16   : > { %v3244_v26 = vpop.permute.xlu1 %3243  ;;  %v3032_v22 = vpop.permute.xlu0 %3031 }
 0xa17   : > { %4888 = vrsqrt.f32 %v2861_v8  ;;  %v2860_v25 = vmax.f32 %v2858_v62, 0.0  ;;  %v7964_v48 = vsel %vm657_vm8, %v3016_v45, %v3032_v22  ;;  %v7968_v20 = vsel %vm657_vm8, %v3032_v22, %v3016_v45  ;;  %v4459_v62 = vld [vmem:[%s8984_s5 + $0x90] sm:$0xff]  ;;  %v4460_v22 = vld [vmem:[%s8984_s5 + $0x98] sm:$0xff] }
 0xa18   : > { %v4466_v45 = vld [vmem:[%s8985_s6 + $0x34] ss:$8 sm:$0x3] }
 0xa19   : > { %v2862_v49 = vadd.f32 1e-05, %v2860_v25  ;;  %v4461_v25 = vld [vmem:[%s8984_s5 + $0xa0] sm:$0xff]  ;;  %v7999_v37 = vrot.slane %v4466_v45, %v9689_v46 }
 0xa1a   : > { %v7970_v60 = vpop.permute.xlu1 %3245 }
 0xa1b   : > { %9714 = vst [vmem:[#allocation15_spill] sm:$0xff] %v7970_v60  ;;  %4890 = vrsqrt.f32 %v2862_v49  ;;  %9718 = vst [vmem:[#allocation38_spill] sm:$0xff] %v7999_v37 }
 0xa1e   : > { %v7972_v54 = vpop.permute.xlu1 %3261  ;;  %v7974_v43 = vpop.permute.xlu0 %3111 }
 0xa1f   : > { %9715 = vst [vmem:[#allocation9_spill] sm:$0xff] %v7972_v54  ;;  %v7996_v54 = vrot.slane %v4466_v45, %v9687_v38 }
 0xa21   : > { %v4889_v11 = vpop.eup %4888  ;;  %9717 = vst [vmem:[#allocation18_spill] sm:$0xff] %v7996_v54 }
 0xa22   : > { %v2865_v40 = vmul.f32 %v4889_v11, %v4459_v62  ;;  %v7979_v55 = vpop.permute.xlu1 %3337  ;;  %v4468_v62 = vld [vmem:[%s8985_s6 + $0x36] ss:$8 sm:$0x3] }
 0xa23   : > { %v7981_v8 = vpop.permute.xlu0 %3321  ;;  %v8023_v39 = vrot.slane %v4468_v62, %v9689_v46 }
 0xa24   : > { %9716 = vst [vmem:[#allocation56_spill] sm:$0xff] %v7981_v8  ;;  %2873 = vperm.xlu1 %4834, %v2865_v40   ;;  %v2867_v24 = vmul.f32 %v2865_v40, %v2841_v41  ;;  %v4462_v41 = vld [vmem:[%s8984_s5 + $0xa8] sm:$0xff]  ;;  %v2993_v40 = vmul.f32 %v7783_v36, %v9695_v2 }
 0xa25   : > { %v4891_v49 = vpop.eup %4890 }
 0xa26   : > { %v2869_v11 = vsub.f32 %v4461_v25, %v2867_v24  ;;  %v3512_v8 = vpop.permute.xlu1 %3511  ;;  %v2866_v60 = vmul.f32 %v4891_v49, %v4460_v22  ;;  %v2994_v25 = vmul.f32 %v7783_v36, %v9699_v9  ;;  %v4467_v22 = vld [vmem:[%s8985_s6 + $0x35] ss:$8 sm:$0x3]  ;;  %v3163_v24 = vmul.f32 %v7996_v54, %v9699_v9 }
 0xa27   : > { %v8001_v7 = vpop.permute.xlu0 %3329  ;;  %v3164_v49 = vmul.f32 %v7999_v37, %v9695_v2  ;;  %v3134_v1 = vadd.f32 %v7824_v42, %v2993_v40  ;;  %v8030_v9 = vrot.slane %v4467_v22, %v9687_v38  ;;  %v8033_v2 = vrot.slane %v4467_v22, %v9689_v46 }
 0xa28   : > { %9719 = vst [vmem:[#allocation50_spill] sm:$0xff] %v8001_v7  ;;  %2887 = vperm.xlu1 %4834, %v2869_v11   ;;  %2878 = vperm.xlu0 %4835, %v2866_v60   ;;  %v2868_v45 = vmul.f32 %v2866_v60, %v2842_v56  ;;  %v8018_v7 = vrot.slane %v4468_v62, %v9687_v38  ;;  %v4469_v56 = vld [vmem:[%s8985_s6 + $0x40] ss:$8 sm:$0x3] }
 0xa29   : > { %v3135_v36 = vadd.f32 %v7826_v5, %v2994_v25  ;;  %v3211_v11 = vmul.f32 %v7791_v58, %v3163_v24  ;;  %v3212_v5 = vmul.f32 %v7791_v58, %v3164_v49  ;;  %v8048_v40 = vrot.slane %v4469_v56, %v9687_v38 }
 0xa2a   : > { %9720 = vst [vmem:[#allocation31_spill] sm:$0xff] %v8018_v7  ;;  %v2870_v60 = vsub.f32 %v4462_v41, %v2868_v45  ;;  %v8051_v25 = vrot.slane %v4469_v56, %v9689_v46 }
 0xa2b   : > { %v3260_v30 = vpop.permute.xlu0 %3259  ;;  %v8035_v42 = vpop.permute.xlu1 %3689  ;;  %v3227_v45 = vadd.f32 %v3211_v11, %v3134_v1  ;;  %v3228_v24 = vadd.f32 %v3212_v5, %v3135_v36  ;;  %v9725_v5 = vmov 34  }
 0xa2c   : > { %9721 = vst [vmem:[#allocation25_spill] sm:$0xff] %v8035_v42  ;;  %v8040_v62 = vsel %vm703_vm9, %v3244_v26, %v3260_v30  ;;  %v8044_v41 = vsel %vm703_vm9, %v3260_v30, %v3244_v26  ;;  %4837 = vset.pattern.permute.xlu0 %v9696_v28  ;;  %2892 = vperm.xlu1 %4834, %v2870_v60  }
 0xa2d   : > { %9722 = vst [vmem:[#allocation47_spill] sm:$0xff] %v8040_v62  ;;  %9723 = vst [vmem:[#allocation57_spill] sm:$0xff] %v8044_v41  ;;  %v3304_v58 = vmul.f32 %v8030_v9, %v8044_v41  ;;  %v3305_v22 = vmul.f32 %v8033_v2, %v8040_v62  ;;  %3345 = vperm.xlu0 %4837, %v7681_v19   ;;  %v3397_v30 = vmul.f32 %v8018_v7, %v7818_v23 }
 0xa2e   : > { %v3398_v26 = vmul.f32 %v8023_v39, %v7814_v16  ;;  %v3490_v60 = vmul.f32 %v8048_v40, %v8040_v62  ;;  %v3491_v42 = vmul.f32 %v8051_v25, %v8044_v41 }
 0xa2f   : > { %v3352_v49 = vmul.f32 %v7920_v59, %v3304_v58  ;;  %v3353_v56 = vmul.f32 %v7920_v59, %v3305_v22  ;;  %v8068_v18 = vpop.permute.xlu1 %3693  ;;  %v8070_v52 = vpop.permute.xlu0 %3333  ;;  %v3445_v7 = vmul.f32 %v7942_v12, %v3397_v30 }
 0xa30   : > { %9724 = vst [vmem:[#allocation93_spill] sm:$0xff] %v8068_v18  ;;  %4836 = vset.pattern.permute.xlu1 %v9696_v28  ;;  %v3446_v1 = vmul.f32 %v7942_v12, %v3398_v26  ;;  %v3538_v59 = vmul.f32 %v3512_v8, %v3490_v60  ;;  %v3539_v58 = vmul.f32 %v3512_v8, %v3491_v42  ;;  %v4470_v12 = vld [vmem:[%s8985_s6 + $0x41] ss:$8 sm:$0x3] }
 0xa31   : > { %v3368_v36 = vadd.f32 %v3352_v49, %v3227_v45  ;;  %v3369_v11 = vadd.f32 %v3353_v56, %v3228_v24  ;;  %4839 = vset.pattern.permute.xlu0 %v9725_v5  ;;  %3341 = vperm.xlu1 %4836, %v7851_v34   ;;  %v8092_v42 = vrot.slane %v4470_v12, %v9687_v38 }
 0xa32   : > { %3697 = vperm.xlu0 %4839, %v7878_v63   ;;  %v8095_v26 = vrot.slane %v4470_v12, %v9689_v46 }
 0xa33   : > { %v3461_v22 = vadd.f32 %v3445_v7, %v3368_v36  ;;  %v3462_v18 = vadd.f32 %v3446_v1, %v3369_v11  ;;  %v3583_v45 = vmul.f32 %v8092_v42, %v7814_v16  ;;  %v3076_v16 = vmul.f32 %v7807_v61, %v7964_v48 }
 0xa34   : > { %v3205_v62 = vpop.permute.xlu1 %3204  ;;  %v8078_v41 = vpop.permute.xlu0 %3176  ;;  %v3584_v24 = vmul.f32 %v8095_v26, %v7818_v23  ;;  %v3077_v23 = vmul.f32 %v7810_v57, %v7968_v20 }
 0xa35   : > { %9726 = vst [vmem:[#allocation10_spill] sm:$0xff] %v8078_v41  ;;  %4838 = vset.pattern.permute.xlu1 %v9698_v4  ;;  %v3554_v28 = vadd.f32 %v3538_v59, %v3461_v22  ;;  %v3555_v30 = vadd.f32 %v3539_v58, %v3462_v18 }
 0xa36   : > { %4840 = vset.pattern.permute.xlu0 %v9620_v47  ;;  %3519 = vperm.xlu1 %4838, %v7899_v14  }
 0xa37   : > { %3410 = vperm.xlu0 %4840, %v7891_v50  }
 0xa38   : > { %v8087_v8 = vpop.permute.xlu0 %3192 }
 0xa39   : > { %v8089_v7 = vpop.permute.xlu1 %3426 }
 0xa3a   : > { %3523 = vperm.xlu1 %4838, %v7867_v13  }
 0xa3b   : > { %3422 = vperm.xlu0 %4840, %v7884_v0  }
 0xa3c   : > { %v8099_v18 = vpop.permute.xlu0 %3200 }
 0xa3e   : > { %v3605_v49 = vpop.permute.xlu1 %3604  ;;  %4841 = vset.pattern.permute.xlu1 %v9725_v5 }
 0xa3f   : > { %v3631_v56 = vmul.f32 %v3605_v49, %v3583_v45  ;;  %v3632_v60 = vmul.f32 %v3605_v49, %v3584_v24  ;;  %3430 = vperm.xlu0 %4840, %v7867_v13   ;;  %3701 = vperm.xlu1 %4841, %v7884_v0   ;;  %v3003_v45 = vmul.f32 %v7948_v6, %v9701_v33 }
 0xa40   : > { %v3020_v1 = vpop.permute.xlu0 %3019  ;;  %v3124_v24 = vmul.f32 %v7912_v51, %v3076_v16  ;;  %v3125_v49 = vmul.f32 %v7912_v51, %v3077_v23  ;;  %v2999_v51 = vmul.f32 %v7793_v31, %v9704_v32  ;;  %v3000_v23 = vmul.f32 %v7793_v31, %v9697_v3 }
 0xa41   : > { %v8108_v36 = vadd.f32 %v3631_v56, %v3554_v28  ;;  %v8110_v11 = vadd.f32 %v3632_v60, %v3555_v30  ;;  %v3173_v30 = vmul.f32 %v7996_v54, %v9703_v29  ;;  %v3174_v56 = vmul.f32 %v7999_v37, %v9701_v33 }
 0xa42   : > { %v8112_v59 = vpop.permute.xlu1 %3608  ;;  %v8163_v31 = vsel %vm657_vm8, %v7950_v53, %v7952_v10 }
 0xa43   : > { %9727 = vst [vmem:[#allocation48_spill] sm:$0xff] %v8108_v36  ;;  %9728 = vst [vmem:[#allocation49_spill] sm:$0xff] %v8110_v11  ;;  %3438 = vperm.xlu0 %4840, %v7681_v19   ;;  %4842 = vset.pattern.permute.xlu1 %v9620_v47  ;;  %v9733_v36 = vmov 33   ;;  %v3222_v41 = vmul.f32 %v3205_v62, %v3174_v56 }
 0xa44   : > { %9729 = vst [vmem:[#allocation26_spill] sm:$0xff] %v8112_v59  ;;  %3434 = vperm.xlu1 %4842, %v7851_v34   ;;  %v3036_v58 = vpop.permute.xlu0 %3035 }
 0xa45   : > { %v8123_v22 = vsel %vm657_vm8, %v3020_v1, %v3036_v58  ;;  %v8127_v28 = vsel %vm657_vm8, %v3036_v58, %v3020_v1  ;;  %v3004_v1 = vmul.f32 %v7948_v6, %v9703_v29 }
 0xa46   : > { %9730 = vst [vmem:[#allocation83_spill] sm:$0xff] %v8123_v22  ;;  %9731 = vst [vmem:[#allocation69_spill] sm:$0xff] %v8127_v28  ;;  %v3080_v12 = vmul.f32 %v7807_v61, %v8123_v22  ;;  %v3081_v47 = vmul.f32 %v7810_v57, %v8127_v28  ;;  %v3141_v28 = vadd.f32 %v3125_v49, %v3000_v23 }
 0xa47   : > { %v8141_v60 = vpop.permute.xlu1 %3786  ;;  %4843 = vset.pattern.permute.xlu0 %v9698_v4 }
 0xa48   : > { %9732 = vst [vmem:[#allocation84_spill] sm:$0xff] %v8141_v60  ;;  %v3128_v58 = vmul.f32 %v7974_v43, %v3080_v12  ;;  %v3129_v11 = vmul.f32 %v7974_v43, %v3081_v47  ;;  %3515 = vperm.xlu0 %4843, %v7884_v0   ;;  %4844 = vset.pattern.permute.xlu1 %v9733_v36  ;;  %v3250_v16 = vpop.permute.xlu0 %3249 }
 0xa49   : > { %3612 = vperm.xlu1 %4844, %v7899_v14   ;;  %v3221_v60 = vmul.f32 %v3205_v62, %v3173_v30  ;;  %v3169_v43 = vmul.f32 %v7996_v54, %v9697_v3  ;;  %v3170_v12 = vmul.f32 %v7999_v37, %v9704_v32  ;;  %v3140_v47 = vadd.f32 %v3124_v24, %v2999_v51 }
 0xa4a   : > { %v3144_v6 = vadd.f32 %v3128_v58, %v3003_v45  ;;  %v3145_v22 = vadd.f32 %v3129_v11, %v3004_v1  ;;  %v8169_v62 = vsel %vm657_vm8, %v7952_v10, %v7950_v53 }
 0xa4b   : > { %v3018_v59 = vpop.permute.xlu1 %3017  ;;  %v3217_v24 = vmul.f32 %v7938_v44, %v3169_v43  ;;  %v3218_v49 = vmul.f32 %v7938_v44, %v3170_v12  ;;  %v3075_v44 = vmul.f32 %v7810_v57, %v8169_v62  ;;  %v9736_v12 = vmov 35  }
 0xa4c   : > { %3253 = vrot.lane.b32.xlu0 %v9701_v33, %s4990_s19  ;;  %v3266_v11 = vpop.permute.xlu0 %3265  ;;  %v8173_v30 = vadd.f32 %v3221_v60, %v3144_v6  ;;  %v8175_v45 = vadd.f32 %v3222_v41, %v3145_v22  ;;  %v3074_v22 = vmul.f32 %v7807_v61, %v8163_v31  ;;  %v9737_v33 = vld [vmem:[#allocation51_spill] sm:$0xff] }
 0xa4d   : > { %v8181_v56 = vsel %vm703_vm9, %v3250_v16, %v3266_v11  ;;  %v8185_v10 = vsel %vm703_vm9, %v3266_v11, %v3250_v16  ;;  %3616 = vperm.xlu1 %4844, %v7867_v13   ;;  %v3233_v1 = vadd.f32 %v3217_v24, %v3140_v47  ;;  %v3234_v58 = vadd.f32 %v3218_v49, %v3141_v28 }
 0xa4e   : > { %9734 = vst [vmem:[#allocation72_spill] sm:$0xff] %v8181_v56  ;;  %9735 = vst [vmem:[#allocation67_spill] sm:$0xff] %v8185_v10  ;;  %v3310_v53 = vmul.f32 %v8030_v9, %v8185_v10  ;;  %v3311_v41 = vmul.f32 %v8033_v2, %v8181_v56  ;;  %v3172_v47 = vmul.f32 %v7999_v37, %v9706_v27 }
 0xa4f   : > { %v3034_v60 = vpop.permute.xlu1 %3033  ;;  %v3001_v24 = vmul.f32 %v7804_v15, %v9706_v27  ;;  %v3002_v49 = vmul.f32 %v7804_v15, %v9707_v21  ;;  %v3123_v32 = vmul.f32 %v9737_v33, %v3075_v44 }
 0xa50   : > { %v3358_v16 = vmul.f32 %v7979_v55, %v3310_v53  ;;  %v3359_v51 = vmul.f32 %v7979_v55, %v3311_v41  ;;  %v8200_v23 = vsel %vm657_vm8, %v3018_v59, %v3034_v60  ;;  %v8204_v6 = vsel %vm657_vm8, %v3034_v60, %v3018_v59  ;;  %3269 = vrot.lane.b32.xlu0 %v9703_v29, %s4990_s19 }
 0xa51   : > { %v3078_v43 = vmul.f32 %v7807_v61, %v8200_v23  ;;  %v3079_v28 = vmul.f32 %v7810_v57, %v8204_v6  ;;  %4845 = vset.pattern.permute.xlu1 %v9736_v12  ;;  %v3171_v55 = vmul.f32 %v7996_v54, %v9707_v21  ;;  %v3122_v29 = vmul.f32 %v9737_v33, %v3074_v22 }
 0xa52   : > { %3794 = vperm.xlu1 %4845, %v7884_v0   ;;  %v8218_v59 = vadd.f32 %v3358_v16, %v3233_v1  ;;  %v8220_v11 = vadd.f32 %v3359_v51, %v3234_v58  ;;  %v9738_v0 = vld [vmem:[#allocation35_spill] sm:$0xff]  ;;  %v9739_v58 = vld [vmem:[#allocation34_spill] sm:$0xff]  ;;  %v3220_v15 = vmul.f32 %v8099_v18, %v3172_v47 }
 0xa53   : > { %v3126_v53 = vmul.f32 %v7960_v35, %v3078_v43  ;;  %v3127_v41 = vmul.f32 %v7960_v35, %v3079_v28  ;;  %v3248_v60 = vpop.permute.xlu1 %3247  ;;  %v3167_v1 = vmul.f32 %v7996_v54, %v9738_v0  ;;  %v3168_v16 = vmul.f32 %v7999_v37, %v9739_v58  ;;  %v9740_v35 = vld [vmem:[#allocation32_spill] sm:$0xff] }
 0xa54   : > { %3531 = vperm.xlu0 %4843, %v7681_v19   ;;  %v3219_v51 = vmul.f32 %v8099_v18, %v3171_v55  ;;  %v2997_v28 = vmul.f32 %v9740_v35, %v9739_v58  ;;  %v2998_v33 = vmul.f32 %v9740_v35, %v9738_v0  ;;  %v9767_v58 = vld [vmem:[#allocation73_spill] sm:$0xff] }
 0xa55   : > { %v3142_v43 = vadd.f32 %v3126_v53, %v3001_v24  ;;  %v3143_v3 = vadd.f32 %v3127_v41, %v3002_v49  ;;  %v3215_v22 = vmul.f32 %v8087_v8, %v3167_v1  ;;  %v3216_v44 = vmul.f32 %v8087_v8, %v3168_v16 }
 0xa56   : > { %3251 = vrot.lane.b32.xlu1 %v9706_v27, %s4990_s19  ;;  %v3138_v49 = vadd.f32 %v3122_v29, %v2997_v28  ;;  %v3139_v53 = vadd.f32 %v3123_v32, %v2998_v33  ;;  %v3402_v1 = vmul.f32 %v8023_v39, %v8163_v31 }
 0xa57   : > { %v3264_v19 = vpop.permute.xlu1 %3263  ;;  %4846 = vset.pattern.permute.xlu1 %v9698_v4  ;;  %v8246_v55 = vadd.f32 %v3219_v51, %v3142_v43  ;;  %v8248_v18 = vadd.f32 %v3220_v15, %v3143_v3  ;;  %v9745_v3 = vld [vmem:[#allocation31_spill] sm:$0xff] }
 0xa58   : > { %v8252_v47 = vsel %vm703_vm9, %v3248_v60, %v3264_v19  ;;  %v8256_v24 = vsel %vm703_vm9, %v3264_v19, %v3248_v60  ;;  %4848 = vset.pattern.permute.xlu0 %v9733_v36  ;;  %v3401_v41 = vmul.f32 %v9745_v3, %v8169_v62  ;;  %v3231_v60 = vadd.f32 %v3215_v22, %v3138_v49  ;;  %v9747_v49 = vld [vmem:[#allocation74_spill] sm:$0xff] }
 0xa59   : > { %9741 = vst [vmem:[#allocation27_spill] sm:$0xff] %v8246_v55  ;;  %9742 = vst [vmem:[#allocation59_spill] sm:$0xff] %v8248_v18  ;;  %v3308_v8 = vmul.f32 %v8030_v9, %v8256_v24  ;;  %v3309_v4 = vmul.f32 %v8033_v2, %v8252_v47  ;;  %v3232_v16 = vadd.f32 %v3216_v44, %v3139_v53  ;;  %v9746_v44 = vld [vmem:[#allocation53_spill] sm:$0xff] }
 0xa5a   : > { %9743 = vst [vmem:[#allocation85_spill] sm:$0xff] %v8252_v47  ;;  %9744 = vst [vmem:[#allocation90_spill] sm:$0xff] %v8256_v24  ;;  %3267 = vrot.lane.b32.xlu1 %v9707_v21, %s4990_s19  ;;  %v3449_v51 = vmul.f32 %v8089_v7, %v3401_v41  ;;  %v3450_v15 = vmul.f32 %v8089_v7, %v3402_v1  ;;  %v9748_v7 = vld [vmem:[#allocation75_spill] sm:$0xff]  ;;  %v3497_v21 = vmul.f32 %v8051_v25, %v8185_v10 }
 0xa5b   : > { %v3356_v29 = vmul.f32 %v8070_v52, %v3308_v8  ;;  %v3357_v32 = vmul.f32 %v8070_v52, %v3309_v4 }
 0xa5d   : > { %v3372_v43 = vadd.f32 %v3356_v29, %v3231_v60  ;;  %v3373_v35 = vadd.f32 %v3357_v32, %v3232_v16  ;;  %v9749_v60 = vld [vmem:[#allocation77_spill] sm:$0xff]  ;;  %v9750_v29 = vld [vmem:[#allocation54_spill] sm:$0xff] }
 0xa5e   : > { %3527 = vperm.xlu1 %4846, %v7851_v34  }
 0xa5f   : > { %v3465_v28 = vadd.f32 %v3449_v51, %v3372_v43  ;;  %v3466_v33 = vadd.f32 %v3450_v15, %v3373_v35 }
 0xa62   : > { %4847 = vset.pattern.permute.xlu1 %v9725_v5 }
 0xa63   : > { %3705 = vperm.xlu1 %4847, %v7899_v14  }
 0xaa3   : > { %v2874_v22 = vpop.permute.xlu1 %2873 }
 0xaa4   : > { %v2881_v19 = vmul.f32 %v2874_v22, %v9746_v44  ;;  %v2882_v53 = vmul.f32 %v2874_v22, %v9747_v49 }
 0xaa7   : > { %v2888_v52 = vpop.permute.xlu1 %2887  ;;  %v2879_v8 = vpop.permute.xlu0 %2878 }
 0xaa8   : > { %v2895_v4 = vadd.f32 %v2888_v52, %v2881_v19  ;;  %v2896_v41 = vadd.f32 %v2888_v52, %v2882_v53  ;;  %v2883_v1 = vmul.f32 %v2879_v8, %v9748_v7  ;;  %v2884_v16 = vmul.f32 %v2879_v8, %v9749_v60  ;;  %v9753_v19 = vld [vmem:[#allocation17_spill] sm:$0xff] }
 0xaaa   : > { %vm2899_vm3 = vcmp.ge.f32.partialorder %v2895_v4, 0.0  ;;  %vm2900_vm4 = vcmp.ge.f32.partialorder %v2896_v41, 0.0  ;;  %v2913_v32 = vmul.f32 %v9750_v29, %v2895_v4  ;;  %v2914_v51 = vmul.f32 %v9750_v29, %v2896_v41 }
 0xaab   : > { %v2893_v15 = vpop.permute.xlu1 %2892  ;;  %v3494_v29 = vmul.f32 %v8048_v40, %v8252_v47 }
 0xaac   : > { %v2897_v43 = vadd.f32 %v2893_v15, %v2883_v1  ;;  %v2898_v35 = vadd.f32 %v2893_v15, %v2884_v16  ;;  %v8282_v44 = vsel %vm2900_vm4, %v2896_v41, %v2914_v51  ;;  %v8284_v22 = vsel %vm2899_vm3, %v2895_v4, %v2913_v32  ;;  %v8286_v49 = vpop.permute.xlu0 %3345  ;;  %v9756_v41 = vld [vmem:[#allocation55_spill] sm:$0xff]  ;;  %v9757_v1 = vld [vmem:[#allocation20_spill] sm:$0xff] }
 0xaad   : > { %9751 = vst [vmem:[#allocation86_spill] sm:$0xff] %v8282_v44  ;;  %9752 = vst [vmem:[#allocation94_spill] sm:$0xff] %v8284_v22  ;;  %3021 = vrot.lane.b32.xlu0 %v8282_v44, %s4993_s22  ;;  %3005 = vrot.lane.b32.xlu1 %v8284_v22, %s4993_s22  ;;  %v8308_v60 = vsel %vm657_vm8, %v9757_v1, %v9756_v41  ;;  %v8314_v16 = vsel %vm657_vm8, %v9756_v41, %v9757_v1 }
 0xaae   : > { %vm2901_vm5 = vcmp.ge.f32.partialorder %v2897_v43, 0.0  ;;  %v2915_v53 = vmul.f32 %v9753_v19, %v2897_v43  ;;  %v2916_v52 = vmul.f32 %v9753_v19, %v2898_v35  ;;  %vm2902_vm6 = vcmp.ge.f32.partialorder %v2898_v35, 0.0 }
 0xaaf   : > { %v3495_v32 = vmul.f32 %v8051_v25, %v8256_v24  ;;  %v3072_v41 = vmul.f32 %v7807_v61, %v8308_v60  ;;  %v3073_v1 = vmul.f32 %v7810_v57, %v8314_v16  ;;  %v9760_v24 = vld [vmem:[#allocation8_spill] sm:$0xff] }
 0xab0   : > { %v8294_v8 = vpop.permute.xlu1 %3341  ;;  %v8296_v7 = vsel %vm2901_vm5, %v2897_v43, %v2915_v53  ;;  %v8320_v51 = vsel %vm2902_vm6, %v2898_v35, %v2916_v52  ;;  %v3496_v52 = vmul.f32 %v8048_v40, %v8181_v56  ;;  %v9763_v56 = vld [vmem:[#allocation65_spill] sm:$0xff] }
 0xab1   : > { %9754 = vst [vmem:[#allocation19_spill] sm:$0xff] %v8296_v7  ;;  %3239 = vrot.lane.b32.xlu1 %v8284_v22, %s4990_s19  ;;  %3241 = vrot.lane.b32.xlu0 %v8296_v7, %s4990_s19  ;;  %v8302_v4 = vpop.permute.xlu0 %3697  ;;  %9758 = vst [vmem:[#allocation60_spill] sm:$0xff] %v8320_v51 }
 0xab2   : > { %9755 = vst [vmem:[#allocation30_spill] sm:$0xff] %v8302_v4 }
 0xab5   : > { %3255 = vrot.lane.b32.xlu1 %v8282_v44, %s4990_s19  ;;  %v3520_v15 = vpop.permute.xlu1 %3519  ;;  %3257 = vrot.lane.b32.xlu0 %v8320_v51, %s4990_s19 }
 0xab6   : > { %v3542_v43 = vmul.f32 %v3520_v15, %v3494_v29  ;;  %v3543_v19 = vmul.f32 %v3520_v15, %v3495_v32  ;;  %v8326_v53 = vpop.permute.xlu0 %3410 }
 0xab7   : > { %9759 = vst [vmem:[#allocation41_spill] sm:$0xff] %v8326_v53  ;;  %v9762_v53 = vld [vmem:[#allocation71_spill] sm:$0xff] }
 0xab8   : > { %v8332_v27 = vadd.f32 %v3542_v43, %v3465_v28  ;;  %v8334_v35 = vadd.f32 %v3543_v19, %v3466_v33  ;;  %v3120_v28 = vmul.f32 %v9760_v24, %v3072_v41  ;;  %v3121_v33 = vmul.f32 %v9760_v24, %v3073_v1  ;;  %v4471_v43 = vld [vmem:[%s8985_s6 + $0x42] ss:$8 sm:$0x3] }
 0xab9   : > { %v3524_v29 = vpop.permute.xlu1 %3523  ;;  %3620 = vperm.xlu0 %4848, %v7851_v34   ;;  %3007 = vrot.lane.b32.xlu1 %v8296_v7, %s4993_s22  ;;  %v9761_v19 = vld [vmem:[#allocation64_spill] sm:$0xff]  ;;  %v2996_v10 = vmul.f32 %v9762_v53, %v9763_v56  ;;  %v3403_v7 = vmul.f32 %v9745_v3, %v7968_v20  ;;  %v3165_v1 = vmul.f32 %v7996_v54, %v9763_v56 }
 0xaba   : > { %v3544_v32 = vmul.f32 %v3524_v29, %v3496_v52  ;;  %v3545_v15 = vmul.f32 %v3524_v29, %v3497_v21  ;;  %v3423_v47 = vpop.permute.xlu0 %3422  ;;  %v2995_v4 = vmul.f32 %v9762_v53, %v9761_v19  ;;  %v9764_v52 = vld [vmem:[#allocation9_spill] sm:$0xff]  ;;  %v9765_v21 = vld [vmem:[#allocation15_spill] sm:$0xff]  ;;  %v3404_v53 = vmul.f32 %v8023_v39, %v7964_v48 }
 0xabb   : > { %v8358_v41 = vsel %vm703_vm9, %v9765_v21, %v9764_v52  ;;  %v8364_v24 = vsel %vm703_vm9, %v9764_v52, %v9765_v21  ;;  %v3166_v29 = vmul.f32 %v7999_v37, %v9761_v19  ;;  %v8376_v57 = vrot.slane %v4471_v43, %v9687_v38 }
 0xabc   : > { %v3136_v21 = vadd.f32 %v3120_v28, %v2995_v4  ;;  %v3137_v22 = vadd.f32 %v3121_v33, %v2996_v10  ;;  %v3213_v0 = vmul.f32 %v9767_v58, %v3165_v1  ;;  %v3306_v54 = vmul.f32 %v8030_v9, %v8364_v24  ;;  %v9768_v4 = vld [vmem:[#allocation50_spill] sm:$0xff] }
 0xabd   : > { %4849 = vset.pattern.permute.xlu0 %v9736_v12  ;;  %3023 = vrot.lane.b32.xlu1 %v8320_v51, %s4993_s22  ;;  %9766 = vst [vmem:[#allocation43_spill] sm:$0xff] %v8376_v57  ;;  %v3214_v18 = vmul.f32 %v9767_v58, %v3166_v29  ;;  %v3307_v37 = vmul.f32 %v8033_v2, %v8358_v41  ;;  %s4405_s22 = sshll.u32 %s296_s25, 4 }
 0xabe   : > { %v8378_v61 = vpop.permute.xlu1 %3701  ;;  %3782 = vperm.xlu0 %4849, %v7891_v50   ;;  %v3431_v52 = vpop.permute.xlu0 %3430  ;;  %v3399_v38 = vmul.f32 %v9745_v3, %v8314_v16  ;;  %v3400_v50 = vmul.f32 %v8023_v39, %v8308_v60  ;;  %v3354_v58 = vmul.f32 %v9768_v4, %v3306_v54  ;;  %v3406_v1 = vmul.f32 %v8023_v39, %v8200_v23  ;;  %s298_s12 = scalar_lea.vmem [#allocation4], %s4405_s22 }
 0xabf   : > { %v3451_v51 = vmul.f32 %v3431_v52, %v3403_v7  ;;  %v3452_v44 = vmul.f32 %v3431_v52, %v3404_v53  ;;  %v3355_v28 = vmul.f32 %v9768_v4, %v3307_v37  ;;  %v3405_v53 = vmul.f32 %v9745_v3, %v8204_v6  ;;  %s4339_s13 = sshll.u32 %s298_s12, 4  ;;  %s8931_s13 = int_to_ptr.vmem [resolvable:$true] %s4339_s13 }
 0xac0   : > { %v3229_v29 = vadd.f32 %v3213_v0, %v3136_v21  ;;  %v3447_v52 = vmul.f32 %v3423_v47, %v3399_v38  ;;  %v3448_v55 = vmul.f32 %v3423_v47, %v3400_v50  ;;  %v3678_v4 = vmul.f32 %v8376_v57, %v9763_v56  ;;  %v4911_v38 = vld [vmem:[%s8981_s2 + $0x38] sm:$0xff]  ;;  %s4912_s23 = scalar_lea.vmem %s8931_s13, 256 }
 0xac1   : > { %v3467_v10 = vadd.f32 %v3451_v51, %v8218_v59  ;;  %v3468_v7 = vadd.f32 %v3452_v44, %v8220_v11  ;;  %3709 = vperm.xlu1 %4847, %v7867_v13   ;;  %v3230_v59 = vadd.f32 %v3214_v18, %v3137_v22  ;;  %v3492_v0 = vmul.f32 %v8048_v40, %v8358_v41  ;;  %p4913_p11 = scmp.ne.s32.totalorder %s8931_s13, %s4912_s23 }
 0xac2   : > { %3790 = vperm.xlu0 %4849, %v7878_v63   ;;  %v8397_v33 = vpop.permute.xlu0 %3438  ;;  %v8408_v63 = vrot.slane %v4471_v43, %v9689_v46  ;;  %v3370_v18 = vadd.f32 %v3354_v58, %v3229_v29  ;;  %v3493_v47 = vmul.f32 %v8051_v25, %v8364_v24  ;;  %v3585_v56 = vmul.f32 %v8092_v42, %v8308_v60  ;;  %v9769_v58 = vld [vmem:[#allocation26_spill] sm:$0xff] }
 0xac3   : > { %v3435_v51 = vpop.permute.xlu1 %3434  ;;  %v3560_v11 = vadd.f32 %v3544_v32, %v3467_v10  ;;  %v3561_v44 = vadd.f32 %v3545_v15, %v3468_v7  ;;  %v3371_v22 = vadd.f32 %v3355_v28, %v3230_v59  ;;  %v3587_v15 = vmul.f32 %v8092_v42, %v8163_v31  ;;  %p4914_p12 = pnand %p4913_p11, %p5117_p5 }
 0xac4   : > { %v8403_v54 = vmul.f32 %v3435_v51, %v3405_v53  ;;  %v8405_v37 = vmul.f32 %v3435_v51, %v3406_v1  ;;  %v3463_v43 = vadd.f32 %v3447_v52, %v3370_v18  ;;  %v3633_v28 = vmul.f32 %v9769_v58, %v3585_v56 }
 0xac5   : > { %4850 = vset.pattern.permute.xlu1 %v9733_v36  ;;  %v3586_v36 = vmul.f32 %v8095_v26, %v8314_v16  ;;  %v3464_v21 = vadd.f32 %v3448_v55, %v3371_v22  ;;  %v3679_v60 = vmul.f32 %v8408_v63, %v9761_v19  ;;  %v3589_v19 = vmul.f32 %v8092_v42, %v7964_v48  ;;  %p4915_p13 = pneg %p4914_p12 }
 0xac6   : > { %3802 = vperm.xlu0 %4849, %v7867_v13   ;;  %3624 = vperm.xlu1 %4850, %v4911_v38   ;;  %v3588_v13 = vmul.f32 %v8095_v26, %v8169_v62  ;;  %v3590_v51 = vmul.f32 %v8095_v26, %v7968_v20  ;;  %v3726_v52 = vmul.f32 %v8378_v61, %v3678_v4 }
 0xac7   : > { %v3516_v32 = vpop.permute.xlu0 %3515  ;;  %v3634_v16 = vmul.f32 %v9769_v58, %v3586_v36 }
 0xac8   : > { %v3540_v50 = vmul.f32 %v3516_v32, %v3492_v0  ;;  %v3541_v10 = vmul.f32 %v3516_v32, %v3493_v47  ;;  %v3613_v7 = vpop.permute.xlu1 %3612  ;;  %v3727_v0 = vmul.f32 %v8378_v61, %v3679_v60 }
 0xac9   : > { %v3635_v53 = vmul.f32 %v3613_v7, %v3587_v15  ;;  %v3636_v1 = vmul.f32 %v3613_v7, %v3588_v13 }
 0xaca   : > { %v3556_v29 = vadd.f32 %v3540_v50, %v3463_v43  ;;  %v3557_v59 = vadd.f32 %v3541_v10, %v3464_v21  ;;  %3806 = vperm.xlu0 %4849, %v7851_v34   ;;  %4851 = vset.pattern.permute.xlu1 %v9736_v12  ;;  %v9778_v43 = vld [vmem:[#allocation83_spill] sm:$0xff] }
 0xacb   : > { %v8436_v31 = vadd.f32 %v3635_v53, %v8332_v27  ;;  %v8439_v62 = vadd.f32 %v3636_v1, %v8334_v35  ;;  %3798 = vperm.xlu1 %4851, %v7899_v14   ;;  %v3254_v55 = vpop.permute.xlu0 %3253  ;;  %v9774_v14 = vmov 0   ;;  %v3408_v21 = vmul.f32 %v8023_v39, %v9778_v43 }
 0xacc   : > { %v3649_v18 = vadd.f32 %v3633_v28, %v3556_v29  ;;  %v3650_v22 = vadd.f32 %v3634_v16, %v3557_v59  ;;  %v3617_v27 = vpop.permute.xlu1 %3616 }
 0xacd   : > { %9770 = vst [vmem:[#allocation44_spill] sm:$0xff] %v8436_v31  ;;  %9771 = vst [vmem:[#allocation61_spill] sm:$0xff] %v8439_v62  ;;  %v3637_v47 = vmul.f32 %v3617_v27, %v3589_v19  ;;  %v3638_v56 = vmul.f32 %v3617_v27, %v3590_v51  ;;  %v3456_v7 = vmul.f32 %v8397_v33, %v3408_v21  ;;  %v9787_v27 = vld [vmem:[#allocation21_spill] sm:$0xff] }
 0xace   : > { %v8448_v35 = vadd.f32 %v3726_v52, %v3649_v18  ;;  %v8450_v36 = vadd.f32 %v3727_v0, %v3650_v22  ;;  %4854 = vset.pattern.permute.xlu0 %v9774_v14  ;;  %v4472_v18 = vld [vmem:[%s8985_s6 + $0x43] ss:$8 sm:$0x3] }
 0xacf   : > { %v8453_v32 = vadd.f32 %v3637_v47, %v3560_v11  ;;  %v8455_v48 = vadd.f32 %v3638_v56, %v3561_v44  ;;  %4852 = vset.pattern.permute.xlu1 %v9725_v5  ;;  %v3270_v20 = vpop.permute.xlu0 %3269  ;;  %v9777_v5 = vld [vmem:[#allocation69_spill] sm:$0xff]  ;;  %v8521_v47 = vrot.slane %v4472_v18, %v9787_v27  ;;  %v8524_v56 = vrot.slane %v4472_v18, %v9689_v46 }
 0xad0   : > { %9772 = vst [vmem:[#allocation95_spill] sm:$0xff] %v8448_v35  ;;  %9773 = vst [vmem:[#allocation16_spill] sm:$0xff] %v8450_v36  ;;  %v8460_v61 = vsel %vm703_vm9, %v3254_v55, %v3270_v20  ;;  %v8464_v4 = vsel %vm703_vm9, %v3270_v20, %v3254_v55  ;;  %3713 = vperm.xlu1 %4852, %v7851_v34   ;;  %v3407_v13 = vmul.f32 %v9745_v3, %v9777_v5  ;;  %v9784_v55 = vld [vmem:[#allocation59_spill] sm:$0xff] }
 0xad1   : > { %9775 = vst [vmem:[#allocation87_spill] sm:$0xff] %v8453_v32  ;;  %9776 = vst [vmem:[#allocation92_spill] sm:$0xff] %v8455_v48  ;;  %v3314_v15 = vmul.f32 %v8030_v9, %v8464_v4  ;;  %v3315_v11 = vmul.f32 %v8033_v2, %v8460_v61  ;;  %v8471_v44 = vpop.permute.xlu1 %3794  ;;  %v8588_v48 = vmul.f32 %v8092_v42, %v8200_v23 }
 0xad2   : > { %v3455_v34 = vmul.f32 %v8397_v33, %v3407_v13  ;;  %v9793_v13 = vld [vmem:[#allocation62_spill] sm:$0xff] }
 0xad3   : > { %v3362_v50 = vmul.f32 %v8286_v49, %v3314_v15  ;;  %v3363_v10 = vmul.f32 %v8286_v49, %v3315_v11  ;;  %v8516_v22 = vpop.permute.xlu0 %3531  ;;  %v9792_v15 = vld [vmem:[#allocation63_spill] sm:$0xff]  ;;  %v3677_v21 = vmul.f32 %v8408_v63, %v9793_v13  ;;  %v8574_v13 = vmul.f32 %v8092_v42, %v9778_v43 }
 0xad4   : > { %3717 = vperm.xlu1 %4852, %v4911_v38   ;;  %9785 = vst [vmem:[#allocation29_spill] sm:$0xff] %v8516_v22  ;;  %v3676_v11 = vmul.f32 %v8376_v57, %v9792_v15  ;;  %v8592_v43 = vmul.f32 %v8095_v26, %v8204_v6  ;;  %v9818_v6 = vld [vmem:[#allocation60_spill] sm:$0xff] }
 0xad5   : > { %v3378_v58 = vadd.f32 %v3362_v50, %v8173_v30  ;;  %v3379_v28 = vadd.f32 %v3363_v10, %v8175_v45  ;;  %v3252_v60 = vpop.permute.xlu1 %3251  ;;  %9808 = vst [vmem:[#allocation70_spill] sm:$0xff] %v8574_v13 }
 0xad7   : > { %v8483_v53 = vadd.f32 %v3455_v34, %v3378_v58  ;;  %v8485_v1 = vadd.f32 %v3456_v7, %v3379_v28  ;;  %v9794_v34 = vld [vmem:[#allocation37_spill] sm:$0xff]  ;;  %v9796_v7 = vld [vmem:[#allocation36_spill] sm:$0xff]  ;;  %v8548_v28 = vmul.f32 %v8521_v47, %v8364_v24 }
 0xad8   : > { %4853 = vset.pattern.permute.xlu1 %v9736_v12  ;;  %v8540_v46 = vmul.f32 %v8376_v57, %v9794_v34  ;;  %v8544_v58 = vmul.f32 %v8408_v63, %v9796_v7  ;;  %v9803_v24 = vld [vmem:[#allocation76_spill] sm:$0xff] }
 0xad9   : > { %9779 = vst [vmem:[#allocation88_spill] sm:$0xff] %v8483_v53  ;;  %9780 = vst [vmem:[#allocation91_spill] sm:$0xff] %v8485_v1  ;;  %v3268_v16 = vpop.permute.xlu1 %3267  ;;  %3810 = vperm.xlu1 %4853, %v4911_v38   ;;  %v9783_v38 = vld [vmem:[#allocation27_spill] sm:$0xff] }
 0xada   : > { %v8490_v49 = vsel %vm703_vm9, %v3252_v60, %v3268_v16  ;;  %v8494_v33 = vsel %vm703_vm9, %v3268_v16, %v3252_v60  ;;  %9795 = vst [vmem:[#allocation96_spill] sm:$0xff] %v8540_v46  ;;  %9797 = vst [vmem:[#allocation97_spill] sm:$0xff] %v8544_v58  ;;  %v8552_v60 = vmul.f32 %v8524_v56, %v8358_v41 }
 0xadb   : > { %9781 = vst [vmem:[#allocation89_spill] sm:$0xff] %v8490_v49  ;;  %9782 = vst [vmem:[#allocation42_spill] sm:$0xff] %v8494_v33  ;;  %v3312_v30 = vmul.f32 %v8030_v9, %v8494_v33  ;;  %v3313_v45 = vmul.f32 %v8033_v2, %v8490_v49  ;;  %v3498_v36 = vmul.f32 %v8048_v40, %v8490_v49 }
 0xadc   : > { %v3499_v35 = vmul.f32 %v8051_v25, %v8494_v33 }
 0xadd   : > { %v3360_v29 = vmul.f32 %v8294_v8, %v3312_v30  ;;  %v3361_v12 = vmul.f32 %v8294_v8, %v3313_v45  ;;  %4855 = vset.pattern.permute.xlu1 %v9774_v14  ;;  %v8511_v0 = vpop.permute.xlu1 %3527  ;;  %v9790_v14 = vld [vmem:[#allocation34_spill] sm:$0xff] }
 0xade   : > { %v8532_v20 = vmul.f32 %v8408_v63, %v9790_v14  ;;  %v9798_v45 = vld [vmem:[#allocation86_spill] sm:$0xff]  ;;  %v9806_v14 = vld [vmem:[#allocation47_spill] sm:$0xff] }
 0xadf   : > { %v3376_v59 = vadd.f32 %v3360_v29, %v9783_v38  ;;  %v3377_v19 = vadd.f32 %v3361_v12, %v9784_v55  ;;  %v9799_v29 = vld [vmem:[#allocation18_spill] sm:$0xff]  ;;  %v8570_v15 = vmul.f32 %v8524_v56, %v9806_v14 }
 0xae0   : > { %9791 = vst [vmem:[#allocation23_spill] sm:$0xff] %v8532_v20  ;;  %v3159_v12 = vmul.f32 %v9799_v29, %v9798_v45  ;;  %v9800_v38 = vld [vmem:[#allocation94_spill] sm:$0xff]  ;;  %v3161_v1 = vmul.f32 %v9799_v29, %v9818_v6 }
 0xae1   : > { %v8506_v51 = vadd.f32 %v8403_v54, %v3376_v59  ;;  %v8509_v52 = vadd.f32 %v8405_v37, %v3377_v19  ;;  %v9788_v54 = vld [vmem:[#allocation35_spill] sm:$0xff]  ;;  %v9801_v59 = vld [vmem:[#allocation38_spill] sm:$0xff]  ;;  %v9802_v19 = vld [vmem:[#allocation52_spill] sm:$0xff]  ;;  %9807 = vst [vmem:[#allocation58_spill] sm:$0xff] %v8570_v15 }
 0xae2   : > { %v8518_v8 = vpop.permute.xlu1 %3705  ;;  %v8528_v37 = vmul.f32 %v8376_v57, %v9788_v54  ;;  %v3160_v55 = vmul.f32 %v9801_v59, %v9800_v38  ;;  %v9804_v54 = vld [vmem:[#allocation57_spill] sm:$0xff] }
 0xae3   : > { %9786 = vst [vmem:[#allocation45_spill] sm:$0xff] %v8518_v8  ;;  %v8566_v41 = vmul.f32 %v8521_v47, %v9804_v54  ;;  %v9811_v54 = vld [vmem:[#allocation66_spill] sm:$0xff]  ;;  %v9817_v8 = vld [vmem:[#allocation19_spill] sm:$0xff] }
 0xae4   : > { %9789 = vst [vmem:[#allocation46_spill] sm:$0xff] %v8528_v37  ;;  %v3162_v37 = vmul.f32 %v9801_v59, %v9817_v8 }
 0xae5   : > { %9805 = vst [vmem:[#allocation28_spill] sm:$0xff] %v8566_v41 }
 0xb1f   : > { %v3006_v50 = vpop.permute.xlu1 %3005  ;;  %v3022_v10 = vpop.permute.xlu0 %3021 }
 0xb20   : > { %v3037_v16 = vsel %vm657_vm8, %v3006_v50, %v3022_v10  ;;  %v3045_v30 = vsel %vm657_vm8, %v3022_v10, %v3006_v50  ;;  %v8578_v50 = vmul.f32 %v8095_v26, %v9777_v5  ;;  %v9810_v10 = vld [vmem:[#allocation7_spill] sm:$0xff] }
 0xb21   : > { %v3066_v18 = vmul.f32 %v9802_v19, %v3037_v16  ;;  %v3067_v27 = vmul.f32 %v9803_v24, %v3045_v30  ;;  %v2989_v34 = vmul.f32 %v9810_v10, %v9800_v38  ;;  %v2990_v7 = vmul.f32 %v9810_v10, %v9798_v45  ;;  %v9812_v5 = vld [vmem:[#allocation67_spill] sm:$0xff] }
 0xb22   : > { %9809 = vst [vmem:[#allocation40_spill] sm:$0xff] %v8578_v50  ;;  %v8596_v20 = vmul.f32 %v8521_v47, %v9812_v5  ;;  %v9814_v50 = vld [vmem:[#allocation72_spill] sm:$0xff]  ;;  %v3672_v5 = vmul.f32 %v8376_v57, %v9798_v45 }
 0xb23   : > { %v3114_v62 = vmul.f32 %v9811_v54, %v3066_v18  ;;  %v3115_v31 = vmul.f32 %v9811_v54, %v3067_v27  ;;  %v3240_v14 = vpop.permute.xlu1 %3239  ;;  %v8600_v10 = vmul.f32 %v8524_v56, %v9814_v50  ;;  %v3242_v27 = vpop.permute.xlu0 %3241  ;;  %v9816_v54 = vld [vmem:[#allocation10_spill] sm:$0xff]  ;;  %v3673_v50 = vmul.f32 %v8408_v63, %v9800_v38 }
 0xb24   : > { %9813 = vst [vmem:[#allocation22_spill] sm:$0xff] %v8596_v20  ;;  %v3207_v32 = vmul.f32 %v9816_v54, %v3159_v12  ;;  %v3208_v23 = vmul.f32 %v9816_v54, %v3160_v55  ;;  %v3394_v54 = vmul.f32 %v8023_v39, %v3037_v16 }
 0xb25   : > { %9815 = vst [vmem:[#allocation51_spill] sm:$0xff] %v8600_v10  ;;  %v3130_v18 = vadd.f32 %v3114_v62, %v2989_v34  ;;  %v3131_v13 = vadd.f32 %v3115_v31, %v2990_v7  ;;  %v9819_v10 = vld [vmem:[#allocation30_spill] sm:$0xff]  ;;  %v8615_v31 = vmul.f32 %v8376_v57, %v9818_v6  ;;  %v3393_v7 = vmul.f32 %v9745_v3, %v3045_v30 }
 0xb26   : > { %v3724_v62 = vmul.f32 %v9819_v10, %v3676_v11  ;;  %v8618_v59 = vmul.f32 %v9819_v10, %v3677_v21  ;;  %v9820_v11 = vld [vmem:[#allocation39_spill] sm:$0xff] }
 0xb27   : > { %v3256_v12 = vpop.permute.xlu1 %3255  ;;  %v3223_v55 = vadd.f32 %v3207_v32, %v3130_v18  ;;  %v3224_v34 = vadd.f32 %v3208_v23, %v3131_v13  ;;  %v2992_v38 = vmul.f32 %v9820_v11, %v9818_v6  ;;  %v9821_v13 = vld [vmem:[#allocation33_spill] sm:$0xff]  ;;  %v2991_v18 = vmul.f32 %v9820_v11, %v9817_v8  ;;  %v9823_v6 = vld [vmem:[#allocation80_spill] sm:$0xff]  ;;  %v3258_v15 = vpop.permute.xlu0 %3257 }
 0xb28   : > { %v8622_v29 = vsel %vm703_vm9, %v3240_v14, %v3256_v12  ;;  %v8626_v45 = vsel %vm703_vm9, %v3256_v12, %v3240_v14  ;;  %v3209_v10 = vmul.f32 %v9821_v13, %v3161_v1  ;;  %v3210_v14 = vmul.f32 %v9821_v13, %v3162_v37  ;;  %v9822_v23 = vld [vmem:[#allocation25_spill] sm:$0xff]  ;;  %v9824_v1 = vld [vmem:[#allocation48_spill] sm:$0xff] }
 0xb29   : > { %v3300_v32 = vmul.f32 %v8030_v9, %v8626_v45  ;;  %v3301_v21 = vmul.f32 %v8033_v2, %v8622_v29  ;;  %v3720_v12 = vmul.f32 %v9822_v23, %v3672_v5  ;;  %v3486_v53 = vmul.f32 %v8048_v40, %v8622_v29 }
 0xb2a   : > { %v3487_v58 = vmul.f32 %v8051_v25, %v8626_v45  ;;  %v8648_v46 = vadd.f32 %v3724_v62, %v9824_v1  ;;  %v3579_v11 = vmul.f32 %v8092_v42, %v3037_v16  ;;  %v3580_v37 = vmul.f32 %v8095_v26, %v3045_v30 }
 0xb2b   : > { %v3348_v57 = vmul.f32 %v9823_v6, %v3300_v32  ;;  %v3349_v20 = vmul.f32 %v9823_v6, %v3301_v21  ;;  %v3008_v41 = vpop.permute.xlu1 %3007  ;;  %v3721_v5 = vmul.f32 %v9822_v23, %v3673_v50  ;;  %v9825_v32 = vld [vmem:[#allocation41_spill] sm:$0xff]  ;;  %v3272_v62 = vsel %vm703_vm9, %v3242_v27, %v3258_v15  ;;  %v9826_v23 = vld [vmem:[#allocation78_spill] sm:$0xff] }
 0xb2c   : > { %v3441_v13 = vmul.f32 %v9825_v32, %v3393_v7  ;;  %v3442_v21 = vmul.f32 %v9825_v32, %v3394_v54  ;;  %v3280_v16 = vsel %vm703_vm9, %v3258_v15, %v3242_v27  ;;  %v3534_v7 = vmul.f32 %v9826_v23, %v3486_v53 }
 0xb2d   : > { %v3364_v6 = vadd.f32 %v3348_v57, %v3223_v55  ;;  %v3365_v22 = vadd.f32 %v3349_v20, %v3224_v34  ;;  %v3535_v54 = vmul.f32 %v9826_v23, %v3487_v58  ;;  %v9827_v20 = vld [vmem:[#allocation24_spill] sm:$0xff]  ;;  %v3500_v53 = vmul.f32 %v8048_v40, %v8460_v61 }
 0xb2e   : > { %v3627_v55 = vmul.f32 %v9827_v20, %v3579_v11  ;;  %v3628_v34 = vmul.f32 %v9827_v20, %v3580_v37  ;;  %v3302_v58 = vmul.f32 %v8030_v9, %v3280_v16  ;;  %v3303_v27 = vmul.f32 %v8033_v2, %v3272_v62  ;;  %v9828_v37 = vld [vmem:[#allocation82_spill] sm:$0xff]  ;;  %v9830_v20 = vld [vmem:[#allocation81_spill] sm:$0xff] }
 0xb2f   : > { %v3457_v30 = vadd.f32 %v3441_v13, %v3364_v6  ;;  %v3458_v50 = vadd.f32 %v3442_v21, %v3365_v22  ;;  %v3024_v57 = vpop.permute.xlu1 %3023  ;;  %v3675_v11 = vmul.f32 %v8408_v63, %v9817_v8 }
 0xb30   : > { %v3038_v1 = vsel %vm657_vm8, %v3008_v41, %v3024_v57  ;;  %v3046_v32 = vsel %vm657_vm8, %v3024_v57, %v3008_v41  ;;  %v3488_v57 = vmul.f32 %v8048_v40, %v3272_v62  ;;  %vm3848_vm8 = vcmask 523264  }
 0xb31   : > { %v3550_v49 = vadd.f32 %v3534_v7, %v3457_v30  ;;  %v3551_v33 = vadd.f32 %v3535_v54, %v3458_v50  ;;  %v3068_v15 = vmul.f32 %v9802_v19, %v3038_v1  ;;  %v3069_v22 = vmul.f32 %v9803_v24, %v3046_v32 }
 0xb32   : > { %v3546_v19 = vmul.f32 %v8511_v0, %v3498_v36  ;;  %v3547_v24 = vmul.f32 %v8511_v0, %v3499_v35  ;;  %v3395_v30 = vmul.f32 %v9745_v3, %v3046_v32  ;;  %v3396_v50 = vmul.f32 %v8023_v39, %v3038_v1 }
 0xb33   : > { %v3116_v13 = vmul.f32 %v9828_v37, %v3068_v15  ;;  %v3117_v41 = vmul.f32 %v9828_v37, %v3069_v22  ;;  %v3643_v21 = vadd.f32 %v3627_v55, %v3550_v49  ;;  %v3644_v6 = vadd.f32 %v3628_v34, %v3551_v33  ;;  %v9829_v33 = vld [vmem:[#allocation56_spill] sm:$0xff] }
 0xb34   : > { %v3562_v8 = vadd.f32 %v3546_v19, %v8506_v51  ;;  %v3563_v54 = vadd.f32 %v3547_v24, %v8509_v52  ;;  %v3489_v49 = vmul.f32 %v8051_v25, %v3280_v16  ;;  %v3350_v36 = vmul.f32 %v9829_v33, %v3302_v58 }
 0xb35   : > { %v3132_v9 = vadd.f32 %v3116_v13, %v2991_v18  ;;  %v3133_v23 = vadd.f32 %v3117_v41, %v2992_v38  ;;  %v3736_v2 = vadd.f32 %v3720_v12, %v3643_v21  ;;  %v3737_v7 = vadd.f32 %v3721_v5, %v3644_v6  ;;  %v9833_v21 = vld [vmem:[#allocation49_spill] sm:$0xff] }
 0xb36   : > { %v3351_v35 = vmul.f32 %v9829_v33, %v3303_v27  ;;  %v3443_v39 = vmul.f32 %v9830_v20, %v3395_v30  ;;  %v3444_v38 = vmul.f32 %v9830_v20, %v3396_v50  ;;  %v3581_v18 = vmul.f32 %v8092_v42, %v3038_v1  ;;  %v9832_v27 = vld [vmem:[#allocation68_spill] sm:$0xff] }
 0xb37   : > { %v3225_v0 = vadd.f32 %v3209_v10, %v3132_v9  ;;  %v3226_v3 = vadd.f32 %v3210_v14, %v3133_v23  ;;  %v3582_v51 = vmul.f32 %v8095_v26, %v3046_v32  ;;  %v3819_v34 = vmul.f32 %v8471_v44, %v8548_v28  ;;  %v9831_v14 = vld [vmem:[#allocation79_spill] sm:$0xff]  ;;  %v9838_v33 = vld [vmem:[#allocation84_spill] sm:$0xff] }
 0xb38   : > { %v3621_v12 = vpop.permute.xlu0 %3620  ;;  %v3820_v10 = vmul.f32 %v8471_v44, %v8552_v60  ;;  %v3536_v15 = vmul.f32 %v9831_v14, %v3488_v57  ;;  %v3537_v22 = vmul.f32 %v9831_v14, %v3489_v49  ;;  %v3765_v28 = vmul.f32 %v8521_v47, %v8626_v45  ;;  %v9835_v9 = vld [vmem:[#allocation95_spill] sm:$0xff]  ;;  %v9837_v57 = vld [vmem:[#allocation29_spill] sm:$0xff] }
 0xb39   : > { %v3366_v52 = vadd.f32 %v3350_v36, %v3225_v0  ;;  %v3367_v5 = vadd.f32 %v3351_v35, %v3226_v3  ;;  %v3639_v40 = vmul.f32 %v3621_v12, %v8588_v48  ;;  %v3640_v55 = vmul.f32 %v3621_v12, %v8592_v43  ;;  %v9839_v0 = vld [vmem:[#allocation96_spill] sm:$0xff]  ;;  %v9844_v14 = vld [vmem:[#allocation91_spill] sm:$0xff] }
 0xb3a   : > { %v3767_v48 = vmul.f32 %v8521_v47, %v3280_v16  ;;  %v3768_v43 = vmul.f32 %v8524_v56, %v3272_v62  ;;  %v3766_v44 = vmul.f32 %v8524_v56, %v8622_v29  ;;  %v3629_v37 = vmul.f32 %v9832_v27, %v3581_v18  ;;  %v9834_v62 = vld [vmem:[#allocation93_spill] sm:$0xff] }
 0xb3b   : > { %v3459_v42 = vadd.f32 %v3443_v39, %v3366_v52  ;;  %v3460_v1 = vadd.f32 %v3444_v38, %v3367_v5  ;;  %v8703_v26 = vadd.f32 %v3639_v40, %v3562_v8  ;;  %v8705_v32 = vadd.f32 %v3640_v55, %v3563_v54  ;;  %v9836_v8 = vld [vmem:[#allocation16_spill] sm:$0xff] }
 0xb3c   : > { %v3630_v13 = vmul.f32 %v9832_v27, %v3582_v51  ;;  %v3741_v6 = vadd.f32 %v8618_v59, %v9833_v21  ;;  %v3501_v16 = vmul.f32 %v8051_v25, %v8464_v4  ;;  %v3722_v19 = vmul.f32 %v9834_v62, %v8615_v31  ;;  %v9841_v51 = vld [vmem:[#allocation58_spill] sm:$0xff] }
 0xb3d   : > { %v3552_v60 = vadd.f32 %v3536_v15, %v3459_v42  ;;  %v3553_v58 = vadd.f32 %v3537_v22, %v3460_v1  ;;  %v3783_v41 = vpop.permute.xlu0 %3782  ;;  %v3723_v50 = vmul.f32 %v9834_v62, %v3675_v11  ;;  %v3835_v23 = vadd.f32 %v3819_v34, %v9835_v9  ;;  %v9840_v11 = vld [vmem:[#allocation28_spill] sm:$0xff]  ;;  %v9845_v1 = vld [vmem:[#allocation46_spill] sm:$0xff] }
 0xb3e   : > { %v3813_v45 = vmul.f32 %v3783_v41, %v3765_v28  ;;  %v3814_v29 = vmul.f32 %v3783_v41, %v3766_v44  ;;  %v3836_v54 = vadd.f32 %v3820_v10, %v9836_v8  ;;  %v3548_v49 = vmul.f32 %v9837_v57, %v3500_v53  ;;  %v9842_v53 = vld [vmem:[#allocation97_spill] sm:$0xff]  ;;  %v9843_v34 = vld [vmem:[#allocation88_spill] sm:$0xff]  ;;  %v9847_v28 = vld [vmem:[#allocation87_spill] sm:$0xff] }
 0xb3f   : > { %v3645_v24 = vadd.f32 %v3629_v37, %v3552_v60  ;;  %v3646_v30 = vadd.f32 %v3630_v13, %v3553_v58  ;;  %v3815_v59 = vmul.f32 %v9838_v33, %v3767_v48  ;;  %v3816_v25 = vmul.f32 %v9838_v33, %v3768_v43  ;;  %v9846_v48 = vld [vmem:[#allocation45_spill] sm:$0xff]  ;;  %v9848_v37 = vld [vmem:[#allocation70_spill] sm:$0xff]  ;;  %v9849_v41 = vld [vmem:[#allocation40_spill] sm:$0xff] }
 0xb40   : > { %v3710_v36 = vpop.permute.xlu1 %3709  ;;  %v3549_v39 = vmul.f32 %v9837_v57, %v3501_v16  ;;  %v3829_v38 = vadd.f32 %v3813_v45, %v3736_v2  ;;  %v3830_v5 = vadd.f32 %v3814_v29, %v3737_v7  ;;  %v3564_v10 = vadd.f32 %v3548_v49, %v9843_v34  ;;  %v9850_v16 = vld [vmem:[#allocation22_spill] sm:$0xff]  ;;  %v9855_v33 = vld [vmem:[#allocation85_spill] sm:$0xff] }
 0xb41   : > { %v3738_v35 = vadd.f32 %v3722_v19, %v3645_v24  ;;  %v3730_v31 = vmul.f32 %v3710_v36, %v9839_v0  ;;  %v3791_v3 = vpop.permute.xlu0 %3790  ;;  %v3739_v20 = vadd.f32 %v3723_v50, %v3646_v30  ;;  %v3731_v40 = vmul.f32 %v3710_v36, %v9842_v53  ;;  %v9851_v19 = vld [vmem:[#allocation23_spill] sm:$0xff]  ;;  %v9854_v57 = vld [vmem:[#allocation90_spill] sm:$0xff]  ;;  %v9857_v0 = vld [vmem:[#allocation61_spill] sm:$0xff] }
 0xb42   : > { %v3817_v18 = vmul.f32 %v3791_v3, %v9840_v11  ;;  %v3818_v12 = vmul.f32 %v3791_v3, %v9841_v51  ;;  %v3565_v15 = vadd.f32 %v3549_v39, %v9844_v14  ;;  %v3728_v43 = vmul.f32 %v9846_v48, %v9845_v1  ;;  %v9853_v24 = vld [vmem:[#allocation51_spill] sm:$0xff]  ;;  %v9858_v51 = vld [vmem:[#allocation12_spill] sm:$0xff]  ;;  %v9861_v34 = vld [vmem:[#allocation14_spill] sm:$0xff] }
 0xb43   : > { %v3831_v52 = vadd.f32 %v3815_v59, %v3738_v35  ;;  %v3832_v55 = vadd.f32 %v3816_v25, %v3739_v20  ;;  %v3746_v44 = vadd.f32 %v3730_v31, %v9847_v28  ;;  %v3773_v49 = vmul.f32 %v8521_v47, %v9854_v57  ;;  %v9856_v25 = vld [vmem:[#allocation44_spill] sm:$0xff]  ;;  %v9862_v14 = vld [vmem:[#allocation13_spill] sm:$0xff] }
 0xb44   : > { %v3833_v22 = vadd.f32 %v3817_v18, %v8648_v46  ;;  %v3834_v42 = vadd.f32 %v3818_v12, %v3741_v6  ;;  %v3729_v46 = vmul.f32 %v9846_v48, %v9851_v19  ;;  %v9852_v6 = vld [vmem:[#allocation92_spill] sm:$0xff]  ;;  %v3774_v59 = vmul.f32 %v8524_v56, %v9855_v33  ;;  %v9859_v12 = vld [vmem:[#allocation43_spill] sm:$0xff]  ;;  %v9864_v28 = vld [vmem:[#allocation89_spill] sm:$0xff] }
 0xb45   : > { %v4562_v2 = vpack.c.bf16 %v3831_v52, %v3829_v38  ;;  %v3625_v60 = vpop.permute.xlu1 %3624  ;;  %v3803_v58 = vpop.permute.xlu0 %3802  ;;  %v4560_v27 = vpack.c.bf16 %v3832_v55, %v3830_v5  ;;  %v3747_v45 = vadd.f32 %v3731_v40, %v9852_v6  ;;  %v3744_v35 = vadd.f32 %v3728_v43, %v9856_v25  ;;  %v9860_v5 = vld [vmem:[#allocation11_spill] sm:$0xff]  ;;  %v9863_v43 = vld [vmem:[#allocation42_spill] sm:$0xff] }
 0xb46   : > { %v4566_v7 = vpack.c.bf16 %v3835_v23, %v3833_v22  ;;  %v3641_v13 = vmul.f32 %v3625_v60, %v9848_v37  ;;  %v3642_v21 = vmul.f32 %v3625_v60, %v9849_v41  ;;  %v3823_v62 = vmul.f32 %v3803_v58, %v9850_v16 }
 0xb47   : > { %v3824_v30 = vmul.f32 %v3803_v58, %v9853_v24  ;;  %4561 = vmatprep.subr.bf16.mxu1 %v4560_v27  ;;  %v4564_v29 = vpack.c.bf16 %v3836_v54, %v3834_v42  ;;  %v3745_v31 = vadd.f32 %v3729_v46, %v9857_v0  ;;  %v3684_v52 = vmul.f32 %v9859_v12, %v9858_v51 }
 0xb48   : > { %v3657_v50 = vadd.f32 %v3641_v13, %v3564_v10  ;;  %v3658_v9 = vadd.f32 %v3642_v21, %v3565_v15  ;;  %v3839_v8 = vadd.f32 %v3823_v62, %v3746_v44  ;;  %4563 = vmatpush1.bf16.msra.mxu1 %v4562_v2  ;;  %v3685_v53 = vmul.f32 %v8408_v63, %v9860_v5 }
 0xb49   : > { %v3840_v23 = vadd.f32 %v3824_v30, %v3747_v45  ;;  %4565 = vmatprep.subr.bf16.mxu1 %v4564_v29  ;;  %v3686_v10 = vmul.f32 %v9859_v12, %v9861_v34  ;;  %v3687_v15 = vmul.f32 %v8408_v63, %v9862_v14  ;;  %v3807_v42 = vpop.permute.xlu0 %3806  ;;  %v3777_v2 = vmul.f32 %v8521_v47, %v9863_v43  ;;  %v4480_v43 = vld [vmem:[%s8984_s5 + $0xd8] sm:$0xff] }
 0xb4a   : > { %v3799_v36 = vpop.permute.xlu1 %3798  ;;  %v3778_v44 = vmul.f32 %v8524_v56, %v9864_v28  ;;  %v3779_v27 = vmul.f32 %v8521_v47, %v8464_v4  ;;  %v3780_v63 = vmul.f32 %v8524_v56, %v8460_v61  ;;  %v4473_v4 = vld [vmem:[%s8982_s3 + $0x30] sm:$0xff]  ;;  %v9865_v61 = vmov 0.0   ;;  %v4474_v47 = vld [vmem:[%s8982_s3 + $0x38] sm:$0xff]  ;;  %v4482_v28 = vld [vmem:[%s8984_s5 + $0xe8] sm:$0xff] }
 0xb4b   : > { %v3821_v3 = vmul.f32 %v3799_v36, %v3773_v49  ;;  %v3822_v20 = vmul.f32 %v3799_v36, %v3774_v59  ;;  %v4481_v36 = vld [vmem:[%s8984_s5 + $0xe0] sm:$0xff] }
 0xb4c   : > { %4567 = vmatpush1.bf16.msra.mxu1 %v4566_v7  ;;  %v3825_v7 = vmul.f32 %v3807_v42, %v3777_v2  ;;  %v3826_v37 = vmul.f32 %v3807_v42, %v3778_v44  ;;  %v4479_v42 = vld [vmem:[%s8984_s5 + $0xd0] sm:$0xff] }
 0xb4d   : > { %v3837_v54 = vadd.f32 %v3821_v3, %v3744_v35  ;;  %v3838_v39 = vadd.f32 %v3822_v20, %v3745_v31 }
 0xb4f   : > { %v4570_v38 = vpack.c.bf16 %v3839_v8, %v3837_v54  ;;  %v3714_v11 = vpop.permute.xlu1 %3713  ;;  %v4568_v18 = vpack.c.bf16 %v3840_v23, %v3838_v39 }
 0xb50   : > { %v3732_v40 = vmul.f32 %v3714_v11, %v3684_v52  ;;  %v3733_v55 = vmul.f32 %v3714_v11, %v3685_v53 }
 0xb51   : > { %4569 = vmatprep.subr.bf16.mxu1 %v4568_v18 }
 0xb52   : > { %4571 = vmatpush1.bf16.msra.mxu1 %v4570_v38  ;;  %v3748_v60 = vadd.f32 %v3732_v40, %v8703_v26  ;;  %v3749_v58 = vadd.f32 %v3733_v55, %v8705_v32  ;;  %v4477_v40 = vld [vmem:[%s8984_s5 + $0xc0] sm:$0xff] }
 0xb53   : > { %v3718_v22 = vpop.permute.xlu1 %3717 }
 0xb54   : > { %v3734_v1 = vmul.f32 %v3718_v22, %v3686_v10  ;;  %v3735_v48 = vmul.f32 %v3718_v22, %v3687_v15  ;;  %v3841_v19 = vadd.f32 %v3825_v7, %v3748_v60  ;;  %v3842_v46 = vadd.f32 %v3826_v37, %v3749_v58  ;;  %v4478_v10 = vld [vmem:[%s8984_s5 + $0xc8] sm:$0xff] }
 0xb56   : > { %v3750_v41 = vadd.f32 %v3734_v1, %v3657_v50  ;;  %v3751_v21 = vadd.f32 %v3735_v48, %v3658_v9 }
 0xb58   : > { %v3811_v13 = vpop.permute.xlu1 %3810 }
 0xb59   : > { %v3827_v16 = vmul.f32 %v3811_v13, %v3779_v27  ;;  %v3828_v62 = vmul.f32 %v3811_v13, %v3780_v63 }
 0xb5b   : > { %v3843_v6 = vadd.f32 %v3827_v16, %v3750_v41  ;;  %v3844_v45 = vadd.f32 %v3828_v62, %v3751_v21 }
 0xb5d   : > { %v4574_v26 = vpack.c.bf16 %v3843_v6, %v3841_v19  ;;  %v4572_v24 = vpack.c.bf16 %v3844_v45, %v3842_v46 }
 0xb5f   : > { %4573 = vmatprep.subr.bf16.mxu1 %v4572_v24 }
 0xb60   : > { %4575 = vmatpush1.bf16.msra.mxu1 %v4574_v26 }
 0xb63   : > { %4475 = vmatmul.mubr.msk.f32.vlgmr.msra.gmra.mrb[8].mxu1 %vm3848_vm8, %v4473_v4 }
 0xb64   : > { %3925 = vmatprep.mubr.f32.mxu1 %v9865_v61 }
 0xb67   : > { %4476 = vmatmul.mubr.msk.f32.gmra.mrb[10].mxu1 %vm3848_vm8, %v4474_v47 }
 0xb68   : > { %4124 = vmatprep.mubr.f32.mxu1 %v9865_v61 }
 0xc36   : > { %v3921_v56 = vpop.f32.mrb[8].mxu1 }
 0xc37   : > { %v3949_v32 = vmul.f32 %v3921_v56, %v3921_v56  ;;  %v3923_v30 = vpop.f32.mrb[9].mxu1 }
 0xc38   : > { %v3941_v29 = vadd.f32 %v3923_v30, %v3921_v56  ;;  %v3950_v50 = vmul.f32 %v3923_v30, %v3923_v30 }
 0xc3a   : > { %3942 = vadd.xlane.f32.xlu0 %v3941_v29  ;;  %v3927_v9 = vpop.f32.mrb[10].mxu1  ;;  %v3953_v8 = vadd.f32 %v3950_v50, %v3949_v32 }
 0xc3b   : > { %v3951_v23 = vmul.f32 %v3927_v9, %v3927_v9  ;;  %v3929_v57 = vpop.f32.mrb[11].mxu1 }
 0xc3c   : > { %v3944_v49 = vadd.f32 %v3929_v57, %v3927_v9  ;;  %v3952_v33 = vmul.f32 %v3929_v57, %v3929_v57 }
 0xc3e   : > { %3954 = vadd.xlane.f32.xlu0 %v3953_v8  ;;  %3945 = vadd.xlane.f32.xlu1 %v3944_v49  ;;  %v3956_v59 = vadd.f32 %v3952_v33, %v3951_v23  ;;  %v4153_v8 = vld [vmem:[%s8986_s7 + $0x80] sm:$0xff]  ;;  %v4154_v23 = vld [vmem:[%s8986_s7 + $0x88] sm:$0xff] }
 0xc3f   : > { %v4588_v49 = vpack.c.bf16 %v4154_v23, %v4153_v8  ;;  %v4138_v33 = vld [vmem:[%s8986_s7 + $0x8] sm:$0xff] }
 0xc41   : > { %4589 = vmatprep.subr.bf16.mxu0 %v4588_v49 }
 0xc42   : > { %3957 = vadd.xlane.f32.xlu0 %v3956_v59  ;;  %v4155_v59 = vld [vmem:[%s8986_s7 + $0x90] sm:$0xff] }
 0xc4f   : > { %4011 = vperm.xlu1 %4855, %v4481_v36   ;;  %v4156_v36 = vld [vmem:[%s8986_s7 + $0x98] sm:$0xff] }
 0xcc7   : > { %v3943_v25 = vpop.xlane.xlu0 %3942 }
 0xcc8   : > { %v3947_v35 = vmul.f32 0.00390625, %v3943_v25 }
 0xcca   : > { %v3961_v3 = vmul.f32 %v3947_v35, %v3947_v35 }
 0xccb   : > { %v3955_v0 = vpop.xlane.xlu0 %3954  ;;  %v3946_v31 = vpop.xlane.xlu1 %3945 }
 0xccc   : > { %v3959_v20 = vmul.f32 0.00390625, %v3955_v0  ;;  %v3948_v54 = vmul.f32 0.00390625, %v3946_v31  ;;  %v4139_v0 = vld [vmem:[%s8986_s7 + $0x10] sm:$0xff]  ;;  %v4140_v31 = vld [vmem:[%s8986_s7 + $0x18] sm:$0xff] }
 0xcce   : > { %v3963_v39 = vsub.f32 %v3959_v20, %v3961_v3  ;;  %v3962_v38 = vmul.f32 %v3948_v54, %v3948_v54  ;;  %v4157_v3 = vld [vmem:[%s8986_s7 + $0xa0] sm:$0xff]  ;;  %v4158_v20 = vld [vmem:[%s8986_s7 + $0xa8] sm:$0xff] }
 0xccf   : > { %v3958_v11 = vpop.xlane.xlu0 %3957  ;;  %v4012_v44 = vpop.permute.xlu1 %4011 }
 0xcd0   : > { %v3965_v18 = vmax.f32 %v3963_v39, 0.0  ;;  %v3960_v51 = vmul.f32 0.00390625, %v3958_v11  ;;  %v4596_v39 = vpack.c.bf16 %v4158_v20, %v4157_v3  ;;  %v4142_v11 = vld [vmem:[%s8986_s7 + $0x28] sm:$0xff] }
 0xcd2   : > { %v3967_v12 = vadd.f32 1e-05, %v3965_v18  ;;  %v3964_v52 = vsub.f32 %v3960_v51, %v3962_v38  ;;  %v4141_v38 = vld [vmem:[%s8986_s7 + $0x20] sm:$0xff]  ;;  %v4159_v18 = vld [vmem:[%s8986_s7 + $0xb0] sm:$0xff]  ;;  %v4160_v51 = vld [vmem:[%s8986_s7 + $0xb8] sm:$0xff] }
 0xcd4   : > { %4892 = vrsqrt.f32 %v3967_v12  ;;  %v3966_v5 = vmax.f32 %v3964_v52, 0.0  ;;  %v4598_v12 = vpack.c.bf16 %v4142_v11, %v4141_v38  ;;  %v4600_v52 = vpack.c.bf16 %v4160_v51, %v4159_v18 }
 0xcd6   : > { %v3968_v53 = vadd.f32 1e-05, %v3966_v5  ;;  %v4143_v5 = vld [vmem:[%s8986_s7 + $0x30] sm:$0xff] }
 0xcd8   : > { %4894 = vrsqrt.f32 %v3968_v53  ;;  %v4144_v53 = vld [vmem:[%s8986_s7 + $0x38] sm:$0xff] }
 0xcde   : > { %v4893_v55 = vpop.eup %4892 }
 0xcdf   : > { %v3971_v34 = vmul.f32 %v4893_v55, %v4477_v40  ;;  %v4161_v40 = vld [vmem:[%s8986_s7 + $0xc0] sm:$0xff]  ;;  %v4162_v55 = vld [vmem:[%s8986_s7 + $0xc8] sm:$0xff] }
 0xce1   : > { %3979 = vperm.xlu0 %4854, %v3971_v34   ;;  %v3973_v22 = vmul.f32 %v3971_v34, %v3947_v35  ;;  %v4592_v35 = vpack.c.bf16 %v4156_v36, %v4155_v59  ;;  %v4602_v34 = vpack.c.bf16 %v4144_v53, %v4143_v5 }
 0xce2   : > { %v4895_v14 = vpop.eup %4894 }
 0xce3   : > { %v3972_v15 = vmul.f32 %v4895_v14, %v4478_v10  ;;  %v3975_v1 = vsub.f32 %v4479_v42, %v3973_v22  ;;  %v4604_v10 = vpack.c.bf16 %v4162_v55, %v4161_v40  ;;  %v4145_v14 = vld [vmem:[%s8986_s7 + $0x40] sm:$0xff]  ;;  %v4163_v22 = vld [vmem:[%s8986_s7 + $0xd0] sm:$0xff]  ;;  %v4164_v42 = vld [vmem:[%s8986_s7 + $0xd8] sm:$0xff] }
 0xce5   : > { %3984 = vperm.xlu1 %4855, %v3972_v15   ;;  %v3974_v48 = vmul.f32 %v3972_v15, %v3948_v54  ;;  %v4594_v54 = vpack.c.bf16 %v4140_v31, %v4139_v0  ;;  %v4146_v15 = vld [vmem:[%s8986_s7 + $0x48] sm:$0xff]  ;;  %v4152_v0 = vld [vmem:[%s8986_s7 + $0x78] sm:$0xff] }
 0xce7   : > { %v3976_v2 = vsub.f32 %v4480_v43, %v3974_v48  ;;  %v4608_v48 = vpack.c.bf16 %v4164_v42, %v4163_v22  ;;  %v4147_v43 = vld [vmem:[%s8986_s7 + $0x50] sm:$0xff] }
 0xce9   : > { %3993 = vperm.xlu1 %4855, %v3975_v1   ;;  %v4606_v1 = vpack.c.bf16 %v4146_v15, %v4145_v14 }
 0xced   : > { %3998 = vperm.xlu1 %4855, %v3976_v2   ;;  %v4148_v2 = vld [vmem:[%s8986_s7 + $0x58] sm:$0xff] }
 0xcf1   : > { %4016 = vperm.xlu1 %4855, %v4482_v28   ;;  %v4165_v28 = vld [vmem:[%s8986_s7 + $0xe0] sm:$0xff] }
 0xd60   : > { %v3980_v58 = vpop.permute.xlu0 %3979 }
 0xd61   : > { %v3987_v63 = vmul.f32 %v3980_v58, %v3921_v56  ;;  %v3988_v7 = vmul.f32 %v3980_v58, %v3923_v30 }
 0xd64   : > { %v3985_v60 = vpop.permute.xlu1 %3984 }
 0xd65   : > { %v3989_v41 = vmul.f32 %v3985_v60, %v3927_v9  ;;  %v3990_v21 = vmul.f32 %v3985_v60, %v3929_v57  ;;  %v4137_v57 = vld [vmem:[%s8986_s7] sm:$0xff]  ;;  %v4610_v60 = vpack.c.bf16 %v4148_v2, %v4147_v43 }
 0xd66   : > { %v4590_v25 = vpack.c.bf16 %v4138_v33, %v4137_v57 }
 0xd68   : > { %v3994_v27 = vpop.permute.xlu1 %3993  ;;  %4591 = vmatpush3.bf16.msra.mxu0 %v4590_v25  ;;  %v4053_v25 = vld [vmem:[%s8983_s4 + $0x8] sm:$0xff] }
 0xd69   : > { %v4001_v37 = vadd.f32 %v3994_v27, %v3987_v63  ;;  %v4002_v13 = vadd.f32 %v3994_v27, %v3988_v7  ;;  %4593 = vmatprep.subr.bf16.mxu0 %v4592_v35  ;;  %v4149_v27 = vld [vmem:[%s8986_s7 + $0x60] sm:$0xff]  ;;  %v4150_v63 = vld [vmem:[%s8986_s7 + $0x68] sm:$0xff]  ;;  %v4167_v7 = vld [vmem:[%s8986_s7 + $0xf0] sm:$0xff] }
 0xd6a   : > { %v4151_v35 = vld [vmem:[%s8986_s7 + $0x70] sm:$0xff] }
 0xd6b   : > { %v4019_v46 = vmul.f32 %v4012_v44, %v4001_v37  ;;  %v4020_v6 = vmul.f32 %v4012_v44, %v4002_v13  ;;  %vm4005_vm7 = vcmp.ge.f32.partialorder %v4001_v37, 0.0  ;;  %vm4006_vm10 = vcmp.ge.f32.partialorder %v4002_v13, 0.0  ;;  %v4166_v44 = vld [vmem:[%s8986_s7 + $0xe8] sm:$0xff] }
 0xd6c   : > { %v3999_v16 = vpop.permute.xlu1 %3998  ;;  %4595 = vmatpush3.bf16.msra.mxu0 %v4594_v54  ;;  %v4612_v58 = vpack.c.bf16 %v4166_v44, %v4165_v28  ;;  %v4618_v31 = vpack.c.bf16 %v4152_v0, %v4151_v35 }
 0xd6d   : > { %v4003_v62 = vadd.f32 %v3999_v16, %v3989_v41  ;;  %v4004_v19 = vadd.f32 %v3999_v16, %v3990_v21  ;;  %v4023_v4 = vsel %vm4005_vm7, %v4001_v37, %v4019_v46  ;;  %v4024_v47 = vsel %vm4006_vm10, %v4002_v13, %v4020_v6  ;;  %4597 = vmatprep.subr.bf16.mxu0 %v4596_v39  ;;  %v4168_v37 = vld [vmem:[%s8986_s7 + $0xf8] sm:$0xff] }
 0xd6e   : > { %v4614_v13 = vpack.c.bf16 %v4150_v63, %v4149_v27  ;;  %v4616_v41 = vpack.c.bf16 %v4168_v37, %v4167_v7  ;;  %v4485_v63 = vld [vmem:[%s8984_s5 + $0xf0] sm:$0xff] }
 0xd6f   : > { %vm4007_vm11 = vcmp.ge.f32.partialorder %v4003_v62, 0.0  ;;  %vm4008_vm12 = vcmp.ge.f32.partialorder %v4004_v19, 0.0 }
 0xd70   : > { %v4017_v45 = vpop.permute.xlu1 %4016  ;;  %4599 = vmatpush3.bf16.msra.mxu0 %v4598_v12 }
 0xd71   : > { %v4021_v26 = vmul.f32 %v4017_v45, %v4003_v62  ;;  %v4022_v24 = vmul.f32 %v4017_v45, %v4004_v19  ;;  %4601 = vmatprep.subr.bf16.mxu0 %v4600_v52 }
 0xd73   : > { %v4025_v56 = vsel %vm4007_vm11, %v4003_v62, %v4021_v26  ;;  %v4026_v32 = vsel %vm4008_vm12, %v4004_v19, %v4022_v24 }
 0xd74   : > { %v4871_v30 = vpack.i.bf16 %v4026_v32, %v4024_v47  ;;  %v4576_v29 = vpack.c.bf16 %v4026_v32, %v4024_v47  ;;  %v4856_v50 = vpack.i.bf16 %v4025_v56, %v4023_v4  ;;  %v4578_v9 = vpack.c.bf16 %v4025_v56, %v4023_v4  ;;  %4603 = vmatpush3.bf16.msra.mxu0 %v4602_v34 }
 0xd75   : > { %4605 = vmatprep.subr.bf16.mxu0 %v4604_v10 }
 0xd76   : > { %4872 = vrot.lane.b32.xlu0 %v4871_v30, %s5030_s18  ;;  %4577 = vmatprep.subr.bf16.mxu1 %v4576_v29 }
 0xd77   : > { %4857 = vrot.lane.b32.xlu1 %v4856_v50, %s4990_s19  ;;  %4579 = vmatpush1.bf16.msra.mxu1 %v4578_v9 }
 0xd78   : > { %4607 = vmatpush3.bf16.msra.mxu0 %v4606_v1 }
 0xd79   : > { %4609 = vmatprep.subr.bf16.mxu0 %v4608_v48 }
 0xd7b   : > { %4862 = vrot.lane.b32.xlu1 %v4871_v30, %s4990_s19  ;;  %s8936_s19 = scalar_lea.hbm %s8987_s8, %s4497_s20 }
 0xd7c   : > { %4611 = vmatpush3.bf16.msra.mxu0 %v4610_v60 }
 0xd7d   : > { %4613 = vmatprep.subr.bf16.mxu0 %v4612_v58  ;;  %v4486_v58 = vld [vmem:[%s8984_s5 + $0xf8] sm:$0xff] }
 0xd7f   : > { %4867 = vrot.lane.b32.xlu1 %v4856_v50, %s5030_s18  ;;  %s4916_s18 = sshll.u32 %s5031_s17, 4  ;;  %s4917_s18 = int_to_ptr.vmem [resolvable:$false] %s4916_s18 }
 0xd80   : > { %4615 = vmatpush3.bf16.msra.mxu0 %v4614_v13  ;;  %s4918_s26 = scalar_lea.vmem %s4917_s18, 512  ;;  %p4919_p0 = scmp.lt.s32.totalorder %s8931_s13, %s4917_s18 }
 0xd81   : > { %4617 = vmatprep.subr.bf16.mxu0 %v4616_v41  ;;  %p4920_p1 = scmp.lt.s32.totalorder %s4918_s26, %s4912_s23 }
 0xd83   : > { %p4921_p2 = por %p4920_p1, %p4919_p0 }
 0xd84   : > { %4619 = vmatpush3.bf16.msra.mxu0 %v4618_v31 }
 0xd85   : > { %p4922_p3 = pnand %p4921_p2, %p4915_p13 }
 0xde8   : > { %v4873_v45 = vpop.permute.xlu0 %4872 }
 0xde9   : > { %v4858_v21 = vpop.permute.xlu1 %4857  ;;  %v4875_v29 = vunpack.i.h.bf16 %v4873_v45  ;;  %v4874_v50 = vunpack.i.l.bf16 %v4873_v45  ;;  %v4490_v45 = vld [vmem:[%s8984_s5 + $0x118] sm:$0xff] }
 0xdea   : > { %v4860_v62 = vunpack.i.h.bf16 %v4858_v21  ;;  %v4859_v19 = vunpack.i.l.bf16 %v4858_v21  ;;  %v4487_v21 = vld [vmem:[%s8984_s5 + $0x100] sm:$0xff] }
 0xded   : > { %v4863_v16 = vpop.permute.xlu1 %4862 }
 0xdee   : > { %v4865_v46 = vunpack.i.h.bf16 %v4863_v16  ;;  %v4864_v6 = vunpack.i.l.bf16 %v4863_v16  ;;  %v4488_v16 = vld [vmem:[%s8984_s5 + $0x108] sm:$0xff] }
 0xdf0   : > { %v4035_v26 = vsel %vm703_vm9, %v4859_v19, %v4864_v6  ;;  %v4036_v24 = vsel %vm703_vm9, %v4860_v62, %v4865_v46  ;;  %v4037_v4 = vsel %vm703_vm9, %v4864_v6, %v4859_v19  ;;  %v4038_v47 = vsel %vm703_vm9, %v4865_v46, %v4860_v62  ;;  %v4489_v6 = vld [vmem:[%s8984_s5 + $0x110] sm:$0xff] }
 0xdf1   : > { %v4582_v56 = vpack.c.bf16 %v4036_v24, %v4035_v26  ;;  %v4868_v32 = vpop.permute.xlu1 %4867  ;;  %v4580_v30 = vpack.c.bf16 %v4038_v47, %v4037_v4 }
 0xdf2   : > { %v4870_v9 = vunpack.i.h.bf16 %v4868_v32  ;;  %v4869_v8 = vunpack.i.l.bf16 %v4868_v32 }
 0xdf3   : > { %4581 = vmatprep.subr.bf16.mxu1 %v4580_v30 }
 0xdf4   : > { %v4049_v23 = vsel %vm4047_vm13, %v4870_v9, %v4875_v29  ;;  %v4048_v57 = vsel %vm4047_vm13, %v4869_v8, %v4874_v50  ;;  %4583 = vmatpush1.bf16.msra.mxu1 %v4582_v56  ;;  %v4050_v49 = vsel %vm4047_vm13, %v4874_v50, %v4869_v8  ;;  %v4051_v33 = vsel %vm4047_vm13, %v4875_v29, %v4870_v9 }
 0xdf5   : > { %v4586_v59 = vpack.c.bf16 %v4049_v23, %v4048_v57  ;;  %v4584_v36 = vpack.c.bf16 %v4051_v33, %v4050_v49 }
 0xdf7   : > { %4585 = vmatprep.subr.bf16.mxu1 %v4584_v36 }
 0xdf8   : > { %4587 = vmatpush1.bf16.msra.mxu1 %v4586_v59 }
 0xdfb   : > { %4483 = vmatmul.mubr.msk.f32.vlgmr.msra.gmra.mrb[12].mxu1 %vm2742_vm2, %v4052_v17 }
 0xdfc   : > { %4130 = vmatprep.mubr.f32.mxu1 %v9865_v61 }
 0xdff   : > { %4484 = vmatmul.mubr.msk.f32.gmra.mrb[14].mxu1 %vm2742_vm2, %v4053_v25 }
 0xece   : > { %v4126_v3 = vpop.f32.mrb[12].mxu1 }
 0xecf   : > { %v4128_v20 = vpop.f32.mrb[13].mxu1 }
 0xed0   : > { %4233 = vmatprep.mubr.f32.mxu0 %v4128_v20 }
 0xed1   : > { %4234 = vmatmul.mubr.f32.vlgmr.msra.gmra.mrb[8].mxu0 %v4126_v3 }
 0xed2   : > { %v4132_v61 = vpop.f32.mrb[14].mxu1 }
 0xed3   : > { %v4134_v54 = vpop.f32.mrb[15].mxu1 }
 0xed4   : > { %4238 = vmatprep.mubr.f32.mxu0 %v4134_v54 }
 0xed5   : > { %4239 = vmatmul.mubr.f32.gmra.mrb[10].mxu0 %v4132_v61 }
 0xfa4   : > { %v4530_v39 = vpop.f32.mrb[8].mxu0 }
 0xfa5   : > { %v4531_v38 = vpop.f32.mrb[9].mxu0 }
 0xfa6   : > { %v4532_v11 = vadd.f32 %v4531_v38, %v4530_v39 }
 0xfa8   : > { %4253 = vadd.xlane.f32.xlu1 %v4532_v11  ;;  %v4533_v18 = vpop.f32.mrb[10].mxu0  ;;  %v4259_v5 = vmul.f32 %v4532_v11, %v4532_v11 }
 0xfa9   : > { %v4534_v51 = vpop.f32.mrb[11].mxu0 }
 0xfaa   : > { %v4535_v12 = vadd.f32 %v4534_v51, %v4533_v18 }
 0xfac   : > { %4255 = vadd.xlane.f32.xlu0 %v4535_v12  ;;  %v4260_v52 = vmul.f32 %v4535_v12, %v4535_v12 }
 0xfae   : > { %4263 = vadd.xlane.f32.xlu1 %v4260_v52 }
 0xfb0   : > { %4261 = vadd.xlane.f32.xlu0 %v4259_v5 }
0x1035   : > { %v4254_v53 = vpop.xlane.xlu1 %4253 }
0x1036   : > { %v4257_v55 = vmul.f32 0.008928572, %v4254_v53 }
0x1038   : > { %v4267_v42 = vmul.f32 %v4257_v55, %v4257_v55 }
0x1039   : > { %v4256_v40 = vpop.xlane.xlu0 %4255 }
0x103a   : > { %v4258_v34 = vmul.f32 0.008928572, %v4256_v40 }
0x103b   : > { %v4264_v10 = vpop.xlane.xlu1 %4263 }
0x103c   : > { %v4268_v14 = vmul.f32 %v4258_v34, %v4258_v34  ;;  %v4266_v15 = vmul.f32 0.008928572, %v4264_v10 }
0x103d   : > { %v4262_v22 = vpop.xlane.xlu0 %4261 }
0x103e   : > { %v4270_v1 = vsub.f32 %v4266_v15, %v4268_v14  ;;  %v4265_v48 = vmul.f32 0.008928572, %v4262_v22 }
0x1040   : > { %v4272_v43 = vmax.f32 %v4270_v1, 0.0  ;;  %v4269_v2 = vsub.f32 %v4265_v48, %v4267_v42 }
0x1042   : > { %v4274_v28 = vadd.f32 1e-05, %v4272_v43  ;;  %v4271_v44 = vmax.f32 %v4269_v2, 0.0 }
0x1044   : > { %4896 = vrsqrt.f32 %v4274_v28  ;;  %v4273_v60 = vadd.f32 1e-05, %v4271_v44 }
0x1046   : > { %4898 = vrsqrt.f32 %v4273_v60 }
0x104e   : > { %v4897_v27 = vpop.eup %4896 }
0x104f   : > { %v4278_v7 = vmul.f32 %v4897_v27, %v4486_v58 }
0x1050   : > { %v4899_v37 = vpop.eup %4898 }
0x1051   : > { %4290 = vperm.xlu1 %4855, %v4278_v7   ;;  %v4277_v13 = vmul.f32 %v4899_v37, %v4485_v63  ;;  %v4280_v41 = vmul.f32 %v4278_v7, %v4258_v34 }
0x1053   : > { %4285 = vperm.xlu0 %4854, %v4277_v13   ;;  %v4279_v62 = vmul.f32 %v4277_v13, %v4257_v55  ;;  %v4282_v46 = vsub.f32 %v4488_v16, %v4280_v41 }
0x1055   : > { %v4281_v19 = vsub.f32 %v4487_v21, %v4279_v62 }
0x1057   : > { %4297 = vperm.xlu1 %4855, %v4281_v19   ;;  %4302 = vperm.xlu0 %4854, %v4282_v46  }
0x105b   : > { %4311 = vperm.xlu1 %4855, %v4489_v6   ;;  %4316 = vperm.xlu0 %4854, %v4490_v45  }
0x10d0   : > { %v4291_v26 = vpop.permute.xlu1 %4290 }
0x10d1   : > { %v4294_v4 = vmul.f32 %v4535_v12, %v4291_v26 }
0x10d2   : > { %v4286_v24 = vpop.permute.xlu0 %4285 }
0x10d3   : > { %v4293_v47 = vmul.f32 %v4532_v11, %v4286_v24 }
0x10d6   : > { %v4298_v56 = vpop.permute.xlu1 %4297  ;;  %v4303_v32 = vpop.permute.xlu0 %4302 }
0x10d7   : > { %v4305_v30 = vadd.f32 %v4298_v56, %v4293_v47  ;;  %v4306_v29 = vadd.f32 %v4303_v32, %v4294_v4 }
0x10d9   : > { %vm4307_vm9 = vcmp.ge.f32.partialorder %v4305_v30, 0.0  ;;  %vm4308_vm14 = vcmp.ge.f32.partialorder %v4306_v29, 0.0 }
0x10da   : > { %v4312_v50 = vpop.permute.xlu1 %4311  ;;  %v4317_v9 = vpop.permute.xlu0 %4316 }
0x10db   : > { %v4319_v8 = vmul.f32 %v4312_v50, %v4305_v30  ;;  %v4320_v23 = vmul.f32 %v4317_v9, %v4306_v29 }
0x10dd   : > { %v4321_v57 = vsel %vm4307_vm9, %v4305_v30, %v4319_v8  ;;  %v4322_v49 = vsel %vm4308_vm14, %v4306_v29, %v4320_v23 }
0x10de   : > { %4323 = vst [vmem:[%s298_s12] sm:$0xff] %v4321_v57  ;;  %4324 = vst [vmem:[%s298_s12 + $0x8] sm:$0xff] %v4322_v49 }
0x10df   : > { %4925 = shalt.err (!%p4922_p3)
}
0x10e0   : > { %s4926_s10 = scalar_lea.hbm %s8936_s19, 256  ;;  %s4930_s12 = scalar_lea.hbm %s8987_s8, 512 }
0x10e1   : > { %p4927_p4 = scmp.ne.s32.totalorder %s8936_s19, %s4926_s10  ;;  %p4931_p9 = scmp.lt.u32.totalorder %s8936_s19, %s8987_s8 }
0x10e2   : > { %p4932_p10 = scmp.lt.u32.totalorder %s4930_s12, %s4926_s10  ;;  %p4934_p12 = scmp.lt.u32.totalorder %s4926_s10, %s8936_s19 }
0x10e3   : > { %p4928_p7 = pnand %p4927_p4, %p5117_p5 }
0x10e4   : > { %p4933_p11 = por %p4932_p10, %p4931_p9 }
0x10e5   : > { %p4929_p8 = pneg %p4928_p7 }
0x10e6   : > { %p4935_p13 = por %p4934_p12, %p4933_p11 }
0x10e8   : > { %p4936_p0 = pnand %p4935_p13, %p4929_p8 }
0x10ea   : > { %4939 = shalt.err (!%p4936_p0)
}
0x10eb   : > { %s5032_s21 = smov 128   ;;  %s5033_s23 = smov 8  }
0x10ec   : > { %4620 = dma.vmem_to_hbm [thread:$0]  (%p5117_p5), %s8931_s13, 256, %s8936_s19, %s8938_s9, %s5032_s21, %s5032_s21, %s5033_s23  }
0x10ed PF: > { %p4626_p1 = scmp.ge.s32.totalorder %s4974_s30, 2  ;;  %s4354_s17 = sand.u32 1, %s4962_s27  }
0x10ee   : > { %s4355_s18 = scalar_lea.sflag [#allocation5], %s4354_s17 }
0x10ef   : > { %p4623_p2 = pnand %p4626_p1, %p5121_p6 }
0x10f1   : > { %4957 = dma.done.wait (!%p4623_p2), %s4355_s18, 256  }
0x10f2   : > { %4959 = vsyncadd (!%p4623_p2), %s4355_s18, 4294967040  ;;  %p18_p3 = scmp.ge.s32.totalorder %s5104_s11, 4   ;;  %s9866_s27 = smov %s4966_s28 }
0x10f3   : > { %s9867_s28 = smov %s4970_s29  ;;  %s9868_s29 = smov %s5115_s14 }
0x10f4   : > { %s9869_s30 = smov %s5104_s11  ;;  %20 = sbr.rel (!%p18_p3) target bundleno = 3 (0x3), region = 138 }
0x10fb   :  { %4360 = vsyncpa [#allocation5], 1 }
0x10fc   :  { %4362 = vsyncpa [#allocation5 + $0x1], 1 }

</bundles_post_ra>
